<compile_context>
chip_gen: v7x
topology: tpu7x:2x2x1
jax: 0.10.0
libtpu: 0.0.40
codegen_flags: <defaults>
</compile_context>

<pallas_src>
import jax
import jax.numpy as jnp
from jax.experimental import pallas as pl
from jax.experimental.pallas import tpu as pltpu

# ---------------------------------------------------------------------------
# Model geometry.
# ---------------------------------------------------------------------------
L_IN = 492
L1, L2, L3 = 164, 54, 18
C1, C2, C3 = 32, 64, 128
K1, K2, K3 = 3, 5, 3
S = 3                            # every conv has stride 3

# Time-packed layout constants (one packed row per (u, batch), u = 0..17).
U = L3                           # 18 packed rows per batch element (no pad row)
J1 = 11                          # conv1 positions materialised per row
A_COLS = S * (J1 - 1) + K1       # 33 raw input samples feeding one packed row
H1_W = J1 * C1                   # 352 = packed conv1 row width
H2_W = 3 * C2                    # 192 = packed conv2 row width
FC1_IN = U * C3                  # 2304 features into fc1
FC1_OUT = 512
X_LO = U * 27                    # 486 (= 18 * 27 non-overlapping samples)
X_EXT = X_LO + 27                # 513 (extra 27 cover the overlapping tail)


def _round_up(n, m):
    return ((n + m - 1) // m) * m


def _chip_config():
    """(max batch-tile rows, vmem_limit_bytes), tuned per TPU generation."""
    # Default: tb=64 keeps the 'parallel' grid >= 2 steps for B in 65..128 so
    # v7x's two TensorCores both engage, and ~7 MB live VMEM fits v7x's
    # 64 MiB (limit set to 48 MiB, safe on every generation).
    tb, limit = 64, 48 * 1024 * 1024
    try:
        info = pltpu.get_tpu_info()
        vmem = int(getattr(info, "vmem_capacity_bytes", 0))
        if vmem >= 100 * 1024 * 1024:        # v5e / v6e: 128 MiB VMEM, 1 TC
            tb, limit = 256, 96 * 1024 * 1024
    except Exception:
        pass
    return tb, limit


_TB_MAX, _VMEM_LIMIT = _chip_config()


# ---------------------------------------------------------------------------
# Fused kernel: conv1/conv2/conv3 + fc1/fc2/fc3, all intermediates in VMEM.
# ---------------------------------------------------------------------------
def _fused_kernel(a_ref, w1_ref, b1_ref, w2_ref, b2_ref, w3_ref, b3_ref,
                  fc1w_ref, fc1b_ref, fc2w_ref, fc2b_ref, fc3w_ref, fc3b_ref,
                  o_ref):
    u_dim, tb, _ = a_ref.shape
    # u-major packed rows: row = u * tb + b (layout-preserving collapse,
    # tb is a multiple of 8 sublanes).
    a = a_ref[...].reshape(u_dim * tb, A_COLS)                       # bf16

    # Conv stack as three back-to-back GEMMs (bias + ReLU fused).
    h1 = jnp.dot(a, w1_ref[...], preferred_element_type=jnp.float32)
    h1 = jnp.maximum(h1 + b1_ref[...], 0.0).astype(jnp.bfloat16)     # (U*tb, 352)
    h2 = jnp.dot(h1, w2_ref[...], preferred_element_type=jnp.float32)
    h2 = jnp.maximum(h2 + b2_ref[...], 0.0).astype(jnp.bfloat16)     # (U*tb, 192)
    h3 = jnp.dot(h2, w3_ref[...], preferred_element_type=jnp.float32)
    h3 = jnp.maximum(h3 + b3_ref[...], 0.0).astype(jnp.bfloat16)     # (U*tb, 128)

    # fc1: 18-step accumulation of contiguous (tb,128) x (128,512) matmuls
    # (fc1 weights are stored time-major as (U, 128, 512)).
    h3 = h3.reshape(u_dim, tb, C3)
    acc = jnp.dot(h3[0], fc1w_ref[0], preferred_element_type=jnp.float32)
    for u in range(1, u_dim):
        acc = acc + jnp.dot(h3[u], fc1w_ref[u],
                            preferred_element_type=jnp.float32)
    y1 = jnp.maximum(acc + fc1b_ref[...], 0.0).astype(jnp.bfloat16)  # (tb, 512)

    y2 = jnp.dot(y1, fc2w_ref[...], preferred_element_type=jnp.float32)
    y2 = jnp.maximum(y2 + fc2b_ref[...], 0.0)                        # (tb, 128) f32

    # fc3 (N=1): contract the 128 channels against the (1,128) weight row,
    # producing a lane-dense (1, tb) result directly.
    z = jax.lax.dot_general(fc3w_ref[...], y2, (((1,), (1,)), ((), ())),
                            preferred_element_type=jnp.float32)      # (1, tb)
    o_ref[...] = jax.nn.sigmoid(z + fc3b_ref[...])[None]             # (1, 1, tb)


# ---------------------------------------------------------------------------
# Forward pass builder (single_buffer_weights toggles pl.Buffered(1)).
# ---------------------------------------------------------------------------
def build_forward(single_buffer_weights):
    def resident(shape):
        zeros = (0,) * len(shape)
        if single_buffer_weights:
            # Block index never changes -> a second buffer is pure VMEM waste.
            return pl.BlockSpec(shape, lambda i: zeros,
                                pipeline_mode=pl.Buffered(1))
        return pl.BlockSpec(shape, lambda i: zeros)

    @jax.jit
    def forward(packed, x):
        """x: (B, 492) f32 -> (B,) f32 (matches TimeSeriesConvModel.forward)."""
        B = x.shape[0]
        tb = min(_TB_MAX, _round_up(B, 8))
        bp = _round_up(B, tb)
        num_tiles = bp // tb

        # conv1 "super-im2col": one 33-sample window per packed row, built with
        # pad / reshape / slice / concat / transpose on the tiny raw input
        # (no gather).  Rows are ordered u-major for the in-kernel fc1 loop.
        xe = jnp.pad(x, ((0, bp - B), (0, X_EXT - L_IN))).astype(jnp.bfloat16)
        a_lo = xe[:, :X_LO].reshape(bp, U, 27)
        a_hi = xe[:, 27:X_EXT].reshape(bp, U, 27)[:, :, :A_COLS - 27]
        a = jnp.concatenate([a_lo, a_hi], axis=2)                    # (bp, U, 33)
        a = jnp.transpose(a, (1, 0, 2))                              # (U, bp, 33)

        conv_flops = 2 * U * bp * (A_COLS * H1_W + H1_W * H2_W + H2_W * C3)
        mlp_flops = 2 * bp * (FC1_IN * FC1_OUT + FC1_OUT * C3 + C3)
        weight_bytes = sum(int(v.size) * v.dtype.itemsize
                           for v in packed.values())
        cost = pl.CostEstimate(
            flops=conv_flops + mlp_flops,
            transcendentals=bp,
            bytes_accessed=int(a.size) * a.dtype.itemsize + weight_bytes + bp * 4)

        out = pl.pallas_call(
            _fused_kernel,
            out_shape=jax.ShapeDtypeStruct((num_tiles, 1, tb), jnp.float32),
            grid=(num_tiles,),
            in_specs=[
                pl.BlockSpec((U, tb, A_COLS), lambda i: (0, i, 0)),
                resident((A_COLS, H1_W)),
                resident((1, H1_W)),
                resident((H1_W, H2_W)),
                resident((1, H2_W)),
                resident((H2_W, C3)),
                resident((1, C3)),
                resident((U, C3, FC1_OUT)),
                resident((1, FC1_OUT)),
                resident((FC1_OUT, C3)),
                resident((1, C3)),
                resident((1, C3)),
                resident((1, 1)),
            ],
            out_specs=pl.BlockSpec((1, 1, tb), lambda i: (i, 0, 0)),
            compiler_params=pltpu.CompilerParams(
                dimension_semantics=("parallel",),
                vmem_limit_bytes=_VMEM_LIMIT),
            cost_estimate=cost,
        )(a, packed["w1"], packed["b1"], packed["w2"], packed["b2"],
          packed["w3"], packed["b3"], packed["fc1_w"], packed["fc1_b"],
          packed["fc2_w"], packed["fc2_b"], packed["fc3_w"], packed["fc3_b"])

        return out.reshape(bp)[:B]

    return forward


# ---------------------------------------------------------------------------
# Parameters.
# ---------------------------------------------------------------------------
def init_params(key):
    """Deterministic init mimicking PyTorch's default U(-1/sqrt(fan_in), +)."""
    def unif(k, shape, fan_in):
        bound = 1.0 / float(fan_in) ** 0.5
        return jax.random.uniform(k, shape, jnp.float32, -bound, bound)

    ks = jax.random.split(key, 12)
    return {
        # Conv weights in PyTorch layout (C_out, C_in, K).
        "conv1_w": unif(ks[0], (C1, 1, K1), 1 * K1),
        "conv1_b": unif(ks[1], (C1,), 1 * K1),
        "conv2_w": unif(ks[2], (C2, C1, K2), C1 * K2),
        "conv2_b": unif(ks[3], (C2,), C1 * K2),
        "conv3_w": unif(ks[4], (C3, C2, K3), C2 * K3),
        "conv3_b": unif(ks[5], (C3,), C2 * K3),
        # Linear weights stored as (in_features, out_features).
        "fc1_w": unif(ks[6], (C3 * L3, FC1_OUT), C3 * L3),
        "fc1_b": unif(ks[7], (FC1_OUT,), C3 * L3),
        "fc2_w": unif(ks[8], (FC1_OUT, C3), FC1_OUT),
        "fc2_b": unif(ks[9], (C3,), FC1_OUT),
        "fc3_w": unif(ks[10], (C3, 1), C3),
        "fc3_b": unif(ks[11], (1,), C3),
    }


def prepare_params(params):
    """One-time repacking of PyTorch-layout params into kernel layouts (bf16)."""
    f32, bf16 = jnp.float32, jnp.bfloat16

    # conv1 -> block-diagonal (33, 352): 11 packed output positions per row.
    w1m = jnp.transpose(params["conv1_w"][:, 0, :]).astype(f32)       # (3, 32)
    w1 = jnp.zeros((A_COLS, H1_W), f32)
    for j in range(J1):
        w1 = w1.at[S * j:S * j + K1, C1 * j:C1 * (j + 1)].set(w1m)
    b1 = jnp.tile(params["conv1_b"], J1)[None, :].astype(f32)         # (1, 352)

    # conv2 -> block-banded (352, 192): 3 packed output positions per row.
    w2c = params["conv2_w"]                                           # (64, 32, 5)
    w2 = jnp.zeros((H1_W, H2_W), f32)
    for m in range(3):
        for k in range(K2):
            j = S * m + k
            w2 = w2.at[C1 * j:C1 * (j + 1), C2 * m:C2 * (m + 1)].set(
                jnp.transpose(w2c[:, :, k]))
    b2 = jnp.tile(params["conv2_b"], 3)[None, :].astype(f32)          # (1, 192)

    # conv3 -> (192, 128): contraction over (k, c) of the packed conv2 row.
    w3 = jnp.transpose(params["conv3_w"], (2, 1, 0)).reshape(K3 * C2, C3)
    b3 = params["conv3_b"][None, :].astype(f32)

    # fc1: PyTorch rows are channel-major (c*18 + t); repack time-major as
    # (U, 128, 512) so the kernel's per-u accumulation indexes contiguously.
    fc1 = params["fc1_w"].reshape(C3, L3, FC1_OUT).transpose(1, 0, 2)

    return {
        "w1": w1.astype(bf16), "b1": b1,
        "w2": w2.astype(bf16), "b2": b2,
        "w3": w3.astype(bf16), "b3": b3,
        "fc1_w": fc1.astype(bf16),
        "fc1_b": params["fc1_b"][None, :].astype(f32),
        "fc2_w": params["fc2_w"].astype(bf16),
        "fc2_b": params["fc2_b"][None, :].astype(f32),
        "fc3_w": params["fc3_w"][:, 0][None, :].astype(f32),          # (1, 128)
        "fc3_b": params["fc3_b"].reshape(1, 1).astype(f32),
    }


# ---------------------------------------------------------------------------
# Pure-JAX f32 reference (mirrors the PyTorch module) for validation.
# ---------------------------------------------------------------------------
def reference_forward(params, x):
    def conv1d_relu(h, w, b):
        y = jax.lax.conv_general_dilated(
            h, w, window_strides=(S,), padding="VALID",
            dimension_numbers=("NCH", "OIH", "NCH"))
        return jnp.maximum(y + b[None, :, None], 0.0)

    h = x[:, None, :]
    h = conv1d_relu(h, params["conv1_w"], params["conv1_b"])
    h = conv1d_relu(h, params["conv2_w"], params["conv2_b"])
    h = conv1d_relu(h, params["conv3_w"], params["conv3_b"])
    h = h.reshape(h.shape[0], -1)
    h = jnp.maximum(h @ params["fc1_w"] + params["fc1_b"], 0.0)
    h = jnp.maximum(h @ params["fc2_w"] + params["fc2_b"], 0.0)
    h = jax.nn.sigmoid(h @ params["fc3_w"] + params["fc3_b"])
    return h[:, 0]


if __name__ == "__main__":
    key = jax.random.PRNGKey(0)
    pkey, xkey = jax.random.split(key)
    params = init_params(pkey)
    packed = prepare_params(params)

    B = 2  # L = 492 is the smallest length compatible with fc1's 128*18 input
    x = jax.random.normal(xkey, (B, L_IN), dtype=jnp.float32)

    # Prefer single-buffered resident weights; fall back to default
    # double-buffering if the installed JAX rejects pl.Buffered(1).
    try:
        forward = build_forward(True)
        out = jax.block_until_ready(forward(packed, x))
    except Exception:
        forward = build_forward(False)
        out = jax.block_until_ready(forward(packed, x))

    assert out.shape == (B,), out.shape
    assert bool(jnp.all(jnp.isfinite(out))), "non-finite output"
    assert bool(jnp.all((out >= 0.0) & (out <= 1.0))), "sigmoid range violated"

    ref = reference_forward(params, x)
    err = float(jnp.max(jnp.abs(out - ref)))
    assert err < 5e-2, f"mismatch vs f32 reference: {err}"
    print("KERNEL_OK")
</pallas_src>

<mosaic_0001>
module attributes {stable_mosaic.version = 11 : i64} {
  func.func @_fused_kernel(%arg0: i32, %arg1: memref<18x8x33xbf16, #tpu.memory_space<vmem>>, %arg2: memref<33x352xbf16, #tpu.memory_space<vmem>>, %arg3: memref<1x352xf32, #tpu.memory_space<vmem>>, %arg4: memref<352x192xbf16, #tpu.memory_space<vmem>>, %arg5: memref<1x192xf32, #tpu.memory_space<vmem>>, %arg6: memref<192x128xbf16, #tpu.memory_space<vmem>>, %arg7: memref<1x128xf32, #tpu.memory_space<vmem>>, %arg8: memref<18x128x512xbf16, #tpu.memory_space<vmem>>, %arg9: memref<1x512xf32, #tpu.memory_space<vmem>>, %arg10: memref<512x128xbf16, #tpu.memory_space<vmem>>, %arg11: memref<1x128xf32, #tpu.memory_space<vmem>>, %arg12: memref<1x128xf32, #tpu.memory_space<vmem>>, %arg13: memref<1x1xf32, #tpu.memory_space<vmem>>, %arg14: memref<1x1x8xf32, #tpu.memory_space<vmem>>) attributes {dimension_semantics = [#tpu.dimension_semantics<parallel>], iteration_bounds = array<i64: 1>, scalar_prefetch = 0 : i64, scratch_operands = 0 : i64, tpu.core_type = #tpu.core_type<tc>, window_params = [{transform_indices = @transform_0, window_bounds = array<i64: 18, 8, 33>}, {pipeline_mode = #tpu.pipeline_mode<synchronous>, transform_indices = @transform_1, window_bounds = array<i64: 33, 352>}, {pipeline_mode = #tpu.pipeline_mode<synchronous>, transform_indices = @transform_2, window_bounds = array<i64: 1, 352>}, {pipeline_mode = #tpu.pipeline_mode<synchronous>, transform_indices = @transform_3, window_bounds = array<i64: 352, 192>}, {pipeline_mode = #tpu.pipeline_mode<synchronous>, transform_indices = @transform_4, window_bounds = array<i64: 1, 192>}, {pipeline_mode = #tpu.pipeline_mode<synchronous>, transform_indices = @transform_5, window_bounds = array<i64: 192, 128>}, {pipeline_mode = #tpu.pipeline_mode<synchronous>, transform_indices = @transform_6, window_bounds = array<i64: 1, 128>}, {pipeline_mode = #tpu.pipeline_mode<synchronous>, transform_indices = @transform_7, window_bounds = array<i64: 18, 128, 512>}, {pipeline_mode = #tpu.pipeline_mode<synchronous>, transform_indices = @transform_8, window_bounds = array<i64: 1, 512>}, {pipeline_mode = #tpu.pipeline_mode<synchronous>, transform_indices = @transform_9, window_bounds = array<i64: 512, 128>}, {pipeline_mode = #tpu.pipeline_mode<synchronous>, transform_indices = @transform_10, window_bounds = array<i64: 1, 128>}, {pipeline_mode = #tpu.pipeline_mode<synchronous>, transform_indices = @transform_11, window_bounds = array<i64: 1, 128>}, {pipeline_mode = #tpu.pipeline_mode<synchronous>, transform_indices = @transform_12, window_bounds = array<i64: 1, 1>}, {transform_indices = @transform_13, window_bounds = array<i64: 1, 1, 8>}]} {
    %c0 = arith.constant 0 : index
    %c0_0 = arith.constant 0 : index
    %c0_1 = arith.constant 0 : index
    %0 = vector.load %arg1[%c0, %c0_0, %c0_1] : memref<18x8x33xbf16, #tpu.memory_space<vmem>>, vector<18x8x33xbf16>
    %1 = vector.shape_cast %0 : vector<18x8x33xbf16> to vector<144x33xbf16>
    %c0_2 = arith.constant 0 : index
    %c0_3 = arith.constant 0 : index
    %2 = vector.load %arg2[%c0_2, %c0_3] : memref<33x352xbf16, #tpu.memory_space<vmem>>, vector<33x352xbf16>
    %cst = arith.constant dense<0.000000e+00> : vector<144x352xf32>
    %3 = tpu.matmul %1, %2, %cst {dimension_numbers = #tpu.dot_dimension_numbers<[1], [0], [0], [1], [0, 0, 1, 1], [], []>} : vector<144x33xbf16>, vector<33x352xbf16>, vector<144x352xf32> -> vector<144x352xf32>
    %c0_4 = arith.constant 0 : index
    %c0_5 = arith.constant 0 : index
    %4 = vector.load %arg3[%c0_4, %c0_5] : memref<1x352xf32, #tpu.memory_space<vmem>>, vector<1x352xf32>
    %5 = vector.broadcast %4 : vector<1x352xf32> to vector<144x352xf32>
    %6 = arith.addf %3, %5 : vector<144x352xf32>
    %cst_6 = arith.constant 0.000000e+00 : f32
    %7 = vector.broadcast %cst_6 : f32 to vector<144x352xf32>
    %8 = arith.maximumf %6, %7 : vector<144x352xf32>
    %9 = arith.truncf %8 : vector<144x352xf32> to vector<144x352xbf16>
    %c0_7 = arith.constant 0 : index
    %c0_8 = arith.constant 0 : index
    %10 = vector.load %arg4[%c0_7, %c0_8] : memref<352x192xbf16, #tpu.memory_space<vmem>>, vector<352x192xbf16>
    %cst_9 = arith.constant dense<0.000000e+00> : vector<144x192xf32>
    %11 = tpu.matmul %9, %10, %cst_9 {dimension_numbers = #tpu.dot_dimension_numbers<[1], [0], [0], [1], [0, 0, 1, 1], [], []>} : vector<144x352xbf16>, vector<352x192xbf16>, vector<144x192xf32> -> vector<144x192xf32>
    %c0_10 = arith.constant 0 : index
    %c0_11 = arith.constant 0 : index
    %12 = vector.load %arg5[%c0_10, %c0_11] : memref<1x192xf32, #tpu.memory_space<vmem>>, vector<1x192xf32>
    %13 = vector.broadcast %12 : vector<1x192xf32> to vector<144x192xf32>
    %14 = arith.addf %11, %13 : vector<144x192xf32>
    %cst_12 = arith.constant 0.000000e+00 : f32
    %15 = vector.broadcast %cst_12 : f32 to vector<144x192xf32>
    %16 = arith.maximumf %14, %15 : vector<144x192xf32>
    %17 = arith.truncf %16 : vector<144x192xf32> to vector<144x192xbf16>
    %c0_13 = arith.constant 0 : index
    %c0_14 = arith.constant 0 : index
    %18 = vector.load %arg6[%c0_13, %c0_14] : memref<192x128xbf16, #tpu.memory_space<vmem>>, vector<192x128xbf16>
    %cst_15 = arith.constant dense<0.000000e+00> : vector<144x128xf32>
    %19 = tpu.matmul %17, %18, %cst_15 {dimension_numbers = #tpu.dot_dimension_numbers<[1], [0], [0], [1], [0, 0, 1, 1], [], []>} : vector<144x192xbf16>, vector<192x128xbf16>, vector<144x128xf32> -> vector<144x128xf32>
    %c0_16 = arith.constant 0 : index
    %c0_17 = arith.constant 0 : index
    %20 = vector.load %arg7[%c0_16, %c0_17] : memref<1x128xf32, #tpu.memory_space<vmem>>, vector<1x128xf32>
    %21 = vector.broadcast %20 : vector<1x128xf32> to vector<144x128xf32>
    %22 = arith.addf %19, %21 : vector<144x128xf32>
    %cst_18 = arith.constant 0.000000e+00 : f32
    %23 = vector.broadcast %cst_18 : f32 to vector<144x128xf32>
    %24 = arith.maximumf %22, %23 : vector<144x128xf32>
    %25 = arith.truncf %24 : vector<144x128xf32> to vector<144x128xbf16>
    %26 = vector.shape_cast %25 : vector<144x128xbf16> to vector<18x8x128xbf16>
    %27 = vector.extract_strided_slice %26 {offsets = [0, 0, 0], sizes = [1, 8, 128], strides = [1, 1, 1]} : vector<18x8x128xbf16> to vector<1x8x128xbf16>
    %28 = vector.shape_cast %27 : vector<1x8x128xbf16> to vector<8x128xbf16>
    %c0_19 = arith.constant 0 : index
    %c0_20 = arith.constant 0 : index
    %c0_21 = arith.constant 0 : index
    %29 = vector.load %arg8[%c0_19, %c0_20, %c0_21] : memref<18x128x512xbf16, #tpu.memory_space<vmem>>, vector<1x128x512xbf16>
    %30 = vector.shape_cast %29 : vector<1x128x512xbf16> to vector<128x512xbf16>
    %cst_22 = arith.constant dense<0.000000e+00> : vector<8x512xf32>
    %31 = tpu.matmul %28, %30, %cst_22 {dimension_numbers = #tpu.dot_dimension_numbers<[1], [0], [0], [1], [0, 0, 1, 1], [], []>} : vector<8x128xbf16>, vector<128x512xbf16>, vector<8x512xf32> -> vector<8x512xf32>
    %32 = vector.extract_strided_slice %26 {offsets = [1, 0, 0], sizes = [1, 8, 128], strides = [1, 1, 1]} : vector<18x8x128xbf16> to vector<1x8x128xbf16>
    %33 = vector.shape_cast %32 : vector<1x8x128xbf16> to vector<8x128xbf16>
    %c1 = arith.constant 1 : index
    %c0_23 = arith.constant 0 : index
    %c0_24 = arith.constant 0 : index
    %34 = vector.load %arg8[%c1, %c0_23, %c0_24] : memref<18x128x512xbf16, #tpu.memory_space<vmem>>, vector<1x128x512xbf16>
    %35 = vector.shape_cast %34 : vector<1x128x512xbf16> to vector<128x512xbf16>
    %cst_25 = arith.constant dense<0.000000e+00> : vector<8x512xf32>
    %36 = tpu.matmul %33, %35, %cst_25 {dimension_numbers = #tpu.dot_dimension_numbers<[1], [0], [0], [1], [0, 0, 1, 1], [], []>} : vector<8x128xbf16>, vector<128x512xbf16>, vector<8x512xf32> -> vector<8x512xf32>
    %37 = arith.addf %31, %36 : vector<8x512xf32>
    %38 = vector.extract_strided_slice %26 {offsets = [2, 0, 0], sizes = [1, 8, 128], strides = [1, 1, 1]} : vector<18x8x128xbf16> to vector<1x8x128xbf16>
    %39 = vector.shape_cast %38 : vector<1x8x128xbf16> to vector<8x128xbf16>
    %c2 = arith.constant 2 : index
    %c0_26 = arith.constant 0 : index
    %c0_27 = arith.constant 0 : index
    %40 = vector.load %arg8[%c2, %c0_26, %c0_27] : memref<18x128x512xbf16, #tpu.memory_space<vmem>>, vector<1x128x512xbf16>
    %41 = vector.shape_cast %40 : vector<1x128x512xbf16> to vector<128x512xbf16>
    %cst_28 = arith.constant dense<0.000000e+00> : vector<8x512xf32>
    %42 = tpu.matmul %39, %41, %cst_28 {dimension_numbers = #tpu.dot_dimension_numbers<[1], [0], [0], [1], [0, 0, 1, 1], [], []>} : vector<8x128xbf16>, vector<128x512xbf16>, vector<8x512xf32> -> vector<8x512xf32>
    %43 = arith.addf %37, %42 : vector<8x512xf32>
    %44 = vector.extract_strided_slice %26 {offsets = [3, 0, 0], sizes = [1, 8, 128], strides = [1, 1, 1]} : vector<18x8x128xbf16> to vector<1x8x128xbf16>
    %45 = vector.shape_cast %44 : vector<1x8x128xbf16> to vector<8x128xbf16>
    %c3 = arith.constant 3 : index
    %c0_29 = arith.constant 0 : index
    %c0_30 = arith.constant 0 : index
    %46 = vector.load %arg8[%c3, %c0_29, %c0_30] : memref<18x128x512xbf16, #tpu.memory_space<vmem>>, vector<1x128x512xbf16>
    %47 = vector.shape_cast %46 : vector<1x128x512xbf16> to vector<128x512xbf16>
    %cst_31 = arith.constant dense<0.000000e+00> : vector<8x512xf32>
    %48 = tpu.matmul %45, %47, %cst_31 {dimension_numbers = #tpu.dot_dimension_numbers<[1], [0], [0], [1], [0, 0, 1, 1], [], []>} : vector<8x128xbf16>, vector<128x512xbf16>, vector<8x512xf32> -> vector<8x512xf32>
    %49 = arith.addf %43, %48 : vector<8x512xf32>
    %50 = vector.extract_strided_slice %26 {offsets = [4, 0, 0], sizes = [1, 8, 128], strides = [1, 1, 1]} : vector<18x8x128xbf16> to vector<1x8x128xbf16>
    %51 = vector.shape_cast %50 : vector<1x8x128xbf16> to vector<8x128xbf16>
    %c4 = arith.constant 4 : index
    %c0_32 = arith.constant 0 : index
    %c0_33 = arith.constant 0 : index
    %52 = vector.load %arg8[%c4, %c0_32, %c0_33] : memref<18x128x512xbf16, #tpu.memory_space<vmem>>, vector<1x128x512xbf16>
    %53 = vector.shape_cast %52 : vector<1x128x512xbf16> to vector<128x512xbf16>
    %cst_34 = arith.constant dense<0.000000e+00> : vector<8x512xf32>
    %54 = tpu.matmul %51, %53, %cst_34 {dimension_numbers = #tpu.dot_dimension_numbers<[1], [0], [0], [1], [0, 0, 1, 1], [], []>} : vector<8x128xbf16>, vector<128x512xbf16>, vector<8x512xf32> -> vector<8x512xf32>
    %55 = arith.addf %49, %54 : vector<8x512xf32>
    %56 = vector.extract_strided_slice %26 {offsets = [5, 0, 0], sizes = [1, 8, 128], strides = [1, 1, 1]} : vector<18x8x128xbf16> to vector<1x8x128xbf16>
    %57 = vector.shape_cast %56 : vector<1x8x128xbf16> to vector<8x128xbf16>
    %c5 = arith.constant 5 : index
    %c0_35 = arith.constant 0 : index
    %c0_36 = arith.constant 0 : index
    %58 = vector.load %arg8[%c5, %c0_35, %c0_36] : memref<18x128x512xbf16, #tpu.memory_space<vmem>>, vector<1x128x512xbf16>
    %59 = vector.shape_cast %58 : vector<1x128x512xbf16> to vector<128x512xbf16>
    %cst_37 = arith.constant dense<0.000000e+00> : vector<8x512xf32>
    %60 = tpu.matmul %57, %59, %cst_37 {dimension_numbers = #tpu.dot_dimension_numbers<[1], [0], [0], [1], [0, 0, 1, 1], [], []>} : vector<8x128xbf16>, vector<128x512xbf16>, vector<8x512xf32> -> vector<8x512xf32>
    %61 = arith.addf %55, %60 : vector<8x512xf32>
    %62 = vector.extract_strided_slice %26 {offsets = [6, 0, 0], sizes = [1, 8, 128], strides = [1, 1, 1]} : vector<18x8x128xbf16> to vector<1x8x128xbf16>
    %63 = vector.shape_cast %62 : vector<1x8x128xbf16> to vector<8x128xbf16>
    %c6 = arith.constant 6 : index
    %c0_38 = arith.constant 0 : index
    %c0_39 = arith.constant 0 : index
    %64 = vector.load %arg8[%c6, %c0_38, %c0_39] : memref<18x128x512xbf16, #tpu.memory_space<vmem>>, vector<1x128x512xbf16>
    %65 = vector.shape_cast %64 : vector<1x128x512xbf16> to vector<128x512xbf16>
    %cst_40 = arith.constant dense<0.000000e+00> : vector<8x512xf32>
    %66 = tpu.matmul %63, %65, %cst_40 {dimension_numbers = #tpu.dot_dimension_numbers<[1], [0], [0], [1], [0, 0, 1, 1], [], []>} : vector<8x128xbf16>, vector<128x512xbf16>, vector<8x512xf32> -> vector<8x512xf32>
    %67 = arith.addf %61, %66 : vector<8x512xf32>
    %68 = vector.extract_strided_slice %26 {offsets = [7, 0, 0], sizes = [1, 8, 128], strides = [1, 1, 1]} : vector<18x8x128xbf16> to vector<1x8x128xbf16>
    %69 = vector.shape_cast %68 : vector<1x8x128xbf16> to vector<8x128xbf16>
    %c7 = arith.constant 7 : index
    %c0_41 = arith.constant 0 : index
    %c0_42 = arith.constant 0 : index
    %70 = vector.load %arg8[%c7, %c0_41, %c0_42] : memref<18x128x512xbf16, #tpu.memory_space<vmem>>, vector<1x128x512xbf16>
    %71 = vector.shape_cast %70 : vector<1x128x512xbf16> to vector<128x512xbf16>
    %cst_43 = arith.constant dense<0.000000e+00> : vector<8x512xf32>
    %72 = tpu.matmul %69, %71, %cst_43 {dimension_numbers = #tpu.dot_dimension_numbers<[1], [0], [0], [1], [0, 0, 1, 1], [], []>} : vector<8x128xbf16>, vector<128x512xbf16>, vector<8x512xf32> -> vector<8x512xf32>
    %73 = arith.addf %67, %72 : vector<8x512xf32>
    %74 = vector.extract_strided_slice %26 {offsets = [8, 0, 0], sizes = [1, 8, 128], strides = [1, 1, 1]} : vector<18x8x128xbf16> to vector<1x8x128xbf16>
    %75 = vector.shape_cast %74 : vector<1x8x128xbf16> to vector<8x128xbf16>
    %c8 = arith.constant 8 : index
    %c0_44 = arith.constant 0 : index
    %c0_45 = arith.constant 0 : index
    %76 = vector.load %arg8[%c8, %c0_44, %c0_45] : memref<18x128x512xbf16, #tpu.memory_space<vmem>>, vector<1x128x512xbf16>
    %77 = vector.shape_cast %76 : vector<1x128x512xbf16> to vector<128x512xbf16>
    %cst_46 = arith.constant dense<0.000000e+00> : vector<8x512xf32>
    %78 = tpu.matmul %75, %77, %cst_46 {dimension_numbers = #tpu.dot_dimension_numbers<[1], [0], [0], [1], [0, 0, 1, 1], [], []>} : vector<8x128xbf16>, vector<128x512xbf16>, vector<8x512xf32> -> vector<8x512xf32>
    %79 = arith.addf %73, %78 : vector<8x512xf32>
    %80 = vector.extract_strided_slice %26 {offsets = [9, 0, 0], sizes = [1, 8, 128], strides = [1, 1, 1]} : vector<18x8x128xbf16> to vector<1x8x128xbf16>
    %81 = vector.shape_cast %80 : vector<1x8x128xbf16> to vector<8x128xbf16>
    %c9 = arith.constant 9 : index
    %c0_47 = arith.constant 0 : index
    %c0_48 = arith.constant 0 : index
    %82 = vector.load %arg8[%c9, %c0_47, %c0_48] : memref<18x128x512xbf16, #tpu.memory_space<vmem>>, vector<1x128x512xbf16>
    %83 = vector.shape_cast %82 : vector<1x128x512xbf16> to vector<128x512xbf16>
    %cst_49 = arith.constant dense<0.000000e+00> : vector<8x512xf32>
    %84 = tpu.matmul %81, %83, %cst_49 {dimension_numbers = #tpu.dot_dimension_numbers<[1], [0], [0], [1], [0, 0, 1, 1], [], []>} : vector<8x128xbf16>, vector<128x512xbf16>, vector<8x512xf32> -> vector<8x512xf32>
    %85 = arith.addf %79, %84 : vector<8x512xf32>
    %86 = vector.extract_strided_slice %26 {offsets = [10, 0, 0], sizes = [1, 8, 128], strides = [1, 1, 1]} : vector<18x8x128xbf16> to vector<1x8x128xbf16>
    %87 = vector.shape_cast %86 : vector<1x8x128xbf16> to vector<8x128xbf16>
    %c10 = arith.constant 10 : index
    %c0_50 = arith.constant 0 : index
    %c0_51 = arith.constant 0 : index
    %88 = vector.load %arg8[%c10, %c0_50, %c0_51] : memref<18x128x512xbf16, #tpu.memory_space<vmem>>, vector<1x128x512xbf16>
    %89 = vector.shape_cast %88 : vector<1x128x512xbf16> to vector<128x512xbf16>
    %cst_52 = arith.constant dense<0.000000e+00> : vector<8x512xf32>
    %90 = tpu.matmul %87, %89, %cst_52 {dimension_numbers = #tpu.dot_dimension_numbers<[1], [0], [0], [1], [0, 0, 1, 1], [], []>} : vector<8x128xbf16>, vector<128x512xbf16>, vector<8x512xf32> -> vector<8x512xf32>
    %91 = arith.addf %85, %90 : vector<8x512xf32>
    %92 = vector.extract_strided_slice %26 {offsets = [11, 0, 0], sizes = [1, 8, 128], strides = [1, 1, 1]} : vector<18x8x128xbf16> to vector<1x8x128xbf16>
    %93 = vector.shape_cast %92 : vector<1x8x128xbf16> to vector<8x128xbf16>
    %c11 = arith.constant 11 : index
    %c0_53 = arith.constant 0 : index
    %c0_54 = arith.constant 0 : index
    %94 = vector.load %arg8[%c11, %c0_53, %c0_54] : memref<18x128x512xbf16, #tpu.memory_space<vmem>>, vector<1x128x512xbf16>
    %95 = vector.shape_cast %94 : vector<1x128x512xbf16> to vector<128x512xbf16>
    %cst_55 = arith.constant dense<0.000000e+00> : vector<8x512xf32>
    %96 = tpu.matmul %93, %95, %cst_55 {dimension_numbers = #tpu.dot_dimension_numbers<[1], [0], [0], [1], [0, 0, 1, 1], [], []>} : vector<8x128xbf16>, vector<128x512xbf16>, vector<8x512xf32> -> vector<8x512xf32>
    %97 = arith.addf %91, %96 : vector<8x512xf32>
    %98 = vector.extract_strided_slice %26 {offsets = [12, 0, 0], sizes = [1, 8, 128], strides = [1, 1, 1]} : vector<18x8x128xbf16> to vector<1x8x128xbf16>
    %99 = vector.shape_cast %98 : vector<1x8x128xbf16> to vector<8x128xbf16>
    %c12 = arith.constant 12 : index
    %c0_56 = arith.constant 0 : index
    %c0_57 = arith.constant 0 : index
    %100 = vector.load %arg8[%c12, %c0_56, %c0_57] : memref<18x128x512xbf16, #tpu.memory_space<vmem>>, vector<1x128x512xbf16>
    %101 = vector.shape_cast %100 : vector<1x128x512xbf16> to vector<128x512xbf16>
    %cst_58 = arith.constant dense<0.000000e+00> : vector<8x512xf32>
    %102 = tpu.matmul %99, %101, %cst_58 {dimension_numbers = #tpu.dot_dimension_numbers<[1], [0], [0], [1], [0, 0, 1, 1], [], []>} : vector<8x128xbf16>, vector<128x512xbf16>, vector<8x512xf32> -> vector<8x512xf32>
    %103 = arith.addf %97, %102 : vector<8x512xf32>
    %104 = vector.extract_strided_slice %26 {offsets = [13, 0, 0], sizes = [1, 8, 128], strides = [1, 1, 1]} : vector<18x8x128xbf16> to vector<1x8x128xbf16>
    %105 = vector.shape_cast %104 : vector<1x8x128xbf16> to vector<8x128xbf16>
    %c13 = arith.constant 13 : index
    %c0_59 = arith.constant 0 : index
    %c0_60 = arith.constant 0 : index
    %106 = vector.load %arg8[%c13, %c0_59, %c0_60] : memref<18x128x512xbf16, #tpu.memory_space<vmem>>, vector<1x128x512xbf16>
    %107 = vector.shape_cast %106 : vector<1x128x512xbf16> to vector<128x512xbf16>
    %cst_61 = arith.constant dense<0.000000e+00> : vector<8x512xf32>
    %108 = tpu.matmul %105, %107, %cst_61 {dimension_numbers = #tpu.dot_dimension_numbers<[1], [0], [0], [1], [0, 0, 1, 1], [], []>} : vector<8x128xbf16>, vector<128x512xbf16>, vector<8x512xf32> -> vector<8x512xf32>
    %109 = arith.addf %103, %108 : vector<8x512xf32>
    %110 = vector.extract_strided_slice %26 {offsets = [14, 0, 0], sizes = [1, 8, 128], strides = [1, 1, 1]} : vector<18x8x128xbf16> to vector<1x8x128xbf16>
    %111 = vector.shape_cast %110 : vector<1x8x128xbf16> to vector<8x128xbf16>
    %c14 = arith.constant 14 : index
    %c0_62 = arith.constant 0 : index
    %c0_63 = arith.constant 0 : index
    %112 = vector.load %arg8[%c14, %c0_62, %c0_63] : memref<18x128x512xbf16, #tpu.memory_space<vmem>>, vector<1x128x512xbf16>
    %113 = vector.shape_cast %112 : vector<1x128x512xbf16> to vector<128x512xbf16>
    %cst_64 = arith.constant dense<0.000000e+00> : vector<8x512xf32>
    %114 = tpu.matmul %111, %113, %cst_64 {dimension_numbers = #tpu.dot_dimension_numbers<[1], [0], [0], [1], [0, 0, 1, 1], [], []>} : vector<8x128xbf16>, vector<128x512xbf16>, vector<8x512xf32> -> vector<8x512xf32>
    %115 = arith.addf %109, %114 : vector<8x512xf32>
    %116 = vector.extract_strided_slice %26 {offsets = [15, 0, 0], sizes = [1, 8, 128], strides = [1, 1, 1]} : vector<18x8x128xbf16> to vector<1x8x128xbf16>
    %117 = vector.shape_cast %116 : vector<1x8x128xbf16> to vector<8x128xbf16>
    %c15 = arith.constant 15 : index
    %c0_65 = arith.constant 0 : index
    %c0_66 = arith.constant 0 : index
    %118 = vector.load %arg8[%c15, %c0_65, %c0_66] : memref<18x128x512xbf16, #tpu.memory_space<vmem>>, vector<1x128x512xbf16>
    %119 = vector.shape_cast %118 : vector<1x128x512xbf16> to vector<128x512xbf16>
    %cst_67 = arith.constant dense<0.000000e+00> : vector<8x512xf32>
    %120 = tpu.matmul %117, %119, %cst_67 {dimension_numbers = #tpu.dot_dimension_numbers<[1], [0], [0], [1], [0, 0, 1, 1], [], []>} : vector<8x128xbf16>, vector<128x512xbf16>, vector<8x512xf32> -> vector<8x512xf32>
    %121 = arith.addf %115, %120 : vector<8x512xf32>
    %122 = vector.extract_strided_slice %26 {offsets = [16, 0, 0], sizes = [1, 8, 128], strides = [1, 1, 1]} : vector<18x8x128xbf16> to vector<1x8x128xbf16>
    %123 = vector.shape_cast %122 : vector<1x8x128xbf16> to vector<8x128xbf16>
    %c16 = arith.constant 16 : index
    %c0_68 = arith.constant 0 : index
    %c0_69 = arith.constant 0 : index
    %124 = vector.load %arg8[%c16, %c0_68, %c0_69] : memref<18x128x512xbf16, #tpu.memory_space<vmem>>, vector<1x128x512xbf16>
    %125 = vector.shape_cast %124 : vector<1x128x512xbf16> to vector<128x512xbf16>
    %cst_70 = arith.constant dense<0.000000e+00> : vector<8x512xf32>
    %126 = tpu.matmul %123, %125, %cst_70 {dimension_numbers = #tpu.dot_dimension_numbers<[1], [0], [0], [1], [0, 0, 1, 1], [], []>} : vector<8x128xbf16>, vector<128x512xbf16>, vector<8x512xf32> -> vector<8x512xf32>
    %127 = arith.addf %121, %126 : vector<8x512xf32>
    %128 = vector.extract_strided_slice %26 {offsets = [17, 0, 0], sizes = [1, 8, 128], strides = [1, 1, 1]} : vector<18x8x128xbf16> to vector<1x8x128xbf16>
    %129 = vector.shape_cast %128 : vector<1x8x128xbf16> to vector<8x128xbf16>
    %c17 = arith.constant 17 : index
    %c0_71 = arith.constant 0 : index
    %c0_72 = arith.constant 0 : index
    %130 = vector.load %arg8[%c17, %c0_71, %c0_72] : memref<18x128x512xbf16, #tpu.memory_space<vmem>>, vector<1x128x512xbf16>
    %131 = vector.shape_cast %130 : vector<1x128x512xbf16> to vector<128x512xbf16>
    %cst_73 = arith.constant dense<0.000000e+00> : vector<8x512xf32>
    %132 = tpu.matmul %129, %131, %cst_73 {dimension_numbers = #tpu.dot_dimension_numbers<[1], [0], [0], [1], [0, 0, 1, 1], [], []>} : vector<8x128xbf16>, vector<128x512xbf16>, vector<8x512xf32> -> vector<8x512xf32>
    %133 = arith.addf %127, %132 : vector<8x512xf32>
    %c0_74 = arith.constant 0 : index
    %c0_75 = arith.constant 0 : index
    %134 = vector.load %arg9[%c0_74, %c0_75] : memref<1x512xf32, #tpu.memory_space<vmem>>, vector<1x512xf32>
    %135 = vector.broadcast %134 : vector<1x512xf32> to vector<8x512xf32>
    %136 = arith.addf %133, %135 : vector<8x512xf32>
    %cst_76 = arith.constant 0.000000e+00 : f32
    %137 = vector.broadcast %cst_76 : f32 to vector<8x512xf32>
    %138 = arith.maximumf %136, %137 : vector<8x512xf32>
    %139 = arith.truncf %138 : vector<8x512xf32> to vector<8x512xbf16>
    %c0_77 = arith.constant 0 : index
    %c0_78 = arith.constant 0 : index
    %140 = vector.load %arg10[%c0_77, %c0_78] : memref<512x128xbf16, #tpu.memory_space<vmem>>, vector<512x128xbf16>
    %cst_79 = arith.constant dense<0.000000e+00> : vector<8x128xf32>
    %141 = tpu.matmul %139, %140, %cst_79 {dimension_numbers = #tpu.dot_dimension_numbers<[1], [0], [0], [1], [0, 0, 1, 1], [], []>} : vector<8x512xbf16>, vector<512x128xbf16>, vector<8x128xf32> -> vector<8x128xf32>
    %c0_80 = arith.constant 0 : index
    %c0_81 = arith.constant 0 : index
    %142 = vector.load %arg11[%c0_80, %c0_81] : memref<1x128xf32, #tpu.memory_space<vmem>>, vector<1x128xf32>
    %143 = vector.broadcast %142 : vector<1x128xf32> to vector<8x128xf32>
    %144 = arith.addf %141, %143 : vector<8x128xf32>
    %cst_82 = arith.constant 0.000000e+00 : f32
    %145 = vector.broadcast %cst_82 : f32 to vector<8x128xf32>
    %146 = arith.maximumf %144, %145 : vector<8x128xf32>
    %c0_83 = arith.constant 0 : index
    %c0_84 = arith.constant 0 : index
    %147 = vector.load %arg12[%c0_83, %c0_84] : memref<1x128xf32, #tpu.memory_space<vmem>>, vector<1x128xf32>
    %cst_85 = arith.constant dense<0.000000e+00> : vector<1x8xf32>
    %148 = tpu.matmul %147, %146, %cst_85 {dimension_numbers = #tpu.dot_dimension_numbers<[1], [1], [0], [0], [0, 0, 1, 0], [], []>} : vector<1x128xf32>, vector<8x128xf32>, vector<1x8xf32> -> vector<1x8xf32>
    %c0_86 = arith.constant 0 : index
    %c0_87 = arith.constant 0 : index
    %149 = vector.load %arg13[%c0_86, %c0_87] : memref<1x1xf32, #tpu.memory_space<vmem>>, vector<1x1xf32>
    %150 = vector.broadcast %149 : vector<1x1xf32> to vector<1x8xf32>
    %151 = arith.addf %148, %150 : vector<1x8xf32>
    %152 = arith.negf %151 : vector<1x8xf32>
    %153 = math.exp %152 : vector<1x8xf32>
    %cst_88 = arith.constant 1.000000e+00 : f32
    %154 = vector.broadcast %cst_88 : f32 to vector<1x8xf32>
    %155 = arith.addf %154, %153 : vector<1x8xf32>
    %156 = arith.divf %154, %155 : vector<1x8xf32>
    %157 = vector.shape_cast %156 : vector<1x8xf32> to vector<1x1x8xf32>
    %c0_89 = arith.constant 0 : index
    %c0_90 = arith.constant 0 : index
    %c0_91 = arith.constant 0 : index
    %158 = vector.load %arg14[%c0_89, %c0_90, %c0_91] : memref<1x1x8xf32, #tpu.memory_space<vmem>>, vector<1x1x8xf32>
    tpu.vector_store %arg14[%c0_89, %c0_90, %c0_91], %157 {strides = array<i32>} : memref<1x1x8xf32, #tpu.memory_space<vmem>>, vector<1x1x8xf32>,
    return
  }
  func.func @transform_0(%arg0: i32) -> (i32, i32, i32) {
    %c0_i32 = arith.constant 0 : i32
    %c0_i32_0 = arith.constant 0 : i32
    %c0_i32_1 = arith.constant 0 : i32
    return %c0_i32, %arg0, %c0_i32_0 : i32, i32, i32
  }
  func.func @transform_1(%arg0: i32) -> (i32, i32) {
    %c0_i32 = arith.constant 0 : i32
    %c0_i32_0 = arith.constant 0 : i32
    %c0_i32_1 = arith.constant 0 : i32
    return %c0_i32, %c0_i32_0 : i32, i32
  }
  func.func @transform_2(%arg0: i32) -> (i32, i32) {
    %c0_i32 = arith.constant 0 : i32
    %c0_i32_0 = arith.constant 0 : i32
    %c0_i32_1 = arith.constant 0 : i32
    return %c0_i32, %c0_i32_0 : i32, i32
  }
  func.func @transform_3(%arg0: i32) -> (i32, i32) {
    %c0_i32 = arith.constant 0 : i32
    %c0_i32_0 = arith.constant 0 : i32
    %c0_i32_1 = arith.constant 0 : i32
    return %c0_i32, %c0_i32_0 : i32, i32
  }
  func.func @transform_4(%arg0: i32) -> (i32, i32) {
    %c0_i32 = arith.constant 0 : i32
    %c0_i32_0 = arith.constant 0 : i32
    %c0_i32_1 = arith.constant 0 : i32
    return %c0_i32, %c0_i32_0 : i32, i32
  }
  func.func @transform_5(%arg0: i32) -> (i32, i32) {
    %c0_i32 = arith.constant 0 : i32
    %c0_i32_0 = arith.constant 0 : i32
    %c0_i32_1 = arith.constant 0 : i32
    return %c0_i32, %c0_i32_0 : i32, i32
  }
  func.func @transform_6(%arg0: i32) -> (i32, i32) {
    %c0_i32 = arith.constant 0 : i32
    %c0_i32_0 = arith.constant 0 : i32
    %c0_i32_1 = arith.constant 0 : i32
    return %c0_i32, %c0_i32_0 : i32, i32
  }
  func.func @transform_7(%arg0: i32) -> (i32, i32, i32) {
    %c0_i32 = arith.constant 0 : i32
    %c0_i32_0 = arith.constant 0 : i32
    %c0_i32_1 = arith.constant 0 : i32
    %c0_i32_2 = arith.constant 0 : i32
    return %c0_i32, %c0_i32_0, %c0_i32_1 : i32, i32, i32
  }
  func.func @transform_8(%arg0: i32) -> (i32, i32) {
    %c0_i32 = arith.constant 0 : i32
    %c0_i32_0 = arith.constant 0 : i32
    %c0_i32_1 = arith.constant 0 : i32
    return %c0_i32, %c0_i32_0 : i32, i32
  }
  func.func @transform_9(%arg0: i32) -> (i32, i32) {
    %c0_i32 = arith.constant 0 : i32
    %c0_i32_0 = arith.constant 0 : i32
    %c0_i32_1 = arith.constant 0 : i32
    return %c0_i32, %c0_i32_0 : i32, i32
  }
  func.func @transform_10(%arg0: i32) -> (i32, i32) {
    %c0_i32 = arith.constant 0 : i32
    %c0_i32_0 = arith.constant 0 : i32
    %c0_i32_1 = arith.constant 0 : i32
    return %c0_i32, %c0_i32_0 : i32, i32
  }
  func.func @transform_11(%arg0: i32) -> (i32, i32) {
    %c0_i32 = arith.constant 0 : i32
    %c0_i32_0 = arith.constant 0 : i32
    %c0_i32_1 = arith.constant 0 : i32
    return %c0_i32, %c0_i32_0 : i32, i32
  }
  func.func @transform_12(%arg0: i32) -> (i32, i32) {
    %c0_i32 = arith.constant 0 : i32
    %c0_i32_0 = arith.constant 0 : i32
    %c0_i32_1 = arith.constant 0 : i32
    return %c0_i32, %c0_i32_0 : i32, i32
  }
  func.func @transform_13(%arg0: i32) -> (i32, i32, i32) {
    %c0_i32 = arith.constant 0 : i32
    %c0_i32_0 = arith.constant 0 : i32
    %c0_i32_1 = arith.constant 0 : i32
    return %arg0, %c0_i32, %c0_i32_0 : i32, i32, i32
  }
}

module attributes {stable_mosaic.version = 11 : i64} {
  func.func @_fused_kernel(%arg0: i32, %arg1: memref<18x8x33xbf16, #tpu.memory_space<vmem>>, %arg2: memref<33x352xbf16, #tpu.memory_space<vmem>>, %arg3: memref<1x352xf32, #tpu.memory_space<vmem>>, %arg4: memref<352x192xbf16, #tpu.memory_space<vmem>>, %arg5: memref<1x192xf32, #tpu.memory_space<vmem>>, %arg6: memref<192x128xbf16, #tpu.memory_space<vmem>>, %arg7: memref<1x128xf32, #tpu.memory_space<vmem>>, %arg8: memref<18x128x512xbf16, #tpu.memory_space<vmem>>, %arg9: memref<1x512xf32, #tpu.memory_space<vmem>>, %arg10: memref<512x128xbf16, #tpu.memory_space<vmem>>, %arg11: memref<1x128xf32, #tpu.memory_space<vmem>>, %arg12: memref<1x128xf32, #tpu.memory_space<vmem>>, %arg13: memref<1x1xf32, #tpu.memory_space<vmem>>, %arg14: memref<1x1x8xf32, #tpu.memory_space<vmem>>) attributes {dimension_semantics = [#tpu.dimension_semantics<parallel>], iteration_bounds = array<i64: 1>, scalar_prefetch = 0 : i64, scratch_operands = 0 : i64, tpu.core_type = #tpu.core_type<tc>, window_params = [{transform_indices = @transform_0, window_bounds = array<i64: 18, 8, 33>}, {pipeline_mode = #tpu.pipeline_mode<synchronous>, transform_indices = @transform_1, window_bounds = array<i64: 33, 352>}, {pipeline_mode = #tpu.pipeline_mode<synchronous>, transform_indices = @transform_2, window_bounds = array<i64: 1, 352>}, {pipeline_mode = #tpu.pipeline_mode<synchronous>, transform_indices = @transform_3, window_bounds = array<i64: 352, 192>}, {pipeline_mode = #tpu.pipeline_mode<synchronous>, transform_indices = @transform_4, window_bounds = array<i64: 1, 192>}, {pipeline_mode = #tpu.pipeline_mode<synchronous>, transform_indices = @transform_5, window_bounds = array<i64: 192, 128>}, {pipeline_mode = #tpu.pipeline_mode<synchronous>, transform_indices = @transform_6, window_bounds = array<i64: 1, 128>}, {pipeline_mode = #tpu.pipeline_mode<synchronous>, transform_indices = @transform_7, window_bounds = array<i64: 18, 128, 512>}, {pipeline_mode = #tpu.pipeline_mode<synchronous>, transform_indices = @transform_8, window_bounds = array<i64: 1, 512>}, {pipeline_mode = #tpu.pipeline_mode<synchronous>, transform_indices = @transform_9, window_bounds = array<i64: 512, 128>}, {pipeline_mode = #tpu.pipeline_mode<synchronous>, transform_indices = @transform_10, window_bounds = array<i64: 1, 128>}, {pipeline_mode = #tpu.pipeline_mode<synchronous>, transform_indices = @transform_11, window_bounds = array<i64: 1, 128>}, {pipeline_mode = #tpu.pipeline_mode<synchronous>, transform_indices = @transform_12, window_bounds = array<i64: 1, 1>}, {transform_indices = @transform_13, window_bounds = array<i64: 1, 1, 8>}]} {
    %c0 = arith.constant 0 : index
    %c0_0 = arith.constant 0 : index
    %c0_1 = arith.constant 0 : index
    %0 = vector.load %arg1[%c0, %c0_0, %c0_1] : memref<18x8x33xbf16, #tpu.memory_space<vmem>>, vector<18x8x33xbf16>
    %1 = vector.shape_cast %0 : vector<18x8x33xbf16> to vector<144x33xbf16>
    %c0_2 = arith.constant 0 : index
    %c0_3 = arith.constant 0 : index
    %2 = vector.load %arg2[%c0_2, %c0_3] : memref<33x352xbf16, #tpu.memory_space<vmem>>, vector<33x352xbf16>
    %cst = arith.constant dense<0.000000e+00> : vector<144x352xf32>
    %3 = tpu.matmul %1, %2, %cst {dimension_numbers = #tpu.dot_dimension_numbers<[1], [0], [0], [1], [0, 0, 1, 1], [], []>} : vector<144x33xbf16>, vector<33x352xbf16>, vector<144x352xf32> -> vector<144x352xf32>
    %c0_4 = arith.constant 0 : index
    %c0_5 = arith.constant 0 : index
    %4 = vector.load %arg3[%c0_4, %c0_5] : memref<1x352xf32, #tpu.memory_space<vmem>>, vector<1x352xf32>
    %5 = vector.broadcast %4 : vector<1x352xf32> to vector<144x352xf32>
    %6 = arith.addf %3, %5 : vector<144x352xf32>
    %cst_6 = arith.constant 0.000000e+00 : f32
    %7 = vector.broadcast %cst_6 : f32 to vector<144x352xf32>
    %8 = arith.maximumf %6, %7 : vector<144x352xf32>
    %9 = arith.truncf %8 : vector<144x352xf32> to vector<144x352xbf16>
    %c0_7 = arith.constant 0 : index
    %c0_8 = arith.constant 0 : index
    %10 = vector.load %arg4[%c0_7, %c0_8] : memref<352x192xbf16, #tpu.memory_space<vmem>>, vector<352x192xbf16>
    %cst_9 = arith.constant dense<0.000000e+00> : vector<144x192xf32>
    %11 = tpu.matmul %9, %10, %cst_9 {dimension_numbers = #tpu.dot_dimension_numbers<[1], [0], [0], [1], [0, 0, 1, 1], [], []>} : vector<144x352xbf16>, vector<352x192xbf16>, vector<144x192xf32> -> vector<144x192xf32>
    %c0_10 = arith.constant 0 : index
    %c0_11 = arith.constant 0 : index
    %12 = vector.load %arg5[%c0_10, %c0_11] : memref<1x192xf32, #tpu.memory_space<vmem>>, vector<1x192xf32>
    %13 = vector.broadcast %12 : vector<1x192xf32> to vector<144x192xf32>
    %14 = arith.addf %11, %13 : vector<144x192xf32>
    %cst_12 = arith.constant 0.000000e+00 : f32
    %15 = vector.broadcast %cst_12 : f32 to vector<144x192xf32>
    %16 = arith.maximumf %14, %15 : vector<144x192xf32>
    %17 = arith.truncf %16 : vector<144x192xf32> to vector<144x192xbf16>
    %c0_13 = arith.constant 0 : index
    %c0_14 = arith.constant 0 : index
    %18 = vector.load %arg6[%c0_13, %c0_14] : memref<192x128xbf16, #tpu.memory_space<vmem>>, vector<192x128xbf16>
    %cst_15 = arith.constant dense<0.000000e+00> : vector<144x128xf32>
    %19 = tpu.matmul %17, %18, %cst_15 {dimension_numbers = #tpu.dot_dimension_numbers<[1], [0], [0], [1], [0, 0, 1, 1], [], []>} : vector<144x192xbf16>, vector<192x128xbf16>, vector<144x128xf32> -> vector<144x128xf32>
    %c0_16 = arith.constant 0 : index
    %c0_17 = arith.constant 0 : index
    %20 = vector.load %arg7[%c0_16, %c0_17] : memref<1x128xf32, #tpu.memory_space<vmem>>, vector<1x128xf32>
    %21 = vector.broadcast %20 : vector<1x128xf32> to vector<144x128xf32>
    %22 = arith.addf %19, %21 : vector<144x128xf32>
    %cst_18 = arith.constant 0.000000e+00 : f32
    %23 = vector.broadcast %cst_18 : f32 to vector<144x128xf32>
    %24 = arith.maximumf %22, %23 : vector<144x128xf32>
    %25 = arith.truncf %24 : vector<144x128xf32> to vector<144x128xbf16>
    %26 = vector.shape_cast %25 : vector<144x128xbf16> to vector<18x8x128xbf16>
    %27 = vector.extract_strided_slice %26 {offsets = [0, 0, 0], sizes = [1, 8, 128], strides = [1, 1, 1]} : vector<18x8x128xbf16> to vector<1x8x128xbf16>
    %28 = vector.shape_cast %27 : vector<1x8x128xbf16> to vector<8x128xbf16>
    %c0_19 = arith.constant 0 : index
    %c0_20 = arith.constant 0 : index
    %c0_21 = arith.constant 0 : index
    %29 = vector.load %arg8[%c0_19, %c0_20, %c0_21] : memref<18x128x512xbf16, #tpu.memory_space<vmem>>, vector<1x128x512xbf16>
    %30 = vector.shape_cast %29 : vector<1x128x512xbf16> to vector<128x512xbf16>
    %cst_22 = arith.constant dense<0.000000e+00> : vector<8x512xf32>
    %31 = tpu.matmul %28, %30, %cst_22 {dimension_numbers = #tpu.dot_dimension_numbers<[1], [0], [0], [1], [0, 0, 1, 1], [], []>} : vector<8x128xbf16>, vector<128x512xbf16>, vector<8x512xf32> -> vector<8x512xf32>
    %32 = vector.extract_strided_slice %26 {offsets = [1, 0, 0], sizes = [1, 8, 128], strides = [1, 1, 1]} : vector<18x8x128xbf16> to vector<1x8x128xbf16>
    %33 = vector.shape_cast %32 : vector<1x8x128xbf16> to vector<8x128xbf16>
    %c1 = arith.constant 1 : index
    %c0_23 = arith.constant 0 : index
    %c0_24 = arith.constant 0 : index
    %34 = vector.load %arg8[%c1, %c0_23, %c0_24] : memref<18x128x512xbf16, #tpu.memory_space<vmem>>, vector<1x128x512xbf16>
    %35 = vector.shape_cast %34 : vector<1x128x512xbf16> to vector<128x512xbf16>
    %cst_25 = arith.constant dense<0.000000e+00> : vector<8x512xf32>
    %36 = tpu.matmul %33, %35, %cst_25 {dimension_numbers = #tpu.dot_dimension_numbers<[1], [0], [0], [1], [0, 0, 1, 1], [], []>} : vector<8x128xbf16>, vector<128x512xbf16>, vector<8x512xf32> -> vector<8x512xf32>
    %37 = arith.addf %31, %36 : vector<8x512xf32>
    %38 = vector.extract_strided_slice %26 {offsets = [2, 0, 0], sizes = [1, 8, 128], strides = [1, 1, 1]} : vector<18x8x128xbf16> to vector<1x8x128xbf16>
    %39 = vector.shape_cast %38 : vector<1x8x128xbf16> to vector<8x128xbf16>
    %c2 = arith.constant 2 : index
    %c0_26 = arith.constant 0 : index
    %c0_27 = arith.constant 0 : index
    %40 = vector.load %arg8[%c2, %c0_26, %c0_27] : memref<18x128x512xbf16, #tpu.memory_space<vmem>>, vector<1x128x512xbf16>
    %41 = vector.shape_cast %40 : vector<1x128x512xbf16> to vector<128x512xbf16>
    %cst_28 = arith.constant dense<0.000000e+00> : vector<8x512xf32>
    %42 = tpu.matmul %39, %41, %cst_28 {dimension_numbers = #tpu.dot_dimension_numbers<[1], [0], [0], [1], [0, 0, 1, 1], [], []>} : vector<8x128xbf16>, vector<128x512xbf16>, vector<8x512xf32> -> vector<8x512xf32>
    %43 = arith.addf %37, %42 : vector<8x512xf32>
    %44 = vector.extract_strided_slice %26 {offsets = [3, 0, 0], sizes = [1, 8, 128], strides = [1, 1, 1]} : vector<18x8x128xbf16> to vector<1x8x128xbf16>
    %45 = vector.shape_cast %44 : vector<1x8x128xbf16> to vector<8x128xbf16>
    %c3 = arith.constant 3 : index
    %c0_29 = arith.constant 0 : index
    %c0_30 = arith.constant 0 : index
    %46 = vector.load %arg8[%c3, %c0_29, %c0_30] : memref<18x128x512xbf16, #tpu.memory_space<vmem>>, vector<1x128x512xbf16>
    %47 = vector.shape_cast %46 : vector<1x128x512xbf16> to vector<128x512xbf16>
    %cst_31 = arith.constant dense<0.000000e+00> : vector<8x512xf32>
    %48 = tpu.matmul %45, %47, %cst_31 {dimension_numbers = #tpu.dot_dimension_numbers<[1], [0], [0], [1], [0, 0, 1, 1], [], []>} : vector<8x128xbf16>, vector<128x512xbf16>, vector<8x512xf32> -> vector<8x512xf32>
    %49 = arith.addf %43, %48 : vector<8x512xf32>
    %50 = vector.extract_strided_slice %26 {offsets = [4, 0, 0], sizes = [1, 8, 128], strides = [1, 1, 1]} : vector<18x8x128xbf16> to vector<1x8x128xbf16>
    %51 = vector.shape_cast %50 : vector<1x8x128xbf16> to vector<8x128xbf16>
    %c4 = arith.constant 4 : index
    %c0_32 = arith.constant 0 : index
    %c0_33 = arith.constant 0 : index
    %52 = vector.load %arg8[%c4, %c0_32, %c0_33] : memref<18x128x512xbf16, #tpu.memory_space<vmem>>, vector<1x128x512xbf16>
    %53 = vector.shape_cast %52 : vector<1x128x512xbf16> to vector<128x512xbf16>
    %cst_34 = arith.constant dense<0.000000e+00> : vector<8x512xf32>
    %54 = tpu.matmul %51, %53, %cst_34 {dimension_numbers = #tpu.dot_dimension_numbers<[1], [0], [0], [1], [0, 0, 1, 1], [], []>} : vector<8x128xbf16>, vector<128x512xbf16>, vector<8x512xf32> -> vector<8x512xf32>
    %55 = arith.addf %49, %54 : vector<8x512xf32>
    %56 = vector.extract_strided_slice %26 {offsets = [5, 0, 0], sizes = [1, 8, 128], strides = [1, 1, 1]} : vector<18x8x128xbf16> to vector<1x8x128xbf16>
    %57 = vector.shape_cast %56 : vector<1x8x128xbf16> to vector<8x128xbf16>
    %c5 = arith.constant 5 : index
    %c0_35 = arith.constant 0 : index
    %c0_36 = arith.constant 0 : index
    %58 = vector.load %arg8[%c5, %c0_35, %c0_36] : memref<18x128x512xbf16, #tpu.memory_space<vmem>>, vector<1x128x512xbf16>
    %59 = vector.shape_cast %58 : vector<1x128x512xbf16> to vector<128x512xbf16>
    %cst_37 = arith.constant dense<0.000000e+00> : vector<8x512xf32>
    %60 = tpu.matmul %57, %59, %cst_37 {dimension_numbers = #tpu.dot_dimension_numbers<[1], [0], [0], [1], [0, 0, 1, 1], [], []>} : vector<8x128xbf16>, vector<128x512xbf16>, vector<8x512xf32> -> vector<8x512xf32>
    %61 = arith.addf %55, %60 : vector<8x512xf32>
    %62 = vector.extract_strided_slice %26 {offsets = [6, 0, 0], sizes = [1, 8, 128], strides = [1, 1, 1]} : vector<18x8x128xbf16> to vector<1x8x128xbf16>
    %63 = vector.shape_cast %62 : vector<1x8x128xbf16> to vector<8x128xbf16>
    %c6 = arith.constant 6 : index
    %c0_38 = arith.constant 0 : index
    %c0_39 = arith.constant 0 : index
    %64 = vector.load %arg8[%c6, %c0_38, %c0_39] : memref<18x128x512xbf16, #tpu.memory_space<vmem>>, vector<1x128x512xbf16>
    %65 = vector.shape_cast %64 : vector<1x128x512xbf16> to vector<128x512xbf16>
    %cst_40 = arith.constant dense<0.000000e+00> : vector<8x512xf32>
    %66 = tpu.matmul %63, %65, %cst_40 {dimension_numbers = #tpu.dot_dimension_numbers<[1], [0], [0], [1], [0, 0, 1, 1], [], []>} : vector<8x128xbf16>, vector<128x512xbf16>, vector<8x512xf32> -> vector<8x512xf32>
    %67 = arith.addf %61, %66 : vector<8x512xf32>
    %68 = vector.extract_strided_slice %26 {offsets = [7, 0, 0], sizes = [1, 8, 128], strides = [1, 1, 1]} : vector<18x8x128xbf16> to vector<1x8x128xbf16>
    %69 = vector.shape_cast %68 : vector<1x8x128xbf16> to vector<8x128xbf16>
    %c7 = arith.constant 7 : index
    %c0_41 = arith.constant 0 : index
    %c0_42 = arith.constant 0 : index
    %70 = vector.load %arg8[%c7, %c0_41, %c0_42] : memref<18x128x512xbf16, #tpu.memory_space<vmem>>, vector<1x128x512xbf16>
    %71 = vector.shape_cast %70 : vector<1x128x512xbf16> to vector<128x512xbf16>
    %cst_43 = arith.constant dense<0.000000e+00> : vector<8x512xf32>
    %72 = tpu.matmul %69, %71, %cst_43 {dimension_numbers = #tpu.dot_dimension_numbers<[1], [0], [0], [1], [0, 0, 1, 1], [], []>} : vector<8x128xbf16>, vector<128x512xbf16>, vector<8x512xf32> -> vector<8x512xf32>
    %73 = arith.addf %67, %72 : vector<8x512xf32>
    %74 = vector.extract_strided_slice %26 {offsets = [8, 0, 0], sizes = [1, 8, 128], strides = [1, 1, 1]} : vector<18x8x128xbf16> to vector<1x8x128xbf16>
    %75 = vector.shape_cast %74 : vector<1x8x128xbf16> to vector<8x128xbf16>
    %c8 = arith.constant 8 : index
    %c0_44 = arith.constant 0 : index
    %c0_45 = arith.constant 0 : index
    %76 = vector.load %arg8[%c8, %c0_44, %c0_45] : memref<18x128x512xbf16, #tpu.memory_space<vmem>>, vector<1x128x512xbf16>
    %77 = vector.shape_cast %76 : vector<1x128x512xbf16> to vector<128x512xbf16>
    %cst_46 = arith.constant dense<0.000000e+00> : vector<8x512xf32>
    %78 = tpu.matmul %75, %77, %cst_46 {dimension_numbers = #tpu.dot_dimension_numbers<[1], [0], [0], [1], [0, 0, 1, 1], [], []>} : vector<8x128xbf16>, vector<128x512xbf16>, vector<8x512xf32> -> vector<8x512xf32>
    %79 = arith.addf %73, %78 : vector<8x512xf32>
    %80 = vector.extract_strided_slice %26 {offsets = [9, 0, 0], sizes = [1, 8, 128], strides = [1, 1, 1]} : vector<18x8x128xbf16> to vector<1x8x128xbf16>
    %81 = vector.shape_cast %80 : vector<1x8x128xbf16> to vector<8x128xbf16>
    %c9 = arith.constant 9 : index
    %c0_47 = arith.constant 0 : index
    %c0_48 = arith.constant 0 : index
    %82 = vector.load %arg8[%c9, %c0_47, %c0_48] : memref<18x128x512xbf16, #tpu.memory_space<vmem>>, vector<1x128x512xbf16>
    %83 = vector.shape_cast %82 : vector<1x128x512xbf16> to vector<128x512xbf16>
    %cst_49 = arith.constant dense<0.000000e+00> : vector<8x512xf32>
    %84 = tpu.matmul %81, %83, %cst_49 {dimension_numbers = #tpu.dot_dimension_numbers<[1], [0], [0], [1], [0, 0, 1, 1], [], []>} : vector<8x128xbf16>, vector<128x512xbf16>, vector<8x512xf32> -> vector<8x512xf32>
    %85 = arith.addf %79, %84 : vector<8x512xf32>
    %86 = vector.extract_strided_slice %26 {offsets = [10, 0, 0], sizes = [1, 8, 128], strides = [1, 1, 1]} : vector<18x8x128xbf16> to vector<1x8x128xbf16>
    %87 = vector.shape_cast %86 : vector<1x8x128xbf16> to vector<8x128xbf16>
    %c10 = arith.constant 10 : index
    %c0_50 = arith.constant 0 : index
    %c0_51 = arith.constant 0 : index
    %88 = vector.load %arg8[%c10, %c0_50, %c0_51] : memref<18x128x512xbf16, #tpu.memory_space<vmem>>, vector<1x128x512xbf16>
    %89 = vector.shape_cast %88 : vector<1x128x512xbf16> to vector<128x512xbf16>
    %cst_52 = arith.constant dense<0.000000e+00> : vector<8x512xf32>
    %90 = tpu.matmul %87, %89, %cst_52 {dimension_numbers = #tpu.dot_dimension_numbers<[1], [0], [0], [1], [0, 0, 1, 1], [], []>} : vector<8x128xbf16>, vector<128x512xbf16>, vector<8x512xf32> -> vector<8x512xf32>
    %91 = arith.addf %85, %90 : vector<8x512xf32>
    %92 = vector.extract_strided_slice %26 {offsets = [11, 0, 0], sizes = [1, 8, 128], strides = [1, 1, 1]} : vector<18x8x128xbf16> to vector<1x8x128xbf16>
    %93 = vector.shape_cast %92 : vector<1x8x128xbf16> to vector<8x128xbf16>
    %c11 = arith.constant 11 : index
    %c0_53 = arith.constant 0 : index
    %c0_54 = arith.constant 0 : index
    %94 = vector.load %arg8[%c11, %c0_53, %c0_54] : memref<18x128x512xbf16, #tpu.memory_space<vmem>>, vector<1x128x512xbf16>
    %95 = vector.shape_cast %94 : vector<1x128x512xbf16> to vector<128x512xbf16>
    %cst_55 = arith.constant dense<0.000000e+00> : vector<8x512xf32>
    %96 = tpu.matmul %93, %95, %cst_55 {dimension_numbers = #tpu.dot_dimension_numbers<[1], [0], [0], [1], [0, 0, 1, 1], [], []>} : vector<8x128xbf16>, vector<128x512xbf16>, vector<8x512xf32> -> vector<8x512xf32>
    %97 = arith.addf %91, %96 : vector<8x512xf32>
    %98 = vector.extract_strided_slice %26 {offsets = [12, 0, 0], sizes = [1, 8, 128], strides = [1, 1, 1]} : vector<18x8x128xbf16> to vector<1x8x128xbf16>
    %99 = vector.shape_cast %98 : vector<1x8x128xbf16> to vector<8x128xbf16>
    %c12 = arith.constant 12 : index
    %c0_56 = arith.constant 0 : index
    %c0_57 = arith.constant 0 : index
    %100 = vector.load %arg8[%c12, %c0_56, %c0_57] : memref<18x128x512xbf16, #tpu.memory_space<vmem>>, vector<1x128x512xbf16>
    %101 = vector.shape_cast %100 : vector<1x128x512xbf16> to vector<128x512xbf16>
    %cst_58 = arith.constant dense<0.000000e+00> : vector<8x512xf32>
    %102 = tpu.matmul %99, %101, %cst_58 {dimension_numbers = #tpu.dot_dimension_numbers<[1], [0], [0], [1], [0, 0, 1, 1], [], []>} : vector<8x128xbf16>, vector<128x512xbf16>, vector<8x512xf32> -> vector<8x512xf32>
    %103 = arith.addf %97, %102 : vector<8x512xf32>
    %104 = vector.extract_strided_slice %26 {offsets = [13, 0, 0], sizes = [1, 8, 128], strides = [1, 1, 1]} : vector<18x8x128xbf16> to vector<1x8x128xbf16>
    %105 = vector.shape_cast %104 : vector<1x8x128xbf16> to vector<8x128xbf16>
    %c13 = arith.constant 13 : index
    %c0_59 = arith.constant 0 : index
    %c0_60 = arith.constant 0 : index
    %106 = vector.load %arg8[%c13, %c0_59, %c0_60] : memref<18x128x512xbf16, #tpu.memory_space<vmem>>, vector<1x128x512xbf16>
    %107 = vector.shape_cast %106 : vector<1x128x512xbf16> to vector<128x512xbf16>
    %cst_61 = arith.constant dense<0.000000e+00> : vector<8x512xf32>
    %108 = tpu.matmul %105, %107, %cst_61 {dimension_numbers = #tpu.dot_dimension_numbers<[1], [0], [0], [1], [0, 0, 1, 1], [], []>} : vector<8x128xbf16>, vector<128x512xbf16>, vector<8x512xf32> -> vector<8x512xf32>
    %109 = arith.addf %103, %108 : vector<8x512xf32>
    %110 = vector.extract_strided_slice %26 {offsets = [14, 0, 0], sizes = [1, 8, 128], strides = [1, 1, 1]} : vector<18x8x128xbf16> to vector<1x8x128xbf16>
    %111 = vector.shape_cast %110 : vector<1x8x128xbf16> to vector<8x128xbf16>
    %c14 = arith.constant 14 : index
    %c0_62 = arith.constant 0 : index
    %c0_63 = arith.constant 0 : index
    %112 = vector.load %arg8[%c14, %c0_62, %c0_63] : memref<18x128x512xbf16, #tpu.memory_space<vmem>>, vector<1x128x512xbf16>
    %113 = vector.shape_cast %112 : vector<1x128x512xbf16> to vector<128x512xbf16>
    %cst_64 = arith.constant dense<0.000000e+00> : vector<8x512xf32>
    %114 = tpu.matmul %111, %113, %cst_64 {dimension_numbers = #tpu.dot_dimension_numbers<[1], [0], [0], [1], [0, 0, 1, 1], [], []>} : vector<8x128xbf16>, vector<128x512xbf16>, vector<8x512xf32> -> vector<8x512xf32>
    %115 = arith.addf %109, %114 : vector<8x512xf32>
    %116 = vector.extract_strided_slice %26 {offsets = [15, 0, 0], sizes = [1, 8, 128], strides = [1, 1, 1]} : vector<18x8x128xbf16> to vector<1x8x128xbf16>
    %117 = vector.shape_cast %116 : vector<1x8x128xbf16> to vector<8x128xbf16>
    %c15 = arith.constant 15 : index
    %c0_65 = arith.constant 0 : index
    %c0_66 = arith.constant 0 : index
    %118 = vector.load %arg8[%c15, %c0_65, %c0_66] : memref<18x128x512xbf16, #tpu.memory_space<vmem>>, vector<1x128x512xbf16>
    %119 = vector.shape_cast %118 : vector<1x128x512xbf16> to vector<128x512xbf16>
    %cst_67 = arith.constant dense<0.000000e+00> : vector<8x512xf32>
    %120 = tpu.matmul %117, %119, %cst_67 {dimension_numbers = #tpu.dot_dimension_numbers<[1], [0], [0], [1], [0, 0, 1, 1], [], []>} : vector<8x128xbf16>, vector<128x512xbf16>, vector<8x512xf32> -> vector<8x512xf32>
    %121 = arith.addf %115, %120 : vector<8x512xf32>
    %122 = vector.extract_strided_slice %26 {offsets = [16, 0, 0], sizes = [1, 8, 128], strides = [1, 1, 1]} : vector<18x8x128xbf16> to vector<1x8x128xbf16>
    %123 = vector.shape_cast %122 : vector<1x8x128xbf16> to vector<8x128xbf16>
    %c16 = arith.constant 16 : index
    %c0_68 = arith.constant 0 : index
    %c0_69 = arith.constant 0 : index
    %124 = vector.load %arg8[%c16, %c0_68, %c0_69] : memref<18x128x512xbf16, #tpu.memory_space<vmem>>, vector<1x128x512xbf16>
    %125 = vector.shape_cast %124 : vector<1x128x512xbf16> to vector<128x512xbf16>
    %cst_70 = arith.constant dense<0.000000e+00> : vector<8x512xf32>
    %126 = tpu.matmul %123, %125, %cst_70 {dimension_numbers = #tpu.dot_dimension_numbers<[1], [0], [0], [1], [0, 0, 1, 1], [], []>} : vector<8x128xbf16>, vector<128x512xbf16>, vector<8x512xf32> -> vector<8x512xf32>
    %127 = arith.addf %121, %126 : vector<8x512xf32>
    %128 = vector.extract_strided_slice %26 {offsets = [17, 0, 0], sizes = [1, 8, 128], strides = [1, 1, 1]} : vector<18x8x128xbf16> to vector<1x8x128xbf16>
    %129 = vector.shape_cast %128 : vector<1x8x128xbf16> to vector<8x128xbf16>
    %c17 = arith.constant 17 : index
    %c0_71 = arith.constant 0 : index
    %c0_72 = arith.constant 0 : index
    %130 = vector.load %arg8[%c17, %c0_71, %c0_72] : memref<18x128x512xbf16, #tpu.memory_space<vmem>>, vector<1x128x512xbf16>
    %131 = vector.shape_cast %130 : vector<1x128x512xbf16> to vector<128x512xbf16>
    %cst_73 = arith.constant dense<0.000000e+00> : vector<8x512xf32>
    %132 = tpu.matmul %129, %131, %cst_73 {dimension_numbers = #tpu.dot_dimension_numbers<[1], [0], [0], [1], [0, 0, 1, 1], [], []>} : vector<8x128xbf16>, vector<128x512xbf16>, vector<8x512xf32> -> vector<8x512xf32>
    %133 = arith.addf %127, %132 : vector<8x512xf32>
    %c0_74 = arith.constant 0 : index
    %c0_75 = arith.constant 0 : index
    %134 = vector.load %arg9[%c0_74, %c0_75] : memref<1x512xf32, #tpu.memory_space<vmem>>, vector<1x512xf32>
    %135 = vector.broadcast %134 : vector<1x512xf32> to vector<8x512xf32>
    %136 = arith.addf %133, %135 : vector<8x512xf32>
    %cst_76 = arith.constant 0.000000e+00 : f32
    %137 = vector.broadcast %cst_76 : f32 to vector<8x512xf32>
    %138 = arith.maximumf %136, %137 : vector<8x512xf32>
    %139 = arith.truncf %138 : vector<8x512xf32> to vector<8x512xbf16>
    %c0_77 = arith.constant 0 : index
    %c0_78 = arith.constant 0 : index
    %140 = vector.load %arg10[%c0_77, %c0_78] : memref<512x128xbf16, #tpu.memory_space<vmem>>, vector<512x128xbf16>
    %cst_79 = arith.constant dense<0.000000e+00> : vector<8x128xf32>
    %141 = tpu.matmul %139, %140, %cst_79 {dimension_numbers = #tpu.dot_dimension_numbers<[1], [0], [0], [1], [0, 0, 1, 1], [], []>} : vector<8x512xbf16>, vector<512x128xbf16>, vector<8x128xf32> -> vector<8x128xf32>
    %c0_80 = arith.constant 0 : index
    %c0_81 = arith.constant 0 : index
    %142 = vector.load %arg11[%c0_80, %c0_81] : memref<1x128xf32, #tpu.memory_space<vmem>>, vector<1x128xf32>
    %143 = vector.broadcast %142 : vector<1x128xf32> to vector<8x128xf32>
    %144 = arith.addf %141, %143 : vector<8x128xf32>
    %cst_82 = arith.constant 0.000000e+00 : f32
    %145 = vector.broadcast %cst_82 : f32 to vector<8x128xf32>
    %146 = arith.maximumf %144, %145 : vector<8x128xf32>
    %c0_83 = arith.constant 0 : index
    %c0_84 = arith.constant 0 : index
    %147 = vector.load %arg12[%c0_83, %c0_84] : memref<1x128xf32, #tpu.memory_space<vmem>>, vector<1x128xf32>
    %cst_85 = arith.constant dense<0.000000e+00> : vector<1x8xf32>
    %148 = tpu.matmul %147, %146, %cst_85 {dimension_numbers = #tpu.dot_dimension_numbers<[1], [1], [0], [0], [0, 0, 1, 0], [], []>} : vector<1x128xf32>, vector<8x128xf32>, vector<1x8xf32> -> vector<1x8xf32>
    %c0_86 = arith.constant 0 : index
    %c0_87 = arith.constant 0 : index
    %149 = vector.load %arg13[%c0_86, %c0_87] : memref<1x1xf32, #tpu.memory_space<vmem>>, vector<1x1xf32>
    %150 = vector.broadcast %149 : vector<1x1xf32> to vector<1x8xf32>
    %151 = arith.addf %148, %150 : vector<1x8xf32>
    %152 = arith.negf %151 : vector<1x8xf32>
    %153 = math.exp %152 : vector<1x8xf32>
    %cst_88 = arith.constant 1.000000e+00 : f32
    %154 = vector.broadcast %cst_88 : f32 to vector<1x8xf32>
    %155 = arith.addf %154, %153 : vector<1x8xf32>
    %156 = arith.divf %154, %155 : vector<1x8xf32>
    %157 = vector.shape_cast %156 : vector<1x8xf32> to vector<1x1x8xf32>
    %c0_89 = arith.constant 0 : index
    %c0_90 = arith.constant 0 : index
    %c0_91 = arith.constant 0 : index
    %158 = vector.load %arg14[%c0_89, %c0_90, %c0_91] : memref<1x1x8xf32, #tpu.memory_space<vmem>>, vector<1x1x8xf32>
    tpu.vector_store %arg14[%c0_89, %c0_90, %c0_91], %157 {strides = array<i32>} : memref<1x1x8xf32, #tpu.memory_space<vmem>>, vector<1x1x8xf32>,
    return
  }
  func.func @transform_0(%arg0: i32) -> (i32, i32, i32) {
    %c0_i32 = arith.constant 0 : i32
    %c0_i32_0 = arith.constant 0 : i32
    %c0_i32_1 = arith.constant 0 : i32
    return %c0_i32, %arg0, %c0_i32_0 : i32, i32, i32
  }
  func.func @transform_1(%arg0: i32) -> (i32, i32) {
    %c0_i32 = arith.constant 0 : i32
    %c0_i32_0 = arith.constant 0 : i32
    %c0_i32_1 = arith.constant 0 : i32
    return %c0_i32, %c0_i32_0 : i32, i32
  }
  func.func @transform_2(%arg0: i32) -> (i32, i32) {
    %c0_i32 = arith.constant 0 : i32
    %c0_i32_0 = arith.constant 0 : i32
    %c0_i32_1 = arith.constant 0 : i32
    return %c0_i32, %c0_i32_0 : i32, i32
  }
  func.func @transform_3(%arg0: i32) -> (i32, i32) {
    %c0_i32 = arith.constant 0 : i32
    %c0_i32_0 = arith.constant 0 : i32
    %c0_i32_1 = arith.constant 0 : i32
    return %c0_i32, %c0_i32_0 : i32, i32
  }
  func.func @transform_4(%arg0: i32) -> (i32, i32) {
    %c0_i32 = arith.constant 0 : i32
    %c0_i32_0 = arith.constant 0 : i32
    %c0_i32_1 = arith.constant 0 : i32
    return %c0_i32, %c0_i32_0 : i32, i32
  }
  func.func @transform_5(%arg0: i32) -> (i32, i32) {
    %c0_i32 = arith.constant 0 : i32
    %c0_i32_0 = arith.constant 0 : i32
    %c0_i32_1 = arith.constant 0 : i32
    return %c0_i32, %c0_i32_0 : i32, i32
  }
  func.func @transform_6(%arg0: i32) -> (i32, i32) {
    %c0_i32 = arith.constant 0 : i32
    %c0_i32_0 = arith.constant 0 : i32
    %c0_i32_1 = arith.constant 0 : i32
    return %c0_i32, %c0_i32_0 : i32, i32
  }
  func.func @transform_7(%arg0: i32) -> (i32, i32, i32) {
    %c0_i32 = arith.constant 0 : i32
    %c0_i32_0 = arith.constant 0 : i32
    %c0_i32_1 = arith.constant 0 : i32
    %c0_i32_2 = arith.constant 0 : i32
    return %c0_i32, %c0_i32_0, %c0_i32_1 : i32, i32, i32
  }
  func.func @transform_8(%arg0: i32) -> (i32, i32) {
    %c0_i32 = arith.constant 0 : i32
    %c0_i32_0 = arith.constant 0 : i32
    %c0_i32_1 = arith.constant 0 : i32
    return %c0_i32, %c0_i32_0 : i32, i32
  }
  func.func @transform_9(%arg0: i32) -> (i32, i32) {
    %c0_i32 = arith.constant 0 : i32
    %c0_i32_0 = arith.constant 0 : i32
    %c0_i32_1 = arith.constant 0 : i32
    return %c0_i32, %c0_i32_0 : i32, i32
  }
  func.func @transform_10(%arg0: i32) -> (i32, i32) {
    %c0_i32 = arith.constant 0 : i32
    %c0_i32_0 = arith.constant 0 : i32
    %c0_i32_1 = arith.constant 0 : i32
    return %c0_i32, %c0_i32_0 : i32, i32
  }
  func.func @transform_11(%arg0: i32) -> (i32, i32) {
    %c0_i32 = arith.constant 0 : i32
    %c0_i32_0 = arith.constant 0 : i32
    %c0_i32_1 = arith.constant 0 : i32
    return %c0_i32, %c0_i32_0 : i32, i32
  }
  func.func @transform_12(%arg0: i32) -> (i32, i32) {
    %c0_i32 = arith.constant 0 : i32
    %c0_i32_0 = arith.constant 0 : i32
    %c0_i32_1 = arith.constant 0 : i32
    return %c0_i32, %c0_i32_0 : i32, i32
  }
  func.func @transform_13(%arg0: i32) -> (i32, i32, i32) {
    %c0_i32 = arith.constant 0 : i32
    %c0_i32_0 = arith.constant 0 : i32
    %c0_i32_1 = arith.constant 0 : i32
    return %arg0, %c0_i32, %c0_i32_0 : i32, i32, i32
  }
}

</mosaic_0001>

<bundles_post_ra>
// kernel: forward.1
= control target key start
LH: loop header
LB: loop body
LE: loop exit
PB: predicated region body
PF: predicated region fallthrough
CT: control target
= control target key end

     0   :  { %s10153_s0 = inlined_call_operand.vmem [shape: bf16[18,8,33], index: 0, kind: input, shape index: {}]   ;;  %s10154_s1 = inlined_call_operand.hbm [shape: bf16[33,352], index: 1, kind: input, shape index: {}]   ;;  %s10155_s2 = inlined_call_operand.hbm [shape: f32[1,352], index: 2, kind: input, shape index: {}]   ;;  %s10156_s3 = inlined_call_operand.vmem [shape: bf16[352,192], index: 3, kind: input, shape index: {}]   ;;  %s10157_s4 = inlined_call_operand.hbm [shape: f32[1,192], index: 4, kind: input, shape index: {}]   ;;  %s10158_s5 = inlined_call_operand.hbm [shape: bf16[192,128], index: 5, kind: input, shape index: {}]   ;;  %s10159_s6 = inlined_call_operand.hbm [shape: f32[1,128], index: 6, kind: input, shape index: {}]   ;;  %s10160_s7 = inlined_call_operand.hbm [shape: bf16[18,128,512], index: 7, kind: input, shape index: {}]   ;;  %s10161_s8 = inlined_call_operand.hbm [shape: f32[1,512], index: 8, kind: input, shape index: {}]   ;;  %s10162_s9 = inlined_call_operand.hbm [shape: bf16[512,128], index: 9, kind: input, shape index: {}]   ;;  %s10163_s10 = inlined_call_operand.hbm [shape: f32[1,128], index: 10, kind: input, shape index: {}]   ;;  %s10164_s11 = inlined_call_operand.hbm [shape: f32[1,128], index: 11, kind: input, shape index: {}]   ;;  %s10165_s12 = inlined_call_operand.<no memory space> [shape: f32[1,1], index: 12, kind: input, shape index: {}]   ;;  %s10166_s13 = inlined_call_operand.vmem [shape: f32[1,1,8], index: 13, kind: output, shape index: {}]  }
   0x1   :  { %v18_v0 = vstv %s10165_s12 }
   0x2   :  { %19 = vst [vmem:[#allocation2] sm:$0x1] %v18_v0 }
   0x3   :  { %20 = vsyncpa [#allocation4], 0 }
   0x4   :  { %21 = vsyncpa [#allocation6], 0 }
   0x5   :  { %22 = vsyncpa [#allocation9], 0 }
   0x6   :  { %23 = vsyncpa [#allocation12], 0 }
   0x7   :  { %24 = vsyncpa [#allocation15], 0 }
   0x8   :  { %25 = vsyncpa [#allocation18], 0  ;;  %s9256_s27 = smov [#allocation5]   ;;  %s9257_s29 = smov [#allocation8]  }
   0x9   :  { %s46_s28 = sshll.u32 %s9256_s27, 4  ;;  %s67_s30 = sshll.u32 %s9257_s29, 4  ;;  %s47_s28 = int_to_ptr.vmem [resolvable:$true] %s46_s28  ;;  %s9348_s30 = int_to_ptr.vmem [resolvable:$true] %s67_s30 }
   0xa   :  { %s9024_s16 = scalar_lea.hbm %s10155_s2, 48 }
   0xb   :  { %p9025_p0 = scmp.ne.s32.totalorder %s10155_s2, %s9024_s16  ;;  %p9028_p1 = scmp.lt.u32.totalorder %s9024_s16, %s10155_s2 }
   0xd   :  { %p9030_p2 = pnand %p9028_p1, %p9025_p0 }
   0xf   :  { %9033 = shalt.err (!%p9030_p2)
}
  0x10   :  { %s9034_s20 = scalar_lea.vmem %s47_s28, 48  ;;  %s9038_s21 = scalar_lea.vmem %s47_s28, 64 }
  0x11   :  { %p9035_p3 = scmp.ne.s32.totalorder %s47_s28, %s9034_s20  ;;  %p9039_p4 = scmp.lt.s32.totalorder %s47_s28, %s47_s28 }
  0x12   :  { %p9040_p5 = scmp.lt.s32.totalorder %s9038_s21, %s9034_s20 }
  0x14   :  { %p9041_p6 = por %p9040_p5, %p9039_p4 }
  0x16   :  { %p9042_p7 = pnand %p9041_p6, %p9035_p3 }
  0x18   :  { %9045 = shalt.err (!%p9042_p7)
}
  0x19   :  { %49 = dma.hbm_to_vmem [thread:$0]  %s10155_s2, 48, %s47_s28, [#allocation6]  }
  0x1a   :  { %s9046_s26 = scalar_lea.hbm %s10158_s5, 1536 }
  0x1b   :  { %p9047_p8 = scmp.ne.s32.totalorder %s10158_s5, %s9046_s26  ;;  %p9050_p9 = scmp.lt.u32.totalorder %s9046_s26, %s10158_s5 }
  0x1d   :  { %p9052_p10 = pnand %p9050_p9, %p9047_p8 }
  0x1f   :  { %9055 = shalt.err (!%p9052_p10)
}
  0x20   :  { %s9056_s16 = scalar_lea.vmem %s9348_s30, 1536  ;;  %p9061_p12 = scmp.lt.s32.totalorder %s9348_s30, %s9348_s30 }
  0x21   :  { %p9057_p11 = scmp.ne.s32.totalorder %s9348_s30, %s9056_s16  ;;  %p9062_p13 = scmp.lt.s32.totalorder %s9056_s16, %s9056_s16 }
  0x23   :  { %p9063_p0 = por %p9062_p13, %p9061_p12 }
  0x25   :  { %p9064_p1 = pnand %p9063_p0, %p9057_p11 }
  0x27   :  { %9067 = shalt.err (!%p9064_p1)
}
  0x28   :  { %s9258_s2 = smov 64   ;;  %s9259_s28 = smov 4  }
  0x29   :  { %73 = dma.hbm_to_vmem [thread:$0]  %s10158_s5, 1536, %s9348_s30, [#allocation9], %s9258_s2, %s9258_s2, %s9259_s28  }
  0x2a   :  { %s9260_s18 = smov [#allocation11]   ;;  %s9068_s22 = scalar_lea.hbm %s10160_s7, 73728 }
  0x2b   :  { %s89_s19 = sshll.u32 %s9260_s18, 4  ;;  %p9069_p2 = scmp.ne.s32.totalorder %s10160_s7, %s9068_s22  ;;  %s90_s19 = int_to_ptr.vmem [resolvable:$true] %s89_s19 }
  0x2c   :  { %p9072_p3 = scmp.lt.u32.totalorder %s9068_s22, %s10160_s7 }
  0x2e   :  { %p9074_p4 = pnand %p9072_p3, %p9069_p2 }
  0x30   :  { %9077 = shalt.err (!%p9074_p4)
}
  0x31   :  { %s9078_s27 = scalar_lea.vmem %s90_s19, 73728  ;;  %p9083_p6 = scmp.lt.s32.totalorder %s90_s19, %s90_s19 }
  0x32   :  { %p9079_p5 = scmp.ne.s32.totalorder %s90_s19, %s9078_s27  ;;  %p9084_p7 = scmp.lt.s32.totalorder %s9078_s27, %s9078_s27 }
  0x34   :  { %p9085_p8 = por %p9084_p7, %p9083_p6 }
  0x36   :  { %p9086_p9 = pnand %p9085_p8, %p9079_p5 }
  0x38   :  { %9089 = shalt.err (!%p9086_p9)
}
  0x39   :  { %s9261_s5 = smov 256   ;;  %s9262_s30 = smov 16  }
  0x3a   :  { %95 = dma.hbm_to_vmem [thread:$0]  %s10160_s7, 73728, %s90_s19, [#allocation12], %s9261_s5, %s9261_s5, %s9262_s30  }
  0x3b   :  { %s9263_s15 = smov [#allocation14]   ;;  %s9264_s17 = smov [#allocation3]  }
  0x3c   :  { %s111_s16 = sshll.u32 %s9263_s15, 4  ;;  %s33_s12 = sshll.u32 %s9264_s17, 4  ;;  %s112_s16 = int_to_ptr.vmem [resolvable:$true] %s111_s16  ;;  %s34_s12 = int_to_ptr.vmem [resolvable:$true] %s33_s12 }
  0x3d   :  { %s9090_s21 = scalar_lea.hbm %s10162_s9, 4096 }
  0x3e   :  { %p9091_p10 = scmp.ne.s32.totalorder %s10162_s9, %s9090_s21  ;;  %p9094_p11 = scmp.lt.u32.totalorder %s9090_s21, %s10162_s9 }
  0x40   :  { %p9096_p12 = pnand %p9094_p11, %p9091_p10 }
  0x42   :  { %9099 = shalt.err (!%p9096_p12)
}
  0x43   :  { %s9100_s7 = scalar_lea.vmem %s112_s16, 4096  ;;  %p9105_p0 = scmp.lt.s32.totalorder %s112_s16, %s112_s16 }
  0x44   :  { %p9101_p13 = scmp.ne.s32.totalorder %s112_s16, %s9100_s7  ;;  %p9106_p1 = scmp.lt.s32.totalorder %s9100_s7, %s9100_s7 }
  0x46   :  { %p9107_p2 = por %p9106_p1, %p9105_p0 }
  0x48   :  { %p9108_p3 = pnand %p9107_p2, %p9101_p13 }
  0x4a   :  { %9111 = shalt.err (!%p9108_p3)
}
  0x4b   :  { %117 = dma.hbm_to_vmem [thread:$0]  %s10162_s9, 4096, %s112_s16, [#allocation15], %s9258_s2, %s9258_s2, %s9259_s28  }
  0x4c   :  { %s9112_s30 = scalar_lea.hbm %s10154_s1, 960 }
  0x4d   :  { %p9113_p4 = scmp.ne.s32.totalorder %s10154_s1, %s9112_s30  ;;  %p9116_p5 = scmp.lt.u32.totalorder %s9112_s30, %s10154_s1 }
  0x4f   :  { %p9118_p6 = pnand %p9116_p5, %p9113_p4 }
  0x51   :  { %9121 = shalt.err (!%p9118_p6)
}
  0x52   :  { %s9122_s18 = scalar_lea.vmem %s34_s12, 960  ;;  %p9127_p8 = scmp.lt.s32.totalorder %s34_s12, %s34_s12 }
  0x53   :  { %p9123_p7 = scmp.ne.s32.totalorder %s34_s12, %s9122_s18  ;;  %p9128_p9 = scmp.lt.s32.totalorder %s9122_s18, %s9122_s18 }
  0x55   :  { %p9129_p10 = por %p9128_p9, %p9127_p8 }
  0x57   :  { %p9130_p11 = pnand %p9129_p10, %p9123_p7 }
  0x59   :  { %9133 = shalt.err (!%p9130_p11)
}
  0x5a   :  { %s9265_s9 = smov 192   ;;  %s9266_s2 = smov 12  }
  0x5b   :  { %39 = dma.hbm_to_vmem [thread:$0]  %s10154_s1, 960, %s34_s12, [#allocation4], %s9265_s9, %s9265_s9, %s9266_s2  }
  0x5c   :  { %s9267_s20 = smov [#allocation7]   ;;  %s9268_s22 = smov [#allocation10]  }
  0x5d   :  { %s58_s21 = sshll.u32 %s9267_s20, 4  ;;  %s80_s23 = sshll.u32 %s9268_s22, 4  ;;  %s59_s21 = int_to_ptr.vmem [resolvable:$true] %s58_s21  ;;  %s81_s23 = int_to_ptr.vmem [resolvable:$true] %s80_s23 }
  0x5e   :  { %s9134_s7 = scalar_lea.hbm %s10157_s4, 32 }
  0x5f   :  { %p9135_p12 = scmp.ne.s32.totalorder %s10157_s4, %s9134_s7  ;;  %p9138_p13 = scmp.lt.u32.totalorder %s9134_s7, %s10157_s4 }
  0x61   :  { %p9140_p0 = pnand %p9138_p13, %p9135_p12 }
  0x63   :  { %9143 = shalt.err (!%p9140_p0)
}
  0x64   :  { %s9144_s1 = scalar_lea.vmem %s59_s21, 32  ;;  %p9149_p2 = scmp.lt.s32.totalorder %s59_s21, %s59_s21 }
  0x65   :  { %p9145_p1 = scmp.ne.s32.totalorder %s59_s21, %s9144_s1  ;;  %p9150_p3 = scmp.lt.s32.totalorder %s9144_s1, %s9144_s1 }
  0x67   :  { %p9151_p4 = por %p9150_p3, %p9149_p2 }
  0x69   :  { %p9152_p5 = pnand %p9151_p4, %p9145_p1 }
  0x6b   :  { %9155 = shalt.err (!%p9152_p5)
}
  0x6c   :  { %61 = dma.hbm_to_vmem [thread:$0]  %s10157_s4, 32, %s59_s21, [#allocation6]  }
  0x6d   :  { %s9156_s15 = scalar_lea.hbm %s10159_s6, 16 }
  0x6e   :  { %p9157_p6 = scmp.ne.s32.totalorder %s10159_s6, %s9156_s15  ;;  %p9160_p7 = scmp.lt.u32.totalorder %s9156_s15, %s10159_s6 }
  0x70   :  { %p9162_p8 = pnand %p9160_p7, %p9157_p6 }
  0x72   :  { %9165 = shalt.err (!%p9162_p8)
}
  0x73   :  { %s9166_s28 = scalar_lea.vmem %s81_s23, 16  ;;  %s9170_s16 = scalar_lea.vmem %s81_s23, 32 }
  0x74   :  { %p9167_p9 = scmp.ne.s32.totalorder %s81_s23, %s9166_s28  ;;  %p9171_p10 = scmp.lt.s32.totalorder %s81_s23, %s81_s23 }
  0x75   :  { %p9172_p11 = scmp.lt.s32.totalorder %s9170_s16, %s9166_s28 }
  0x77   :  { %p9173_p12 = por %p9172_p11, %p9171_p10 }
  0x79   :  { %p9174_p13 = pnand %p9173_p12, %p9167_p9 }
  0x7b   :  { %9177 = shalt.err (!%p9174_p13)
}
  0x7c   :  { %83 = dma.hbm_to_vmem [thread:$0]  %s10159_s6, 16, %s81_s23, [#allocation9]  }
  0x7d   :  { %s9269_s21 = smov [#allocation13]   ;;  %s9270_s24 = smov [#allocation16]  }
  0x7e   :  { %s102_s22 = sshll.u32 %s9269_s21, 4  ;;  %s124_s25 = sshll.u32 %s9270_s24, 4  ;;  %s103_s22 = int_to_ptr.vmem [resolvable:$true] %s102_s22  ;;  %s125_s25 = int_to_ptr.vmem [resolvable:$true] %s124_s25 }
  0x7f   :  { %s9178_s26 = scalar_lea.hbm %s10161_s8, 64 }
  0x80   :  { %p9179_p0 = scmp.ne.s32.totalorder %s10161_s8, %s9178_s26  ;;  %p9182_p1 = scmp.lt.u32.totalorder %s9178_s26, %s10161_s8 }
  0x82   :  { %p9184_p2 = pnand %p9182_p1, %p9179_p0 }
  0x84   :  { %9187 = shalt.err (!%p9184_p2)
}
  0x85   :  { %s9188_s6 = scalar_lea.vmem %s103_s22, 64  ;;  %p9193_p4 = scmp.lt.s32.totalorder %s103_s22, %s103_s22 }
  0x86   :  { %p9189_p3 = scmp.ne.s32.totalorder %s103_s22, %s9188_s6  ;;  %p9194_p5 = scmp.lt.s32.totalorder %s9188_s6, %s9188_s6 }
  0x88   :  { %p9195_p6 = por %p9194_p5, %p9193_p4 }
  0x8a   :  { %p9196_p7 = pnand %p9195_p6, %p9189_p3 }
  0x8c   :  { %9199 = shalt.err (!%p9196_p7)
}
  0x8d   :  { %105 = dma.hbm_to_vmem [thread:$0]  %s10161_s8, 64, %s103_s22, [#allocation12]  }
  0x8e   :  { %s9200_s15 = scalar_lea.hbm %s10163_s10, 16 }
  0x8f   :  { %p9201_p8 = scmp.ne.s32.totalorder %s10163_s10, %s9200_s15  ;;  %p9204_p9 = scmp.lt.u32.totalorder %s9200_s15, %s10163_s10 }
  0x91   :  { %p9206_p10 = pnand %p9204_p9, %p9201_p8 }
  0x93   :  { %9209 = shalt.err (!%p9206_p10)
}
  0x94   :  { %s9210_s28 = scalar_lea.vmem %s125_s25, 16  ;;  %s9214_s16 = scalar_lea.vmem %s125_s25, 32 }
  0x95   :  { %p9211_p11 = scmp.ne.s32.totalorder %s125_s25, %s9210_s28  ;;  %p9215_p12 = scmp.lt.s32.totalorder %s125_s25, %s125_s25 }
  0x96   :  { %p9216_p13 = scmp.lt.s32.totalorder %s9214_s16, %s9210_s28 }
  0x98   :  { %p9217_p0 = por %p9216_p13, %p9215_p12 }
  0x9a   :  { %p9218_p1 = pnand %p9217_p0, %p9211_p11 }
  0x9c   :  { %9221 = shalt.err (!%p9218_p1)
}
  0x9d   :  { %127 = dma.hbm_to_vmem [thread:$0]  %s10163_s10, 16, %s125_s25, [#allocation15]  }
  0x9e   :  { %s9271_s20 = smov [#allocation17]   ;;  %s9222_s7 = scalar_lea.hbm %s10164_s11, 16 }
  0x9f   :  { %s134_s21 = sshll.u32 %s9271_s20, 4  ;;  %p9223_p2 = scmp.ne.s32.totalorder %s10164_s11, %s9222_s7  ;;  %s135_s21 = int_to_ptr.vmem [resolvable:$true] %s134_s21 }
  0xa0   :  { %p9226_p3 = scmp.lt.u32.totalorder %s9222_s7, %s10164_s11 }
  0xa2   :  { %p9228_p4 = pnand %p9226_p3, %p9223_p2 }
  0xa4   :  { %9231 = shalt.err (!%p9228_p4)
}
  0xa5   :  { %s9232_s1 = scalar_lea.vmem %s135_s21, 16  ;;  %s9236_s10 = scalar_lea.vmem %s135_s21, 32 }
  0xa6   :  { %p9233_p5 = scmp.ne.s32.totalorder %s135_s21, %s9232_s1  ;;  %p9237_p6 = scmp.lt.s32.totalorder %s135_s21, %s135_s21 }
  0xa7   :  { %p9238_p7 = scmp.lt.s32.totalorder %s9236_s10, %s9232_s1 }
  0xa9   :  { %p9239_p8 = por %p9238_p7, %p9237_p6 }
  0xab   :  { %p9240_p9 = pnand %p9239_p8, %p9233_p5 }
  0xad   :  { %9243 = shalt.err (!%p9240_p9)
}
  0xae   :  { %137 = dma.hbm_to_vmem [thread:$0]  %s10164_s11, 16, %s135_s21, [#allocation18]  }
  0xaf   :  { %9244 = dma.done.wait [#allocation4], 960  }
  0xb0   :  { %9245 = vsyncadd [#allocation4], 4294966336 }
  0xb1   :  { %9246 = dma.done.wait [#allocation6], 80  }
  0xb2   :  { %9247 = vsyncadd [#allocation6], 4294967216 }
  0xb3   :  { %9248 = dma.done.wait [#allocation9], 1552  }
  0xb4   :  { %9249 = vsyncadd [#allocation9], 4294965744 }
  0xb5   :  { %9250 = dma.done.wait [#allocation12], 73792  }
  0xb6   :  { %9251 = vsyncadd [#allocation12], 4294893504 }
  0xb7   :  { %9252 = dma.done.wait [#allocation15], 4112  }
  0xb8   :  { %9253 = vsyncadd [#allocation15], 4294963184 }
  0xb9   :  { %9254 = dma.done.wait [#allocation18], 16  }
  0xba   :  { %9255 = vsyncadd [#allocation18], 4294967280  ;;  %v9272_v1 = vmov 0   ;;  %v9273_v2 = vmov 0.0   ;;  %vm9274_vm0 = vmmov 0   ;;  %vm329_vm1 = vcmask 1040384  }
  0xbb   :  { %373 = vmatprep.mubr.bf16.mxu0 %v9272_v1  ;;  %7885 = vmatprep.subr.bf16.mxu1 %v9273_v2  ;;  %v8024_v3 = vld [vmem:[#allocation3 + $0x4] ss:$12 sps:$4 sm:$0xff]   ;;  %v8026_v4 = vld [vmem:[#allocation3] ss:$12 sps:$4 sm:$0xff]   ;;  %v8027_v5 = vld [vmem:[#allocation3 + $0x1c] ss:$12 sps:$4 sm:$0xff]   ;;  %v201_v59 = vlaneseq }
  0xbc   :  { %7891 = vmatprep.mubr.msk.bf16.mxu1 %vm9274_vm0, %v9273_v2  ;;  %8023 = vset.pattern.permute.xlu0 %v9272_v1  ;;  %v197_v6 = vld [vmem:[#allocation3 + $0x30] sm:$0x11]  ;;  %v331_v7 = vsel %vm329_vm1, 65535, %v9272_v1  ;;  %v8029_v8 = vld [vmem:[#allocation3 + $0x18] ss:$12 sps:$4 sm:$0xff]   ;;  %vm301_vm2 = vcmask 269312  }
  0xbd   :  { %341 = vmatprep.subr.bf16.mxu0 %v8024_v3  ;;  %v7086_v9 = vcombine.high %v197_v6, %v197_v6  ;;  %v7085_v10 = vcombine.low %v197_v6, %v197_v6  ;;  %v8032_v13 = vld [vmem:[%s10153_s0] sm:$0xff]   ;;  %v8040_v14 = vld [vmem:[#allocation3 + $0x8] ss:$12 sps:$4 sm:$0xff]   ;;  %v8043_v16 = vld [vmem:[#allocation3 + $0x38] ss:$0 sps:$4 sm:$0x11]  }
  0xbe   :  { %342 = vmatpush1.bf16.msra.mxu0 %v8026_v4  ;;  %7886 = vmatpush3.bf16.msra.mxu1 %v8040_v14  ;;  %v8042_v15 = vld [vmem:[#allocation3 + $0x20] ss:$12 sps:$4 sm:$0xff]   ;;  %v339_v19 = vand.u32 %v8043_v16, %v331_v7  ;;  %v8049_v20 = vld [vmem:[%s10156_s3 + $0x14] ss:$8 sps:$4 sm:$0xff]   ;;  %v9658_v60 = vshrl.u32 %v201_v59, 7  ;;  %vm926_vm3 = vcmask 785408  }
  0xbf   :  { %343 = vmatprep.subr.bf16.mxu0 %v8027_v5  ;;  %v336_v11 = vand.u32 %v7086_v9, %v331_v7  ;;  %v333_v12 = vand.u32 %v7085_v10, %v331_v7  ;;  %7887 = vmatprep.subr.bf16.mxu1 %v9273_v2  ;;  %v8044_v17 = vld [vmem:[%s10156_s3] ss:$8 sps:$4 sm:$0xff]   ;;  %v8046_v18 = vld [vmem:[%s10156_s3 + $0x4] ss:$8 sps:$4 sm:$0xff]   ;;  %v8047_v22 = vld [vmem:[%s10156_s3 + $0x10] ss:$8 sps:$4 sm:$0xff]  }
  0xc0   :  { %v8033_v21 = vld [vmem:[%s10153_s0 + $0x8] sm:$0xff]   ;;  %v8055_v25 = vld [vmem:[%s10156_s3 + $0x34] ss:$8 sps:$4 sm:$0xff]   ;;  %v8053_v27 = vld [vmem:[%s10156_s3 + $0x30] ss:$8 sps:$4 sm:$0xff]   ;;  %v9661_v62 = vsub.s32 0, %v9658_v60 }
  0xc1   :  { %v8052_v23 = vld [vmem:[%s10156_s3 + $0x24] ss:$8 sps:$4 sm:$0xff]   ;;  %v8050_v24 = vld [vmem:[%s10156_s3 + $0x20] ss:$8 sps:$4 sm:$0xff]   ;;  %v8034_v26 = vld [vmem:[%s10153_s0 + $0x10] sm:$0xff]   ;;  %v9664_v63 = vsub.s32 1, %v9658_v60 }
  0xc2   :  { %344 = vmatpush1.bf16.msra.mxu0 %v8029_v8  ;;  %7888 = vmatpush3.bf16.msra.mxu1 %v8042_v15  ;;  %v8058_v28 = vld [vmem:[%s10156_s3 + $0x44] ss:$8 sps:$4 sm:$0xff]   ;;  %v8056_v29 = vld [vmem:[%s10156_s3 + $0x40] ss:$8 sps:$4 sm:$0xff]   ;;  %v8061_v30 = vld [vmem:[%s10156_s3 + $0x54] ss:$8 sps:$4 sm:$0xff]  }
  0xc3   :  { %345 = vmatprep.subr.bf16.mxu0 %v336_v11  ;;  %7889 = vmatprep.subr.bf16.mxu1 %v9273_v2  ;;  %v8035_v31 = vld [vmem:[%s10153_s0 + $0x18] sm:$0xff]   ;;  %v8064_v33 = vld [vmem:[%s10156_s3 + $0x64] ss:$8 sps:$4 sm:$0xff]   ;;  %v8062_v34 = vld [vmem:[%s10156_s3 + $0x60] ss:$8 sps:$4 sm:$0xff]   ;;  %v211_v11 = vsub.s32 2, %v9658_v60 }
  0xc4   :  { %v8059_v32 = vld [vmem:[%s10156_s3 + $0x50] ss:$8 sps:$4 sm:$0xff]   ;;  %v8067_v35 = vld [vmem:[%s10156_s3 + $0x74] ss:$8 sps:$4 sm:$0xff]   ;;  %v8036_v36 = vld [vmem:[%s10153_s0 + $0x20] sm:$0xff]   ;;  %vm1357_vm4 = vcmask 523264  }
  0xc5   :  { %v8065_v37 = vld [vmem:[%s10156_s3 + $0x70] ss:$8 sps:$4 sm:$0xff]   ;;  %v8070_v38 = vld [vmem:[%s10156_s3 + $0x84] ss:$8 sps:$4 sm:$0xff]   ;;  %v8068_v39 = vld [vmem:[%s10156_s3 + $0x80] ss:$8 sps:$4 sm:$0xff]  }
  0xc6   :  { %346 = vmatpush1.bf16.msra.mxu0 %v333_v12  ;;  %7890 = vmatpush3.bf16.msra.mxu1 %v339_v19  ;;  %v8073_v40 = vld [vmem:[%s10156_s3 + $0x94] ss:$8 sps:$4 sm:$0xff]   ;;  %v8037_v41 = vld [vmem:[%s10153_s0 + $0x28] sm:$0xff]   ;;  %v8071_v42 = vld [vmem:[%s10156_s3 + $0x90] ss:$8 sps:$4 sm:$0xff]   ;;  %vm7058_vm5 = vcmask 57344  }
  0xc7   :  { %954 = vmatprep.subr.bf16.mxu0 %v8046_v18  ;;  %1385 = vmatprep.subr.bf16.mxu1 %v9272_v1  ;;  %v8076_v43 = vld [vmem:[%s10156_s3 + $0xa4] ss:$8 sps:$4 sm:$0xff]   ;;  %v8074_v44 = vld [vmem:[%s10156_s3 + $0xa0] ss:$8 sps:$4 sm:$0xff]   ;;  %v8079_v45 = vld [vmem:[%s10156_s3 + $0xb4] ss:$8 sps:$4 sm:$0xff]  }
  0xc8   :  { %v8038_v46 = vld [vmem:[%s10153_s0 + $0x30] sm:$0xff]   ;;  %v8082_v48 = vld [vmem:[%s10156_s3 + $0xc4] ss:$8 sps:$4 sm:$0xff]   ;;  %v8080_v49 = vld [vmem:[%s10156_s3 + $0xc0] ss:$8 sps:$4 sm:$0xff]  }
  0xc9   :  { %7088 = vmatmul.mubr.msk.bf16.vlgmr.msra.gmra.mrb[0].mxu0 %vm301_vm2, %v8032_v13  ;;  %7892 = vmatmul.mubr.msk.bf16.vlgmr.msra.gmra.mrb[0].mxu1 %vm301_vm2, %v8032_v13  ;;  %v8077_v47 = vld [vmem:[%s10156_s3 + $0xb0] ss:$8 sps:$4 sm:$0xff]   ;;  %v8085_v50 = vld [vmem:[%s10156_s3 + $0xd4] ss:$8 sps:$4 sm:$0xff]   ;;  %v8041_v53 = vld [vmem:[%s10153_s0 + $0x40] sm:$0xff]  }
  0xca   :  { %383 = vmatprep.mubr.bf16.mxu0 %v9272_v1  ;;  %955 = vmatpush1.bf16.msra.mxu0 %v8044_v17  ;;  %v8039_v51 = vld [vmem:[%s10153_s0 + $0x38] sm:$0xff]   ;;  %v8088_v54 = vld [vmem:[%s10156_s3 + $0xe4] ss:$8 sps:$4 sm:$0xff]   ;;  %v8086_v55 = vld [vmem:[%s10156_s3 + $0xe0] ss:$8 sps:$4 sm:$0xff]  }
  0xcb   :  { %956 = vmatprep.subr.bf16.mxu0 %v8049_v20  ;;  %7895 = vmatprep.mubr.msk.bf16.mxu1 %vm9274_vm0, %v9273_v2  ;;  %v8083_v52 = vld [vmem:[%s10156_s3 + $0xd0] ss:$8 sps:$4 sm:$0xff]   ;;  %v8091_v56 = vld [vmem:[%s10156_s3 + $0xf4] ss:$8 sps:$4 sm:$0xff]   ;;  %v8094_v58 = vld [vmem:[%s10156_s3 + $0x104] ss:$8 sps:$4 sm:$0xff]  }
  0xcc   :  { %v8089_v57 = vld [vmem:[%s10156_s3 + $0xf0] ss:$8 sps:$4 sm:$0xff]   ;;  %v199_v61 = vld [vmem:[#allocation5] sm:$0x7]  ;;  %v8092_v17 = vld [vmem:[%s10156_s3 + $0x100] ss:$8 sps:$4 sm:$0xff]  }
  0xcd   :  { %v9667_v0 = vrot.slane %v199_v61, %v9661_v62  ;;  %v9670_v3 = vrot.slane %v199_v61, %v9664_v63  ;;  %v8097_v19 = vld [vmem:[%s10156_s3 + $0x114] ss:$8 sps:$4 sm:$0xff]   ;;  %v9685_v20 = vrot.slane %v199_v61, %v211_v11  ;;  %v8110_v59 = vld [vmem:[#allocation8] sm:$0xff]  }
  0xce   :  { %957 = vmatpush1.bf16.msra.mxu0 %v8047_v22  ;;  %1386 = vmatpush1.bf16.msra.mxu1 %v8110_v59 }
  0xcf   :  { %958 = vmatprep.subr.bf16.mxu0 %v8052_v23  ;;  %1387 = vmatprep.subr.bf16.mxu1 %v9272_v1 }
  0xd1   :  { %7089 = vmatmul.mubr.msk.bf16.gmra.mrb[4].mxu0 %vm301_vm2, %v8033_v21  ;;  %7896 = vmatmul.mubr.msk.bf16.gmra.mrb[4].mxu1 %vm301_vm2, %v8033_v21 }
  0xd2   :  { %393 = vmatprep.mubr.bf16.mxu0 %v9272_v1  ;;  %959 = vmatpush1.bf16.msra.mxu0 %v8050_v24 }
  0xd3   :  { %960 = vmatprep.subr.bf16.mxu0 %v8055_v25  ;;  %7899 = vmatprep.mubr.msk.bf16.mxu1 %vm9274_vm0, %v9273_v2 }
  0xd6   :  { %961 = vmatpush1.bf16.msra.mxu0 %v8053_v27  ;;  %v8095_v27 = vld [vmem:[%s10156_s3 + $0x110] ss:$8 sps:$4 sm:$0xff]  }
  0xd7   :  { %962 = vmatprep.subr.bf16.mxu0 %v8058_v28 }
  0xd9   :  { %7090 = vmatmul.mubr.msk.bf16.gmra.mrb[8].mxu0 %vm301_vm2, %v8034_v26  ;;  %7900 = vmatmul.mubr.msk.bf16.gmra.mrb[8].mxu1 %vm301_vm2, %v8034_v26 }
  0xda   :  { %403 = vmatprep.mubr.bf16.mxu0 %v9272_v1  ;;  %963 = vmatpush1.bf16.msra.mxu0 %v8056_v29 }
  0xdb   :  { %964 = vmatprep.subr.bf16.mxu0 %v8061_v30  ;;  %7903 = vmatprep.mubr.msk.bf16.mxu1 %vm9274_vm0, %v9273_v2 }
  0xde   :  { %965 = vmatpush1.bf16.msra.mxu0 %v8059_v32 }
  0xdf   :  { %966 = vmatprep.subr.bf16.mxu0 %v8064_v33 }
  0xe1   :  { %7091 = vmatmul.mubr.msk.bf16.gmra.mrb[12].mxu0 %vm301_vm2, %v8035_v31  ;;  %7904 = vmatmul.mubr.msk.bf16.gmra.mrb[12].mxu1 %vm301_vm2, %v8035_v31  ;;  %v8100_v31 = vld [vmem:[%s10156_s3 + $0x124] ss:$8 sps:$4 sm:$0xff]  }
  0xe2   :  { %413 = vmatprep.mubr.bf16.mxu0 %v9272_v1  ;;  %967 = vmatpush1.bf16.msra.mxu0 %v8062_v34 }
  0xe3   :  { %968 = vmatprep.subr.bf16.mxu0 %v8067_v35  ;;  %7907 = vmatprep.mubr.msk.bf16.mxu1 %vm9274_vm0, %v9273_v2 }
  0xe6   :  { %969 = vmatpush1.bf16.msra.mxu0 %v8065_v37 }
  0xe7   :  { %970 = vmatprep.subr.bf16.mxu0 %v8070_v38 }
  0xe9   :  { %7092 = vmatmul.mubr.msk.bf16.gmra.mrb[16].mxu0 %vm301_vm2, %v8036_v36  ;;  %7908 = vmatmul.mubr.msk.bf16.gmra.mrb[16].mxu1 %vm301_vm2, %v8036_v36 }
  0xea   :  { %423 = vmatprep.mubr.bf16.mxu0 %v9272_v1  ;;  %971 = vmatpush1.bf16.msra.mxu0 %v8068_v39 }
  0xeb   :  { %972 = vmatprep.subr.bf16.mxu0 %v8073_v40  ;;  %7911 = vmatprep.mubr.msk.bf16.mxu1 %vm9274_vm0, %v9273_v2 }
  0xee   :  { %973 = vmatpush1.bf16.msra.mxu0 %v8071_v42 }
  0xef   :  { %974 = vmatprep.subr.bf16.mxu0 %v8076_v43  ;;  %v8098_v43 = vld [vmem:[%s10156_s3 + $0x120] ss:$8 sps:$4 sm:$0xff]  }
  0xf1   :  { %7093 = vmatmul.mubr.msk.bf16.gmra.mrb[20].mxu0 %vm301_vm2, %v8037_v41  ;;  %7912 = vmatmul.mubr.msk.bf16.gmra.mrb[20].mxu1 %vm301_vm2, %v8037_v41 }
  0xf2   :  { %433 = vmatprep.mubr.bf16.mxu0 %v9272_v1  ;;  %975 = vmatpush1.bf16.msra.mxu0 %v8074_v44 }
  0xf3   :  { %976 = vmatprep.subr.bf16.mxu0 %v8079_v45  ;;  %7915 = vmatprep.mubr.msk.bf16.mxu1 %vm9274_vm0, %v9273_v2  ;;  %v8103_v45 = vld [vmem:[%s10156_s3 + $0x134] ss:$8 sps:$4 sm:$0xff]  }
  0xf6   :  { %977 = vmatpush1.bf16.msra.mxu0 %v8077_v47 }
  0xf7   :  { %978 = vmatprep.subr.bf16.mxu0 %v8082_v48 }
  0xf9   :  { %7094 = vmatmul.mubr.msk.bf16.gmra.mrb[24].mxu0 %vm301_vm2, %v8038_v46  ;;  %7916 = vmatmul.mubr.msk.bf16.gmra.mrb[24].mxu1 %vm301_vm2, %v8038_v46 }
  0xfa   :  { %443 = vmatprep.mubr.bf16.mxu0 %v9272_v1  ;;  %979 = vmatpush1.bf16.msra.mxu0 %v8080_v49 }
  0xfb   :  { %980 = vmatprep.subr.bf16.mxu0 %v8085_v50  ;;  %7919 = vmatprep.mubr.msk.bf16.mxu1 %vm9274_vm0, %v9273_v2 }
  0xfe   :  { %981 = vmatpush1.bf16.msra.mxu0 %v8083_v52 }
  0xff   :  { %982 = vmatprep.subr.bf16.mxu0 %v8088_v54 }
 0x101   :  { %7095 = vmatmul.mubr.msk.bf16.gmra.mrb[28].mxu0 %vm301_vm2, %v8039_v51  ;;  %7920 = vmatmul.mubr.msk.bf16.gmra.mrb[28].mxu1 %vm301_vm2, %v8039_v51 }
 0x102   :  { %453 = vmatprep.mubr.bf16.mxu0 %v9272_v1  ;;  %7923 = vmatprep.mubr.msk.bf16.mxu1 %vm9274_vm0, %v9273_v2 }
 0x103   :  { %983 = vmatpush1.bf16.msra.mxu0 %v8086_v55 }
 0x104   :  { %984 = vmatprep.subr.bf16.mxu0 %v8091_v56 }
 0x107   :  { %985 = vmatpush1.bf16.msra.mxu0 %v8089_v57 }
 0x108   :  { %1077 = vmatprep.subr.bf16.mxu0 %v8094_v58 }
 0x109   :  { %7096 = vmatmul.mubr.msk.bf16.gmra.mrb[32].mxu0 %vm301_vm2, %v8041_v53  ;;  %7924 = vmatmul.mubr.msk.bf16.gmra.mrb[32].mxu1 %vm301_vm2, %v8041_v53 }
 0x19c   :  { %v375_v4 = vpop.f32.mrb[0].mxu0  ;;  %v498_v28 = vpop.f32.mrb[0].mxu1 }
 0x19d   :  { %v376_v5 = vadd.f32 %v375_v4, %v9667_v0  ;;  %v377_v6 = vpop.f32.mrb[1].mxu0  ;;  %v499_v32 = vadd.f32 %v498_v28, %v9685_v20  ;;  %v7893_v33 = vpop.f32.mrb[1].mxu1  ;;  %v8101_v4 = vld [vmem:[%s10156_s3 + $0x130] ss:$8 sps:$4 sm:$0xff]  }
 0x19e   :  { %v378_v7 = vadd.f32 %v377_v6, %v9670_v3  ;;  %v379_v8 = vpop.f32.mrb[2].mxu0  ;;  %v501_v36 = vpop.f32.mrb[2].mxu1 }
 0x19f   :  { %v380_v9 = vadd.f32 %v379_v8, %v9667_v0  ;;  %v381_v10 = vpop.f32.mrb[3].mxu0  ;;  %v569_v13 = vmax.f32 %v376_v5, 0.0  ;;  %v571_v38 = vmax.f32 %v499_v32, 0.0  ;;  %v502_v39 = vadd.f32 %v501_v36, %v9685_v20  ;;  %v7894_v40 = vpop.f32.mrb[3].mxu1  ;;  %v8106_v5 = vld [vmem:[%s10156_s3 + $0x144] ss:$8 sps:$4 sm:$0xff]  }
 0x1a0   :  { %v382_v12 = vadd.f32 %v381_v10, %v9670_v3  ;;  %v570_v15 = vmax.f32 %v378_v7, 0.0  ;;  %v8107_v32 = vld [vmem:[%s10156_s3 + $0x150] ss:$8 sps:$4 sm:$0xff]  }
 0x1a1   :  { %v572_v14 = vmax.f32 %v380_v9, 0.0  ;;  %v574_v46 = vmax.f32 %v502_v39, 0.0 }
 0x1a2   :  { %v573_v16 = vmax.f32 %v382_v12, 0.0 }
 0x1a3   :  { %v623_v18 = vpack.c.bf16 %v572_v14, %v569_v13  ;;  %v9706_v51 = vpack.c.bf16 %v574_v46, %v571_v38  ;;  %v8111_v13 = vld [vmem:[#allocation8 + $0x8] sm:$0xff]  }
 0x1a4   :  { %v624_v21 = vpack.c.bf16 %v573_v16, %v570_v15  ;;  %v385_v22 = vpop.f32.mrb[4].mxu0  ;;  %v506_v54 = vpop.f32.mrb[4].mxu1  ;;  %v8104_v16 = vld [vmem:[%s10156_s3 + $0x140] ss:$8 sps:$4 sm:$0xff]   ;;  %1388 = vmatpush1.bf16.msra.mxu1 %v8111_v13 }
 0x1a5   :  { %v386_v23 = vadd.f32 %v385_v22, %v9667_v0  ;;  %v387_v24 = vpop.f32.mrb[5].mxu0  ;;  %v507_v57 = vadd.f32 %v506_v54, %v9685_v20  ;;  %v7897_v58 = vpop.f32.mrb[5].mxu1  ;;  %1389 = vmatprep.subr.bf16.mxu1 %v9272_v1 }
 0x1a6   :  { %v388_v25 = vadd.f32 %v387_v24, %v9670_v3  ;;  %v389_v26 = vpop.f32.mrb[6].mxu0  ;;  %986 = vmatprep.mubr.bf16.mxu0 %v624_v21  ;;  %v509_v6 = vpop.f32.mrb[6].mxu1 }
 0x1a7   :  { %v390_v29 = vadd.f32 %v389_v26, %v9667_v0  ;;  %v391_v30 = vpop.f32.mrb[7].mxu0  ;;  %987 = vmatmul.mubr.bf16.vlgmr.msra.gmra.mrb[36].mxu0 %v623_v18  ;;  %v575_v34 = vmax.f32 %v386_v23, 0.0  ;;  %v577_v9 = vmax.f32 %v507_v57, 0.0  ;;  %v510_v10 = vadd.f32 %v509_v6, %v9685_v20  ;;  %v7898_v12 = vpop.f32.mrb[7].mxu1  ;;  %v8109_v18 = vld [vmem:[%s10156_s3 + $0x154] ss:$8 sps:$4 sm:$0xff]  }
 0x1a8   :  { %v392_v35 = vadd.f32 %v391_v30, %v9670_v3  ;;  %1078 = vmatpush1.bf16.msra.mxu0 %v8092_v17  ;;  %v576_v41 = vmax.f32 %v388_v25, 0.0  ;;  %v8112_v26 = vld [vmem:[#allocation8 + $0x10] sm:$0xff]   ;;  %v8115_v6 = vld [vmem:[#allocation8 + $0x28] sm:$0xff]  }
 0x1a9   :  { %v578_v37 = vmax.f32 %v390_v29, 0.0  ;;  %1079 = vmatprep.subr.bf16.mxu0 %v8097_v19  ;;  %v580_v19 = vmax.f32 %v510_v10, 0.0  ;;  %1390 = vmatpush1.bf16.msra.mxu1 %v8112_v26 }
 0x1aa   :  { %v579_v42 = vmax.f32 %v392_v35, 0.0  ;;  %1391 = vmatprep.subr.bf16.mxu1 %v9272_v1 }
 0x1ab   :  { %v626_v44 = vpack.c.bf16 %v578_v37, %v575_v34  ;;  %v9727_v25 = vpack.c.bf16 %v580_v19, %v577_v9  ;;  %v8113_v37 = vld [vmem:[#allocation8 + $0x18] sm:$0xff]  }
 0x1ac   :  { %v627_v47 = vpack.c.bf16 %v579_v42, %v576_v41  ;;  %v395_v48 = vpop.f32.mrb[8].mxu0  ;;  %1080 = vmatpush1.bf16.msra.mxu0 %v8095_v27  ;;  %v514_v29 = vpop.f32.mrb[8].mxu1 }
 0x1ad   :  { %v396_v49 = vadd.f32 %v395_v48, %v9667_v0  ;;  %v397_v50 = vpop.f32.mrb[9].mxu0  ;;  %1081 = vmatprep.subr.bf16.mxu0 %v8100_v31  ;;  %v515_v33 = vadd.f32 %v514_v29, %v9685_v20  ;;  %v7901_v34 = vpop.f32.mrb[9].mxu1  ;;  %1392 = vmatpush1.bf16.msra.mxu1 %v8113_v37 }
 0x1ae   :  { %v398_v52 = vadd.f32 %v397_v50, %v9670_v3  ;;  %v399_v53 = vpop.f32.mrb[10].mxu0  ;;  %996 = vmatprep.mubr.bf16.mxu0 %v627_v47  ;;  %v517_v36 = vpop.f32.mrb[10].mxu1  ;;  %1393 = vmatprep.subr.bf16.mxu1 %v9272_v1  ;;  %v8117_v34 = vld [vmem:[#allocation8 + $0x38] sm:$0xff]  }
 0x1af   :  { %v400_v55 = vadd.f32 %v399_v53, %v9667_v0  ;;  %v401_v56 = vpop.f32.mrb[11].mxu0  ;;  %997 = vmatmul.mubr.bf16.gmra.mrb[40].mxu0 %v626_v44  ;;  %v581_v7 = vmax.f32 %v396_v49, 0.0  ;;  %v583_v40 = vmax.f32 %v515_v33, 0.0  ;;  %v518_v41 = vadd.f32 %v517_v36, %v9685_v20  ;;  %v7902_v42 = vpop.f32.mrb[11].mxu1  ;;  %v8114_v53 = vld [vmem:[#allocation8 + $0x20] sm:$0xff]  }
 0x1b0   :  { %v402_v61 = vadd.f32 %v401_v56, %v9670_v3  ;;  %1082 = vmatpush1.bf16.msra.mxu0 %v8098_v43  ;;  %v582_v14 = vmax.f32 %v398_v52, 0.0 }
 0x1b1   :  { %v584_v8 = vmax.f32 %v400_v55, 0.0  ;;  %1083 = vmatprep.subr.bf16.mxu0 %v8103_v45  ;;  %v586_v46 = vmax.f32 %v518_v41, 0.0  ;;  %1394 = vmatpush1.bf16.msra.mxu1 %v8114_v53 }
 0x1b2   :  { %v585_v15 = vmax.f32 %v402_v61, 0.0  ;;  %1395 = vmatprep.subr.bf16.mxu1 %v9272_v1 }
 0x1b3   :  { %v629_v17 = vpack.c.bf16 %v584_v8, %v581_v7  ;;  %v9740_v52 = vpack.c.bf16 %v586_v46, %v583_v40 }
 0x1b4   :  { %v630_v21 = vpack.c.bf16 %v585_v15, %v582_v14  ;;  %v405_v22 = vpop.f32.mrb[12].mxu0  ;;  %1084 = vmatpush1.bf16.msra.mxu0 %v8101_v4  ;;  %v522_v56 = vpop.f32.mrb[12].mxu1 }
 0x1b5   :  { %v406_v23 = vadd.f32 %v405_v22, %v9667_v0  ;;  %v407_v24 = vpop.f32.mrb[13].mxu0  ;;  %1085 = vmatprep.subr.bf16.mxu0 %v8106_v5  ;;  %v523_v59 = vadd.f32 %v522_v56, %v9685_v20  ;;  %v7905_v61 = vpop.f32.mrb[13].mxu1  ;;  %1396 = vmatpush1.bf16.msra.mxu1 %v8115_v6 }
 0x1b6   :  { %v408_v27 = vadd.f32 %v407_v24, %v9670_v3  ;;  %v409_v28 = vpop.f32.mrb[14].mxu0  ;;  %1006 = vmatprep.mubr.bf16.mxu0 %v630_v21  ;;  %v525_v5 = vpop.f32.mrb[14].mxu1  ;;  %1397 = vmatprep.subr.bf16.mxu1 %v9272_v1 }
 0x1b7   :  { %v410_v30 = vadd.f32 %v409_v28, %v9667_v0  ;;  %v411_v31 = vpop.f32.mrb[15].mxu0  ;;  %1007 = vmatmul.mubr.bf16.gmra.mrb[44].mxu0 %v629_v17  ;;  %v587_v38 = vmax.f32 %v406_v23, 0.0  ;;  %v589_v9 = vmax.f32 %v523_v59, 0.0  ;;  %v526_v10 = vadd.f32 %v525_v5, %v9685_v20  ;;  %v7906_v12 = vpop.f32.mrb[15].mxu1  ;;  %v8116_v23 = vld [vmem:[#allocation8 + $0x30] sm:$0xff]  }
 0x1b8   :  { %v412_v35 = vadd.f32 %v411_v31, %v9670_v3  ;;  %1086 = vmatpush1.bf16.msra.mxu0 %v8104_v16  ;;  %v588_v43 = vmax.f32 %v408_v27, 0.0 }
 0x1b9   :  { %v590_v39 = vmax.f32 %v410_v30, 0.0  ;;  %1087 = vmatprep.subr.bf16.mxu0 %v8109_v18  ;;  %v592_v16 = vmax.f32 %v526_v10, 0.0  ;;  %1398 = vmatpush1.bf16.msra.mxu1 %v8116_v23 }
 0x1ba   :  { %v591_v44 = vmax.f32 %v412_v35, 0.0  ;;  %1399 = vmatprep.subr.bf16.mxu1 %v9272_v1 }
 0x1bb   :  { %v632_v45 = vpack.c.bf16 %v590_v39, %v587_v38  ;;  %v9750_v22 = vpack.c.bf16 %v592_v16, %v589_v9 }
 0x1bc   :  { %v633_v47 = vpack.c.bf16 %v591_v44, %v588_v43  ;;  %v415_v48 = vpop.f32.mrb[16].mxu0  ;;  %1088 = vmatpush1.bf16.msra.mxu0 %v8107_v32  ;;  %v530_v27 = vpop.f32.mrb[16].mxu1 }
 0x1bd   :  { %v416_v49 = vadd.f32 %v415_v48, %v9667_v0  ;;  %v417_v50 = vpop.f32.mrb[17].mxu0  ;;  %v531_v30 = vadd.f32 %v530_v27, %v9685_v20  ;;  %v7909_v31 = vpop.f32.mrb[17].mxu1  ;;  %1400 = vmatpush1.bf16.msra.mxu1 %v8117_v34 }
 0x1be   :  { %v418_v54 = vadd.f32 %v417_v50, %v9670_v3  ;;  %v419_v55 = vpop.f32.mrb[18].mxu0  ;;  %1016 = vmatprep.mubr.bf16.mxu0 %v633_v47  ;;  %v533_v33 = vpop.f32.mrb[18].mxu1  ;;  %1401 = vmatprep.subr.bf16.mxu1 %v9272_v1 }
 0x1bf   :  { %v420_v57 = vadd.f32 %v419_v55, %v9667_v0  ;;  %v421_v58 = vpop.f32.mrb[19].mxu0  ;;  %1017 = vmatmul.mubr.bf16.gmra.mrb[48].mxu0 %v632_v45  ;;  %v593_v7 = vmax.f32 %v416_v49, 0.0  ;;  %v595_v37 = vmax.f32 %v531_v30, 0.0  ;;  %v534_v38 = vadd.f32 %v533_v33, %v9685_v20  ;;  %v7910_v39 = vpop.f32.mrb[19].mxu1  ;;  %v8118_v49 = vld [vmem:[#allocation8 + $0x40] sm:$0xff]  }
 0x1c0   :  { %v422_v4 = vadd.f32 %v421_v58, %v9670_v3  ;;  %v594_v13 = vmax.f32 %v418_v54, 0.0 }
 0x1c1   :  { %v596_v8 = vmax.f32 %v420_v57, 0.0  ;;  %v598_v43 = vmax.f32 %v534_v38, 0.0  ;;  %1402 = vmatpush1.bf16.msra.mxu1 %v8118_v49 }
 0x1c2   :  { %v597_v14 = vmax.f32 %v422_v4, 0.0  ;;  %v8119_v4 = vld [vmem:[#allocation8 + $0x48] sm:$0xff]   ;;  %1403 = vmatprep.subr.bf16.mxu1 %v9272_v1 }
 0x1c3   :  { %v635_v15 = vpack.c.bf16 %v596_v8, %v593_v7  ;;  %v9760_v48 = vpack.c.bf16 %v598_v43, %v595_v37 }
 0x1c4   :  { %v636_v17 = vpack.c.bf16 %v597_v14, %v594_v13  ;;  %v425_v18 = vpop.f32.mrb[20].mxu0  ;;  %v538_v54 = vpop.f32.mrb[20].mxu1 }
 0x1c5   :  { %v426_v19 = vadd.f32 %v425_v18, %v9667_v0  ;;  %v427_v21 = vpop.f32.mrb[21].mxu0  ;;  %v539_v57 = vadd.f32 %v538_v54, %v9685_v20  ;;  %v7913_v58 = vpop.f32.mrb[21].mxu1  ;;  %1404 = vmatpush1.bf16.msra.mxu1 %v8119_v4 }
 0x1c6   :  { %v428_v24 = vadd.f32 %v427_v21, %v9670_v3  ;;  %v429_v26 = vpop.f32.mrb[22].mxu0  ;;  %1026 = vmatprep.mubr.bf16.mxu0 %v636_v17  ;;  %v541_v61 = vpop.f32.mrb[22].mxu1  ;;  %1405 = vmatprep.subr.bf16.mxu1 %v9272_v1 }
 0x1c7   :  { %v430_v28 = vadd.f32 %v429_v26, %v9667_v0  ;;  %v431_v29 = vpop.f32.mrb[23].mxu0  ;;  %1027 = vmatmul.mubr.bf16.gmra.mrb[52].mxu0 %v635_v15  ;;  %v599_v35 = vmax.f32 %v426_v19, 0.0  ;;  %v601_v7 = vmax.f32 %v539_v57, 0.0  ;;  %v542_v8 = vadd.f32 %v541_v61, %v9685_v20  ;;  %v7914_v9 = vpop.f32.mrb[23].mxu1 }
 0x1c8   :  { %v432_v32 = vadd.f32 %v431_v29, %v9670_v3  ;;  %v600_v40 = vmax.f32 %v428_v24, 0.0 }
 0x1c9   :  { %v602_v36 = vmax.f32 %v430_v28, 0.0  ;;  %v604_v14 = vmax.f32 %v542_v8, 0.0 }
 0x1ca   :  { %v603_v41 = vmax.f32 %v432_v32, 0.0 }
 0x1cb   :  { %v638_v42 = vpack.c.bf16 %v602_v36, %v599_v35  ;;  %v9770_v19 = vpack.c.bf16 %v604_v14, %v601_v7 }
 0x1cc   :  { %v639_v44 = vpack.c.bf16 %v603_v41, %v600_v40  ;;  %v435_v45 = vpop.f32.mrb[24].mxu0  ;;  %v546_v24 = vpop.f32.mrb[24].mxu1 }
 0x1cd   :  { %v436_v46 = vadd.f32 %v435_v45, %v9667_v0  ;;  %v437_v47 = vpop.f32.mrb[25].mxu0  ;;  %v547_v28 = vadd.f32 %v546_v24, %v9685_v20  ;;  %v7917_v29 = vpop.f32.mrb[25].mxu1  ;;  %v8143_v24 = vld [vmem:[#allocation11 + $0x48] ss:$16 sps:$4 sm:$0xff]  }
 0x1ce   :  { %v438_v50 = vadd.f32 %v437_v47, %v9670_v3  ;;  %v439_v53 = vpop.f32.mrb[26].mxu0  ;;  %1036 = vmatprep.mubr.bf16.mxu0 %v639_v44  ;;  %v549_v31 = vpop.f32.mrb[26].mxu1  ;;  %v8152_v29 = vld [vmem:[#allocation11 + $0x88] ss:$16 sps:$4 sm:$0xff]  }
 0x1cf   :  { %v440_v55 = vadd.f32 %v439_v53, %v9667_v0  ;;  %v441_v56 = vpop.f32.mrb[27].mxu0  ;;  %1037 = vmatmul.mubr.bf16.gmra.mrb[56].mxu0 %v638_v42  ;;  %v605_v5 = vmax.f32 %v436_v46, 0.0  ;;  %v607_v34 = vmax.f32 %v547_v28, 0.0  ;;  %v550_v35 = vadd.f32 %v549_v31, %v9685_v20  ;;  %v7918_v36 = vpop.f32.mrb[27].mxu1  ;;  %v8154_v28 = vld [vmem:[#allocation11 + $0x8c] ss:$16 sps:$4 sm:$0xff]  }
 0x1d0   :  { %v442_v59 = vadd.f32 %v441_v56, %v9670_v3  ;;  %v606_v10 = vmax.f32 %v438_v50, 0.0  ;;  %v8155_v31 = vld [vmem:[#allocation11 + $0xa8] ss:$16 sps:$4 sm:$0xff]  }
 0x1d1   :  { %v608_v6 = vmax.f32 %v440_v55, 0.0  ;;  %v610_v40 = vmax.f32 %v550_v35, 0.0 }
 0x1d2   :  { %v609_v12 = vmax.f32 %v442_v59, 0.0 }
 0x1d3   :  { %v641_v13 = vpack.c.bf16 %v608_v6, %v605_v5  ;;  %v643_v45 = vpack.c.bf16 %v610_v40, %v607_v34  ;;  %v694_v34 = vld [vmem:[#allocation7] sm:$0x3] }
 0x1d4   :  { %v642_v15 = vpack.c.bf16 %v609_v12, %v606_v10  ;;  %v445_v16 = vpop.f32.mrb[28].mxu0  ;;  %v554_v49 = vpop.f32.mrb[28].mxu1  ;;  %v9813_v35 = vrot.slane %v694_v34, %v9661_v62  ;;  %v9816_v36 = vrot.slane %v694_v34, %v9664_v63 }
 0x1d5   :  { %v446_v17 = vadd.f32 %v445_v16, %v9667_v0  ;;  %v447_v18 = vpop.f32.mrb[29].mxu0  ;;  %v555_v54 = vadd.f32 %v554_v49, %v9685_v20  ;;  %v7921_v55 = vpop.f32.mrb[29].mxu1 }
 0x1d6   :  { %v448_v21 = vadd.f32 %v447_v18, %v9670_v3  ;;  %v449_v23 = vpop.f32.mrb[30].mxu0  ;;  %1046 = vmatprep.mubr.bf16.mxu0 %v642_v15  ;;  %v557_v57 = vpop.f32.mrb[30].mxu1  ;;  %v8122_v55 = vld [vmem:[#allocation11 + $0x100] ss:$16 sps:$4 sm:$0xff]  }
 0x1d7   :  { %v450_v26 = vadd.f32 %v449_v23, %v9667_v0  ;;  %v451_v27 = vpop.f32.mrb[31].mxu0  ;;  %1047 = vmatmul.mubr.bf16.gmra.mrb[60].mxu0 %v641_v13  ;;  %v611_v32 = vmax.f32 %v446_v17, 0.0  ;;  %v613_v61 = vmax.f32 %v555_v54, 0.0  ;;  %v558_v4 = vadd.f32 %v557_v57, %v9685_v20  ;;  %v7922_v5 = vpop.f32.mrb[31].mxu1  ;;  %v8145_v23 = vld [vmem:[#allocation11 + $0x4c] ss:$16 sps:$4 sm:$0xff]  }
 0x1d8   :  { %v452_v30 = vadd.f32 %v451_v27, %v9670_v3  ;;  %v612_v37 = vmax.f32 %v448_v21, 0.0  ;;  %v8149_v27 = vld [vmem:[#allocation11 + $0x68] ss:$16 sps:$4 sm:$0xff]  }
 0x1d9   :  { %v614_v33 = vmax.f32 %v450_v26, 0.0  ;;  %v616_v9 = vmax.f32 %v558_v4, 0.0  ;;  %v8151_v26 = vld [vmem:[#allocation11 + $0x6c] ss:$16 sps:$4 sm:$0xff]  }
 0x1da   :  { %v615_v38 = vmax.f32 %v452_v30, 0.0  ;;  %v8157_v30 = vld [vmem:[#allocation11 + $0xac] ss:$16 sps:$4 sm:$0xff]  }
 0x1db   :  { %v644_v39 = vpack.c.bf16 %v614_v33, %v611_v32  ;;  %v8163_v32 = vld [vmem:[#allocation11 + $0xcc] ss:$16 sps:$4 sm:$0xff]   ;;  %v8161_v33 = vld [vmem:[#allocation11 + $0xc8] ss:$16 sps:$4 sm:$0xff]  }
 0x1dc   :  { %v645_v41 = vpack.c.bf16 %v615_v38, %v612_v37  ;;  %v455_v42 = vpop.f32.mrb[32].mxu0  ;;  %v562_v12 = vpop.f32.mrb[32].mxu1 }
 0x1dd   :  { %v456_v43 = vadd.f32 %v455_v42, %v9667_v0  ;;  %v457_v44 = vpop.f32.mrb[33].mxu0  ;;  %v563_v13 = vadd.f32 %v562_v12, %v9685_v20  ;;  %v7925_v14 = vpop.f32.mrb[33].mxu1 }
 0x1de   :  { %v458_v46 = vadd.f32 %v457_v44, %v9670_v3  ;;  %v459_v47 = vpop.f32.mrb[34].mxu0  ;;  %1056 = vmatprep.mubr.bf16.mxu0 %v645_v41 }
 0x1df   :  { %v460_v50 = vadd.f32 %v459_v47, %v9667_v0  ;;  %v461_v53 = vpop.f32.mrb[35].mxu0  ;;  %1057 = vmatmul.mubr.bf16.gmra.mrb[64].mxu0 %v644_v39  ;;  %v617_v58 = vmax.f32 %v456_v43, 0.0  ;;  %v646_v0 = vpack.c.bf16 %v616_v9, %v613_v61  ;;  %v619_v15 = vmax.f32 %v563_v13, 0.0 }
 0x1e0   :  { %v462_v56 = vadd.f32 %v461_v53, %v9670_v3  ;;  %v618_v6 = vmax.f32 %v458_v46, 0.0  ;;  %v565_v3 = vpop.f32.mrb[34].mxu1 }
 0x1e1   :  { %v620_v59 = vmax.f32 %v460_v50, 0.0  ;;  %v566_v16 = vadd.f32 %v565_v3, %v9685_v20  ;;  %v7926_v17 = vpop.f32.mrb[35].mxu1  ;;  %v8120_v20 = vld [vmem:[#allocation8 + $0x50] sm:$0xff]  }
 0x1e2   :  { %v621_v7 = vmax.f32 %v462_v56, 0.0  ;;  %1406 = vmatpush1.bf16.msra.mxu1 %v8120_v20 }
 0x1e3   :  { %v647_v8 = vpack.c.bf16 %v620_v59, %v617_v58  ;;  %v622_v18 = vmax.f32 %v566_v16, 0.0  ;;  %1407 = vmatprep.subr.bf16.mxu1 %v9272_v1  ;;  %v8127_v58 = vld [vmem:[#allocation11 + $0x124] ss:$16 sps:$4 sm:$0xff]  }
 0x1e4   :  { %v648_v10 = vpack.c.bf16 %v621_v7, %v618_v6  ;;  %v8125_v7 = vld [vmem:[#allocation11 + $0x120] ss:$16 sps:$4 sm:$0xff]  }
 0x1e5   :  { %v649_v21 = vpack.c.bf16 %v622_v18, %v619_v15  ;;  %v8128_v15 = vld [vmem:[#allocation11 + $0x140] ss:$16 sps:$4 sm:$0xff]   ;;  %v8133_v18 = vld [vmem:[#allocation11 + $0x164] ss:$16 sps:$4 sm:$0xff]  }
 0x1e6   :  { %1066 = vmatprep.mubr.bf16.mxu0 %v648_v10  ;;  %v8130_v10 = vld [vmem:[#allocation11 + $0x144] ss:$16 sps:$4 sm:$0xff]  }
 0x1e7   :  { %1067 = vmatmul.mubr.bf16.gmra.mrb[68].mxu0 %v647_v8 }
 0x1e8   :  { %1109 = vmatprep.mubr.bf16.mxu0 %v9272_v1 }
 0x1ef   :  { %7150 = vmatmul.mubr.msk.bf16.vlgmr.msra.gmra.mrb[36].mxu0 %vm926_vm3, %v9706_v51  ;;  %v8121_v51 = vld [vmem:[#allocation8 + $0x58] sm:$0xff]  }
 0x1f0   :  { %1119 = vmatprep.mubr.bf16.mxu0 %v9272_v1  ;;  %1408 = vmatpush1.bf16.msra.mxu1 %v8121_v51 }
 0x1f7   :  { %7151 = vmatmul.mubr.msk.bf16.gmra.mrb[40].mxu0 %vm926_vm3, %v9727_v25  ;;  %v8124_v25 = vld [vmem:[#allocation11 + $0x104] ss:$16 sps:$4 sm:$0xff]  }
 0x1f8   :  { %1129 = vmatprep.mubr.bf16.mxu0 %v9272_v1  ;;  %1805 = vmatprep.subr.bf16.mxu1 %v8124_v25 }
 0x1ff   :  { %7152 = vmatmul.mubr.msk.bf16.gmra.mrb[44].mxu0 %vm926_vm3, %v9740_v52  ;;  %v8134_v52 = vld [vmem:[#allocation11 + $0x8] ss:$16 sps:$4 sm:$0xff]  }
 0x200   :  { %1139 = vmatprep.mubr.bf16.mxu0 %v9272_v1 }
 0x207   :  { %7153 = vmatmul.mubr.msk.bf16.gmra.mrb[48].mxu0 %vm926_vm3, %v9750_v22  ;;  %v8136_v22 = vld [vmem:[#allocation11 + $0xc] ss:$16 sps:$4 sm:$0xff]  }
 0x208   :  { %1149 = vmatprep.mubr.bf16.mxu0 %v9272_v1  ;;  %2088 = vmatprep.subr.bf16.mxu0 %v8136_v22  ;;  %v8131_v22 = vld [vmem:[#allocation11 + $0x160] ss:$16 sps:$4 sm:$0xff]  }
 0x209   :  { %2089 = vmatpush1.bf16.msra.mxu0 %v8134_v52 }
 0x20f   :  { %7154 = vmatmul.mubr.msk.bf16.gmra.mrb[52].mxu0 %vm926_vm3, %v9760_v48  ;;  %v8142_v48 = vld [vmem:[#allocation11 + $0x2c] ss:$16 sps:$4 sm:$0xff]  }
 0x210   :  { %1159 = vmatprep.mubr.bf16.mxu0 %v9272_v1  ;;  %2090 = vmatprep.subr.bf16.mxu0 %v8142_v48 }
 0x217   :  { %7155 = vmatmul.mubr.msk.bf16.gmra.mrb[56].mxu0 %vm926_vm3, %v9770_v19  ;;  %v8140_v19 = vld [vmem:[#allocation11 + $0x28] ss:$16 sps:$4 sm:$0xff]  }
 0x218   :  { %1169 = vmatprep.mubr.bf16.mxu0 %v9272_v1  ;;  %2091 = vmatpush1.bf16.msra.mxu0 %v8140_v19 }
 0x219   :  { %2092 = vmatprep.subr.bf16.mxu0 %v8145_v23  ;;  %v8139_v23 = vld [vmem:[#allocation11 + $0x184] ss:$16 sps:$4 sm:$0xff]  }
 0x21c   :  { %2093 = vmatpush1.bf16.msra.mxu0 %v8143_v24 }
 0x21d   :  { %2094 = vmatprep.subr.bf16.mxu0 %v8151_v26 }
 0x21f   :  { %7156 = vmatmul.mubr.msk.bf16.gmra.mrb[60].mxu0 %vm926_vm3, %v643_v45 }
 0x220   :  { %1179 = vmatprep.mubr.bf16.mxu0 %v9272_v1  ;;  %2095 = vmatpush1.bf16.msra.mxu0 %v8149_v27 }
 0x221   :  { %2096 = vmatprep.subr.bf16.mxu0 %v8154_v28 }
 0x224   :  { %2097 = vmatpush1.bf16.msra.mxu0 %v8152_v29 }
 0x225   :  { %2098 = vmatprep.subr.bf16.mxu0 %v8157_v30  ;;  %v8137_v30 = vld [vmem:[#allocation11 + $0x180] ss:$16 sps:$4 sm:$0xff]  }
 0x227   :  { %7157 = vmatmul.mubr.msk.bf16.gmra.mrb[64].mxu0 %vm926_vm3, %v646_v0 }
 0x228   :  { %1189 = vmatprep.mubr.bf16.mxu0 %v9272_v1  ;;  %2099 = vmatpush1.bf16.msra.mxu0 %v8155_v31 }
 0x229   :  { %2100 = vmatprep.subr.bf16.mxu0 %v8163_v32 }
 0x22c   :  { %2101 = vmatpush1.bf16.msra.mxu0 %v8161_v33  ;;  %v8148_v33 = vld [vmem:[#allocation11 + $0x1a4] ss:$16 sps:$4 sm:$0xff]  }
 0x22f   :  { %7158 = vmatmul.mubr.msk.bf16.gmra.mrb[68].mxu0 %vm926_vm3, %v649_v21 }
 0x230   :  { %2120 = vmatprep.mubr.bf16.mxu0 %v9272_v1 }
 0x2c2   :  { %v1111_v37 = vpop.f32.mrb[36].mxu0 }
 0x2c3   :  { %v7932_v38 = vadd.f32 %v1111_v37, %v9813_v35  ;;  %v1113_v39 = vpop.f32.mrb[37].mxu0 }
 0x2c4   :  { %v7933_v40 = vadd.f32 %v1113_v39, %v9816_v36  ;;  %v1115_v41 = vpop.f32.mrb[38].mxu0 }
 0x2c5   :  { %v7934_v42 = vadd.f32 %v1115_v41, %v9813_v35  ;;  %v1117_v43 = vpop.f32.mrb[39].mxu0  ;;  %v1200_v45 = vmax.f32 %v7932_v38, 0.0  ;;  %v8146_v41 = vld [vmem:[#allocation11 + $0x1a0] ss:$16 sps:$4 sm:$0xff]  }
 0x2c6   :  { %v7935_v44 = vadd.f32 %v1117_v43, %v9816_v36  ;;  %v1201_v47 = vmax.f32 %v7933_v40, 0.0 }
 0x2c7   :  { %v1202_v46 = vmax.f32 %v7934_v42, 0.0 }
 0x2c8   :  { %v1203_v49 = vmax.f32 %v7935_v44, 0.0  ;;  %v8160_v44 = vld [vmem:[#allocation11 + $0x1c4] ss:$16 sps:$4 sm:$0xff]  }
 0x2c9   :  { %v1236_v50 = vpack.c.bf16 %v1202_v46, %v1200_v45 }
 0x2ca   :  { %v1237_v53 = vpack.c.bf16 %v1203_v49, %v1201_v47  ;;  %v1121_v54 = vpop.f32.mrb[40].mxu0 }
 0x2cb   :  { %v7936_v56 = vadd.f32 %v1121_v54, %v9813_v35  ;;  %v1123_v57 = vpop.f32.mrb[41].mxu0 }
 0x2cc   :  { %v7937_v59 = vadd.f32 %v1123_v57, %v9816_v36  ;;  %v1125_v61 = vpop.f32.mrb[42].mxu0  ;;  %7172 = vmatprep.mubr.msk.bf16.mxu1 %vm1357_vm4, %v1237_v53  ;;  %v8158_v53 = vld [vmem:[#allocation11 + $0x1c0] ss:$16 sps:$4 sm:$0xff]  }
 0x2cd   :  { %v7938_v4 = vadd.f32 %v1125_v61, %v9813_v35  ;;  %v1127_v5 = vpop.f32.mrb[43].mxu0  ;;  %1418 = vmatmul.mubr.bf16.vlgmr.msra.gmra.mrb[36].mxu1 %v1236_v50  ;;  %v1204_v8 = vmax.f32 %v7936_v56, 0.0 }
 0x2ce   :  { %v7939_v6 = vadd.f32 %v1127_v5, %v9816_v36  ;;  %1806 = vmatpush1.bf16.msra.mxu1 %v8122_v55  ;;  %v1205_v0 = vmax.f32 %v7937_v59, 0.0 }
 0x2cf   :  { %v1206_v9 = vmax.f32 %v7938_v4, 0.0  ;;  %1807 = vmatprep.subr.bf16.mxu1 %v8127_v58 }
 0x2d0   :  { %v1207_v12 = vmax.f32 %v7939_v6, 0.0 }
 0x2d1   :  { %v1238_v13 = vpack.c.bf16 %v1206_v9, %v1204_v8 }
 0x2d2   :  { %v1239_v14 = vpack.c.bf16 %v1207_v12, %v1205_v0  ;;  %v1131_v3 = vpop.f32.mrb[44].mxu0  ;;  %1808 = vmatpush1.bf16.msra.mxu1 %v8125_v7 }
 0x2d3   :  { %v7940_v16 = vadd.f32 %v1131_v3, %v9813_v35  ;;  %v1133_v17 = vpop.f32.mrb[45].mxu0  ;;  %1809 = vmatprep.subr.bf16.mxu1 %v8130_v10 }
 0x2d4   :  { %v7941_v21 = vadd.f32 %v1133_v17, %v9816_v36  ;;  %v1135_v20 = vpop.f32.mrb[46].mxu0  ;;  %7173 = vmatprep.mubr.msk.bf16.mxu1 %vm1357_vm4, %v1239_v14 }
 0x2d5   :  { %v7942_v51 = vadd.f32 %v1135_v20, %v9813_v35  ;;  %v1137_v25 = vpop.f32.mrb[47].mxu0  ;;  %1426 = vmatmul.mubr.bf16.gmra.mrb[40].mxu1 %v1238_v13  ;;  %v1208_v48 = vmax.f32 %v7940_v16, 0.0 }
 0x2d6   :  { %v7943_v52 = vadd.f32 %v1137_v25, %v9816_v36  ;;  %1810 = vmatpush1.bf16.msra.mxu1 %v8128_v15  ;;  %v1209_v24 = vmax.f32 %v7941_v21, 0.0 }
 0x2d7   :  { %v1210_v19 = vmax.f32 %v7942_v51, 0.0  ;;  %1811 = vmatprep.subr.bf16.mxu1 %v8133_v18 }
 0x2d8   :  { %v1211_v26 = vmax.f32 %v7943_v52, 0.0 }
 0x2d9   :  { %v1240_v27 = vpack.c.bf16 %v1210_v19, %v1208_v48 }
 0x2da   :  { %v1241_v28 = vpack.c.bf16 %v1211_v26, %v1209_v24  ;;  %v1141_v29 = vpop.f32.mrb[48].mxu0  ;;  %1812 = vmatpush1.bf16.msra.mxu1 %v8131_v22 }
 0x2db   :  { %v7944_v31 = vadd.f32 %v1141_v29, %v9813_v35  ;;  %v1143_v32 = vpop.f32.mrb[49].mxu0  ;;  %1813 = vmatprep.subr.bf16.mxu1 %v8139_v23 }
 0x2dc   :  { %v7945_v34 = vadd.f32 %v1143_v32, %v9816_v36  ;;  %v1145_v37 = vpop.f32.mrb[50].mxu0  ;;  %7174 = vmatprep.mubr.msk.bf16.mxu1 %vm1357_vm4, %v1241_v28 }
 0x2dd   :  { %v7946_v38 = vadd.f32 %v1145_v37, %v9813_v35  ;;  %v1147_v39 = vpop.f32.mrb[51].mxu0  ;;  %1434 = vmatmul.mubr.bf16.gmra.mrb[44].mxu1 %v1240_v27  ;;  %v1212_v42 = vmax.f32 %v7944_v31, 0.0 }
 0x2de   :  { %v7947_v40 = vadd.f32 %v1147_v39, %v9816_v36  ;;  %1814 = vmatpush1.bf16.msra.mxu1 %v8137_v30  ;;  %v1213_v45 = vmax.f32 %v7945_v34, 0.0 }
 0x2df   :  { %v1214_v43 = vmax.f32 %v7946_v38, 0.0  ;;  %1815 = vmatprep.subr.bf16.mxu1 %v8148_v33 }
 0x2e0   :  { %v1215_v46 = vmax.f32 %v7947_v40, 0.0 }
 0x2e1   :  { %v1242_v47 = vpack.c.bf16 %v1214_v43, %v1212_v42 }
 0x2e2   :  { %v1243_v49 = vpack.c.bf16 %v1215_v46, %v1213_v45  ;;  %v1151_v50 = vpop.f32.mrb[52].mxu0  ;;  %1816 = vmatpush1.bf16.msra.mxu1 %v8146_v41 }
 0x2e3   :  { %v7948_v54 = vadd.f32 %v1151_v50, %v9813_v35  ;;  %v1153_v55 = vpop.f32.mrb[53].mxu0  ;;  %1817 = vmatprep.subr.bf16.mxu1 %v8160_v44 }
 0x2e4   :  { %v7949_v56 = vadd.f32 %v1153_v55, %v9816_v36  ;;  %v1155_v57 = vpop.f32.mrb[54].mxu0  ;;  %7175 = vmatprep.mubr.msk.bf16.mxu1 %vm1357_vm4, %v1243_v49 }
 0x2e5   :  { %v7950_v58 = vadd.f32 %v1155_v57, %v9813_v35  ;;  %v1157_v59 = vpop.f32.mrb[55].mxu0  ;;  %1442 = vmatmul.mubr.bf16.gmra.mrb[48].mxu1 %v1242_v47  ;;  %v1216_v4 = vmax.f32 %v7948_v54, 0.0 }
 0x2e6   :  { %v7951_v61 = vadd.f32 %v1157_v59, %v9816_v36  ;;  %1818 = vmatpush1.bf16.msra.mxu1 %v8158_v53  ;;  %v1217_v6 = vmax.f32 %v7949_v56, 0.0 }
 0x2e7   :  { %v1218_v5 = vmax.f32 %v7950_v58, 0.0 }
 0x2e8   :  { %v1219_v7 = vmax.f32 %v7951_v61, 0.0 }
 0x2e9   :  { %v1244_v8 = vpack.c.bf16 %v1218_v5, %v1216_v4 }
 0x2ea   :  { %v1245_v9 = vpack.c.bf16 %v1219_v7, %v1217_v6  ;;  %v1161_v10 = vpop.f32.mrb[56].mxu0 }
 0x2eb   :  { %v7952_v0 = vadd.f32 %v1161_v10, %v9813_v35  ;;  %v1163_v12 = vpop.f32.mrb[57].mxu0  ;;  %v8166_v10 = vld [vmem:[#allocation11 + $0xec] ss:$16 sps:$4 sm:$0xff]  }
 0x2ec   :  { %v7953_v13 = vadd.f32 %v1163_v12, %v9816_v36  ;;  %v1165_v14 = vpop.f32.mrb[58].mxu0  ;;  %7176 = vmatprep.mubr.msk.bf16.mxu1 %vm1357_vm4, %v1245_v9  ;;  %2102 = vmatprep.subr.bf16.mxu0 %v8166_v10  ;;  %v8169_v12 = vld [vmem:[#allocation11 + $0x1e4] ss:$16 sps:$4 sm:$0xff]  }
 0x2ed   :  { %v7954_v3 = vadd.f32 %v1165_v14, %v9813_v35  ;;  %v1167_v15 = vpop.f32.mrb[59].mxu0  ;;  %1450 = vmatmul.mubr.bf16.gmra.mrb[52].mxu1 %v1244_v8  ;;  %v1220_v17 = vmax.f32 %v7952_v0, 0.0  ;;  %v8164_v0 = vld [vmem:[#allocation11 + $0xe8] ss:$16 sps:$4 sm:$0xff]   ;;  %1819 = vmatprep.subr.bf16.mxu1 %v8169_v12  ;;  %v9864_v14 = vld [vmem:[#allocation10] ss:$0 sm:$0xff] }
 0x2ee   :  { %v7955_v16 = vadd.f32 %v1167_v15, %v9816_v36  ;;  %v1221_v21 = vmax.f32 %v7953_v13, 0.0  ;;  %2103 = vmatpush1.bf16.msra.mxu0 %v8164_v0  ;;  %v8172_v13 = vld [vmem:[#allocation11 + $0x20c] ss:$16 sps:$4 sm:$0xff]   ;;  %v8212_v0 = vld [vmem:[#allocation11 + $0x2e8] ss:$16 sps:$4 sm:$0xff]  }
 0x2ef   :  { %v1222_v18 = vmax.f32 %v7954_v3, 0.0  ;;  %2363 = vmatprep.subr.bf16.mxu0 %v8172_v13  ;;  %v8220_v13 = vld [vmem:[#allocation11 + $0x30c] ss:$16 sps:$4 sm:$0xff]  }
 0x2f0   :  { %v1223_v20 = vmax.f32 %v7955_v16, 0.0 }
 0x2f1   :  { %v1246_v51 = vpack.c.bf16 %v1222_v18, %v1220_v17 }
 0x2f2   :  { %v1247_v25 = vpack.c.bf16 %v1223_v20, %v1221_v21  ;;  %v1171_v52 = vpop.f32.mrb[60].mxu0 }
 0x2f3   :  { %v7956_v22 = vadd.f32 %v1171_v52, %v9813_v35  ;;  %v1173_v48 = vpop.f32.mrb[61].mxu0 }
 0x2f4   :  { %v7957_v19 = vadd.f32 %v1173_v48, %v9816_v36  ;;  %v1175_v23 = vpop.f32.mrb[62].mxu0  ;;  %7177 = vmatprep.mubr.msk.bf16.mxu1 %vm1357_vm4, %v1247_v25  ;;  %v8173_v48 = vld [vmem:[#allocation11 + $0x108] ss:$16 sps:$4 sm:$0xff]  }
 0x2f5   :  { %v7958_v24 = vadd.f32 %v1175_v23, %v9813_v35  ;;  %v1177_v26 = vpop.f32.mrb[63].mxu0  ;;  %1458 = vmatmul.mubr.bf16.gmra.mrb[56].mxu1 %v1246_v51  ;;  %v1224_v28 = vmax.f32 %v7956_v22, 0.0  ;;  %v8170_v51 = vld [vmem:[#allocation11 + $0x208] ss:$16 sps:$4 sm:$0xff]   ;;  %v8178_v22 = vld [vmem:[#allocation11 + $0x22c] ss:$16 sps:$4 sm:$0xff]  }
 0x2f6   :  { %v7959_v27 = vadd.f32 %v1177_v26, %v9816_v36  ;;  %v1225_v30 = vmax.f32 %v7957_v19, 0.0  ;;  %v8181_v23 = vld [vmem:[#allocation11 + $0x12c] ss:$16 sps:$4 sm:$0xff]   ;;  %v8176_v26 = vld [vmem:[#allocation11 + $0x228] ss:$16 sps:$4 sm:$0xff]  }
 0x2f7   :  { %v1226_v29 = vmax.f32 %v7958_v24, 0.0 }
 0x2f8   :  { %v1227_v31 = vmax.f32 %v7959_v27, 0.0 }
 0x2f9   :  { %v1248_v32 = vpack.c.bf16 %v1226_v29, %v1224_v28  ;;  %v8184_v28 = vld [vmem:[#allocation11 + $0x24c] ss:$16 sps:$4 sm:$0xff]  }
 0x2fa   :  { %v1249_v33 = vpack.c.bf16 %v1227_v31, %v1225_v30  ;;  %v1181_v34 = vpop.f32.mrb[64].mxu0  ;;  %v8179_v30 = vld [vmem:[#allocation11 + $0x128] ss:$16 sps:$4 sm:$0xff]  }
 0x2fb   :  { %v7960_v37 = vadd.f32 %v1181_v34, %v9813_v35  ;;  %v1183_v38 = vpop.f32.mrb[65].mxu0  ;;  %v8190_v34 = vld [vmem:[#allocation11 + $0x26c] ss:$16 sps:$4 sm:$0xff]  }
 0x2fc   :  { %v7961_v39 = vadd.f32 %v1183_v38, %v9816_v36  ;;  %v1185_v40 = vpop.f32.mrb[66].mxu0  ;;  %7178 = vmatprep.mubr.msk.bf16.mxu1 %vm1357_vm4, %v1249_v33  ;;  %v8182_v33 = vld [vmem:[#allocation11 + $0x248] ss:$16 sps:$4 sm:$0xff]   ;;  %v8193_v38 = vld [vmem:[#allocation11 + $0x16c] ss:$16 sps:$4 sm:$0xff]  }
 0x2fd   :  { %v7962_v41 = vadd.f32 %v1185_v40, %v9813_v35  ;;  %v1187_v42 = vpop.f32.mrb[67].mxu0  ;;  %1466 = vmatmul.mubr.bf16.gmra.mrb[60].mxu1 %v1248_v32  ;;  %v1228_v44 = vmax.f32 %v7960_v37, 0.0  ;;  %v8187_v32 = vld [vmem:[#allocation11 + $0x14c] ss:$16 sps:$4 sm:$0xff]   ;;  %v8185_v37 = vld [vmem:[#allocation11 + $0x148] ss:$16 sps:$4 sm:$0xff]  }
 0x2fe   :  { %v7963_v43 = vadd.f32 %v1187_v42, %v9816_v36  ;;  %v1229_v46 = vmax.f32 %v7961_v39, 0.0  ;;  %v8188_v40 = vld [vmem:[#allocation11 + $0x268] ss:$16 sps:$4 sm:$0xff]   ;;  %v8196_v42 = vld [vmem:[#allocation11 + $0x28c] ss:$16 sps:$4 sm:$0xff]  }
 0x2ff   :  { %v1230_v45 = vmax.f32 %v7962_v41, 0.0 }
 0x300   :  { %v1231_v47 = vmax.f32 %v7963_v43, 0.0 }
 0x301   :  { %v1250_v49 = vpack.c.bf16 %v1230_v45, %v1228_v44  ;;  %v8191_v44 = vld [vmem:[#allocation11 + $0x168] ss:$16 sps:$4 sm:$0xff]  }
 0x302   :  { %v1251_v50 = vpack.c.bf16 %v1231_v47, %v1229_v46  ;;  %v1191_v53 = vpop.f32.mrb[68].mxu0  ;;  %v8199_v46 = vld [vmem:[#allocation11 + $0x18c] ss:$16 sps:$4 sm:$0xff]   ;;  %v8194_v47 = vld [vmem:[#allocation11 + $0x288] ss:$16 sps:$4 sm:$0xff]  }
 0x303   :  { %v7964_v54 = vadd.f32 %v1191_v53, %v9813_v35  ;;  %v1193_v55 = vpop.f32.mrb[69].mxu0  ;;  %v8205_v53 = vld [vmem:[#allocation11 + $0x1ac] ss:$16 sps:$4 sm:$0xff]  }
 0x304   :  { %v7965_v56 = vadd.f32 %v1193_v55, %v9816_v36  ;;  %v1195_v57 = vpop.f32.mrb[70].mxu0  ;;  %7179 = vmatprep.mubr.msk.bf16.mxu1 %vm1357_vm4, %v1251_v50  ;;  %v8197_v50 = vld [vmem:[#allocation11 + $0x188] ss:$16 sps:$4 sm:$0xff]  }
 0x305   :  { %v7966_v58 = vadd.f32 %v1195_v57, %v9813_v35  ;;  %v1197_v59 = vpop.f32.mrb[71].mxu0  ;;  %1474 = vmatmul.mubr.bf16.gmra.mrb[64].mxu1 %v1250_v49  ;;  %v1232_v4 = vmax.f32 %v7964_v54, 0.0  ;;  %v8167_v35 = vld [vmem:[#allocation11 + $0x1e0] ss:$16 sps:$4 sm:$0xff]   ;;  %v8202_v49 = vld [vmem:[#allocation11 + $0x2ac] ss:$16 sps:$4 sm:$0xff]  }
 0x306   :  { %v7967_v61 = vadd.f32 %v1197_v59, %v9816_v36  ;;  %v1233_v6 = vmax.f32 %v7965_v56, 0.0  ;;  %1820 = vmatpush1.bf16.msra.mxu1 %v8167_v35  ;;  %v8175_v36 = vld [vmem:[#allocation11 + $0x10c] ss:$16 sps:$4 sm:$0xff]   ;;  %v8200_v55 = vld [vmem:[#allocation11 + $0x2a8] ss:$16 sps:$4 sm:$0xff]  }
 0x307   :  { %v1234_v5 = vmax.f32 %v7966_v58, 0.0  ;;  %1846 = vmatprep.subr.bf16.mxu1 %v8175_v36  ;;  %v8208_v57 = vld [vmem:[#allocation11 + $0x2cc] ss:$16 sps:$4 sm:$0xff]   ;;  %v8203_v59 = vld [vmem:[#allocation11 + $0x1a8] ss:$16 sps:$4 sm:$0xff]  }
 0x308   :  { %v1235_v7 = vmax.f32 %v7967_v61, 0.0 }
 0x309   :  { %v1252_v8 = vpack.c.bf16 %v1234_v5, %v1232_v4  ;;  %v8211_v4 = vld [vmem:[#allocation11 + $0x1cc] ss:$16 sps:$4 sm:$0xff]   ;;  %v8206_v5 = vld [vmem:[#allocation11 + $0x2c8] ss:$16 sps:$4 sm:$0xff]  }
 0x30a   :  { %v1253_v9 = vpack.c.bf16 %v1235_v7, %v1233_v6  ;;  %v8214_v7 = vld [vmem:[#allocation11 + $0x2ec] ss:$16 sps:$4 sm:$0xff]  }
 0x30c   :  { %7180 = vmatprep.mubr.msk.bf16.mxu1 %vm1357_vm4, %v1253_v9  ;;  %v8217_v9 = vld [vmem:[#allocation11 + $0x1ec] ss:$16 sps:$4 sm:$0xff]  }
 0x30d   :  { %1482 = vmatmul.mubr.bf16.gmra.mrb[68].mxu1 %v1252_v8  ;;  %v8209_v8 = vld [vmem:[#allocation11 + $0x1c8] ss:$16 sps:$4 sm:$0xff]  }
 0x30e   :  { %1837 = vmatprep.mubr.bf16.mxu1 %v9272_v1 }
 0x3a0   :  { %v1419_v3 = vpop.f32.mrb[36].mxu1 }
 0x3a1   :  { %v1420_v15 = vadd.f32 %v9864_v14, %v1419_v3  ;;  %v1421_v16 = vpop.f32.mrb[37].mxu1  ;;  %v8215_v3 = vld [vmem:[#allocation11 + $0x1e8] ss:$16 sps:$4 sm:$0xff]  }
 0x3a2   :  { %v1422_v17 = vpop.f32.mrb[38].mxu1  ;;  %v8223_v16 = vld [vmem:[#allocation11 + $0x4] ss:$16 sps:$4 sm:$0xff]  }
 0x3a3   :  { %v1490_v18 = vmax.f32 %v1420_v15, 0.0  ;;  %v1423_v21 = vadd.f32 %v9864_v14, %v1422_v17  ;;  %v1424_v20 = vpop.f32.mrb[39].mxu1  ;;  %v8218_v17 = vld [vmem:[#allocation11 + $0x308] ss:$16 sps:$4 sm:$0xff]  }
 0x3a4   :  { %v8221_v20 = vld [vmem:[#allocation11] ss:$16 sps:$4 sm:$0xff]  }
 0x3a5   :  { %v9868_v25 = vpack.c.bf16 %v1490_v18, %v1490_v18  ;;  %v1491_v52 = vmax.f32 %v1423_v21, 0.0  ;;  %v8226_v21 = vld [vmem:[#allocation11 + $0x32c] ss:$16 sps:$4 sm:$0xff]  }
 0x3a7   :  { %v9870_v19 = vpack.c.bf16 %v1491_v52, %v1491_v52  ;;  %2121 = vmatmul.mubr.bf16.vlgmr.msra.gmra.mrb[72].mxu0 %v9868_v25 }
 0x3a8   :  { %2364 = vmatpush1.bf16.msra.mxu0 %v8170_v51  ;;  %v1427_v24 = vpop.f32.mrb[40].mxu1  ;;  %2395 = vmatprep.mubr.bf16.mxu0 %v9272_v1  ;;  %v8229_v51 = vld [vmem:[#allocation11 + $0x24] ss:$16 sps:$4 sm:$0xff]  }
 0x3a9   :  { %v1429_v27 = vpop.f32.mrb[41].mxu1  ;;  %1838 = vmatmul.mubr.bf16.vlgmr.msra.gmra.mrb[72].mxu1 %v9870_v19  ;;  %2365 = vmatprep.subr.bf16.mxu0 %v8178_v22  ;;  %v1428_v6 = vadd.f32 %v9864_v14, %v1427_v24  ;;  %v8224_v22 = vld [vmem:[#allocation11 + $0x328] ss:$16 sps:$4 sm:$0xff]  }
 0x3aa   :  { %1847 = vmatpush1.bf16.msra.mxu1 %v8173_v48  ;;  %v9875_v29 = vpop.f32.mrb[42].mxu1  ;;  %1878 = vmatprep.mubr.bf16.mxu1 %v9272_v1 }
 0x3ab   :  { %v1432_v31 = vpop.f32.mrb[43].mxu1  ;;  %1848 = vmatprep.subr.bf16.mxu1 %v8181_v23  ;;  %v1492_v12 = vmax.f32 %v1428_v6, 0.0  ;;  %v8232_v23 = vld [vmem:[#allocation11 + $0x34c] ss:$16 sps:$4 sm:$0xff]   ;;  %v1431_v6 = vadd.f32 %v9864_v14, %v9875_v29  ;;  %v8271_v29 = vld [vmem:[#allocation11 + $0x204] ss:$16 sps:$4 sm:$0xff]  }
 0x3ac   :  { %2366 = vmatpush1.bf16.msra.mxu0 %v8176_v26  ;;  %v8227_v26 = vld [vmem:[#allocation11 + $0x20] ss:$16 sps:$4 sm:$0xff]   ;;  %v8238_v31 = vld [vmem:[#allocation11 + $0x36c] ss:$16 sps:$4 sm:$0xff]  }
 0x3ad   :  { %2367 = vmatprep.subr.bf16.mxu0 %v8184_v28  ;;  %v9891_v18 = vpack.c.bf16 %v1492_v12, %v1492_v12  ;;  %v8235_v28 = vld [vmem:[#allocation11 + $0x44] ss:$16 sps:$4 sm:$0xff]   ;;  %v8260_v12 = vld [vmem:[#allocation11 + $0x3e8] ss:$16 sps:$4 sm:$0xff]  }
 0x3ae   :  { %1849 = vmatpush1.bf16.msra.mxu1 %v8179_v30  ;;  %v8230_v30 = vld [vmem:[#allocation11 + $0x348] ss:$16 sps:$4 sm:$0xff]  }
 0x3af   :  { %1850 = vmatprep.subr.bf16.mxu1 %v8187_v32  ;;  %v8233_v32 = vld [vmem:[#allocation11 + $0x40] ss:$16 sps:$4 sm:$0xff]  }
 0x3b0   :  { %2368 = vmatpush1.bf16.msra.mxu0 %v8182_v33  ;;  %v9878_v39 = vpop.f32.mrb[44].mxu1 }
 0x3b1   :  { %v1437_v41 = vpop.f32.mrb[45].mxu1  ;;  %2369 = vmatprep.subr.bf16.mxu0 %v8190_v34  ;;  %v8236_v34 = vld [vmem:[#allocation11 + $0x368] ss:$16 sps:$4 sm:$0xff]  }
 0x3b2   :  { %1851 = vmatpush1.bf16.msra.mxu1 %v8185_v37  ;;  %v9880_v43 = vpop.f32.mrb[46].mxu1  ;;  %v8239_v41 = vld [vmem:[#allocation11 + $0x60] ss:$16 sps:$4 sm:$0xff]  }
 0x3b3   :  { %v1440_v45 = vpop.f32.mrb[47].mxu1  ;;  %1852 = vmatprep.subr.bf16.mxu1 %v8193_v38  ;;  %v8244_v38 = vld [vmem:[#allocation11 + $0x38c] ss:$16 sps:$4 sm:$0xff]  }
 0x3b4   :  { %2370 = vmatpush1.bf16.msra.mxu0 %v8188_v40  ;;  %v8242_v45 = vld [vmem:[#allocation11 + $0x388] ss:$16 sps:$4 sm:$0xff]  }
 0x3b5   :  { %2371 = vmatprep.subr.bf16.mxu0 %v8196_v42 }
 0x3b6   :  { %1853 = vmatpush1.bf16.msra.mxu1 %v8191_v44  ;;  %v8247_v44 = vld [vmem:[#allocation11 + $0x84] ss:$16 sps:$4 sm:$0xff]  }
 0x3b7   :  { %1854 = vmatprep.subr.bf16.mxu1 %v8199_v46  ;;  %v8250_v46 = vld [vmem:[#allocation11 + $0x3ac] ss:$16 sps:$4 sm:$0xff]  }
 0x3b8   :  { %2372 = vmatpush1.bf16.msra.mxu0 %v8194_v47  ;;  %v9882_v54 = vpop.f32.mrb[48].mxu1  ;;  %v8245_v47 = vld [vmem:[#allocation11 + $0x80] ss:$16 sps:$4 sm:$0xff]  }
 0x3b9   :  { %v1445_v56 = vpop.f32.mrb[49].mxu1  ;;  %2373 = vmatprep.subr.bf16.mxu0 %v8202_v49  ;;  %v8253_v49 = vld [vmem:[#allocation11 + $0xa4] ss:$16 sps:$4 sm:$0xff]  }
 0x3ba   :  { %1855 = vmatpush1.bf16.msra.mxu1 %v8197_v50  ;;  %v9884_v58 = vpop.f32.mrb[50].mxu1  ;;  %v8256_v56 = vld [vmem:[#allocation11 + $0x3cc] ss:$16 sps:$4 sm:$0xff]  }
 0x3bb   :  { %v1448_v61 = vpop.f32.mrb[51].mxu1  ;;  %1856 = vmatprep.subr.bf16.mxu1 %v8205_v53  ;;  %v8248_v53 = vld [vmem:[#allocation11 + $0x3a8] ss:$16 sps:$4 sm:$0xff]  }
 0x3bc   :  { %2374 = vmatpush1.bf16.msra.mxu0 %v8200_v55 }
 0x3bd   :  { %2375 = vmatprep.subr.bf16.mxu0 %v8208_v57 }
 0x3be   :  { %1857 = vmatpush1.bf16.msra.mxu1 %v8203_v59  ;;  %v8251_v59 = vld [vmem:[#allocation11 + $0xa0] ss:$16 sps:$4 sm:$0xff]  }
 0x3bf   :  { %1858 = vmatprep.subr.bf16.mxu1 %v8211_v4  ;;  %v8259_v4 = vld [vmem:[#allocation11 + $0xc4] ss:$16 sps:$4 sm:$0xff]  }
 0x3c0   :  { %2376 = vmatpush1.bf16.msra.mxu0 %v8206_v5  ;;  %v9887_v10 = vpop.f32.mrb[52].mxu1  ;;  %v8254_v5 = vld [vmem:[#allocation11 + $0x3c8] ss:$16 sps:$4 sm:$0xff]  }
 0x3c1   :  { %v1453_v35 = vpop.f32.mrb[53].mxu1  ;;  %2377 = vmatprep.subr.bf16.mxu0 %v8214_v7  ;;  %v8262_v7 = vld [vmem:[#allocation11 + $0x3ec] ss:$16 sps:$4 sm:$0xff]  }
 0x3c2   :  { %1859 = vmatpush1.bf16.msra.mxu1 %v8209_v8  ;;  %v9889_v36 = vpop.f32.mrb[54].mxu1  ;;  %v8257_v8 = vld [vmem:[#allocation11 + $0xc0] ss:$16 sps:$4 sm:$0xff]   ;;  %v1493_v35 = vmax.f32 %v1431_v6, 0.0 }
 0x3c3   :  { %v1456_v15 = vpop.f32.mrb[55].mxu1  ;;  %1860 = vmatprep.subr.bf16.mxu1 %v8217_v9  ;;  %v8265_v9 = vld [vmem:[#allocation11 + $0xe4] ss:$16 sps:$4 sm:$0xff]  }
 0x3c4   :  { %2378 = vmatpush1.bf16.msra.mxu0 %v8212_v0 }
 0x3c5   :  { %2642 = vmatprep.subr.bf16.mxu0 %v8220_v13 }
 0x3c6   :  { %1861 = vmatpush1.bf16.msra.mxu1 %v8215_v3  ;;  %v8268_v3 = vld [vmem:[#allocation11 + $0x40c] ss:$16 sps:$4 sm:$0xff]  }
 0x3c7   :  { %2396 = vmatmul.mubr.bf16.vlgmr.msra.gmra.mrb[76].mxu0 %v9891_v18  ;;  %2047 = vmatprep.subr.bf16.mxu1 %v8223_v16  ;;  %v8263_v16 = vld [vmem:[#allocation11 + $0xe0] ss:$16 sps:$4 sm:$0xff]  }
 0x3c8   :  { %2643 = vmatpush1.bf16.msra.mxu0 %v8218_v17  ;;  %v9894_v52 = vpop.f32.mrb[56].mxu1  ;;  %2674 = vmatprep.mubr.bf16.mxu0 %v9272_v1 }
 0x3c9   :  { %1879 = vmatmul.mubr.bf16.vlgmr.msra.gmra.mrb[76].mxu1 %v9870_v19  ;;  %v1461_v48 = vpop.f32.mrb[57].mxu1  ;;  %2644 = vmatprep.subr.bf16.mxu0 %v8226_v21  ;;  %v8241_v19 = vld [vmem:[#allocation11 + $0x64] ss:$16 sps:$4 sm:$0xff]   ;;  %v8266_v21 = vld [vmem:[#allocation11 + $0x408] ss:$16 sps:$4 sm:$0xff]  }
 0x3ca   :  { %2048 = vmatpush1.bf16.msra.mxu1 %v8221_v20  ;;  %v9898_v24 = vpop.f32.mrb[58].mxu1  ;;  %2079 = vmatprep.mubr.bf16.mxu1 %v9272_v1  ;;  %v9915_v20 = vpack.c.bf16 %v1493_v35, %v1493_v35  ;;  %v8277_v48 = vld [vmem:[#allocation11 + $0x224] ss:$16 sps:$4 sm:$0xff]  }
 0x3cb   :  { %v1464_v27 = vpop.f32.mrb[59].mxu1  ;;  %2049 = vmatprep.subr.bf16.mxu1 %v8229_v51  ;;  %v8274_v51 = vld [vmem:[#allocation11 + $0x42c] ss:$16 sps:$4 sm:$0xff]  }
 0x3cc   :  { %2645 = vmatpush1.bf16.msra.mxu0 %v8224_v22  ;;  %v8269_v22 = vld [vmem:[#allocation11 + $0x200] ss:$16 sps:$4 sm:$0xff]  }
 0x3cd   :  { %2646 = vmatprep.subr.bf16.mxu0 %v8232_v23  ;;  %v8272_v23 = vld [vmem:[#allocation11 + $0x428] ss:$16 sps:$4 sm:$0xff]   ;;  %v8275_v27 = vld [vmem:[#allocation11 + $0x220] ss:$16 sps:$4 sm:$0xff]  }
 0x3ce   :  { %2050 = vmatpush1.bf16.msra.mxu1 %v8227_v26  ;;  %v8280_v26 = vld [vmem:[#allocation11 + $0x44c] ss:$16 sps:$4 sm:$0xff]  }
 0x3cf   :  { %2051 = vmatprep.subr.bf16.mxu1 %v8235_v28  ;;  %v8283_v28 = vld [vmem:[#allocation11 + $0x244] ss:$16 sps:$4 sm:$0xff]  }
 0x3d0   :  { %2647 = vmatpush1.bf16.msra.mxu0 %v8230_v30  ;;  %v9901_v33 = vpop.f32.mrb[60].mxu1  ;;  %v8278_v30 = vld [vmem:[#allocation11 + $0x448] ss:$16 sps:$4 sm:$0xff]  }
 0x3d1   :  { %v1469_v37 = vpop.f32.mrb[61].mxu1  ;;  %2648 = vmatprep.subr.bf16.mxu0 %v8238_v31  ;;  %v8286_v31 = vld [vmem:[#allocation11 + $0x46c] ss:$16 sps:$4 sm:$0xff]  }
 0x3d2   :  { %2052 = vmatpush1.bf16.msra.mxu1 %v8233_v32  ;;  %v9903_v40 = vpop.f32.mrb[62].mxu1  ;;  %v8281_v32 = vld [vmem:[#allocation11 + $0x240] ss:$16 sps:$4 sm:$0xff]  }
 0x3d3   :  { %v1472_v42 = vpop.f32.mrb[63].mxu1  ;;  %2053 = vmatprep.subr.bf16.mxu1 %v8241_v19  ;;  %v8289_v19 = vld [vmem:[#allocation11 + $0x264] ss:$16 sps:$4 sm:$0xff]   ;;  %v8287_v37 = vld [vmem:[#allocation11 + $0x260] ss:$16 sps:$4 sm:$0xff]  }
 0x3d4   :  { %2649 = vmatpush1.bf16.msra.mxu0 %v8236_v34  ;;  %v8284_v34 = vld [vmem:[#allocation11 + $0x468] ss:$16 sps:$4 sm:$0xff]   ;;  %v8298_v42 = vld [vmem:[#allocation11 + $0x4ac] ss:$16 sps:$4 sm:$0xff]  }
 0x3d5   :  { %2650 = vmatprep.subr.bf16.mxu0 %v8244_v38  ;;  %v8295_v38 = vld [vmem:[#allocation11 + $0x284] ss:$16 sps:$4 sm:$0xff]  }
 0x3d6   :  { %2054 = vmatpush1.bf16.msra.mxu1 %v8239_v41  ;;  %v8290_v41 = vld [vmem:[#allocation11 + $0x488] ss:$16 sps:$4 sm:$0xff]  }
 0x3d7   :  { %2055 = vmatprep.subr.bf16.mxu1 %v8247_v44  ;;  %v8293_v44 = vld [vmem:[#allocation11 + $0x280] ss:$16 sps:$4 sm:$0xff]  }
 0x3d8   :  { %2651 = vmatpush1.bf16.msra.mxu0 %v8242_v45  ;;  %v9905_v50 = vpop.f32.mrb[64].mxu1  ;;  %v8301_v45 = vld [vmem:[#allocation11 + $0x2a4] ss:$16 sps:$4 sm:$0xff]  }
 0x3d9   :  { %v1477_v55 = vpop.f32.mrb[65].mxu1  ;;  %2652 = vmatprep.subr.bf16.mxu0 %v8250_v46  ;;  %v8296_v46 = vld [vmem:[#allocation11 + $0x4a8] ss:$16 sps:$4 sm:$0xff]  }
 0x3da   :  { %2056 = vmatpush1.bf16.msra.mxu1 %v8245_v47  ;;  %v9907_v57 = vpop.f32.mrb[66].mxu1  ;;  %v8304_v47 = vld [vmem:[#allocation11 + $0x4cc] ss:$16 sps:$4 sm:$0xff]   ;;  %v8302_v55 = vld [vmem:[#allocation11 + $0x4c8] ss:$16 sps:$4 sm:$0xff]  }
 0x3db   :  { %v1480_v61 = vpop.f32.mrb[67].mxu1  ;;  %2057 = vmatprep.subr.bf16.mxu1 %v8253_v49  ;;  %v8299_v49 = vld [vmem:[#allocation11 + $0x2a0] ss:$16 sps:$4 sm:$0xff]  }
 0x3dc   :  { %2653 = vmatpush1.bf16.msra.mxu0 %v8248_v53  ;;  %v8307_v53 = vld [vmem:[#allocation11 + $0x2c4] ss:$16 sps:$4 sm:$0xff]   ;;  %v8305_v61 = vld [vmem:[#allocation11 + $0x2c0] ss:$16 sps:$4 sm:$0xff]  }
 0x3dd   :  { %2654 = vmatprep.subr.bf16.mxu0 %v8256_v56  ;;  %v1436_v56 = vadd.f32 %v9864_v14, %v9878_v39  ;;  %v8322_v39 = vld [vmem:[#allocation11 + $0x52c] ss:$16 sps:$4 sm:$0xff]  }
 0x3de   :  { %2058 = vmatpush1.bf16.msra.mxu1 %v8251_v59  ;;  %v8310_v59 = vld [vmem:[#allocation11 + $0x4ec] ss:$16 sps:$4 sm:$0xff]  }
 0x3df   :  { %2059 = vmatprep.subr.bf16.mxu1 %v8259_v4  ;;  %v8313_v4 = vld [vmem:[#allocation11 + $0x2e4] ss:$16 sps:$4 sm:$0xff]   ;;  %v1494_v6 = vmax.f32 %v1436_v56, 0.0 }
 0x3e0   :  { %2655 = vmatpush1.bf16.msra.mxu0 %v8254_v5  ;;  %v9911_v0 = vpop.f32.mrb[68].mxu1  ;;  %v8308_v5 = vld [vmem:[#allocation11 + $0x4e8] ss:$16 sps:$4 sm:$0xff]   ;;  %v8367_v56 = vld [vmem:[#allocation11 + $0x404] ss:$16 sps:$4 sm:$0xff]  }
 0x3e1   :  { %v1485_v13 = vpop.f32.mrb[69].mxu1  ;;  %2656 = vmatprep.subr.bf16.mxu0 %v8262_v7  ;;  %v8316_v7 = vld [vmem:[#allocation11 + $0x50c] ss:$16 sps:$4 sm:$0xff]   ;;  %v9923_v35 = vpack.c.bf16 %v1494_v6, %v1494_v6  ;;  %v8368_v6 = vld [vmem:[#allocation11 + $0x628] ss:$16 sps:$4 sm:$0xff]  }
 0x3e2   :  { %2060 = vmatpush1.bf16.msra.mxu1 %v8257_v8  ;;  %v9913_v15 = vpop.f32.mrb[70].mxu1  ;;  %v8311_v8 = vld [vmem:[#allocation11 + $0x2e0] ss:$16 sps:$4 sm:$0xff]  }
 0x3e3   :  { %v1488_v17 = vpop.f32.mrb[71].mxu1  ;;  %2061 = vmatprep.subr.bf16.mxu1 %v8265_v9  ;;  %v8319_v9 = vld [vmem:[#allocation11 + $0x304] ss:$16 sps:$4 sm:$0xff]   ;;  %v8317_v13 = vld [vmem:[#allocation11 + $0x300] ss:$16 sps:$4 sm:$0xff]  }
 0x3e4   :  { %2657 = vmatpush1.bf16.msra.mxu0 %v8260_v12  ;;  %v8314_v12 = vld [vmem:[#allocation11 + $0x508] ss:$16 sps:$4 sm:$0xff]   ;;  %v8328_v17 = vld [vmem:[#allocation11 + $0x54c] ss:$16 sps:$4 sm:$0xff]  }
 0x3e5   :  { %2921 = vmatprep.subr.bf16.mxu0 %v8268_v3  ;;  %v8325_v3 = vld [vmem:[#allocation11 + $0x324] ss:$16 sps:$4 sm:$0xff]  }
 0x3e6   :  { %2062 = vmatpush1.bf16.msra.mxu1 %v8263_v16  ;;  %v8320_v16 = vld [vmem:[#allocation11 + $0x528] ss:$16 sps:$4 sm:$0xff]  }
 0x3e7   :  { %2675 = vmatmul.mubr.bf16.vlgmr.msra.gmra.mrb[80].mxu0 %v9915_v20  ;;  %2322 = vmatprep.subr.bf16.mxu1 %v8271_v29  ;;  %v8323_v29 = vld [vmem:[#allocation11 + $0x320] ss:$16 sps:$4 sm:$0xff]  }
 0x3e8   :  { %2922 = vmatpush1.bf16.msra.mxu0 %v8266_v21  ;;  %2953 = vmatprep.mubr.bf16.mxu0 %v9272_v1  ;;  %v8331_v21 = vld [vmem:[#allocation11 + $0x344] ss:$16 sps:$4 sm:$0xff]  }
 0x3e9   :  { %2080 = vmatmul.mubr.bf16.vlgmr.msra.gmra.mrb[80].mxu1 %v9868_v25  ;;  %2923 = vmatprep.subr.bf16.mxu0 %v8274_v51  ;;  %v8292_v25 = vld [vmem:[#allocation11 + $0x48c] ss:$16 sps:$4 sm:$0xff]   ;;  %v8326_v51 = vld [vmem:[#allocation11 + $0x548] ss:$16 sps:$4 sm:$0xff]  }
 0x3ea   :  { %2323 = vmatpush1.bf16.msra.mxu1 %v8269_v22  ;;  %2354 = vmatprep.mubr.bf16.mxu1 %v9272_v1  ;;  %v8334_v22 = vld [vmem:[#allocation11 + $0x56c] ss:$16 sps:$4 sm:$0xff]  }
 0x3eb   :  { %2324 = vmatprep.subr.bf16.mxu1 %v8277_v48  ;;  %v8329_v48 = vld [vmem:[#allocation11 + $0x340] ss:$16 sps:$4 sm:$0xff]  }
 0x3ec   :  { %2924 = vmatpush1.bf16.msra.mxu0 %v8272_v23  ;;  %v8337_v23 = vld [vmem:[#allocation11 + $0x364] ss:$16 sps:$4 sm:$0xff]  }
 0x3ed   :  { %2925 = vmatprep.subr.bf16.mxu0 %v8280_v26  ;;  %v8332_v26 = vld [vmem:[#allocation11 + $0x568] ss:$16 sps:$4 sm:$0xff]  }
 0x3ee   :  { %2325 = vmatpush1.bf16.msra.mxu1 %v8275_v27  ;;  %v8335_v27 = vld [vmem:[#allocation11 + $0x360] ss:$16 sps:$4 sm:$0xff]  }
 0x3ef   :  { %2326 = vmatprep.subr.bf16.mxu1 %v8283_v28  ;;  %v8343_v28 = vld [vmem:[#allocation11 + $0x384] ss:$16 sps:$4 sm:$0xff]  }
 0x3f0   :  { %2926 = vmatpush1.bf16.msra.mxu0 %v8278_v30  ;;  %v8338_v30 = vld [vmem:[#allocation11 + $0x588] ss:$16 sps:$4 sm:$0xff]  }
 0x3f1   :  { %2927 = vmatprep.subr.bf16.mxu0 %v8286_v31  ;;  %v8346_v31 = vld [vmem:[#allocation11 + $0x5ac] ss:$16 sps:$4 sm:$0xff]  }
 0x3f2   :  { %2327 = vmatpush1.bf16.msra.mxu1 %v8281_v32  ;;  %v8341_v32 = vld [vmem:[#allocation11 + $0x380] ss:$16 sps:$4 sm:$0xff]  }
 0x3f3   :  { %2328 = vmatprep.subr.bf16.mxu1 %v8289_v19  ;;  %v8349_v19 = vld [vmem:[#allocation11 + $0x3a4] ss:$16 sps:$4 sm:$0xff]  }
 0x3f4   :  { %2928 = vmatpush1.bf16.msra.mxu0 %v8284_v34  ;;  %v8344_v34 = vld [vmem:[#allocation11 + $0x5a8] ss:$16 sps:$4 sm:$0xff]  }
 0x3f5   :  { %2929 = vmatprep.subr.bf16.mxu0 %v8292_v25  ;;  %v8352_v25 = vld [vmem:[#allocation11 + $0x5cc] ss:$16 sps:$4 sm:$0xff]  }
 0x3f6   :  { %2329 = vmatpush1.bf16.msra.mxu1 %v8287_v37  ;;  %v8347_v37 = vld [vmem:[#allocation11 + $0x3a0] ss:$16 sps:$4 sm:$0xff]  }
 0x3f7   :  { %2330 = vmatprep.subr.bf16.mxu1 %v8295_v38  ;;  %v8355_v38 = vld [vmem:[#allocation11 + $0x3c4] ss:$16 sps:$4 sm:$0xff]  }
 0x3f8   :  { %2930 = vmatpush1.bf16.msra.mxu0 %v8290_v41  ;;  %v8350_v41 = vld [vmem:[#allocation11 + $0x5c8] ss:$16 sps:$4 sm:$0xff]  }
 0x3f9   :  { %2931 = vmatprep.subr.bf16.mxu0 %v8298_v42  ;;  %v1439_v42 = vadd.f32 %v9864_v14, %v9880_v43  ;;  %v8370_v43 = vld [vmem:[#allocation11 + $0x62c] ss:$16 sps:$4 sm:$0xff]  }
 0x3fa   :  { %2331 = vmatpush1.bf16.msra.mxu1 %v8293_v44  ;;  %v8358_v44 = vld [vmem:[#allocation11 + $0x5ec] ss:$16 sps:$4 sm:$0xff]  }
 0x3fb   :  { %2332 = vmatprep.subr.bf16.mxu1 %v8301_v45  ;;  %v8353_v45 = vld [vmem:[#allocation11 + $0x3c0] ss:$16 sps:$4 sm:$0xff]  }
 0x3fc   :  { %2932 = vmatpush1.bf16.msra.mxu0 %v8296_v46  ;;  %v8361_v46 = vld [vmem:[#allocation11 + $0x3e4] ss:$16 sps:$4 sm:$0xff]  }
 0x3fd   :  { %2933 = vmatprep.subr.bf16.mxu0 %v8304_v47  ;;  %v8356_v47 = vld [vmem:[#allocation11 + $0x5e8] ss:$16 sps:$4 sm:$0xff]  }
 0x3fe   :  { %2333 = vmatpush1.bf16.msra.mxu1 %v8299_v49  ;;  %v1495_v49 = vmax.f32 %v1439_v42, 0.0  ;;  %v8410_v42 = vld [vmem:[#allocation11 + $0x708] ss:$16 sps:$4 sm:$0xff]  }
 0x3ff   :  { %2334 = vmatprep.subr.bf16.mxu1 %v8307_v53  ;;  %v8364_v53 = vld [vmem:[#allocation11 + $0x60c] ss:$16 sps:$4 sm:$0xff]  }
 0x400   :  { %2934 = vmatpush1.bf16.msra.mxu0 %v8302_v55  ;;  %v8359_v55 = vld [vmem:[#allocation11 + $0x3e0] ss:$16 sps:$4 sm:$0xff]  }
 0x401   :  { %2935 = vmatprep.subr.bf16.mxu0 %v8310_v59  ;;  %v8362_v59 = vld [vmem:[#allocation11 + $0x608] ss:$16 sps:$4 sm:$0xff]  }
 0x402   :  { %2335 = vmatpush1.bf16.msra.mxu1 %v8305_v61  ;;  %v9931_v61 = vpack.c.bf16 %v1495_v49, %v1495_v49  ;;  %v8424_v49 = vld [vmem:[#allocation11 + $0x74c] ss:$16 sps:$4 sm:$0xff]  }
 0x403   :  { %2336 = vmatprep.subr.bf16.mxu1 %v8313_v4  ;;  %v8365_v4 = vld [vmem:[#allocation11 + $0x400] ss:$16 sps:$4 sm:$0xff]  }
 0x404   :  { %2936 = vmatpush1.bf16.msra.mxu0 %v8308_v5  ;;  %v8373_v5 = vld [vmem:[#allocation11 + $0x424] ss:$16 sps:$4 sm:$0xff]  }
 0x405   :  { %3200 = vmatprep.subr.bf16.mxu0 %v8316_v7  ;;  %v8376_v7 = vld [vmem:[#allocation11 + $0x64c] ss:$16 sps:$4 sm:$0xff]  }
 0x406   :  { %2337 = vmatpush1.bf16.msra.mxu1 %v8311_v8  ;;  %v8371_v8 = vld [vmem:[#allocation11 + $0x420] ss:$16 sps:$4 sm:$0xff]  }
 0x407   :  { %2954 = vmatmul.mubr.bf16.vlgmr.msra.gmra.mrb[84].mxu0 %v9923_v35  ;;  %2601 = vmatprep.subr.bf16.mxu1 %v8319_v9  ;;  %v8379_v9 = vld [vmem:[#allocation11 + $0x444] ss:$16 sps:$4 sm:$0xff]  }
 0x408   :  { %3201 = vmatpush1.bf16.msra.mxu0 %v8314_v12  ;;  %3232 = vmatprep.mubr.bf16.mxu0 %v9272_v1  ;;  %v8374_v12 = vld [vmem:[#allocation11 + $0x648] ss:$16 sps:$4 sm:$0xff]  }
 0x409   :  { %2355 = vmatmul.mubr.bf16.vlgmr.msra.gmra.mrb[84].mxu1 %v9891_v18  ;;  %3202 = vmatprep.subr.bf16.mxu0 %v8322_v39  ;;  %v8340_v18 = vld [vmem:[#allocation11 + $0x58c] ss:$16 sps:$4 sm:$0xff]  }
 0x40a   :  { %2602 = vmatpush1.bf16.msra.mxu1 %v8317_v13  ;;  %2633 = vmatprep.mubr.bf16.mxu1 %v9272_v1  ;;  %v8382_v39 = vld [vmem:[#allocation11 + $0x66c] ss:$16 sps:$4 sm:$0xff]   ;;  %v8377_v13 = vld [vmem:[#allocation11 + $0x440] ss:$16 sps:$4 sm:$0xff]  }
 0x40b   :  { %2603 = vmatprep.subr.bf16.mxu1 %v8325_v3  ;;  %v8385_v3 = vld [vmem:[#allocation11 + $0x464] ss:$16 sps:$4 sm:$0xff]  }
 0x40c   :  { %3203 = vmatpush1.bf16.msra.mxu0 %v8320_v16  ;;  %v8380_v16 = vld [vmem:[#allocation11 + $0x668] ss:$16 sps:$4 sm:$0xff]  }
 0x40d   :  { %3204 = vmatprep.subr.bf16.mxu0 %v8328_v17  ;;  %v8383_v17 = vld [vmem:[#allocation11 + $0x460] ss:$16 sps:$4 sm:$0xff]  }
 0x40e   :  { %2604 = vmatpush1.bf16.msra.mxu1 %v8323_v29  ;;  %v8391_v29 = vld [vmem:[#allocation11 + $0x484] ss:$16 sps:$4 sm:$0xff]  }
 0x40f   :  { %2605 = vmatprep.subr.bf16.mxu1 %v8331_v21  ;;  %v8386_v21 = vld [vmem:[#allocation11 + $0x688] ss:$16 sps:$4 sm:$0xff]  }
 0x410   :  { %3205 = vmatpush1.bf16.msra.mxu0 %v8326_v51  ;;  %v8394_v51 = vld [vmem:[#allocation11 + $0x6ac] ss:$16 sps:$4 sm:$0xff]  }
 0x411   :  { %3206 = vmatprep.subr.bf16.mxu0 %v8334_v22  ;;  %v8389_v22 = vld [vmem:[#allocation11 + $0x480] ss:$16 sps:$4 sm:$0xff]  }
 0x412   :  { %2606 = vmatpush1.bf16.msra.mxu1 %v8329_v48  ;;  %v8397_v48 = vld [vmem:[#allocation11 + $0x4a4] ss:$16 sps:$4 sm:$0xff]  }
 0x413   :  { %2607 = vmatprep.subr.bf16.mxu1 %v8337_v23  ;;  %v8392_v23 = vld [vmem:[#allocation11 + $0x6a8] ss:$16 sps:$4 sm:$0xff]  }
 0x414   :  { %3207 = vmatpush1.bf16.msra.mxu0 %v8332_v26  ;;  %v8400_v26 = vld [vmem:[#allocation11 + $0x6cc] ss:$16 sps:$4 sm:$0xff]  }
 0x415   :  { %3208 = vmatprep.subr.bf16.mxu0 %v8340_v18  ;;  %v8395_v18 = vld [vmem:[#allocation11 + $0x4a0] ss:$16 sps:$4 sm:$0xff]  }
 0x416   :  { %2608 = vmatpush1.bf16.msra.mxu1 %v8335_v27  ;;  %v8403_v27 = vld [vmem:[#allocation11 + $0x4c4] ss:$16 sps:$4 sm:$0xff]  }
 0x417   :  { %2609 = vmatprep.subr.bf16.mxu1 %v8343_v28  ;;  %v8398_v28 = vld [vmem:[#allocation11 + $0x6c8] ss:$16 sps:$4 sm:$0xff]  }
 0x418   :  { %3209 = vmatpush1.bf16.msra.mxu0 %v8338_v30  ;;  %v1444_v30 = vadd.f32 %v9864_v14, %v9882_v54  ;;  %v8418_v54 = vld [vmem:[#allocation11 + $0x72c] ss:$16 sps:$4 sm:$0xff]  }
 0x419   :  { %3210 = vmatprep.subr.bf16.mxu0 %v8346_v31  ;;  %v8406_v31 = vld [vmem:[#allocation11 + $0x6ec] ss:$16 sps:$4 sm:$0xff]  }
 0x41a   :  { %2610 = vmatpush1.bf16.msra.mxu1 %v8341_v32  ;;  %v8401_v32 = vld [vmem:[#allocation11 + $0x4c0] ss:$16 sps:$4 sm:$0xff]  }
 0x41b   :  { %2611 = vmatprep.subr.bf16.mxu1 %v8349_v19  ;;  %v8409_v19 = vld [vmem:[#allocation11 + $0x4e4] ss:$16 sps:$4 sm:$0xff]  }
 0x41c   :  { %3211 = vmatpush1.bf16.msra.mxu0 %v8344_v34  ;;  %v8404_v34 = vld [vmem:[#allocation11 + $0x6e8] ss:$16 sps:$4 sm:$0xff]  }
 0x41d   :  { %3212 = vmatprep.subr.bf16.mxu0 %v8352_v25  ;;  %v1496_v25 = vmax.f32 %v1444_v30, 0.0 }
 0x41e   :  { %2612 = vmatpush1.bf16.msra.mxu1 %v8347_v37  ;;  %v8412_v37 = vld [vmem:[#allocation11 + $0x70c] ss:$16 sps:$4 sm:$0xff]  }
 0x41f   :  { %2613 = vmatprep.subr.bf16.mxu1 %v8355_v38  ;;  %v8407_v38 = vld [vmem:[#allocation11 + $0x4e0] ss:$16 sps:$4 sm:$0xff]  }
 0x420   :  { %3213 = vmatpush1.bf16.msra.mxu0 %v8350_v41  ;;  %v8415_v41 = vld [vmem:[#allocation11 + $0x504] ss:$16 sps:$4 sm:$0xff]  }
 0x421   :  { %3214 = vmatprep.subr.bf16.mxu0 %v8358_v44  ;;  %v9939_v44 = vpack.c.bf16 %v1496_v25, %v1496_v25  ;;  %v8475_v25 = vld [vmem:[#allocation11 + $0x644] ss:$16 sps:$4 sm:$0xff]  }
 0x422   :  { %2614 = vmatpush1.bf16.msra.mxu1 %v8353_v45  ;;  %v8413_v45 = vld [vmem:[#allocation11 + $0x500] ss:$16 sps:$4 sm:$0xff]  }
 0x423   :  { %2615 = vmatprep.subr.bf16.mxu1 %v8361_v46  ;;  %v8421_v46 = vld [vmem:[#allocation11 + $0x524] ss:$16 sps:$4 sm:$0xff]  }
 0x424   :  { %3215 = vmatpush1.bf16.msra.mxu0 %v8356_v47  ;;  %v8416_v47 = vld [vmem:[#allocation11 + $0x728] ss:$16 sps:$4 sm:$0xff]  }
 0x425   :  { %3479 = vmatprep.subr.bf16.mxu0 %v8364_v53  ;;  %v8419_v53 = vld [vmem:[#allocation11 + $0x520] ss:$16 sps:$4 sm:$0xff]  }
 0x426   :  { %2616 = vmatpush1.bf16.msra.mxu1 %v8359_v55  ;;  %v8427_v55 = vld [vmem:[#allocation11 + $0x544] ss:$16 sps:$4 sm:$0xff]  }
 0x427   :  { %3233 = vmatmul.mubr.bf16.vlgmr.msra.gmra.mrb[88].mxu0 %v9931_v61  ;;  %2880 = vmatprep.subr.bf16.mxu1 %v8367_v56  ;;  %v8422_v56 = vld [vmem:[#allocation11 + $0x748] ss:$16 sps:$4 sm:$0xff]  }
 0x428   :  { %3480 = vmatpush1.bf16.msra.mxu0 %v8362_v59  ;;  %3511 = vmatprep.mubr.bf16.mxu0 %v9272_v1  ;;  %v8430_v59 = vld [vmem:[#allocation11 + $0x76c] ss:$16 sps:$4 sm:$0xff]  }
 0x429   :  { %2634 = vmatmul.mubr.bf16.vlgmr.msra.gmra.mrb[88].mxu1 %v9915_v20  ;;  %3481 = vmatprep.subr.bf16.mxu0 %v8370_v43  ;;  %v8388_v20 = vld [vmem:[#allocation11 + $0x68c] ss:$16 sps:$4 sm:$0xff]   ;;  %v8425_v43 = vld [vmem:[#allocation11 + $0x540] ss:$16 sps:$4 sm:$0xff]  }
 0x42a   :  { %2881 = vmatpush1.bf16.msra.mxu1 %v8365_v4  ;;  %2912 = vmatprep.mubr.bf16.mxu1 %v9272_v1  ;;  %v8433_v4 = vld [vmem:[#allocation11 + $0x564] ss:$16 sps:$4 sm:$0xff]  }
 0x42b   :  { %2882 = vmatprep.subr.bf16.mxu1 %v8373_v5  ;;  %v8428_v5 = vld [vmem:[#allocation11 + $0x768] ss:$16 sps:$4 sm:$0xff]  }
 0x42c   :  { %3482 = vmatpush1.bf16.msra.mxu0 %v8368_v6  ;;  %v8431_v6 = vld [vmem:[#allocation11 + $0x560] ss:$16 sps:$4 sm:$0xff]  }
 0x42d   :  { %3483 = vmatprep.subr.bf16.mxu0 %v8376_v7  ;;  %v8439_v7 = vld [vmem:[#allocation11 + $0x584] ss:$16 sps:$4 sm:$0xff]  }
 0x42e   :  { %2883 = vmatpush1.bf16.msra.mxu1 %v8371_v8  ;;  %v8434_v8 = vld [vmem:[#allocation11 + $0x788] ss:$16 sps:$4 sm:$0xff]  }
 0x42f   :  { %2884 = vmatprep.subr.bf16.mxu1 %v8379_v9  ;;  %v8442_v9 = vld [vmem:[#allocation11 + $0x7ac] ss:$16 sps:$4 sm:$0xff]  }
 0x430   :  { %3484 = vmatpush1.bf16.msra.mxu0 %v8374_v12  ;;  %v8437_v12 = vld [vmem:[#allocation11 + $0x580] ss:$16 sps:$4 sm:$0xff]  }
 0x431   :  { %3485 = vmatprep.subr.bf16.mxu0 %v8382_v39  ;;  %v8445_v39 = vld [vmem:[#allocation11 + $0x5a4] ss:$16 sps:$4 sm:$0xff]  }
 0x432   :  { %2885 = vmatpush1.bf16.msra.mxu1 %v8377_v13  ;;  %v8440_v13 = vld [vmem:[#allocation11 + $0x7a8] ss:$16 sps:$4 sm:$0xff]  }
 0x433   :  { %2886 = vmatprep.subr.bf16.mxu1 %v8385_v3  ;;  %v8448_v3 = vld [vmem:[#allocation11 + $0x7cc] ss:$16 sps:$4 sm:$0xff]  }
 0x434   :  { %3486 = vmatpush1.bf16.msra.mxu0 %v8380_v16  ;;  %v8443_v16 = vld [vmem:[#allocation11 + $0x5a0] ss:$16 sps:$4 sm:$0xff]  }
 0x435   :  { %3487 = vmatprep.subr.bf16.mxu0 %v8388_v20  ;;  %v8451_v20 = vld [vmem:[#allocation11 + $0x5c4] ss:$16 sps:$4 sm:$0xff]  }
 0x436   :  { %2887 = vmatpush1.bf16.msra.mxu1 %v8383_v17  ;;  %v8446_v17 = vld [vmem:[#allocation11 + $0x7c8] ss:$16 sps:$4 sm:$0xff]  }
 0x437   :  { %2888 = vmatprep.subr.bf16.mxu1 %v8391_v29  ;;  %v1447_v29 = vadd.f32 %v9864_v14, %v9884_v58  ;;  %v8466_v14 = vld [vmem:[#allocation11 + $0x82c] ss:$16 sps:$4 sm:$0xff]   ;;  %v8461_v58 = vld [vmem:[#allocation11 + $0x600] ss:$16 sps:$4 sm:$0xff]  }
 0x438   :  { %3488 = vmatpush1.bf16.msra.mxu0 %v8386_v21  ;;  %v8454_v21 = vld [vmem:[#allocation11 + $0x7ec] ss:$16 sps:$4 sm:$0xff]  }
 0x439   :  { %3489 = vmatprep.subr.bf16.mxu0 %v8394_v51  ;;  %v8449_v51 = vld [vmem:[#allocation11 + $0x5c0] ss:$16 sps:$4 sm:$0xff]  }
 0x43a   :  { %2889 = vmatpush1.bf16.msra.mxu1 %v8389_v22  ;;  %v8457_v22 = vld [vmem:[#allocation11 + $0x5e4] ss:$16 sps:$4 sm:$0xff]  }
 0x43b   :  { %2890 = vmatprep.subr.bf16.mxu1 %v8397_v48  ;;  %v8452_v48 = vld [vmem:[#allocation11 + $0x7e8] ss:$16 sps:$4 sm:$0xff]  }
 0x43c   :  { %3490 = vmatpush1.bf16.msra.mxu0 %v8392_v23  ;;  %v1497_v23 = vmax.f32 %v1447_v29, 0.0  ;;  %v8505_v29 = vld [vmem:[#allocation11 + $0x6e4] ss:$16 sps:$4 sm:$0xff]  }
 0x43d   :  { %3491 = vmatprep.subr.bf16.mxu0 %v8400_v26  ;;  %v8460_v26 = vld [vmem:[#allocation11 + $0x80c] ss:$16 sps:$4 sm:$0xff]  }
 0x43e   :  { %2891 = vmatpush1.bf16.msra.mxu1 %v8395_v18  ;;  %v8455_v18 = vld [vmem:[#allocation11 + $0x5e0] ss:$16 sps:$4 sm:$0xff]   ;;  %v9947_v30 = vpack.c.bf16 %v1497_v23, %v1497_v23  ;;  %v8506_v23 = vld [vmem:[#allocation11 + $0x908] ss:$16 sps:$4 sm:$0xff]  }
 0x43f   :  { %2892 = vmatprep.subr.bf16.mxu1 %v8403_v27  ;;  %v8463_v27 = vld [vmem:[#allocation11 + $0x604] ss:$16 sps:$4 sm:$0xff]  }
 0x440   :  { %3492 = vmatpush1.bf16.msra.mxu0 %v8398_v28  ;;  %v8458_v28 = vld [vmem:[#allocation11 + $0x808] ss:$16 sps:$4 sm:$0xff]  }
 0x441   :  { %3493 = vmatprep.subr.bf16.mxu0 %v8406_v31  ;;  %v8469_v31 = vld [vmem:[#allocation11 + $0x624] ss:$16 sps:$4 sm:$0xff]  }
 0x442   :  { %2893 = vmatpush1.bf16.msra.mxu1 %v8401_v32  ;;  %v8464_v32 = vld [vmem:[#allocation11 + $0x828] ss:$16 sps:$4 sm:$0xff]  }
 0x443   :  { %2894 = vmatprep.subr.bf16.mxu1 %v8409_v19  ;;  %v8472_v19 = vld [vmem:[#allocation11 + $0x84c] ss:$16 sps:$4 sm:$0xff]  }
 0x444   :  { %3494 = vmatpush1.bf16.msra.mxu0 %v8404_v34  ;;  %v8467_v34 = vld [vmem:[#allocation11 + $0x620] ss:$16 sps:$4 sm:$0xff]  }
 0x445   :  { %3758 = vmatprep.subr.bf16.mxu0 %v8412_v37  ;;  %v8470_v37 = vld [vmem:[#allocation11 + $0x848] ss:$16 sps:$4 sm:$0xff]  }
 0x446   :  { %2895 = vmatpush1.bf16.msra.mxu1 %v8407_v38  ;;  %v8478_v38 = vld [vmem:[#allocation11 + $0x86c] ss:$16 sps:$4 sm:$0xff]  }
 0x447   :  { %3512 = vmatmul.mubr.bf16.vlgmr.msra.gmra.mrb[92].mxu0 %v9939_v44  ;;  %3159 = vmatprep.subr.bf16.mxu1 %v8415_v41  ;;  %v8473_v41 = vld [vmem:[#allocation11 + $0x640] ss:$16 sps:$4 sm:$0xff]  }
 0x448   :  { %3759 = vmatpush1.bf16.msra.mxu0 %v8410_v42  ;;  %3790 = vmatprep.mubr.bf16.mxu0 %v9272_v1  ;;  %v8481_v42 = vld [vmem:[#allocation11 + $0x664] ss:$16 sps:$4 sm:$0xff]  }
 0x449   :  { %2913 = vmatmul.mubr.bf16.vlgmr.msra.gmra.mrb[92].mxu1 %v9923_v35  ;;  %3760 = vmatprep.subr.bf16.mxu0 %v8418_v54  ;;  %v8436_v35 = vld [vmem:[#allocation11 + $0x78c] ss:$16 sps:$4 sm:$0xff]   ;;  %v8476_v54 = vld [vmem:[#allocation11 + $0x868] ss:$16 sps:$4 sm:$0xff]  }
 0x44a   :  { %3160 = vmatpush1.bf16.msra.mxu1 %v8413_v45  ;;  %3191 = vmatprep.mubr.bf16.mxu1 %v9272_v1  ;;  %v8479_v45 = vld [vmem:[#allocation11 + $0x660] ss:$16 sps:$4 sm:$0xff]  }
 0x44b   :  { %3161 = vmatprep.subr.bf16.mxu1 %v8421_v46  ;;  %v8487_v46 = vld [vmem:[#allocation11 + $0x684] ss:$16 sps:$4 sm:$0xff]  }
 0x44c   :  { %3761 = vmatpush1.bf16.msra.mxu0 %v8416_v47  ;;  %v8482_v47 = vld [vmem:[#allocation11 + $0x888] ss:$16 sps:$4 sm:$0xff]  }
 0x44d   :  { %3762 = vmatprep.subr.bf16.mxu0 %v8424_v49  ;;  %v8490_v49 = vld [vmem:[#allocation11 + $0x8ac] ss:$16 sps:$4 sm:$0xff]  }
 0x44e   :  { %3162 = vmatpush1.bf16.msra.mxu1 %v8419_v53  ;;  %v8485_v53 = vld [vmem:[#allocation11 + $0x680] ss:$16 sps:$4 sm:$0xff]  }
 0x44f   :  { %3163 = vmatprep.subr.bf16.mxu1 %v8427_v55  ;;  %v8493_v55 = vld [vmem:[#allocation11 + $0x6a4] ss:$16 sps:$4 sm:$0xff]  }
 0x450   :  { %3763 = vmatpush1.bf16.msra.mxu0 %v8422_v56  ;;  %v8488_v56 = vld [vmem:[#allocation11 + $0x8a8] ss:$16 sps:$4 sm:$0xff]  }
 0x451   :  { %3764 = vmatprep.subr.bf16.mxu0 %v8430_v59  ;;  %v8496_v59 = vld [vmem:[#allocation11 + $0x8cc] ss:$16 sps:$4 sm:$0xff]  }
 0x452   :  { %3164 = vmatpush1.bf16.msra.mxu1 %v8425_v43 }
 0x453   :  { %3165 = vmatprep.subr.bf16.mxu1 %v8433_v4  ;;  %v8491_v4 = vld [vmem:[#allocation11 + $0x6a0] ss:$16 sps:$4 sm:$0xff]  }
 0x454   :  { %3765 = vmatpush1.bf16.msra.mxu0 %v8428_v5 }
 0x455   :  { %3766 = vmatprep.subr.bf16.mxu0 %v8436_v35  ;;  %v8499_v35 = vld [vmem:[#allocation11 + $0x6c4] ss:$16 sps:$4 sm:$0xff]  }
 0x456   :  { %3166 = vmatpush1.bf16.msra.mxu1 %v8431_v6 }
 0x457   :  { %3167 = vmatprep.subr.bf16.mxu1 %v8439_v7 }
 0x458   :  { %3767 = vmatpush1.bf16.msra.mxu0 %v8434_v8  ;;  %v8494_v8 = vld [vmem:[#allocation11 + $0x8c8] ss:$16 sps:$4 sm:$0xff]  }
 0x459   :  { %3768 = vmatprep.subr.bf16.mxu0 %v8442_v9  ;;  %v9959_v9 = vld [vmem:[#allocation10] ss:$0 sm:$0xff] }
 0x45a   :  { %3168 = vmatpush1.bf16.msra.mxu1 %v8437_v12  ;;  %v1452_v12 = vadd.f32 %v9959_v9, %v9887_v10  ;;  %v8511_v10 = vld [vmem:[#allocation11 + $0x704] ss:$16 sps:$4 sm:$0xff]  }
 0x45b   :  { %3169 = vmatprep.subr.bf16.mxu1 %v8445_v39 }
 0x45c   :  { %3769 = vmatpush1.bf16.msra.mxu0 %v8440_v13 }
 0x45d   :  { %3770 = vmatprep.subr.bf16.mxu0 %v8448_v3  ;;  %v8502_v3 = vld [vmem:[#allocation11 + $0x8ec] ss:$16 sps:$4 sm:$0xff]  }
 0x45e   :  { %3170 = vmatpush1.bf16.msra.mxu1 %v8443_v16 }
 0x45f   :  { %3171 = vmatprep.subr.bf16.mxu1 %v8451_v20  ;;  %v8497_v20 = vld [vmem:[#allocation11 + $0x6c0] ss:$16 sps:$4 sm:$0xff]  }
 0x460   :  { %3771 = vmatpush1.bf16.msra.mxu0 %v8446_v17 }
 0x461   :  { %3772 = vmatprep.subr.bf16.mxu0 %v8454_v21  ;;  %v8500_v21 = vld [vmem:[#allocation11 + $0x8e8] ss:$16 sps:$4 sm:$0xff]  }
 0x462   :  { %3172 = vmatpush1.bf16.msra.mxu1 %v8449_v51  ;;  %v1498_v51 = vmax.f32 %v1452_v12, 0.0 }
 0x463   :  { %3173 = vmatprep.subr.bf16.mxu1 %v8457_v22  ;;  %v8508_v22 = vld [vmem:[#allocation11 + $0x90c] ss:$16 sps:$4 sm:$0xff]  }
 0x464   :  { %3773 = vmatpush1.bf16.msra.mxu0 %v8452_v48  ;;  %v8503_v48 = vld [vmem:[#allocation11 + $0x6e0] ss:$16 sps:$4 sm:$0xff]  }
 0x465   :  { %4037 = vmatprep.subr.bf16.mxu0 %v8460_v26  ;;  %v9965_v26 = vpack.c.bf16 %v1498_v51, %v1498_v51  ;;  %v8553_v51 = vld [vmem:[#allocation11 + $0x7e4] ss:$16 sps:$4 sm:$0xff]  }
 0x466   :  { %3174 = vmatpush1.bf16.msra.mxu1 %v8455_v18  ;;  %v8514_v18 = vld [vmem:[#allocation11 + $0x92c] ss:$16 sps:$4 sm:$0xff]  }
 0x467   :  { %3791 = vmatmul.mubr.bf16.vlgmr.msra.gmra.mrb[96].mxu0 %v9947_v30  ;;  %3438 = vmatprep.subr.bf16.mxu1 %v8463_v27  ;;  %v8509_v27 = vld [vmem:[#allocation11 + $0x700] ss:$16 sps:$4 sm:$0xff]  }
 0x468   :  { %4038 = vmatpush1.bf16.msra.mxu0 %v8458_v28  ;;  %4069 = vmatprep.mubr.bf16.mxu0 %v9272_v1  ;;  %v8517_v28 = vld [vmem:[#allocation11 + $0x724] ss:$16 sps:$4 sm:$0xff]  }
 0x469   :  { %3192 = vmatmul.mubr.bf16.vlgmr.msra.gmra.mrb[96].mxu1 %v9931_v61  ;;  %4039 = vmatprep.subr.bf16.mxu0 %v8466_v14  ;;  %v8484_v61 = vld [vmem:[#allocation11 + $0x88c] ss:$16 sps:$4 sm:$0xff]   ;;  %v8512_v14 = vld [vmem:[#allocation11 + $0x928] ss:$16 sps:$4 sm:$0xff]  }
 0x46a   :  { %3439 = vmatpush1.bf16.msra.mxu1 %v8461_v58  ;;  %3470 = vmatprep.mubr.bf16.mxu1 %v9272_v1  ;;  %v8520_v58 = vld [vmem:[#allocation11 + $0x94c] ss:$16 sps:$4 sm:$0xff]  }
 0x46b   :  { %3440 = vmatprep.subr.bf16.mxu1 %v8469_v31  ;;  %v8515_v31 = vld [vmem:[#allocation11 + $0x720] ss:$16 sps:$4 sm:$0xff]  }
 0x46c   :  { %4040 = vmatpush1.bf16.msra.mxu0 %v8464_v32  ;;  %v8523_v32 = vld [vmem:[#allocation11 + $0x744] ss:$16 sps:$4 sm:$0xff]  }
 0x46d   :  { %4041 = vmatprep.subr.bf16.mxu0 %v8472_v19  ;;  %v8518_v19 = vld [vmem:[#allocation11 + $0x948] ss:$16 sps:$4 sm:$0xff]  }
 0x46e   :  { %3441 = vmatpush1.bf16.msra.mxu1 %v8467_v34  ;;  %v8526_v34 = vld [vmem:[#allocation11 + $0x96c] ss:$16 sps:$4 sm:$0xff]  }
 0x46f   :  { %3442 = vmatprep.subr.bf16.mxu1 %v8475_v25  ;;  %v8521_v25 = vld [vmem:[#allocation11 + $0x740] ss:$16 sps:$4 sm:$0xff]  }
 0x470   :  { %4042 = vmatpush1.bf16.msra.mxu0 %v8470_v37  ;;  %v8529_v37 = vld [vmem:[#allocation11 + $0x764] ss:$16 sps:$4 sm:$0xff]  }
 0x471   :  { %4043 = vmatprep.subr.bf16.mxu0 %v8478_v38  ;;  %v8524_v38 = vld [vmem:[#allocation11 + $0x968] ss:$16 sps:$4 sm:$0xff]  }
 0x472   :  { %3443 = vmatpush1.bf16.msra.mxu1 %v8473_v41  ;;  %v8527_v41 = vld [vmem:[#allocation11 + $0x760] ss:$16 sps:$4 sm:$0xff]  }
 0x473   :  { %3444 = vmatprep.subr.bf16.mxu1 %v8481_v42  ;;  %v8535_v42 = vld [vmem:[#allocation11 + $0x784] ss:$16 sps:$4 sm:$0xff]  }
 0x474   :  { %4044 = vmatpush1.bf16.msra.mxu0 %v8476_v54  ;;  %v8530_v54 = vld [vmem:[#allocation11 + $0x988] ss:$16 sps:$4 sm:$0xff]  }
 0x475   :  { %4045 = vmatprep.subr.bf16.mxu0 %v8484_v61  ;;  %v8538_v61 = vld [vmem:[#allocation11 + $0x9ac] ss:$16 sps:$4 sm:$0xff]  }
 0x476   :  { %3445 = vmatpush1.bf16.msra.mxu1 %v8479_v45  ;;  %v8533_v45 = vld [vmem:[#allocation11 + $0x780] ss:$16 sps:$4 sm:$0xff]  }
 0x477   :  { %3446 = vmatprep.subr.bf16.mxu1 %v8487_v46  ;;  %v8541_v46 = vld [vmem:[#allocation11 + $0x7a4] ss:$16 sps:$4 sm:$0xff]  }
 0x478   :  { %4046 = vmatpush1.bf16.msra.mxu0 %v8482_v47  ;;  %v8536_v47 = vld [vmem:[#allocation11 + $0x9a8] ss:$16 sps:$4 sm:$0xff]  }
 0x479   :  { %4047 = vmatprep.subr.bf16.mxu0 %v8490_v49  ;;  %v8544_v49 = vld [vmem:[#allocation11 + $0x9cc] ss:$16 sps:$4 sm:$0xff]  }
 0x47a   :  { %3447 = vmatpush1.bf16.msra.mxu1 %v8485_v53  ;;  %v9953_v43 = vpop.f32.mrb[72].mxu0 }
 0x47b   :  { %v9955_v5 = vpop.f32.mrb[73].mxu0  ;;  %3448 = vmatprep.subr.bf16.mxu1 %v8493_v55  ;;  %v8539_v55 = vld [vmem:[#allocation11 + $0x7a0] ss:$16 sps:$4 sm:$0xff]  }
 0x47c   :  { %4048 = vmatpush1.bf16.msra.mxu0 %v8488_v56  ;;  %v9957_v6 = vpop.f32.mrb[72].mxu1  ;;  %v2126_v7 = vpop.f32.mrb[74].mxu0 }
 0x47d   :  { %v9963_v39 = vpop.f32.mrb[73].mxu1  ;;  %v2127_v13 = vpop.f32.mrb[75].mxu0  ;;  %4049 = vmatprep.subr.bf16.mxu0 %v8496_v59  ;;  %v8547_v59 = vld [vmem:[#allocation11 + $0x7c4] ss:$16 sps:$4 sm:$0xff]   ;;  %v8542_v7 = vld [vmem:[#allocation11 + $0x9c8] ss:$16 sps:$4 sm:$0xff]  }
 0x47e   :  { %3449 = vmatpush1.bf16.msra.mxu1 %v8491_v4  ;;  %v1843_v16 = vpop.f32.mrb[74].mxu1 }
 0x47f   :  { %v1844_v17 = vpop.f32.mrb[75].mxu1  ;;  %3450 = vmatprep.subr.bf16.mxu1 %v8499_v35  ;;  %v8550_v16 = vld [vmem:[#allocation11 + $0x9ec] ss:$16 sps:$4 sm:$0xff]  }
 0x480   :  { %4050 = vmatpush1.bf16.msra.mxu0 %v8494_v8  ;;  %v1455_v8 = vadd.f32 %v9959_v9, %v9889_v36 }
 0x481   :  { %4051 = vmatprep.subr.bf16.mxu0 %v8502_v3 }
 0x482   :  { %3451 = vmatpush1.bf16.msra.mxu1 %v8497_v20  ;;  %v1499_v36 = vmax.f32 %v1455_v8, 0.0 }
 0x483   :  { %3452 = vmatprep.subr.bf16.mxu1 %v8505_v29  ;;  %v8545_v29 = vld [vmem:[#allocation11 + $0x7c0] ss:$16 sps:$4 sm:$0xff]  }
 0x484   :  { %4052 = vmatpush1.bf16.msra.mxu0 %v8500_v21 }
 0x485   :  { %4316 = vmatprep.subr.bf16.mxu0 %v8508_v22 }
 0x486   :  { %3453 = vmatpush1.bf16.msra.mxu1 %v8503_v48  ;;  %v8548_v48 = vld [vmem:[#allocation11 + $0x9e8] ss:$16 sps:$4 sm:$0xff]  }
 0x487   :  { %4070 = vmatmul.mubr.bf16.vlgmr.msra.gmra.mrb[100].mxu0 %v9965_v26  ;;  %3717 = vmatprep.subr.bf16.mxu1 %v8511_v10 }
 0x488   :  { %4317 = vmatpush1.bf16.msra.mxu0 %v8506_v23  ;;  %4348 = vmatprep.mubr.bf16.mxu0 %v9272_v1  ;;  %v8551_v23 = vld [vmem:[#allocation11 + $0x7e0] ss:$16 sps:$4 sm:$0xff]  }
 0x489   :  { %3471 = vmatmul.mubr.bf16.vlgmr.msra.gmra.mrb[100].mxu1 %v9939_v44  ;;  %4318 = vmatprep.subr.bf16.mxu0 %v8514_v18  ;;  %v8532_v44 = vld [vmem:[#allocation11 + $0x98c] ss:$16 sps:$4 sm:$0xff]   ;;  %v8559_v18 = vld [vmem:[#allocation11 + $0x804] ss:$16 sps:$4 sm:$0xff]  }
 0x48a   :  { %3718 = vmatpush1.bf16.msra.mxu1 %v8509_v27  ;;  %3749 = vmatprep.mubr.bf16.mxu1 %v9272_v1  ;;  %v9979_v27 = vpack.c.bf16 %v1499_v36, %v1499_v36  ;;  %v8596_v36 = vld [vmem:[#allocation11 + $0xae8] ss:$16 sps:$4 sm:$0xff]  }
 0x48b   :  { %3719 = vmatprep.subr.bf16.mxu1 %v8517_v28  ;;  %v8562_v28 = vld [vmem:[#allocation11 + $0xa2c] ss:$16 sps:$4 sm:$0xff]  }
 0x48c   :  { %4319 = vmatpush1.bf16.msra.mxu0 %v8512_v14  ;;  %v8557_v14 = vld [vmem:[#allocation11 + $0x800] ss:$16 sps:$4 sm:$0xff]  }
 0x48d   :  { %4320 = vmatprep.subr.bf16.mxu0 %v8520_v58  ;;  %v8565_v58 = vld [vmem:[#allocation11 + $0x824] ss:$16 sps:$4 sm:$0xff]  }
 0x48e   :  { %3720 = vmatpush1.bf16.msra.mxu1 %v8515_v31  ;;  %v8560_v31 = vld [vmem:[#allocation11 + $0xa28] ss:$16 sps:$4 sm:$0xff]  }
 0x48f   :  { %3721 = vmatprep.subr.bf16.mxu1 %v8523_v32  ;;  %v8568_v32 = vld [vmem:[#allocation11 + $0xa4c] ss:$16 sps:$4 sm:$0xff]  }
 0x490   :  { %4321 = vmatpush1.bf16.msra.mxu0 %v8518_v19  ;;  %v8563_v19 = vld [vmem:[#allocation11 + $0x820] ss:$16 sps:$4 sm:$0xff]  }
 0x491   :  { %4322 = vmatprep.subr.bf16.mxu0 %v8526_v34  ;;  %v8571_v34 = vld [vmem:[#allocation11 + $0x844] ss:$16 sps:$4 sm:$0xff]  }
 0x492   :  { %3722 = vmatpush1.bf16.msra.mxu1 %v8521_v25  ;;  %v8566_v25 = vld [vmem:[#allocation11 + $0xa48] ss:$16 sps:$4 sm:$0xff]  }
 0x493   :  { %3723 = vmatprep.subr.bf16.mxu1 %v8529_v37  ;;  %v8574_v37 = vld [vmem:[#allocation11 + $0xa6c] ss:$16 sps:$4 sm:$0xff]  }
 0x494   :  { %4323 = vmatpush1.bf16.msra.mxu0 %v8524_v38  ;;  %v8569_v38 = vld [vmem:[#allocation11 + $0x840] ss:$16 sps:$4 sm:$0xff]  }
 0x495   :  { %4324 = vmatprep.subr.bf16.mxu0 %v8532_v44  ;;  %v8577_v44 = vld [vmem:[#allocation11 + $0x864] ss:$16 sps:$4 sm:$0xff]  }
 0x496   :  { %3724 = vmatpush1.bf16.msra.mxu1 %v8527_v41  ;;  %v8572_v41 = vld [vmem:[#allocation11 + $0xa68] ss:$16 sps:$4 sm:$0xff]  }
 0x497   :  { %3725 = vmatprep.subr.bf16.mxu1 %v8535_v42  ;;  %v8575_v42 = vld [vmem:[#allocation11 + $0x860] ss:$16 sps:$4 sm:$0xff]  }
 0x498   :  { %4325 = vmatpush1.bf16.msra.mxu0 %v8530_v54  ;;  %v8583_v54 = vld [vmem:[#allocation11 + $0x884] ss:$16 sps:$4 sm:$0xff]  }
 0x499   :  { %4326 = vmatprep.subr.bf16.mxu0 %v8538_v61  ;;  %v8578_v61 = vld [vmem:[#allocation11 + $0xa88] ss:$16 sps:$4 sm:$0xff]  }
 0x49a   :  { %v2397_v53 = vpop.f32.mrb[76].mxu0  ;;  %3726 = vmatpush1.bf16.msra.mxu1 %v8533_v45  ;;  %v8586_v45 = vld [vmem:[#allocation11 + $0xaac] ss:$16 sps:$4 sm:$0xff]  }
 0x49b   :  { %v2399_v56 = vpop.f32.mrb[77].mxu0  ;;  %3727 = vmatprep.subr.bf16.mxu1 %v8541_v46  ;;  %v8581_v46 = vld [vmem:[#allocation11 + $0x880] ss:$16 sps:$4 sm:$0xff]  }
 0x49c   :  { %v1880_v4 = vpop.f32.mrb[76].mxu1  ;;  %v2401_v35 = vpop.f32.mrb[78].mxu0  ;;  %4327 = vmatpush1.bf16.msra.mxu0 %v8536_v47  ;;  %v8589_v47 = vld [vmem:[#allocation11 + $0x8a4] ss:$16 sps:$4 sm:$0xff]  }
 0x49d   :  { %v2123_v12 = vadd.f32 %v9953_v43, %v1880_v4  ;;  %v1882_v13 = vpop.f32.mrb[77].mxu1  ;;  %v2402_v3 = vpop.f32.mrb[79].mxu0  ;;  %4328 = vmatprep.subr.bf16.mxu0 %v8544_v49  ;;  %v8556_v43 = vld [vmem:[#allocation11 + $0xa0c] ss:$16 sps:$4 sm:$0xff]   ;;  %v8584_v49 = vld [vmem:[#allocation11 + $0xaa8] ss:$16 sps:$4 sm:$0xff]  }
 0x49e   :  { %v2125_v20 = vadd.f32 %v9955_v5, %v1882_v13  ;;  %v1884_v17 = vpop.f32.mrb[78].mxu1  ;;  %3728 = vmatpush1.bf16.msra.mxu1 %v8539_v55  ;;  %v8554_v5 = vld [vmem:[#allocation11 + $0xa08] ss:$16 sps:$4 sm:$0xff]   ;;  %v8595_v35 = vld [vmem:[#allocation11 + $0x8c4] ss:$16 sps:$4 sm:$0xff]   ;;  %v1460_v3 = vadd.f32 %v9959_v9, %v9894_v52 }
 0x49f   :  { %v1885_v21 = vpop.f32.mrb[79].mxu1  ;;  %3729 = vmatprep.subr.bf16.mxu1 %v8547_v59  ;;  %v9975_v22 = vadd.f32 %v2397_v53, %v2123_v12  ;;  %v8592_v53 = vld [vmem:[#allocation11 + $0xacc] ss:$16 sps:$4 sm:$0xff]   ;;  %v8590_v13 = vld [vmem:[#allocation11 + $0xac8] ss:$16 sps:$4 sm:$0xff]  }
 0x4a0   :  { %4329 = vmatpush1.bf16.msra.mxu0 %v8542_v7  ;;  %v9977_v10 = vadd.f32 %v2399_v56, %v2125_v20  ;;  %v8587_v56 = vld [vmem:[#allocation11 + $0x8a0] ss:$16 sps:$4 sm:$0xff]   ;;  %v8604_v52 = vld [vmem:[#allocation11 + $0xb0c] ss:$16 sps:$4 sm:$0xff]  }
 0x4a1   :  { %4330 = vmatprep.subr.bf16.mxu0 %v8550_v16 }
 0x4a2   :  { %3730 = vmatpush1.bf16.msra.mxu1 %v8545_v29  ;;  %v8598_v29 = vld [vmem:[#allocation11 + $0xaec] ss:$16 sps:$4 sm:$0xff]  }
 0x4a3   :  { %3731 = vmatprep.subr.bf16.mxu1 %v8553_v51 }
 0x4a4   :  { %4331 = vmatpush1.bf16.msra.mxu0 %v8548_v48 }
 0x4a5   :  { %4595 = vmatprep.subr.bf16.mxu0 %v8556_v43  ;;  %v1500_v43 = vmax.f32 %v1460_v3, 0.0  ;;  %v1463_v3 = vadd.f32 %v9959_v9, %v9898_v24  ;;  %v8652_v24 = vld [vmem:[#allocation11 + $0xc0c] ss:$16 sps:$4 sm:$0xff]  }
 0x4a6   :  { %3732 = vmatpush1.bf16.msra.mxu1 %v8551_v23  ;;  %v8607_v23 = vld [vmem:[#allocation11 + $0x904] ss:$16 sps:$4 sm:$0xff]  }
 0x4a7   :  { %4349 = vmatmul.mubr.bf16.vlgmr.msra.gmra.mrb[104].mxu0 %v9979_v27  ;;  %3996 = vmatprep.subr.bf16.mxu1 %v8559_v18  ;;  %v8602_v18 = vld [vmem:[#allocation11 + $0xb08] ss:$16 sps:$4 sm:$0xff]  }
 0x4a8   :  { %4596 = vmatpush1.bf16.msra.mxu0 %v8554_v5  ;;  %4627 = vmatprep.mubr.bf16.mxu0 %v9272_v1  ;;  %v9999_v5 = vpack.c.bf16 %v1500_v43, %v1500_v43  ;;  %v1501_v43 = vmax.f32 %v1463_v3, 0.0 }
 0x4a9   :  { %3750 = vmatmul.mubr.bf16.vlgmr.msra.gmra.mrb[104].mxu1 %v9947_v30  ;;  %4597 = vmatprep.subr.bf16.mxu0 %v8562_v28  ;;  %v8580_v30 = vld [vmem:[#allocation11 + $0xa8c] ss:$16 sps:$4 sm:$0xff]   ;;  %v8605_v28 = vld [vmem:[#allocation11 + $0x900] ss:$16 sps:$4 sm:$0xff]  }
 0x4aa   :  { %3997 = vmatpush1.bf16.msra.mxu1 %v8557_v14  ;;  %4028 = vmatprep.mubr.bf16.mxu1 %v9272_v1  ;;  %v8613_v14 = vld [vmem:[#allocation11 + $0x924] ss:$16 sps:$4 sm:$0xff]  }
 0x4ab   :  { %3998 = vmatprep.subr.bf16.mxu1 %v8565_v58  ;;  %v8608_v58 = vld [vmem:[#allocation11 + $0xb28] ss:$16 sps:$4 sm:$0xff]  }
 0x4ac   :  { %4598 = vmatpush1.bf16.msra.mxu0 %v8560_v31  ;;  %v8616_v31 = vld [vmem:[#allocation11 + $0xb4c] ss:$16 sps:$4 sm:$0xff]  }
 0x4ad   :  { %4599 = vmatprep.subr.bf16.mxu0 %v8568_v32  ;;  %v8611_v32 = vld [vmem:[#allocation11 + $0x920] ss:$16 sps:$4 sm:$0xff]  }
 0x4ae   :  { %3999 = vmatpush1.bf16.msra.mxu1 %v8563_v19  ;;  %v8619_v19 = vld [vmem:[#allocation11 + $0x944] ss:$16 sps:$4 sm:$0xff]  }
 0x4af   :  { %4000 = vmatprep.subr.bf16.mxu1 %v8571_v34  ;;  %v8614_v34 = vld [vmem:[#allocation11 + $0xb48] ss:$16 sps:$4 sm:$0xff]  }
 0x4b0   :  { %4600 = vmatpush1.bf16.msra.mxu0 %v8566_v25  ;;  %v8622_v25 = vld [vmem:[#allocation11 + $0xb6c] ss:$16 sps:$4 sm:$0xff]  }
 0x4b1   :  { %4601 = vmatprep.subr.bf16.mxu0 %v8574_v37  ;;  %v8617_v37 = vld [vmem:[#allocation11 + $0x940] ss:$16 sps:$4 sm:$0xff]  }
 0x4b2   :  { %4001 = vmatpush1.bf16.msra.mxu1 %v8569_v38  ;;  %v8625_v38 = vld [vmem:[#allocation11 + $0x964] ss:$16 sps:$4 sm:$0xff]  }
 0x4b3   :  { %4002 = vmatprep.subr.bf16.mxu1 %v8577_v44  ;;  %v8620_v44 = vld [vmem:[#allocation11 + $0xb68] ss:$16 sps:$4 sm:$0xff]  }
 0x4b4   :  { %4602 = vmatpush1.bf16.msra.mxu0 %v8572_v41  ;;  %v8623_v41 = vld [vmem:[#allocation11 + $0x960] ss:$16 sps:$4 sm:$0xff]  }
 0x4b5   :  { %4603 = vmatprep.subr.bf16.mxu0 %v8580_v30  ;;  %v8631_v30 = vld [vmem:[#allocation11 + $0x984] ss:$16 sps:$4 sm:$0xff]  }
 0x4b6   :  { %4003 = vmatpush1.bf16.msra.mxu1 %v8575_v42  ;;  %v8626_v42 = vld [vmem:[#allocation11 + $0xb88] ss:$16 sps:$4 sm:$0xff]  }
 0x4b7   :  { %4004 = vmatprep.subr.bf16.mxu1 %v8583_v54  ;;  %v8634_v54 = vld [vmem:[#allocation11 + $0xbac] ss:$16 sps:$4 sm:$0xff]  }
 0x4b8   :  { %4604 = vmatpush1.bf16.msra.mxu0 %v8578_v61  ;;  %v8629_v61 = vld [vmem:[#allocation11 + $0x980] ss:$16 sps:$4 sm:$0xff]  }
 0x4b9   :  { %4605 = vmatprep.subr.bf16.mxu0 %v8586_v45  ;;  %v8637_v45 = vld [vmem:[#allocation11 + $0x9a4] ss:$16 sps:$4 sm:$0xff]  }
 0x4ba   :  { %v2676_v55 = vpop.f32.mrb[80].mxu0  ;;  %4005 = vmatpush1.bf16.msra.mxu1 %v8581_v46  ;;  %v8632_v46 = vld [vmem:[#allocation11 + $0xba8] ss:$16 sps:$4 sm:$0xff]  }
 0x4bb   :  { %v9986_v59 = vadd.f32 %v2676_v55, %v9975_v22  ;;  %v2678_v4 = vpop.f32.mrb[81].mxu0  ;;  %4006 = vmatprep.subr.bf16.mxu1 %v8589_v47  ;;  %v8593_v22 = vld [vmem:[#allocation11 + $0x8c0] ss:$16 sps:$4 sm:$0xff]   ;;  %v8640_v47 = vld [vmem:[#allocation11 + $0xbcc] ss:$16 sps:$4 sm:$0xff]  }
 0x4bc   :  { %v9989_v7 = vadd.f32 %v2678_v4, %v9977_v10  ;;  %v2081_v8 = vpop.f32.mrb[80].mxu1  ;;  %v2680_v12 = vpop.f32.mrb[82].mxu0  ;;  %4606 = vmatpush1.bf16.msra.mxu0 %v8584_v49  ;;  %v8601_v10 = vld [vmem:[#allocation11 + $0x8e4] ss:$16 sps:$4 sm:$0xff]  }
 0x4bd   :  { %v9994_v16 = vadd.f32 %v2081_v8, %v9957_v6  ;;  %v2083_v20 = vpop.f32.mrb[81].mxu1  ;;  %v2681_v17 = vpop.f32.mrb[83].mxu0  ;;  %4607 = vmatprep.subr.bf16.mxu0 %v8592_v53  ;;  %v8599_v6 = vld [vmem:[#allocation11 + $0x8e0] ss:$16 sps:$4 sm:$0xff]   ;;  %v8643_v4 = vld [vmem:[#allocation11 + $0x9c4] ss:$16 sps:$4 sm:$0xff]  }
 0x4be   :  { %v9997_v21 = vadd.f32 %v2083_v20, %v9963_v39  ;;  %v2085_v51 = vpop.f32.mrb[82].mxu1  ;;  %4007 = vmatpush1.bf16.msra.mxu1 %v8587_v56  ;;  %v8610_v39 = vld [vmem:[#allocation11 + $0xb2c] ss:$16 sps:$4 sm:$0xff]   ;;  %v8635_v53 = vld [vmem:[#allocation11 + $0x9a0] ss:$16 sps:$4 sm:$0xff]  }
 0x4bf   :  { %v2086_v48 = vpop.f32.mrb[83].mxu1  ;;  %4008 = vmatprep.subr.bf16.mxu1 %v8595_v35 }
 0x4c0   :  { %4608 = vmatpush1.bf16.msra.mxu0 %v8590_v13  ;;  %v8638_v13 = vld [vmem:[#allocation11 + $0xbc8] ss:$16 sps:$4 sm:$0xff]  }
 0x4c1   :  { %4609 = vmatprep.subr.bf16.mxu0 %v8598_v29 }
 0x4c2   :  { %4009 = vmatpush1.bf16.msra.mxu1 %v8593_v22 }
 0x4c3   :  { %4010 = vmatprep.subr.bf16.mxu1 %v8601_v10  ;;  %v8649_v10 = vld [vmem:[#allocation11 + $0x9e4] ss:$16 sps:$4 sm:$0xff]  }
 0x4c4   :  { %4610 = vmatpush1.bf16.msra.mxu0 %v8596_v36  ;;  %v8644_v36 = vld [vmem:[#allocation11 + $0xbe8] ss:$16 sps:$4 sm:$0xff]  }
 0x4c5   :  { %4874 = vmatprep.subr.bf16.mxu0 %v8604_v52  ;;  %v8655_v52 = vld [vmem:[#allocation11 + $0xa04] ss:$16 sps:$4 sm:$0xff]  }
 0x4c6   :  { %4011 = vmatpush1.bf16.msra.mxu1 %v8599_v6  ;;  %v8650_v6 = vld [vmem:[#allocation11 + $0xc08] ss:$16 sps:$4 sm:$0xff]  }
 0x4c7   :  { %4628 = vmatmul.mubr.bf16.vlgmr.msra.gmra.mrb[108].mxu0 %v9999_v5  ;;  %4275 = vmatprep.subr.bf16.mxu1 %v8607_v23  ;;  %v10019_v23 = vpack.c.bf16 %v1501_v43, %v1501_v43  ;;  %v8703_v43 = vld [vmem:[#allocation11 + $0xb04] ss:$16 sps:$4 sm:$0xff]  }
 0x4c8   :  { %4875 = vmatpush1.bf16.msra.mxu0 %v8602_v18  ;;  %4906 = vmatprep.mubr.bf16.mxu0 %v9272_v1  ;;  %v8653_v18 = vld [vmem:[#allocation11 + $0xa00] ss:$16 sps:$4 sm:$0xff]  }
 0x4c9   :  { %4029 = vmatmul.mubr.bf16.vlgmr.msra.gmra.mrb[108].mxu1 %v9965_v26  ;;  %4876 = vmatprep.subr.bf16.mxu0 %v8610_v39  ;;  %v8628_v26 = vld [vmem:[#allocation11 + $0xb8c] ss:$16 sps:$4 sm:$0xff]   ;;  %v8661_v39 = vld [vmem:[#allocation11 + $0xa24] ss:$16 sps:$4 sm:$0xff]  }
 0x4ca   :  { %4276 = vmatpush1.bf16.msra.mxu1 %v8605_v28  ;;  %4307 = vmatprep.mubr.bf16.mxu1 %v9272_v1  ;;  %v8656_v28 = vld [vmem:[#allocation11 + $0xc28] ss:$16 sps:$4 sm:$0xff]  }
 0x4cb   :  { %4277 = vmatprep.subr.bf16.mxu1 %v8613_v14  ;;  %v8664_v14 = vld [vmem:[#allocation11 + $0xc4c] ss:$16 sps:$4 sm:$0xff]  }
 0x4cc   :  { %4877 = vmatpush1.bf16.msra.mxu0 %v8608_v58  ;;  %v8659_v58 = vld [vmem:[#allocation11 + $0xa20] ss:$16 sps:$4 sm:$0xff]  }
 0x4cd   :  { %4878 = vmatprep.subr.bf16.mxu0 %v8616_v31  ;;  %v8667_v31 = vld [vmem:[#allocation11 + $0xa44] ss:$16 sps:$4 sm:$0xff]  }
 0x4ce   :  { %4278 = vmatpush1.bf16.msra.mxu1 %v8611_v32  ;;  %v8662_v32 = vld [vmem:[#allocation11 + $0xc48] ss:$16 sps:$4 sm:$0xff]  }
 0x4cf   :  { %4279 = vmatprep.subr.bf16.mxu1 %v8619_v19  ;;  %v8670_v19 = vld [vmem:[#allocation11 + $0xc6c] ss:$16 sps:$4 sm:$0xff]  }
 0x4d0   :  { %4879 = vmatpush1.bf16.msra.mxu0 %v8614_v34  ;;  %v8665_v34 = vld [vmem:[#allocation11 + $0xa40] ss:$16 sps:$4 sm:$0xff]  }
 0x4d1   :  { %4880 = vmatprep.subr.bf16.mxu0 %v8622_v25  ;;  %v8673_v25 = vld [vmem:[#allocation11 + $0xa64] ss:$16 sps:$4 sm:$0xff]  }
 0x4d2   :  { %4280 = vmatpush1.bf16.msra.mxu1 %v8617_v37  ;;  %v8668_v37 = vld [vmem:[#allocation11 + $0xc68] ss:$16 sps:$4 sm:$0xff]  }
 0x4d3   :  { %4281 = vmatprep.subr.bf16.mxu1 %v8625_v38  ;;  %v8671_v38 = vld [vmem:[#allocation11 + $0xa60] ss:$16 sps:$4 sm:$0xff]  }
 0x4d4   :  { %4881 = vmatpush1.bf16.msra.mxu0 %v8620_v44  ;;  %v8679_v44 = vld [vmem:[#allocation11 + $0xa84] ss:$16 sps:$4 sm:$0xff]  }
 0x4d5   :  { %4882 = vmatprep.subr.bf16.mxu0 %v8628_v26  ;;  %v8674_v26 = vld [vmem:[#allocation11 + $0xc88] ss:$16 sps:$4 sm:$0xff]  }
 0x4d6   :  { %4282 = vmatpush1.bf16.msra.mxu1 %v8623_v41  ;;  %v8682_v41 = vld [vmem:[#allocation11 + $0xcac] ss:$16 sps:$4 sm:$0xff]  }
 0x4d7   :  { %4283 = vmatprep.subr.bf16.mxu1 %v8631_v30  ;;  %v8677_v30 = vld [vmem:[#allocation11 + $0xa80] ss:$16 sps:$4 sm:$0xff]  }
 0x4d8   :  { %4883 = vmatpush1.bf16.msra.mxu0 %v8626_v42  ;;  %v8685_v42 = vld [vmem:[#allocation11 + $0xaa4] ss:$16 sps:$4 sm:$0xff]  }
 0x4d9   :  { %4884 = vmatprep.subr.bf16.mxu0 %v8634_v54  ;;  %v8680_v54 = vld [vmem:[#allocation11 + $0xca8] ss:$16 sps:$4 sm:$0xff]  }
 0x4da   :  { %v2955_v49 = vpop.f32.mrb[84].mxu0  ;;  %4284 = vmatpush1.bf16.msra.mxu1 %v8629_v61  ;;  %v8688_v61 = vld [vmem:[#allocation11 + $0xccc] ss:$16 sps:$4 sm:$0xff]  }
 0x4db   :  { %v10006_v55 = vadd.f32 %v2955_v49, %v9986_v59  ;;  %v2957_v56 = vpop.f32.mrb[85].mxu0  ;;  %4285 = vmatprep.subr.bf16.mxu1 %v8637_v45  ;;  %v8646_v59 = vld [vmem:[#allocation11 + $0xbec] ss:$16 sps:$4 sm:$0xff]  }
 0x4dc   :  { %v10009_v35 = vadd.f32 %v2957_v56, %v9989_v7  ;;  %v2356_v8 = vpop.f32.mrb[84].mxu1  ;;  %v2959_v12 = vpop.f32.mrb[86].mxu0  ;;  %4885 = vmatpush1.bf16.msra.mxu0 %v8632_v46  ;;  %v8641_v7 = vld [vmem:[#allocation11 + $0x9c0] ss:$16 sps:$4 sm:$0xff]  }
 0x4dd   :  { %v10014_v20 = vadd.f32 %v2356_v8, %v9994_v16  ;;  %v2358_v17 = vpop.f32.mrb[85].mxu1  ;;  %v2960_v29 = vpop.f32.mrb[87].mxu0  ;;  %4886 = vmatprep.subr.bf16.mxu0 %v8640_v47  ;;  %v8647_v16 = vld [vmem:[#allocation11 + $0x9e0] ss:$16 sps:$4 sm:$0xff]   ;;  %v8686_v12 = vld [vmem:[#allocation11 + $0xcc8] ss:$16 sps:$4 sm:$0xff]  }
 0x4de   :  { %v10017_v51 = vadd.f32 %v2358_v17, %v9997_v21  ;;  %v2360_v22 = vpop.f32.mrb[86].mxu1  ;;  %4286 = vmatpush1.bf16.msra.mxu1 %v8635_v53  ;;  %v8658_v21 = vld [vmem:[#allocation11 + $0xc2c] ss:$16 sps:$4 sm:$0xff]   ;;  %v8683_v46 = vld [vmem:[#allocation11 + $0xaa0] ss:$16 sps:$4 sm:$0xff]  }
 0x4df   :  { %v2361_v48 = vpop.f32.mrb[87].mxu1  ;;  %4287 = vmatprep.subr.bf16.mxu1 %v8643_v4  ;;  %v8691_v53 = vld [vmem:[#allocation11 + $0xac4] ss:$16 sps:$4 sm:$0xff]  }
 0x4e0   :  { %4887 = vmatpush1.bf16.msra.mxu0 %v8638_v13  ;;  %v1468_v13 = vadd.f32 %v9959_v9, %v9901_v33  ;;  %v8697_v48 = vld [vmem:[#allocation11 + $0xae4] ss:$16 sps:$4 sm:$0xff]   ;;  %v8700_v33 = vld [vmem:[#allocation11 + $0xd0c] ss:$16 sps:$4 sm:$0xff]  }
 0x4e1   :  { %4888 = vmatprep.subr.bf16.mxu0 %v8646_v59 }
 0x4e2   :  { %4288 = vmatpush1.bf16.msra.mxu1 %v8641_v7 }
 0x4e3   :  { %4289 = vmatprep.subr.bf16.mxu1 %v8649_v10  ;;  %v8692_v10 = vld [vmem:[#allocation11 + $0xce8] ss:$16 sps:$4 sm:$0xff]  }
 0x4e4   :  { %4889 = vmatpush1.bf16.msra.mxu0 %v8644_v36  ;;  %v1502_v36 = vmax.f32 %v1468_v13, 0.0 }
 0x4e5   :  { %5153 = vmatprep.subr.bf16.mxu0 %v8652_v24  ;;  %v8698_v24 = vld [vmem:[#allocation11 + $0xd08] ss:$16 sps:$4 sm:$0xff]  }
 0x4e6   :  { %4290 = vmatpush1.bf16.msra.mxu1 %v8647_v16  ;;  %v10039_v16 = vpack.c.bf16 %v1502_v36, %v1502_v36  ;;  %v8746_v36 = vld [vmem:[#allocation11 + $0xe08] ss:$16 sps:$4 sm:$0xff]  }
 0x4e7   :  { %4907 = vmatmul.mubr.bf16.vlgmr.msra.gmra.mrb[112].mxu0 %v10019_v23  ;;  %4554 = vmatprep.subr.bf16.mxu1 %v8655_v52  ;;  %v8701_v52 = vld [vmem:[#allocation11 + $0xb00] ss:$16 sps:$4 sm:$0xff]  }
 0x4e8   :  { %5154 = vmatpush1.bf16.msra.mxu0 %v8650_v6  ;;  %5185 = vmatprep.mubr.bf16.mxu0 %v9272_v1  ;;  %v8709_v6 = vld [vmem:[#allocation11 + $0xb24] ss:$16 sps:$4 sm:$0xff]  }
 0x4e9   :  { %4308 = vmatmul.mubr.bf16.vlgmr.msra.gmra.mrb[112].mxu1 %v9979_v27  ;;  %5155 = vmatprep.subr.bf16.mxu0 %v8658_v21  ;;  %v8676_v27 = vld [vmem:[#allocation11 + $0xc8c] ss:$16 sps:$4 sm:$0xff]   ;;  %v8704_v21 = vld [vmem:[#allocation11 + $0xd28] ss:$16 sps:$4 sm:$0xff]  }
 0x4ea   :  { %4555 = vmatpush1.bf16.msra.mxu1 %v8653_v18  ;;  %4586 = vmatprep.mubr.bf16.mxu1 %v9272_v1  ;;  %v8712_v18 = vld [vmem:[#allocation11 + $0xd4c] ss:$16 sps:$4 sm:$0xff]  }
 0x4eb   :  { %4556 = vmatprep.subr.bf16.mxu1 %v8661_v39  ;;  %v8707_v39 = vld [vmem:[#allocation11 + $0xb20] ss:$16 sps:$4 sm:$0xff]  }
 0x4ec   :  { %5156 = vmatpush1.bf16.msra.mxu0 %v8656_v28  ;;  %v8715_v28 = vld [vmem:[#allocation11 + $0xb44] ss:$16 sps:$4 sm:$0xff]  }
 0x4ed   :  { %5157 = vmatprep.subr.bf16.mxu0 %v8664_v14  ;;  %v8710_v14 = vld [vmem:[#allocation11 + $0xd48] ss:$16 sps:$4 sm:$0xff]  }
 0x4ee   :  { %4557 = vmatpush1.bf16.msra.mxu1 %v8659_v58  ;;  %v8718_v58 = vld [vmem:[#allocation11 + $0xd6c] ss:$16 sps:$4 sm:$0xff]  }
 0x4ef   :  { %4558 = vmatprep.subr.bf16.mxu1 %v8667_v31  ;;  %v8713_v31 = vld [vmem:[#allocation11 + $0xb40] ss:$16 sps:$4 sm:$0xff]  }
 0x4f0   :  { %5158 = vmatpush1.bf16.msra.mxu0 %v8662_v32  ;;  %v8721_v32 = vld [vmem:[#allocation11 + $0xb64] ss:$16 sps:$4 sm:$0xff]  }
 0x4f1   :  { %5159 = vmatprep.subr.bf16.mxu0 %v8670_v19  ;;  %v8716_v19 = vld [vmem:[#allocation11 + $0xd68] ss:$16 sps:$4 sm:$0xff]  }
 0x4f2   :  { %4559 = vmatpush1.bf16.msra.mxu1 %v8665_v34  ;;  %v8719_v34 = vld [vmem:[#allocation11 + $0xb60] ss:$16 sps:$4 sm:$0xff]  }
 0x4f3   :  { %4560 = vmatprep.subr.bf16.mxu1 %v8673_v25  ;;  %v8727_v25 = vld [vmem:[#allocation11 + $0xb84] ss:$16 sps:$4 sm:$0xff]  }
 0x4f4   :  { %5160 = vmatpush1.bf16.msra.mxu0 %v8668_v37  ;;  %v8722_v37 = vld [vmem:[#allocation11 + $0xd88] ss:$16 sps:$4 sm:$0xff]  }
 0x4f5   :  { %5161 = vmatprep.subr.bf16.mxu0 %v8676_v27  ;;  %v8730_v27 = vld [vmem:[#allocation11 + $0xdac] ss:$16 sps:$4 sm:$0xff]  }
 0x4f6   :  { %4561 = vmatpush1.bf16.msra.mxu1 %v8671_v38  ;;  %v8725_v38 = vld [vmem:[#allocation11 + $0xb80] ss:$16 sps:$4 sm:$0xff]  }
 0x4f7   :  { %4562 = vmatprep.subr.bf16.mxu1 %v8679_v44  ;;  %v8733_v44 = vld [vmem:[#allocation11 + $0xba4] ss:$16 sps:$4 sm:$0xff]  }
 0x4f8   :  { %5162 = vmatpush1.bf16.msra.mxu0 %v8674_v26  ;;  %v8728_v26 = vld [vmem:[#allocation11 + $0xda8] ss:$16 sps:$4 sm:$0xff]  }
 0x4f9   :  { %5163 = vmatprep.subr.bf16.mxu0 %v8682_v41  ;;  %v8736_v41 = vld [vmem:[#allocation11 + $0xdcc] ss:$16 sps:$4 sm:$0xff]  }
 0x4fa   :  { %v3234_v45 = vpop.f32.mrb[88].mxu0  ;;  %4563 = vmatpush1.bf16.msra.mxu1 %v8677_v30 }
 0x4fb   :  { %v10026_v47 = vadd.f32 %v3234_v45, %v10006_v55  ;;  %v3236_v49 = vpop.f32.mrb[89].mxu0  ;;  %4564 = vmatprep.subr.bf16.mxu1 %v8685_v42  ;;  %v8694_v55 = vld [vmem:[#allocation11 + $0xcec] ss:$16 sps:$4 sm:$0xff]   ;;  %v8731_v42 = vld [vmem:[#allocation11 + $0xba0] ss:$16 sps:$4 sm:$0xff]  }
 0x4fc   :  { %v10029_v56 = vadd.f32 %v3236_v49, %v10009_v35  ;;  %v2635_v4 = vpop.f32.mrb[88].mxu1  ;;  %v3238_v8 = vpop.f32.mrb[90].mxu0  ;;  %5164 = vmatpush1.bf16.msra.mxu0 %v8680_v54  ;;  %v8689_v35 = vld [vmem:[#allocation11 + $0xac0] ss:$16 sps:$4 sm:$0xff]   ;;  %v8739_v45 = vld [vmem:[#allocation11 + $0xbc4] ss:$16 sps:$4 sm:$0xff]  }
 0x4fd   :  { %v10034_v3 = vadd.f32 %v2635_v4, %v10014_v20  ;;  %v2637_v17 = vpop.f32.mrb[89].mxu1  ;;  %v3239_v29 = vpop.f32.mrb[91].mxu0  ;;  %5165 = vmatprep.subr.bf16.mxu0 %v8688_v61  ;;  %v8695_v20 = vld [vmem:[#allocation11 + $0xae0] ss:$16 sps:$4 sm:$0xff]   ;;  %v8734_v4 = vld [vmem:[#allocation11 + $0xdc8] ss:$16 sps:$4 sm:$0xff]   ;;  %v1471_v8 = vadd.f32 %v9959_v9, %v9903_v40 }
 0x4fe   :  { %v10037_v59 = vadd.f32 %v2637_v17, %v10017_v51  ;;  %v2639_v22 = vpop.f32.mrb[90].mxu1  ;;  %4565 = vmatpush1.bf16.msra.mxu1 %v8683_v46  ;;  %v8706_v51 = vld [vmem:[#allocation11 + $0xd2c] ss:$16 sps:$4 sm:$0xff]  }
 0x4ff   :  { %v2640_v7 = vpop.f32.mrb[91].mxu1  ;;  %4566 = vmatprep.subr.bf16.mxu1 %v8691_v53  ;;  %v8748_v40 = vld [vmem:[#allocation11 + $0xe0c] ss:$16 sps:$4 sm:$0xff]  }
 0x500   :  { %5166 = vmatpush1.bf16.msra.mxu0 %v8686_v12  ;;  %v8740_v7 = vld [vmem:[#allocation11 + $0xde8] ss:$16 sps:$4 sm:$0xff]  }
 0x501   :  { %5167 = vmatprep.subr.bf16.mxu0 %v8694_v55 }
 0x502   :  { %4567 = vmatpush1.bf16.msra.mxu1 %v8689_v35  ;;  %v8745_v35 = vld [vmem:[#allocation11 + $0xbe4] ss:$16 sps:$4 sm:$0xff]  }
 0x503   :  { %4568 = vmatprep.subr.bf16.mxu1 %v8697_v48  ;;  %v1503_v48 = vmax.f32 %v1471_v8, 0.0 }
 0x504   :  { %5168 = vmatpush1.bf16.msra.mxu0 %v8692_v10  ;;  %v8751_v10 = vld [vmem:[#allocation11 + $0xc04] ss:$16 sps:$4 sm:$0xff]  }
 0x505   :  { %5432 = vmatprep.subr.bf16.mxu0 %v8700_v33  ;;  %v10059_v33 = vpack.c.bf16 %v1503_v48, %v1503_v48  ;;  %v8797_v48 = vld [vmem:[#allocation11 + $0xd00] ss:$16 sps:$4 sm:$0xff]  }
 0x506   :  { %4569 = vmatpush1.bf16.msra.mxu1 %v8695_v20  ;;  %v8749_v20 = vld [vmem:[#allocation11 + $0xc00] ss:$16 sps:$4 sm:$0xff]  }
 0x507   :  { %5186 = vmatmul.mubr.bf16.vlgmr.msra.gmra.mrb[116].mxu0 %v10039_v16  ;;  %4833 = vmatprep.subr.bf16.mxu1 %v8703_v43  ;;  %v8757_v43 = vld [vmem:[#allocation11 + $0xc24] ss:$16 sps:$4 sm:$0xff]  }
 0x508   :  { %5433 = vmatpush1.bf16.msra.mxu0 %v8698_v24  ;;  %5464 = vmatprep.mubr.bf16.mxu0 %v9272_v1  ;;  %v8752_v24 = vld [vmem:[#allocation11 + $0xe28] ss:$16 sps:$4 sm:$0xff]  }
 0x509   :  { %4587 = vmatmul.mubr.bf16.vlgmr.msra.gmra.mrb[116].mxu1 %v9999_v5  ;;  %5434 = vmatprep.subr.bf16.mxu0 %v8706_v51  ;;  %v8724_v5 = vld [vmem:[#allocation11 + $0xd8c] ss:$16 sps:$4 sm:$0xff]  }
 0x50a   :  { %4834 = vmatpush1.bf16.msra.mxu1 %v8701_v52  ;;  %4865 = vmatprep.mubr.bf16.mxu1 %v9272_v1  ;;  %v8760_v51 = vld [vmem:[#allocation11 + $0xe4c] ss:$16 sps:$4 sm:$0xff]   ;;  %v8755_v52 = vld [vmem:[#allocation11 + $0xc20] ss:$16 sps:$4 sm:$0xff]  }
 0x50b   :  { %4835 = vmatprep.subr.bf16.mxu1 %v8709_v6  ;;  %v8763_v6 = vld [vmem:[#allocation11 + $0xc44] ss:$16 sps:$4 sm:$0xff]  }
 0x50c   :  { %5435 = vmatpush1.bf16.msra.mxu0 %v8704_v21  ;;  %v8758_v21 = vld [vmem:[#allocation11 + $0xe48] ss:$16 sps:$4 sm:$0xff]  }
 0x50d   :  { %5436 = vmatprep.subr.bf16.mxu0 %v8712_v18  ;;  %v8766_v18 = vld [vmem:[#allocation11 + $0xe6c] ss:$16 sps:$4 sm:$0xff]  }
 0x50e   :  { %4836 = vmatpush1.bf16.msra.mxu1 %v8707_v39  ;;  %v8761_v39 = vld [vmem:[#allocation11 + $0xc40] ss:$16 sps:$4 sm:$0xff]  }
 0x50f   :  { %4837 = vmatprep.subr.bf16.mxu1 %v8715_v28  ;;  %v8769_v28 = vld [vmem:[#allocation11 + $0xc64] ss:$16 sps:$4 sm:$0xff]  }
 0x510   :  { %5437 = vmatpush1.bf16.msra.mxu0 %v8710_v14  ;;  %v8764_v14 = vld [vmem:[#allocation11 + $0xe68] ss:$16 sps:$4 sm:$0xff]  }
 0x511   :  { %5438 = vmatprep.subr.bf16.mxu0 %v8718_v58  ;;  %v8767_v58 = vld [vmem:[#allocation11 + $0xc60] ss:$16 sps:$4 sm:$0xff]  }
 0x512   :  { %4838 = vmatpush1.bf16.msra.mxu1 %v8713_v31  ;;  %v8775_v31 = vld [vmem:[#allocation11 + $0xc84] ss:$16 sps:$4 sm:$0xff]  }
 0x513   :  { %4839 = vmatprep.subr.bf16.mxu1 %v8721_v32  ;;  %v8770_v32 = vld [vmem:[#allocation11 + $0xe88] ss:$16 sps:$4 sm:$0xff]  }
 0x514   :  { %5439 = vmatpush1.bf16.msra.mxu0 %v8716_v19  ;;  %v8778_v19 = vld [vmem:[#allocation11 + $0xeac] ss:$16 sps:$4 sm:$0xff]  }
 0x515   :  { %5440 = vmatprep.subr.bf16.mxu0 %v8724_v5  ;;  %v8773_v5 = vld [vmem:[#allocation11 + $0xc80] ss:$16 sps:$4 sm:$0xff]  }
 0x516   :  { %4840 = vmatpush1.bf16.msra.mxu1 %v8719_v34  ;;  %v8781_v34 = vld [vmem:[#allocation11 + $0xca4] ss:$16 sps:$4 sm:$0xff]  }
 0x517   :  { %4841 = vmatprep.subr.bf16.mxu1 %v8727_v25  ;;  %v8776_v25 = vld [vmem:[#allocation11 + $0xea8] ss:$16 sps:$4 sm:$0xff]  }
 0x518   :  { %5441 = vmatpush1.bf16.msra.mxu0 %v8722_v37  ;;  %v8784_v37 = vld [vmem:[#allocation11 + $0xecc] ss:$16 sps:$4 sm:$0xff]  }
 0x519   :  { %5442 = vmatprep.subr.bf16.mxu0 %v8730_v27 }
 0x51a   :  { %v3513_v30 = vpop.f32.mrb[92].mxu0  ;;  %4842 = vmatpush1.bf16.msra.mxu1 %v8725_v38  ;;  %v8779_v38 = vld [vmem:[#allocation11 + $0xca0] ss:$16 sps:$4 sm:$0xff]  }
 0x51b   :  { %v10046_v54 = vadd.f32 %v3513_v30, %v10026_v47  ;;  %v3515_v61 = vpop.f32.mrb[93].mxu0  ;;  %4843 = vmatprep.subr.bf16.mxu1 %v8733_v44  ;;  %v8742_v47 = vld [vmem:[#allocation11 + $0xdec] ss:$16 sps:$4 sm:$0xff]  }
 0x51c   :  { %v10049_v46 = vadd.f32 %v3515_v61, %v10029_v56  ;;  %v2914_v49 = vpop.f32.mrb[92].mxu1  ;;  %v3517_v53 = vpop.f32.mrb[94].mxu0  ;;  %5443 = vmatpush1.bf16.msra.mxu0 %v8728_v26  ;;  %v8737_v56 = vld [vmem:[#allocation11 + $0xbc0] ss:$16 sps:$4 sm:$0xff]  }
 0x51d   :  { %v10054_v12 = vadd.f32 %v2914_v49, %v10034_v3  ;;  %v2916_v13 = vpop.f32.mrb[93].mxu1  ;;  %v3518_v17 = vpop.f32.mrb[95].mxu0  ;;  %5444 = vmatprep.subr.bf16.mxu0 %v8736_v41  ;;  %v8743_v3 = vld [vmem:[#allocation11 + $0xbe0] ss:$16 sps:$4 sm:$0xff]   ;;  %v8787_v41 = vld [vmem:[#allocation11 + $0xcc4] ss:$16 sps:$4 sm:$0xff]   ;;  %v1476_v49 = vadd.f32 %v9959_v9, %v9905_v50 }
 0x51e   :  { %v10057_v29 = vadd.f32 %v2916_v13, %v10037_v59  ;;  %v2918_v55 = vpop.f32.mrb[94].mxu1  ;;  %4844 = vmatpush1.bf16.msra.mxu1 %v8731_v42  ;;  %v8754_v59 = vld [vmem:[#allocation11 + $0xe2c] ss:$16 sps:$4 sm:$0xff]   ;;  %v8791_v9 = vld [vmem:[#allocation11 + $0xce0] ss:$16 sps:$4 sm:$0xff]  }
 0x51f   :  { %v2919_v22 = vpop.f32.mrb[95].mxu1  ;;  %4845 = vmatprep.subr.bf16.mxu1 %v8739_v45  ;;  %v8782_v45 = vld [vmem:[#allocation11 + $0xec8] ss:$16 sps:$4 sm:$0xff]   ;;  %v8793_v55 = vld [vmem:[#allocation11 + $0xce4] ss:$16 sps:$4 sm:$0xff]  }
 0x520   :  { %5445 = vmatpush1.bf16.msra.mxu0 %v8734_v4  ;;  %v1504_v22 = vmax.f32 %v1476_v49, 0.0  ;;  %v8796_v50 = vld [vmem:[#allocation11 + $0xf0c] ss:$16 sps:$4 sm:$0xff]  }
 0x521   :  { %5446 = vmatprep.subr.bf16.mxu0 %v8742_v47 }
 0x522   :  { %4846 = vmatpush1.bf16.msra.mxu1 %v8737_v56  ;;  %v8788_v56 = vld [vmem:[#allocation11 + $0xee8] ss:$16 sps:$4 sm:$0xff]  }
 0x523   :  { %4847 = vmatprep.subr.bf16.mxu1 %v8745_v35  ;;  %v8794_v35 = vld [vmem:[#allocation11 + $0xf08] ss:$16 sps:$4 sm:$0xff]  }
 0x524   :  { %5447 = vmatpush1.bf16.msra.mxu0 %v8740_v7  ;;  %v10079_v7 = vpack.c.bf16 %v1504_v22, %v1504_v22  ;;  %v8845_v22 = vld [vmem:[#allocation11 + $0xe00] ss:$16 sps:$4 sm:$0xff]  }
 0x525   :  { %5711 = vmatprep.subr.bf16.mxu0 %v8748_v40  ;;  %v8805_v40 = vld [vmem:[#allocation11 + $0xd24] ss:$16 sps:$4 sm:$0xff]  }
 0x526   :  { %4848 = vmatpush1.bf16.msra.mxu1 %v8743_v3  ;;  %v8800_v3 = vld [vmem:[#allocation11 + $0xf28] ss:$16 sps:$4 sm:$0xff]  }
 0x527   :  { %5465 = vmatmul.mubr.bf16.vlgmr.msra.gmra.mrb[120].mxu0 %v10059_v33  ;;  %5112 = vmatprep.subr.bf16.mxu1 %v8751_v10  ;;  %v8808_v10 = vld [vmem:[#allocation11 + $0xf4c] ss:$16 sps:$4 sm:$0xff]  }
 0x528   :  { %5712 = vmatpush1.bf16.msra.mxu0 %v8746_v36  ;;  %5743 = vmatprep.mubr.bf16.mxu0 %v9272_v1  ;;  %v8803_v36 = vld [vmem:[#allocation11 + $0xd20] ss:$16 sps:$4 sm:$0xff]  }
 0x529   :  { %4866 = vmatmul.mubr.bf16.vlgmr.msra.gmra.mrb[120].mxu1 %v10019_v23  ;;  %5713 = vmatprep.subr.bf16.mxu0 %v8754_v59  ;;  %v8772_v23 = vld [vmem:[#allocation11 + $0xe8c] ss:$16 sps:$4 sm:$0xff]   ;;  %v8811_v59 = vld [vmem:[#allocation11 + $0xd44] ss:$16 sps:$4 sm:$0xff]  }
 0x52a   :  { %5113 = vmatpush1.bf16.msra.mxu1 %v8749_v20  ;;  %5144 = vmatprep.mubr.bf16.mxu1 %v9272_v1  ;;  %v8806_v20 = vld [vmem:[#allocation11 + $0xf48] ss:$16 sps:$4 sm:$0xff]  }
 0x52b   :  { %5114 = vmatprep.subr.bf16.mxu1 %v8757_v43  ;;  %v8814_v43 = vld [vmem:[#allocation11 + $0xf6c] ss:$16 sps:$4 sm:$0xff]  }
 0x52c   :  { %5714 = vmatpush1.bf16.msra.mxu0 %v8752_v24  ;;  %v8809_v24 = vld [vmem:[#allocation11 + $0xd40] ss:$16 sps:$4 sm:$0xff]  }
 0x52d   :  { %5715 = vmatprep.subr.bf16.mxu0 %v8760_v51  ;;  %v8817_v51 = vld [vmem:[#allocation11 + $0xd64] ss:$16 sps:$4 sm:$0xff]  }
 0x52e   :  { %5115 = vmatpush1.bf16.msra.mxu1 %v8755_v52  ;;  %v8812_v52 = vld [vmem:[#allocation11 + $0xf68] ss:$16 sps:$4 sm:$0xff]  }
 0x52f   :  { %5116 = vmatprep.subr.bf16.mxu1 %v8763_v6  ;;  %v8815_v6 = vld [vmem:[#allocation11 + $0xd60] ss:$16 sps:$4 sm:$0xff]  }
 0x530   :  { %5716 = vmatpush1.bf16.msra.mxu0 %v8758_v21  ;;  %v8823_v21 = vld [vmem:[#allocation11 + $0xd84] ss:$16 sps:$4 sm:$0xff]  }
 0x531   :  { %5717 = vmatprep.subr.bf16.mxu0 %v8766_v18  ;;  %v8818_v18 = vld [vmem:[#allocation11 + $0xf88] ss:$16 sps:$4 sm:$0xff]  }
 0x532   :  { %5117 = vmatpush1.bf16.msra.mxu1 %v8761_v39  ;;  %v8826_v39 = vld [vmem:[#allocation11 + $0xfac] ss:$16 sps:$4 sm:$0xff]  }
 0x533   :  { %5118 = vmatprep.subr.bf16.mxu1 %v8769_v28  ;;  %v8821_v28 = vld [vmem:[#allocation11 + $0xd80] ss:$16 sps:$4 sm:$0xff]  }
 0x534   :  { %5718 = vmatpush1.bf16.msra.mxu0 %v8764_v14  ;;  %v8829_v14 = vld [vmem:[#allocation11 + $0xda4] ss:$16 sps:$4 sm:$0xff]  }
 0x535   :  { %5719 = vmatprep.subr.bf16.mxu0 %v8772_v23  ;;  %v8824_v23 = vld [vmem:[#allocation11 + $0xfa8] ss:$16 sps:$4 sm:$0xff]  }
 0x536   :  { %5119 = vmatpush1.bf16.msra.mxu1 %v8767_v58  ;;  %v8832_v58 = vld [vmem:[#allocation11 + $0xfcc] ss:$16 sps:$4 sm:$0xff]  }
 0x537   :  { %5120 = vmatprep.subr.bf16.mxu1 %v8775_v31 }
 0x538   :  { %5720 = vmatpush1.bf16.msra.mxu0 %v8770_v32  ;;  %v8827_v32 = vld [vmem:[#allocation11 + $0xda0] ss:$16 sps:$4 sm:$0xff]  }
 0x539   :  { %5721 = vmatprep.subr.bf16.mxu0 %v8778_v19 }
 0x53a   :  { %v3792_v27 = vpop.f32.mrb[96].mxu0  ;;  %5121 = vmatpush1.bf16.msra.mxu1 %v8773_v5 }
 0x53b   :  { %v10066_v44 = vadd.f32 %v3792_v27, %v10046_v54  ;;  %v3794_v26 = vpop.f32.mrb[97].mxu0  ;;  %5122 = vmatprep.subr.bf16.mxu1 %v8781_v34  ;;  %v8790_v54 = vld [vmem:[#allocation11 + $0xeec] ss:$16 sps:$4 sm:$0xff]   ;;  %v8835_v34 = vld [vmem:[#allocation11 + $0xdc4] ss:$16 sps:$4 sm:$0xff]  }
 0x53c   :  { %v10069_v30 = vadd.f32 %v3794_v26, %v10049_v46  ;;  %v3193_v42 = vpop.f32.mrb[96].mxu1  ;;  %v3796_v61 = vpop.f32.mrb[98].mxu0  ;;  %5722 = vmatpush1.bf16.msra.mxu0 %v8776_v25  ;;  %v8785_v46 = vld [vmem:[#allocation11 + $0xcc0] ss:$16 sps:$4 sm:$0xff]   ;;  %v10091_v26 = vld [vmem:[#allocation10] ss:$0 sm:$0xff] }
 0x53d   :  { %v10074_v53 = vadd.f32 %v3193_v42, %v10054_v12  ;;  %v3195_v4 = vpop.f32.mrb[97].mxu1  ;;  %v3797_v8 = vpop.f32.mrb[99].mxu0  ;;  %5723 = vmatprep.subr.bf16.mxu0 %v8784_v37  ;;  %v8799_v12 = vld [vmem:[#allocation11 + $0xd04] ss:$16 sps:$4 sm:$0xff]  }
 0x53e   :  { %v10077_v13 = vadd.f32 %v3195_v4, %v10057_v29  ;;  %v3197_v17 = vpop.f32.mrb[98].mxu1  ;;  %5123 = vmatpush1.bf16.msra.mxu1 %v8779_v38  ;;  %v8802_v29 = vld [vmem:[#allocation11 + $0xf2c] ss:$16 sps:$4 sm:$0xff]   ;;  %v8830_v38 = vld [vmem:[#allocation11 + $0xfc8] ss:$16 sps:$4 sm:$0xff]  }
 0x53f   :  { %v3198_v47 = vpop.f32.mrb[99].mxu1  ;;  %5124 = vmatprep.subr.bf16.mxu1 %v8787_v41  ;;  %v1479_v41 = vadd.f32 %v10091_v26, %v9907_v57  ;;  %v8833_v4 = vld [vmem:[#allocation11 + $0xdc0] ss:$16 sps:$4 sm:$0xff]   ;;  %v8836_v17 = vld [vmem:[#allocation11 + $0xfe8] ss:$16 sps:$4 sm:$0xff]  }
 0x540   :  { %5724 = vmatpush1.bf16.msra.mxu0 %v8782_v45  ;;  %v8838_v45 = vld [vmem:[#allocation11 + $0xfec] ss:$16 sps:$4 sm:$0xff]   ;;  %v8847_v47 = vld [vmem:[#allocation11 + $0xe04] ss:$16 sps:$4 sm:$0xff]  }
 0x541   :  { %5725 = vmatprep.subr.bf16.mxu0 %v8790_v54  ;;  %v8841_v54 = vld [vmem:[#allocation11 + $0xde4] ss:$16 sps:$4 sm:$0xff]   ;;  %v8844_v57 = vld [vmem:[#allocation11 + $0x100c] ss:$16 sps:$4 sm:$0xff]  }
 0x542   :  { %5125 = vmatpush1.bf16.msra.mxu1 %v8785_v46  ;;  %v1505_v46 = vmax.f32 %v1479_v41, 0.0 }
 0x543   :  { %5126 = vmatprep.subr.bf16.mxu1 %v8793_v55  ;;  %v8842_v55 = vld [vmem:[#allocation11 + $0x1008] ss:$16 sps:$4 sm:$0xff]  }
 0x544   :  { %5726 = vmatpush1.bf16.msra.mxu0 %v8788_v56  ;;  %v10101_v56 = vpack.c.bf16 %v1505_v46, %v1505_v46  ;;  %v8901_v46 = vld [vmem:[#allocation11 + $0xf24] ss:$16 sps:$4 sm:$0xff]  }
 0x545   :  { %5990 = vmatprep.subr.bf16.mxu0 %v8796_v50  ;;  %v8853_v50 = vld [vmem:[#allocation11 + $0xe24] ss:$16 sps:$4 sm:$0xff]  }
 0x546   :  { %5127 = vmatpush1.bf16.msra.mxu1 %v8791_v9  ;;  %v8848_v9 = vld [vmem:[#allocation11 + $0x1028] ss:$16 sps:$4 sm:$0xff]  }
 0x547   :  { %5744 = vmatmul.mubr.bf16.vlgmr.msra.gmra.mrb[124].mxu0 %v10079_v7  ;;  %5391 = vmatprep.subr.bf16.mxu1 %v8799_v12  ;;  %v8856_v12 = vld [vmem:[#allocation11 + $0x104c] ss:$16 sps:$4 sm:$0xff]  }
 0x548   :  { %5991 = vmatpush1.bf16.msra.mxu0 %v8794_v35  ;;  %6022 = vmatprep.mubr.bf16.mxu0 %v9272_v1  ;;  %v8851_v35 = vld [vmem:[#allocation11 + $0xe20] ss:$16 sps:$4 sm:$0xff]  }
 0x549   :  { %5145 = vmatmul.mubr.bf16.vlgmr.msra.gmra.mrb[124].mxu1 %v10039_v16  ;;  %5992 = vmatprep.subr.bf16.mxu0 %v8802_v29  ;;  %v8820_v16 = vld [vmem:[#allocation11 + $0xf8c] ss:$16 sps:$4 sm:$0xff]   ;;  %v8859_v29 = vld [vmem:[#allocation11 + $0xe44] ss:$16 sps:$4 sm:$0xff]  }
 0x54a   :  { %5392 = vmatpush1.bf16.msra.mxu1 %v8797_v48  ;;  %5423 = vmatprep.mubr.bf16.mxu1 %v9272_v1  ;;  %v8854_v48 = vld [vmem:[#allocation11 + $0x1048] ss:$16 sps:$4 sm:$0xff]  }
 0x54b   :  { %5393 = vmatprep.subr.bf16.mxu1 %v8805_v40  ;;  %v8862_v40 = vld [vmem:[#allocation11 + $0x106c] ss:$16 sps:$4 sm:$0xff]  }
 0x54c   :  { %5993 = vmatpush1.bf16.msra.mxu0 %v8800_v3  ;;  %v8857_v3 = vld [vmem:[#allocation11 + $0xe40] ss:$16 sps:$4 sm:$0xff]  }
 0x54d   :  { %5994 = vmatprep.subr.bf16.mxu0 %v8808_v10  ;;  %v8865_v10 = vld [vmem:[#allocation11 + $0xe64] ss:$16 sps:$4 sm:$0xff]  }
 0x54e   :  { %5394 = vmatpush1.bf16.msra.mxu1 %v8803_v36  ;;  %v8860_v36 = vld [vmem:[#allocation11 + $0x1068] ss:$16 sps:$4 sm:$0xff]  }
 0x54f   :  { %5395 = vmatprep.subr.bf16.mxu1 %v8811_v59  ;;  %v8863_v59 = vld [vmem:[#allocation11 + $0xe60] ss:$16 sps:$4 sm:$0xff]  }
 0x550   :  { %5995 = vmatpush1.bf16.msra.mxu0 %v8806_v20  ;;  %v8871_v20 = vld [vmem:[#allocation11 + $0xe84] ss:$16 sps:$4 sm:$0xff]  }
 0x551   :  { %5996 = vmatprep.subr.bf16.mxu0 %v8814_v43  ;;  %v8866_v43 = vld [vmem:[#allocation11 + $0x1088] ss:$16 sps:$4 sm:$0xff]  }
 0x552   :  { %5396 = vmatpush1.bf16.msra.mxu1 %v8809_v24  ;;  %v8874_v24 = vld [vmem:[#allocation11 + $0x10ac] ss:$16 sps:$4 sm:$0xff]  }
 0x553   :  { %5397 = vmatprep.subr.bf16.mxu1 %v8817_v51  ;;  %v8869_v51 = vld [vmem:[#allocation11 + $0xe80] ss:$16 sps:$4 sm:$0xff]  }
 0x554   :  { %5997 = vmatpush1.bf16.msra.mxu0 %v8812_v52  ;;  %v8877_v52 = vld [vmem:[#allocation11 + $0xea4] ss:$16 sps:$4 sm:$0xff]  }
 0x555   :  { %5998 = vmatprep.subr.bf16.mxu0 %v8820_v16  ;;  %v8872_v16 = vld [vmem:[#allocation11 + $0x10a8] ss:$16 sps:$4 sm:$0xff]  }
 0x556   :  { %5398 = vmatpush1.bf16.msra.mxu1 %v8815_v6  ;;  %v8880_v6 = vld [vmem:[#allocation11 + $0x10cc] ss:$16 sps:$4 sm:$0xff]  }
 0x557   :  { %5399 = vmatprep.subr.bf16.mxu1 %v8823_v21 }
 0x558   :  { %5999 = vmatpush1.bf16.msra.mxu0 %v8818_v18  ;;  %v8875_v18 = vld [vmem:[#allocation11 + $0xea0] ss:$16 sps:$4 sm:$0xff]  }
 0x559   :  { %6000 = vmatprep.subr.bf16.mxu0 %v8826_v39 }
 0x55a   :  { %v4071_v31 = vpop.f32.mrb[100].mxu0  ;;  %5400 = vmatpush1.bf16.msra.mxu1 %v8821_v28 }
 0x55b   :  { %v10086_v19 = vadd.f32 %v4071_v31, %v10066_v44  ;;  %v4073_v5 = vpop.f32.mrb[101].mxu0  ;;  %5401 = vmatprep.subr.bf16.mxu1 %v8829_v14  ;;  %v8883_v14 = vld [vmem:[#allocation11 + $0xec4] ss:$16 sps:$4 sm:$0xff]  }
 0x55c   :  { %v10089_v25 = vadd.f32 %v4073_v5, %v10069_v30  ;;  %v3472_v37 = vpop.f32.mrb[100].mxu1  ;;  %v4075_v27 = vpop.f32.mrb[102].mxu0  ;;  %6001 = vmatpush1.bf16.msra.mxu0 %v8824_v23  ;;  %v1484_v5 = vadd.f32 %v10091_v26, %v9911_v0  ;;  %v8892_v0 = vld [vmem:[#allocation11 + $0x110c] ss:$16 sps:$4 sm:$0xff]  }
 0x55d   :  { %v10096_v42 = vadd.f32 %v3472_v37, %v10074_v53  ;;  %v3474_v44 = vpop.f32.mrb[101].mxu1  ;;  %v4076_v61 = vpop.f32.mrb[103].mxu0  ;;  %6002 = vmatprep.subr.bf16.mxu0 %v8832_v58  ;;  %v8839_v53 = vld [vmem:[#allocation11 + $0xde0] ss:$16 sps:$4 sm:$0xff]  }
 0x55e   :  { %v10099_v49 = vadd.f32 %v3474_v44, %v10077_v13  ;;  %v3476_v30 = vpop.f32.mrb[102].mxu1  ;;  %5402 = vmatpush1.bf16.msra.mxu1 %v8827_v32  ;;  %v8850_v13 = vld [vmem:[#allocation11 + $0x102c] ss:$16 sps:$4 sm:$0xff]   ;;  %v8878_v32 = vld [vmem:[#allocation11 + $0x10c8] ss:$16 sps:$4 sm:$0xff]  }
 0x55f   :  { %v3477_v8 = vpop.f32.mrb[103].mxu1  ;;  %5403 = vmatprep.subr.bf16.mxu1 %v8835_v34  ;;  %v8889_v61 = vld [vmem:[#allocation11 + $0xee4] ss:$16 sps:$4 sm:$0xff]   ;;  %v1506_v30 = vmax.f32 %v1484_v5, 0.0  ;;  %v8929_v5 = vld [vmem:[#allocation11 + $0xfc0] ss:$16 sps:$4 sm:$0xff]  }
 0x560   :  { %6003 = vmatpush1.bf16.msra.mxu0 %v8830_v38  ;;  %v8890_v8 = vld [vmem:[#allocation11 + $0x1108] ss:$16 sps:$4 sm:$0xff]  }
 0x561   :  { %6004 = vmatprep.subr.bf16.mxu0 %v8838_v45  ;;  %v8884_v45 = vld [vmem:[#allocation11 + $0x10e8] ss:$16 sps:$4 sm:$0xff]  }
 0x562   :  { %5404 = vmatpush1.bf16.msra.mxu1 %v8833_v4  ;;  %v8895_v4 = vld [vmem:[#allocation11 + $0xf04] ss:$16 sps:$4 sm:$0xff]  }
 0x563   :  { %5405 = vmatprep.subr.bf16.mxu1 %v8841_v54  ;;  %v10121_v54 = vpack.c.bf16 %v1506_v30, %v1506_v30  ;;  %v8947_v30 = vld [vmem:[#allocation11 + $0x1060] ss:$16 sps:$4 sm:$0xff]  }
 0x564   :  { %6005 = vmatpush1.bf16.msra.mxu0 %v8836_v17  ;;  %v8893_v17 = vld [vmem:[#allocation11 + $0xf00] ss:$16 sps:$4 sm:$0xff]  }
 0x565   :  { %6269 = vmatprep.subr.bf16.mxu0 %v8844_v57  ;;  %v8896_v57 = vld [vmem:[#allocation11 + $0x1128] ss:$16 sps:$4 sm:$0xff]  }
 0x566   :  { %5406 = vmatpush1.bf16.msra.mxu1 %v8839_v53  ;;  %v8904_v53 = vld [vmem:[#allocation11 + $0x114c] ss:$16 sps:$4 sm:$0xff]  }
 0x567   :  { %6023 = vmatmul.mubr.bf16.vlgmr.msra.gmra.mrb[128].mxu0 %v10101_v56  ;;  %5670 = vmatprep.subr.bf16.mxu1 %v8847_v47  ;;  %v8899_v47 = vld [vmem:[#allocation11 + $0xf20] ss:$16 sps:$4 sm:$0xff]  }
 0x568   :  { %6270 = vmatpush1.bf16.msra.mxu0 %v8842_v55  ;;  %6301 = vmatprep.mubr.bf16.mxu0 %v9272_v1  ;;  %v8907_v55 = vld [vmem:[#allocation11 + $0xf44] ss:$16 sps:$4 sm:$0xff]  }
 0x569   :  { %5424 = vmatmul.mubr.bf16.vlgmr.msra.gmra.mrb[128].mxu1 %v10059_v33  ;;  %6271 = vmatprep.subr.bf16.mxu0 %v8850_v13  ;;  %v8868_v33 = vld [vmem:[#allocation11 + $0x108c] ss:$16 sps:$4 sm:$0xff]   ;;  %v8902_v13 = vld [vmem:[#allocation11 + $0x1148] ss:$16 sps:$4 sm:$0xff]  }
 0x56a   :  { %5671 = vmatpush1.bf16.msra.mxu1 %v8845_v22  ;;  %5702 = vmatprep.mubr.bf16.mxu1 %v9272_v1  ;;  %v8910_v22 = vld [vmem:[#allocation11 + $0x116c] ss:$16 sps:$4 sm:$0xff]  }
 0x56b   :  { %5672 = vmatprep.subr.bf16.mxu1 %v8853_v50  ;;  %v8905_v50 = vld [vmem:[#allocation11 + $0xf40] ss:$16 sps:$4 sm:$0xff]  }
 0x56c   :  { %6272 = vmatpush1.bf16.msra.mxu0 %v8848_v9  ;;  %v8913_v9 = vld [vmem:[#allocation11 + $0xf64] ss:$16 sps:$4 sm:$0xff]  }
 0x56d   :  { %6273 = vmatprep.subr.bf16.mxu0 %v8856_v12  ;;  %v8908_v12 = vld [vmem:[#allocation11 + $0x1168] ss:$16 sps:$4 sm:$0xff]  }
 0x56e   :  { %5673 = vmatpush1.bf16.msra.mxu1 %v8851_v35  ;;  %v8911_v35 = vld [vmem:[#allocation11 + $0xf60] ss:$16 sps:$4 sm:$0xff]  }
 0x56f   :  { %5674 = vmatprep.subr.bf16.mxu1 %v8859_v29  ;;  %v8919_v29 = vld [vmem:[#allocation11 + $0xf84] ss:$16 sps:$4 sm:$0xff]  }
 0x570   :  { %6274 = vmatpush1.bf16.msra.mxu0 %v8854_v48  ;;  %v8914_v48 = vld [vmem:[#allocation11 + $0x1188] ss:$16 sps:$4 sm:$0xff]  }
 0x571   :  { %6275 = vmatprep.subr.bf16.mxu0 %v8862_v40  ;;  %v8922_v40 = vld [vmem:[#allocation11 + $0x11ac] ss:$16 sps:$4 sm:$0xff]  }
 0x572   :  { %5675 = vmatpush1.bf16.msra.mxu1 %v8857_v3  ;;  %v8917_v3 = vld [vmem:[#allocation11 + $0xf80] ss:$16 sps:$4 sm:$0xff]  }
 0x573   :  { %5676 = vmatprep.subr.bf16.mxu1 %v8865_v10  ;;  %v8925_v10 = vld [vmem:[#allocation11 + $0xfa4] ss:$16 sps:$4 sm:$0xff]  }
 0x574   :  { %6276 = vmatpush1.bf16.msra.mxu0 %v8860_v36  ;;  %v8920_v36 = vld [vmem:[#allocation11 + $0x11a8] ss:$16 sps:$4 sm:$0xff]  }
 0x575   :  { %6277 = vmatprep.subr.bf16.mxu0 %v8868_v33  ;;  %v8928_v33 = vld [vmem:[#allocation11 + $0x11cc] ss:$16 sps:$4 sm:$0xff]  }
 0x576   :  { %5677 = vmatpush1.bf16.msra.mxu1 %v8863_v59 }
 0x577   :  { %5678 = vmatprep.subr.bf16.mxu1 %v8871_v20  ;;  %v8923_v20 = vld [vmem:[#allocation11 + $0xfa0] ss:$16 sps:$4 sm:$0xff]  }
 0x578   :  { %6278 = vmatpush1.bf16.msra.mxu0 %v8866_v43 }
 0x579   :  { %6279 = vmatprep.subr.bf16.mxu0 %v8874_v24 }
 0x57a   :  { %v4350_v21 = vpop.f32.mrb[104].mxu0  ;;  %5679 = vmatpush1.bf16.msra.mxu1 %v8869_v51  ;;  %v8931_v51 = vld [vmem:[#allocation11 + $0xfc4] ss:$16 sps:$4 sm:$0xff]  }
 0x57b   :  { %v10108_v39 = vadd.f32 %v4350_v21, %v10086_v19  ;;  %v4352_v28 = vpop.f32.mrb[105].mxu0  ;;  %5680 = vmatprep.subr.bf16.mxu1 %v8877_v52  ;;  %v8886_v19 = vld [vmem:[#allocation11 + $0x10ec] ss:$16 sps:$4 sm:$0xff]   ;;  %v8926_v21 = vld [vmem:[#allocation11 + $0x11c8] ss:$16 sps:$4 sm:$0xff]  }
 0x57c   :  { %v10111_v23 = vadd.f32 %v4352_v28, %v10089_v25  ;;  %v3751_v58 = vpop.f32.mrb[104].mxu1  ;;  %v4354_v31 = vpop.f32.mrb[106].mxu0  ;;  %6280 = vmatpush1.bf16.msra.mxu0 %v8872_v16  ;;  %v8881_v25 = vld [vmem:[#allocation11 + $0xec0] ss:$16 sps:$4 sm:$0xff]  }
 0x57d   :  { %v10116_v34 = vadd.f32 %v3751_v58, %v10096_v42  ;;  %v3753_v37 = vpop.f32.mrb[105].mxu1  ;;  %v4355_v27 = vpop.f32.mrb[107].mxu0  ;;  %6281 = vmatprep.subr.bf16.mxu0 %v8880_v6  ;;  %v8887_v42 = vld [vmem:[#allocation11 + $0xee0] ss:$16 sps:$4 sm:$0xff]   ;;  %v8934_v31 = vld [vmem:[#allocation11 + $0x11ec] ss:$16 sps:$4 sm:$0xff]  }
 0x57e   :  { %v10119_v38 = vadd.f32 %v3753_v37, %v10099_v49  ;;  %v3755_v41 = vpop.f32.mrb[106].mxu1  ;;  %5681 = vmatpush1.bf16.msra.mxu1 %v8875_v18  ;;  %v8898_v49 = vld [vmem:[#allocation11 + $0x112c] ss:$16 sps:$4 sm:$0xff]   ;;  %v1487_v18 = vadd.f32 %v10091_v26, %v9913_v15  ;;  %v8932_v27 = vld [vmem:[#allocation11 + $0x11e8] ss:$16 sps:$4 sm:$0xff]  }
 0x57f   :  { %v3756_v44 = vpop.f32.mrb[107].mxu1  ;;  %5682 = vmatprep.subr.bf16.mxu1 %v8883_v14  ;;  %v8935_v15 = vld [vmem:[#allocation11 + $0xfe0] ss:$16 sps:$4 sm:$0xff]   ;;  %v8940_v26 = vld [vmem:[#allocation11 + $0x1004] ss:$16 sps:$4 sm:$0xff]  }
 0x580   :  { %6282 = vmatpush1.bf16.msra.mxu0 %v8878_v32  ;;  %v8938_v41 = vld [vmem:[#allocation11 + $0x1000] ss:$16 sps:$4 sm:$0xff]   ;;  %v8946_v44 = vld [vmem:[#allocation11 + $0x1044] ss:$16 sps:$4 sm:$0xff]  }
 0x581   :  { %6283 = vmatprep.subr.bf16.mxu0 %v8886_v19  ;;  %v1507_v19 = vmax.f32 %v1487_v18, 0.0 }
 0x582   :  { %5683 = vmatpush1.bf16.msra.mxu1 %v8881_v25  ;;  %v8941_v25 = vld [vmem:[#allocation11 + $0x1020] ss:$16 sps:$4 sm:$0xff]  }
 0x583   :  { %5684 = vmatprep.subr.bf16.mxu1 %v8889_v61  ;;  %v8944_v61 = vld [vmem:[#allocation11 + $0x1040] ss:$16 sps:$4 sm:$0xff]  }
 0x584   :  { %6284 = vmatpush1.bf16.msra.mxu0 %v8884_v45  ;;  %v8949_v45 = vld [vmem:[#allocation11 + $0x1064] ss:$16 sps:$4 sm:$0xff]  }
 0x585   :  { %6548 = vmatprep.subr.bf16.mxu0 %v8892_v0  ;;  %v8952_v0 = vld [vmem:[#allocation11 + $0x1084] ss:$16 sps:$4 sm:$0xff]  }
 0x586   :  { %5685 = vmatpush1.bf16.msra.mxu1 %v8887_v42  ;;  %v8950_v42 = vld [vmem:[#allocation11 + $0x1080] ss:$16 sps:$4 sm:$0xff]  }
 0x587   :  { %6302 = vmatmul.mubr.bf16.vlgmr.msra.gmra.mrb[132].mxu0 %v10121_v54  ;;  %5949 = vmatprep.subr.bf16.mxu1 %v8895_v4  ;;  %v8955_v4 = vld [vmem:[#allocation11 + $0x10a4] ss:$16 sps:$4 sm:$0xff]  }
 0x588   :  { %6549 = vmatpush1.bf16.msra.mxu0 %v8890_v8  ;;  %6580 = vmatprep.mubr.bf16.mxu0 %v9272_v1 }
 0x589   :  { %5703 = vmatmul.mubr.bf16.vlgmr.msra.gmra.mrb[132].mxu1 %v10079_v7  ;;  %6550 = vmatprep.subr.bf16.mxu0 %v8898_v49  ;;  %v8916_v7 = vld [vmem:[#allocation11 + $0x118c] ss:$16 sps:$4 sm:$0xff]  }
 0x58a   :  { %5950 = vmatpush1.bf16.msra.mxu1 %v8893_v17  ;;  %5981 = vmatprep.mubr.bf16.mxu1 %v9272_v1 }
 0x58b   :  { %5951 = vmatprep.subr.bf16.mxu1 %v8901_v46  ;;  %v8958_v46 = vld [vmem:[#allocation11 + $0x10c4] ss:$16 sps:$4 sm:$0xff]  }
 0x58c   :  { %6551 = vmatpush1.bf16.msra.mxu0 %v8896_v57 }
 0x58d   :  { %6552 = vmatprep.subr.bf16.mxu0 %v8904_v53 }
 0x58e   :  { %5952 = vmatpush1.bf16.msra.mxu1 %v8899_v47 }
 0x58f   :  { %5953 = vmatprep.subr.bf16.mxu1 %v8907_v55 }
 0x590   :  { %6553 = vmatpush1.bf16.msra.mxu0 %v8902_v13 }
 0x591   :  { %6554 = vmatprep.subr.bf16.mxu0 %v8910_v22 }
 0x592   :  { %5954 = vmatpush1.bf16.msra.mxu1 %v8905_v50 }
 0x593   :  { %5955 = vmatprep.subr.bf16.mxu1 %v8913_v9 }
 0x594   :  { %6555 = vmatpush1.bf16.msra.mxu0 %v8908_v12  ;;  %v8956_v12 = vld [vmem:[#allocation11 + $0x10c0] ss:$16 sps:$4 sm:$0xff]  }
 0x595   :  { %6556 = vmatprep.subr.bf16.mxu0 %v8916_v7 }
 0x596   :  { %5956 = vmatpush1.bf16.msra.mxu1 %v8911_v35  ;;  %v8961_v35 = vld [vmem:[#allocation11 + $0x10e4] ss:$16 sps:$4 sm:$0xff]  }
 0x597   :  { %5957 = vmatprep.subr.bf16.mxu1 %v8919_v29  ;;  %v8959_v29 = vld [vmem:[#allocation11 + $0x10e0] ss:$16 sps:$4 sm:$0xff]  }
 0x598   :  { %6557 = vmatpush1.bf16.msra.mxu0 %v8914_v48  ;;  %v8964_v48 = vld [vmem:[#allocation11 + $0x1104] ss:$16 sps:$4 sm:$0xff]  }
 0x599   :  { %6558 = vmatprep.subr.bf16.mxu0 %v8922_v40  ;;  %v8962_v40 = vld [vmem:[#allocation11 + $0x1100] ss:$16 sps:$4 sm:$0xff]  }
 0x59a   :  { %v4629_v59 = vpop.f32.mrb[108].mxu0  ;;  %5958 = vmatpush1.bf16.msra.mxu1 %v8917_v3  ;;  %v8967_v3 = vld [vmem:[#allocation11 + $0x1124] ss:$16 sps:$4 sm:$0xff]  }
 0x59b   :  { %v4638_v43 = vadd.f32 %v4629_v59, %v10108_v39  ;;  %v4631_v24 = vpop.f32.mrb[109].mxu0  ;;  %5959 = vmatprep.subr.bf16.mxu1 %v8925_v10  ;;  %v8965_v10 = vld [vmem:[#allocation11 + $0x1120] ss:$16 sps:$4 sm:$0xff]   ;;  %v8973_v59 = vld [vmem:[#allocation11 + $0x1164] ss:$16 sps:$4 sm:$0xff]  }
 0x59c   :  { %v4639_v52 = vadd.f32 %v4631_v24, %v10111_v23  ;;  %v4030_v16 = vpop.f32.mrb[108].mxu1  ;;  %v4633_v6 = vpop.f32.mrb[110].mxu0  ;;  %6559 = vmatpush1.bf16.msra.mxu0 %v8920_v36  ;;  %v8937_v23 = vld [vmem:[#allocation11 + $0xfe4] ss:$16 sps:$4 sm:$0xff]   ;;  %v8974_v24 = vld [vmem:[#allocation11 + $0x1180] ss:$16 sps:$4 sm:$0xff]  }
 0x59d   :  { %v4078_v28 = vadd.f32 %v4030_v16, %v10116_v34  ;;  %v4032_v14 = vpop.f32.mrb[109].mxu1  ;;  %v4634_v58 = vpop.f32.mrb[111].mxu0  ;;  %6560 = vmatprep.subr.bf16.mxu0 %v8928_v33  ;;  %v10133_v34 = vpack.c.bf16 %v1507_v19, %v1507_v19  ;;  %v8970_v36 = vld [vmem:[#allocation11 + $0x1144] ss:$16 sps:$4 sm:$0xff]   ;;  %v8968_v33 = vld [vmem:[#allocation11 + $0x1140] ss:$16 sps:$4 sm:$0xff]  }
 0x59e   :  { %v4079_v39 = vadd.f32 %v4032_v14, %v10119_v38  ;;  %v4034_v32 = vpop.f32.mrb[110].mxu1  ;;  %5960 = vmatpush1.bf16.msra.mxu1 %v8923_v20  ;;  %v8943_v38 = vld [vmem:[#allocation11 + $0x1024] ss:$16 sps:$4 sm:$0xff]   ;;  %v8971_v20 = vld [vmem:[#allocation11 + $0x1160] ss:$16 sps:$4 sm:$0xff]  }
 0x59f   :  { %v4035_v37 = vpop.f32.mrb[111].mxu1  ;;  %5961 = vmatprep.subr.bf16.mxu1 %v8931_v51  ;;  %v8979_v51 = vld [vmem:[#allocation11 + $0x11a4] ss:$16 sps:$4 sm:$0xff]  }
 0x5a0   :  { %6561 = vmatpush1.bf16.msra.mxu0 %v8926_v21  ;;  %v8985_v37 = vld [vmem:[#allocation11 + $0x11e4] ss:$16 sps:$4 sm:$0xff]  }
 0x5a1   :  { %6562 = vmatprep.subr.bf16.mxu0 %v8934_v31  ;;  %v8987_v19 = vld [vmem:[#allocation14 + $0x80] sm:$0xff]  }
 0x5a2   :  { %5962 = vmatpush1.bf16.msra.mxu1 %v8929_v5  ;;  %v8980_v5 = vld [vmem:[#allocation11 + $0x11c0] ss:$16 sps:$4 sm:$0xff]  }
 0x5a3   :  { %5963 = vmatprep.subr.bf16.mxu1 %v8937_v23 }
 0x5a4   :  { %6563 = vmatpush1.bf16.msra.mxu0 %v8932_v27  ;;  %v8986_v27 = vld [vmem:[#allocation14 + $0xc0] sm:$0xff]  }
 0x5a5   :  { %7861 = vmatprep.subr.bf16.mxu0 %v8986_v27 }
 0x5a6   :  { %5964 = vmatpush1.bf16.msra.mxu1 %v8935_v15  ;;  %v8988_v15 = vld [vmem:[#allocation14 + $0xc8] sm:$0xff]  }
 0x5a7   :  { %6581 = vmatmul.mubr.bf16.vlgmr.msra.gmra.mrb[136].mxu0 %v10133_v34  ;;  %6228 = vmatprep.subr.bf16.mxu1 %v8940_v26  ;;  %v8983_v26 = vld [vmem:[#allocation11 + $0x11e0] ss:$16 sps:$4 sm:$0xff]  }
 0x5a8   :  { %7862 = vmatpush3.bf16.msra.mxu0 %v8987_v19 }
 0x5a9   :  { %5982 = vmatmul.mubr.bf16.vlgmr.msra.gmra.mrb[136].mxu1 %v10101_v56  ;;  %v8953_v56 = vld [vmem:[#allocation11 + $0x10a0] ss:$16 sps:$4 sm:$0xff]   ;;  %7863 = vmatprep.subr.bf16.mxu0 %v8988_v15 }
 0x5aa   :  { %6229 = vmatpush1.bf16.msra.mxu1 %v8938_v41  ;;  %6260 = vmatprep.mubr.bf16.mxu1 %v9272_v1  ;;  %v8989_v41 = vld [vmem:[#allocation14 + $0x88] sm:$0xff]  }
 0x5ab   :  { %6230 = vmatprep.subr.bf16.mxu1 %v8943_v38  ;;  %v8990_v38 = vld [vmem:[#allocation14 + $0xd0] sm:$0xff]  }
 0x5ac   :  { %7864 = vmatpush3.bf16.msra.mxu0 %v8989_v41 }
 0x5ad   :  { %7865 = vmatprep.subr.bf16.mxu0 %v8990_v38 }
 0x5ae   :  { %6231 = vmatpush1.bf16.msra.mxu1 %v8941_v25  ;;  %v8991_v25 = vld [vmem:[#allocation14 + $0x90] sm:$0xff]  }
 0x5af   :  { %6232 = vmatprep.subr.bf16.mxu1 %v8946_v44  ;;  %v8992_v44 = vld [vmem:[#allocation14 + $0xd8] sm:$0xff]  }
 0x5b0   :  { %7866 = vmatpush3.bf16.msra.mxu0 %v8991_v25  ;;  %v9015_v25 = vld [vmem:[#allocation14 + $0x30] sm:$0xff]  }
 0x5b1   :  { %7867 = vmatprep.subr.bf16.mxu0 %v8992_v44 }
 0x5b2   :  { %6233 = vmatpush1.bf16.msra.mxu1 %v8944_v61  ;;  %v8993_v61 = vld [vmem:[#allocation14 + $0x98] sm:$0xff]  }
 0x5b3   :  { %6234 = vmatprep.subr.bf16.mxu1 %v8949_v45  ;;  %v8994_v45 = vld [vmem:[#allocation14 + $0xe0] sm:$0xff]  }
 0x5b4   :  { %7868 = vmatpush3.bf16.msra.mxu0 %v8993_v61  ;;  %v9016_v61 = vld [vmem:[#allocation14 + $0x78] sm:$0xff]  }
 0x5b5   :  { %7869 = vmatprep.subr.bf16.mxu0 %v8994_v45  ;;  %v9017_v45 = vld [vmem:[#allocation14 + $0x38] sm:$0xff]  }
 0x5b6   :  { %6235 = vmatpush1.bf16.msra.mxu1 %v8947_v30  ;;  %v8995_v30 = vld [vmem:[#allocation14 + $0xa0] sm:$0xff]  }
 0x5b7   :  { %6236 = vmatprep.subr.bf16.mxu1 %v8952_v0  ;;  %v8996_v0 = vld [vmem:[#allocation14 + $0xe8] sm:$0xff]  }
 0x5b8   :  { %7870 = vmatpush3.bf16.msra.mxu0 %v8995_v30 }
 0x5b9   :  { %7871 = vmatprep.subr.bf16.mxu0 %v8996_v0 }
 0x5ba   :  { %v4908_v8 = vpop.f32.mrb[112].mxu0  ;;  %6237 = vmatpush1.bf16.msra.mxu1 %v8950_v42  ;;  %v8997_v42 = vld [vmem:[#allocation14 + $0xa8] sm:$0xff]  }
 0x5bb   :  { %v4917_v49 = vadd.f32 %v4908_v8, %v4638_v43  ;;  %v4910_v17 = vpop.f32.mrb[113].mxu0  ;;  %6238 = vmatprep.subr.bf16.mxu1 %v8955_v4  ;;  %v8976_v43 = vld [vmem:[#allocation11 + $0x1184] ss:$16 sps:$4 sm:$0xff]  }
 0x5bc   :  { %v4918_v57 = vadd.f32 %v4910_v17, %v4639_v52  ;;  %v4309_v53 = vpop.f32.mrb[112].mxu1  ;;  %v4912_v47 = vpop.f32.mrb[114].mxu0  ;;  %7872 = vmatpush3.bf16.msra.mxu0 %v8997_v42 }
 0x5bd   :  { %v4357_v55 = vadd.f32 %v4309_v53, %v4078_v28  ;;  %v4311_v13 = vpop.f32.mrb[113].mxu1  ;;  %v4913_v22 = vpop.f32.mrb[115].mxu0 }
 0x5be   :  { %v4358_v50 = vadd.f32 %v4311_v13, %v4079_v39  ;;  %v4313_v9 = vpop.f32.mrb[114].mxu1  ;;  %6239 = vmatpush1.bf16.msra.mxu1 %v8953_v56 }
 0x5bf   :  { %v4314_v7 = vpop.f32.mrb[115].mxu1  ;;  %6240 = vmatprep.subr.bf16.mxu1 %v8958_v46  ;;  %v9000_v9 = vld [vmem:[#allocation14 + $0xf8] sm:$0xff]  }
 0x5c2   :  { %6241 = vmatpush1.bf16.msra.mxu1 %v8956_v12  ;;  %v9001_v12 = vld [vmem:[#allocation14 + $0xb8] sm:$0xff]  }
 0x5c3   :  { %6242 = vmatprep.subr.bf16.mxu1 %v8961_v35 }
 0x5c6   :  { %6243 = vmatpush1.bf16.msra.mxu1 %v8959_v29 }
 0x5c7   :  { %6507 = vmatprep.subr.bf16.mxu1 %v8964_v48 }
 0x5c9   :  { %6261 = vmatmul.mubr.bf16.vlgmr.msra.gmra.mrb[140].mxu1 %v10121_v54  ;;  %v8977_v54 = vld [vmem:[#allocation11 + $0x11a0] ss:$16 sps:$4 sm:$0xff]  }
 0x5ca   :  { %6508 = vmatpush1.bf16.msra.mxu1 %v8962_v40  ;;  %6539 = vmatprep.mubr.bf16.mxu1 %v9272_v1  ;;  %v8982_v1 = vld [vmem:[#allocation11 + $0x11c4] ss:$16 sps:$4 sm:$0xff]  }
 0x5cb   :  { %6509 = vmatprep.subr.bf16.mxu1 %v8967_v3 }
 0x5ce   :  { %6510 = vmatpush1.bf16.msra.mxu1 %v8965_v10 }
 0x5cf   :  { %6511 = vmatprep.subr.bf16.mxu1 %v8970_v36 }
 0x5d2   :  { %6512 = vmatpush1.bf16.msra.mxu1 %v8968_v33 }
 0x5d3   :  { %6513 = vmatprep.subr.bf16.mxu1 %v8973_v59 }
 0x5d6   :  { %6514 = vmatpush1.bf16.msra.mxu1 %v8971_v20 }
 0x5d7   :  { %6515 = vmatprep.subr.bf16.mxu1 %v8976_v43 }
 0x5da   :  { %v5187_v52 = vpop.f32.mrb[116].mxu0  ;;  %6516 = vmatpush1.bf16.msra.mxu1 %v8974_v24  ;;  %v9002_v24 = vld [vmem:[#allocation14 + $0x40] sm:$0xff]  }
 0x5db   :  { %v5196_v16 = vadd.f32 %v5187_v52, %v4917_v49  ;;  %v5189_v6 = vpop.f32.mrb[117].mxu0  ;;  %6517 = vmatprep.subr.bf16.mxu1 %v8979_v51  ;;  %v8998_v49 = vld [vmem:[#allocation14 + $0xf0] sm:$0xff]   ;;  %v9003_v51 = vld [vmem:[#allocation14] sm:$0xff]   ;;  %v9004_v52 = vld [vmem:[#allocation14 + $0x48] sm:$0xff]  }
 0x5dc   :  { %v5197_v21 = vadd.f32 %v5189_v6, %v4918_v57  ;;  %v4588_v18 = vpop.f32.mrb[116].mxu1  ;;  %v5191_v28 = vpop.f32.mrb[118].mxu0  ;;  %7873 = vmatprep.subr.bf16.mxu0 %v8998_v49  ;;  %v9007_v6 = vld [vmem:[#allocation14 + $0x10] sm:$0xff]  }
 0x5dd   :  { %v4636_v14 = vadd.f32 %v4588_v18, %v4357_v55  ;;  %v4590_v58 = vpop.f32.mrb[117].mxu1  ;;  %v5192_v31 = vpop.f32.mrb[119].mxu0  ;;  %v9010_v18 = vld [vmem:[#allocation14 + $0x60] sm:$0xff]  }
 0x5de   :  { %v4637_v39 = vadd.f32 %v4590_v58, %v4358_v50  ;;  %v4592_v32 = vpop.f32.mrb[118].mxu1  ;;  %6518 = vmatpush1.bf16.msra.mxu1 %v8977_v54  ;;  %v9005_v54 = vld [vmem:[#allocation14 + $0x8] sm:$0xff]   ;;  %v9011_v28 = vld [vmem:[#allocation14 + $0x20] sm:$0xff]  }
 0x5df   :  { %v4593_v23 = vpop.f32.mrb[119].mxu1  ;;  %6519 = vmatprep.subr.bf16.mxu1 %v8982_v1  ;;  %v9008_v1 = vld [vmem:[#allocation14 + $0x58] sm:$0xff]   ;;  %v9013_v31 = vld [vmem:[#allocation14 + $0x28] sm:$0xff]  }
 0x5e2   :  { %6520 = vmatpush1.bf16.msra.mxu1 %v8980_v5 }
 0x5e3   :  { %6521 = vmatprep.subr.bf16.mxu1 %v8985_v37 }
 0x5e6   :  { %6522 = vmatpush1.bf16.msra.mxu1 %v8983_v26  ;;  %v9014_v26 = vld [vmem:[#allocation14 + $0x70] sm:$0xff]  }
 0x5e7   :  { %7839 = vmatprep.subr.bf16.mxu1 %v9002_v24 }
 0x5e9   :  { %6540 = vmatmul.mubr.bf16.vlgmr.msra.gmra.mrb[144].mxu1 %v10133_v34  ;;  %v8999_v34 = vld [vmem:[#allocation14 + $0xb0] sm:$0xff]  }
 0x5ea   :  { %7874 = vmatpush3.bf16.msra.mxu0 %v8999_v34  ;;  %7840 = vmatpush3.bf16.msra.mxu1 %v9003_v51 }
 0x5eb   :  { %7875 = vmatprep.subr.bf16.mxu0 %v9000_v9  ;;  %7841 = vmatprep.subr.bf16.mxu1 %v9004_v52 }
 0x5ee   :  { %7876 = vmatpush3.bf16.msra.mxu0 %v9001_v12  ;;  %7842 = vmatpush3.bf16.msra.mxu1 %v9005_v54 }
 0x5fa   :  { %v5466_v4 = vpop.f32.mrb[120].mxu0 }
 0x5fb   :  { %v5475_v8 = vadd.f32 %v5466_v4, %v5196_v16  ;;  %v5468_v56 = vpop.f32.mrb[121].mxu0  ;;  %v9006_v16 = vld [vmem:[#allocation14 + $0x50] sm:$0xff]  }
 0x5fc   :  { %v5476_v17 = vadd.f32 %v5468_v56, %v5197_v21  ;;  %v4867_v46 = vpop.f32.mrb[120].mxu1  ;;  %v5470_v57 = vpop.f32.mrb[122].mxu0  ;;  %7843 = vmatprep.subr.bf16.mxu1 %v9006_v16  ;;  %v9009_v21 = vld [vmem:[#allocation14 + $0x18] sm:$0xff]  }
 0x5fd   :  { %v4915_v53 = vadd.f32 %v4867_v46, %v4636_v14  ;;  %v4869_v47 = vpop.f32.mrb[121].mxu1  ;;  %v5471_v55 = vpop.f32.mrb[123].mxu0  ;;  %7844 = vmatpush3.bf16.msra.mxu1 %v9007_v6  ;;  %v9012_v14 = vld [vmem:[#allocation14 + $0x68] sm:$0xff]  }
 0x5fe   :  { %v4916_v13 = vadd.f32 %v4869_v47, %v4637_v39  ;;  %v4871_v22 = vpop.f32.mrb[122].mxu1  ;;  %7845 = vmatprep.subr.bf16.mxu1 %v9008_v1  ;;  %v6593_v47 = vld [vmem:[#allocation13] sm:$0xf]  ;;  %v6609_v55 = vsub.s32 3, %v9658_v60 }
 0x5ff   :  { %v4872_v50 = vpop.f32.mrb[123].mxu1 }
 0x600   :  { %v6610_v50 = vrot.slane %v6593_v47, %v6609_v55 }
 0x601   :  { %7846 = vmatpush3.bf16.msra.mxu1 %v9009_v21  ;;  %v6598_v21 = vrot.slane %v6593_v47, %v9661_v62 }
 0x602   :  { %7847 = vmatprep.subr.bf16.mxu1 %v9010_v18 }
 0x605   :  { %7848 = vmatpush3.bf16.msra.mxu1 %v9011_v28  ;;  %v6602_v28 = vrot.slane %v6593_v47, %v9664_v63 }
 0x606   :  { %7849 = vmatprep.subr.bf16.mxu1 %v9012_v14 }
 0x609   :  { %7850 = vmatpush3.bf16.msra.mxu1 %v9013_v31 }
 0x60a   :  { %7851 = vmatprep.subr.bf16.mxu1 %v9014_v26  ;;  %v6972_v26 = vld [vmem:[#allocation2] sm:$0x1] }
 0x60b   :  { %6975 = vperm.xlu0 %8023, %v6972_v26  }
 0x60d   :  { %7852 = vmatpush3.bf16.msra.mxu1 %v9015_v25 }
 0x60e   :  { %7853 = vmatprep.subr.bf16.mxu1 %v9016_v61 }
 0x611   :  { %7854 = vmatpush3.bf16.msra.mxu1 %v9017_v45  ;;  %v7775_v45 = vld [vmem:[#allocation16] ss:$0 sm:$0xff] }
 0x612   :  { %7927 = vmatprep.subr.mxu1 %v9273_v2 }
 0x61a   :  { %v5745_v7 = vpop.f32.mrb[124].mxu0 }
 0x61b   :  { %v5754_v35 = vadd.f32 %v5745_v7, %v5475_v8  ;;  %v5747_v29 = vpop.f32.mrb[125].mxu0 }
 0x61c   :  { %v5755_v48 = vadd.f32 %v5747_v29, %v5476_v17  ;;  %v5146_v40 = vpop.f32.mrb[124].mxu1  ;;  %v5749_v3 = vpop.f32.mrb[126].mxu0 }
 0x61d   :  { %v5194_v10 = vadd.f32 %v5146_v40, %v4915_v53  ;;  %v5148_v36 = vpop.f32.mrb[125].mxu1  ;;  %v5750_v33 = vpop.f32.mrb[127].mxu0 }
 0x61e   :  { %v5195_v59 = vadd.f32 %v5148_v36, %v4916_v13  ;;  %v5150_v20 = vpop.f32.mrb[126].mxu1  ;;  %v6606_v13 = vrot.slane %v6593_v47, %v211_v11 }
 0x61f   :  { %v5151_v43 = vpop.f32.mrb[127].mxu1 }
 0x63a   :  { %v6024_v58 = vpop.f32.mrb[128].mxu0 }
 0x63b   :  { %v6033_v39 = vadd.f32 %v6024_v58, %v5754_v35  ;;  %v6026_v32 = vpop.f32.mrb[129].mxu0 }
 0x63c   :  { %v6034_v5 = vadd.f32 %v6026_v32, %v5755_v48  ;;  %v5425_v37 = vpop.f32.mrb[128].mxu1  ;;  %v6028_v23 = vpop.f32.mrb[130].mxu0 }
 0x63d   :  { %v5473_v27 = vadd.f32 %v5425_v37, %v5194_v10  ;;  %v5427_v19 = vpop.f32.mrb[129].mxu1  ;;  %v6029_v15 = vpop.f32.mrb[131].mxu0 }
 0x63e   :  { %v5474_v41 = vadd.f32 %v5427_v19, %v5195_v59  ;;  %v5429_v38 = vpop.f32.mrb[130].mxu1 }
 0x63f   :  { %v5430_v44 = vpop.f32.mrb[131].mxu1 }
 0x65a   :  { %v6303_v30 = vpop.f32.mrb[132].mxu0 }
 0x65b   :  { %v6312_v0 = vadd.f32 %v6303_v30, %v6033_v39  ;;  %v6305_v42 = vpop.f32.mrb[133].mxu0 }
 0x65c   :  { %v6313_v4 = vadd.f32 %v6305_v42, %v6034_v5  ;;  %v5704_v8 = vpop.f32.mrb[132].mxu1  ;;  %v6307_v56 = vpop.f32.mrb[134].mxu0 }
 0x65d   :  { %v5752_v49 = vadd.f32 %v5704_v8, %v5473_v27  ;;  %v5706_v17 = vpop.f32.mrb[133].mxu1  ;;  %v6308_v46 = vpop.f32.mrb[135].mxu0 }
 0x65e   :  { %v5753_v57 = vadd.f32 %v5706_v17, %v5474_v41  ;;  %v5708_v34 = vpop.f32.mrb[134].mxu1  ;;  %v6971_v17 = vld [vmem:[#allocation17] sm:$0x1] }
 0x65f   :  { %v5709_v53 = vpop.f32.mrb[135].mxu1 }
 0x67a   :  { %v6582_v22 = vpop.f32.mrb[136].mxu0 }
 0x67b   :  { %v6591_v9 = vadd.f32 %v6582_v22, %v6312_v0  ;;  %v6584_v12 = vpop.f32.mrb[137].mxu0 }
 0x67c   :  { %v6592_v7 = vadd.f32 %v6584_v12, %v6313_v4  ;;  %v5983_v35 = vpop.f32.mrb[136].mxu1  ;;  %v6586_v29 = vpop.f32.mrb[138].mxu0 }
 0x67d   :  { %v6617_v48 = vadd.f32 %v6606_v13, %v6591_v9  ;;  %v6031_v40 = vadd.f32 %v5983_v35, %v5752_v49  ;;  %v5985_v3 = vpop.f32.mrb[137].mxu1  ;;  %v6587_v10 = vpop.f32.mrb[139].mxu0 }
 0x67e   :  { %v6618_v36 = vadd.f32 %v6610_v50, %v6592_v7  ;;  %v6032_v33 = vadd.f32 %v5985_v3, %v5753_v57  ;;  %v5987_v59 = vpop.f32.mrb[138].mxu1 }
 0x67f   :  { %v6621_v20 = vmax.f32 %v6617_v48, 0.0  ;;  %v5988_v43 = vpop.f32.mrb[139].mxu1 }
 0x680   :  { %v6622_v24 = vmax.f32 %v6618_v36, 0.0 }
 0x681   :  { %v6625_v60 = vpack.c.bf16 %v6621_v20, %v6621_v20 }
 0x682   :  { %v6626_v51 = vpack.c.bf16 %v6622_v24, %v6622_v24 }
 0x684   :  { %6962 = vmatprep.mubr.bf16.mxu0 %v6626_v51 }
 0x685   :  { %6963 = vmatmul.mubr.bf16.vlgmr.msra.gmra.mrb[140].mxu0 %v6625_v60 }
 0x69c   :  { %v6262_v11 = vpop.f32.mrb[140].mxu1 }
 0x69d   :  { %v6310_v52 = vadd.f32 %v6262_v11, %v6031_v40  ;;  %v6264_v54 = vpop.f32.mrb[141].mxu1 }
 0x69e   :  { %v6311_v16 = vadd.f32 %v6264_v54, %v6032_v33  ;;  %v6266_v6 = vpop.f32.mrb[142].mxu1 }
 0x69f   :  { %v6267_v1 = vpop.f32.mrb[143].mxu1 }
 0x6bc   :  { %v6541_v18 = vpop.f32.mrb[144].mxu1 }
 0x6bd   :  { %v6589_v14 = vadd.f32 %v6541_v18, %v6310_v52  ;;  %v6543_v58 = vpop.f32.mrb[145].mxu1 }
 0x6be   :  { %v6590_v31 = vadd.f32 %v6543_v58, %v6311_v16  ;;  %v6545_v39 = vpop.f32.mrb[146].mxu1 }
 0x6bf   :  { %v6615_v32 = vadd.f32 %v6598_v21, %v6589_v14  ;;  %v6546_v5 = vpop.f32.mrb[147].mxu1 }
 0x6c0   :  { %v6616_v37 = vadd.f32 %v6602_v28, %v6590_v31 }
 0x6c1   :  { %v6619_v23 = vmax.f32 %v6615_v32, 0.0 }
 0x6c2   :  { %v6620_v27 = vmax.f32 %v6616_v37, 0.0 }
 0x6c3   :  { %v6623_v15 = vpack.c.bf16 %v6619_v23, %v6619_v23 }
 0x6c4   :  { %v6624_v19 = vpack.c.bf16 %v6620_v27, %v6620_v27 }
 0x6c6   :  { %6922 = vmatprep.mubr.bf16.mxu1 %v6624_v19 }
 0x6c7   :  { %6923 = vmatmul.mubr.bf16.vlgmr.msra.gmra.mrb[148].mxu1 %v6623_v15 }
 0x6c8   :  { %7929 = vmatprep.mubr.msk.f32.mxu1 %vm9274_vm0, %v9273_v2  ;;  %v6976_v2 = vpop.permute.xlu0 %6975 }
 0x6c9   :  { %v6981_v46 = vrot.slane %v6976_v2, %v9661_v62 }
 0x758   :  { %v7877_v41 = vpop.f32.mrb[140].mxu0 }
 0x759   :  { %v7878_v63 = vpop.f32.mrb[141].mxu0 }
 0x75a   :  { %v7879_v38 = vadd.f32 %v7878_v63, %v7877_v41  ;;  %v7880_v25 = vpop.f32.mrb[142].mxu0 }
 0x75b   :  { %v7881_v44 = vpop.f32.mrb[143].mxu0 }
 0x79a   :  { %v7855_v61 = vpop.f32.mrb[148].mxu1 }
 0x79b   :  { %v7856_v30 = vpop.f32.mrb[149].mxu1 }
 0x79c   :  { %v7857_v0 = vadd.f32 %v7856_v30, %v7855_v61  ;;  %v7858_v42 = vpop.f32.mrb[150].mxu1 }
 0x79d   :  { %v7859_v4 = vpop.f32.mrb[151].mxu1 }
 0x79e   :  { %v6925_v8 = vadd.f32 %v7857_v0, %v7775_v45 }
 0x7a0   :  { %v6965_v56 = vadd.f32 %v7879_v38, %v6925_v8 }
 0x7a2   :  { %v6970_v49 = vmax.f32 %v6965_v56, 0.0 }
 0x7a4   :  { %7928 = vmatpush3.xpose.msra.mxu1 %v6970_v49 }
 0x7a7   :  { %7930 = vmatmul.mubr.f32.vlgmr.msra.gmra.mrb[152].mxu1 %v6971_v17 }
 0x87a   :  { %v7048_v57 = vpop.f32.mrb[152].mxu1 }
 0x87b   :  { %v7049_v34 = vadd.f32 %v7048_v57, %v6981_v46  ;;  %v7931_v53 = vpop.f32.mrb[153].mxu1 }
 0x87d   :  { %v7808_v47 = vmul.f32 -1.442695, %v7049_v34 }
 0x87f   :  { %9018 = vpow2.f32 %v7808_v47 }
 0x889   :  { %v9019_v55 = vpop.eup %9018 }
 0x88a   :  { %v7055_v13 = vadd.f32 1.0, %v9019_v55 }
 0x88c   :  { %9020 = vrcp.f32 %v7055_v13 }
 0x896   :  { %v9021_v22 = vpop.eup %9020 }
 0x897   :  { %7059 = vst.msk [vmem:[%s10166_s13] sm:$0x1] %vm7058_vm5, %v9021_v22 }
 0x898   :  { %7064 = vsyncpa [#allocation4], 1 }
 0x899   :  { %7065 = vsyncpa [#allocation6], 1 }
 0x89a   :  { %7066 = vsyncpa [#allocation9], 1 }
 0x89b   :  { %7067 = vsyncpa [#allocation12], 1 }
 0x89c   :  { %7068 = vsyncpa [#allocation15], 1 }
 0x89d   :  { %7069 = vsyncpa [#allocation18], 1 }

// kernel: forward.1
= control target key start
LH: loop header
LB: loop body
LE: loop exit
PB: predicated region body
PF: predicated region fallthrough
CT: control target
= control target key end

     0   :  { %s10153_s0 = inlined_call_operand.vmem [shape: bf16[18,8,33], index: 0, kind: input, shape index: {}]   ;;  %s10154_s1 = inlined_call_operand.hbm [shape: bf16[33,352], index: 1, kind: input, shape index: {}]   ;;  %s10155_s2 = inlined_call_operand.hbm [shape: f32[1,352], index: 2, kind: input, shape index: {}]   ;;  %s10156_s3 = inlined_call_operand.vmem [shape: bf16[352,192], index: 3, kind: input, shape index: {}]   ;;  %s10157_s4 = inlined_call_operand.hbm [shape: f32[1,192], index: 4, kind: input, shape index: {}]   ;;  %s10158_s5 = inlined_call_operand.hbm [shape: bf16[192,128], index: 5, kind: input, shape index: {}]   ;;  %s10159_s6 = inlined_call_operand.hbm [shape: f32[1,128], index: 6, kind: input, shape index: {}]   ;;  %s10160_s7 = inlined_call_operand.hbm [shape: bf16[18,128,512], index: 7, kind: input, shape index: {}]   ;;  %s10161_s8 = inlined_call_operand.hbm [shape: f32[1,512], index: 8, kind: input, shape index: {}]   ;;  %s10162_s9 = inlined_call_operand.hbm [shape: bf16[512,128], index: 9, kind: input, shape index: {}]   ;;  %s10163_s10 = inlined_call_operand.hbm [shape: f32[1,128], index: 10, kind: input, shape index: {}]   ;;  %s10164_s11 = inlined_call_operand.hbm [shape: f32[1,128], index: 11, kind: input, shape index: {}]   ;;  %s10165_s12 = inlined_call_operand.<no memory space> [shape: f32[1,1], index: 12, kind: input, shape index: {}]   ;;  %s10166_s13 = inlined_call_operand.vmem [shape: f32[1,1,8], index: 13, kind: output, shape index: {}]  }
   0x1   :  { %v18_v0 = vstv %s10165_s12 }
   0x2   :  { %19 = vst [vmem:[#allocation2] sm:$0x1] %v18_v0 }
   0x3   :  { %20 = vsyncpa [#allocation4], 0 }
   0x4   :  { %21 = vsyncpa [#allocation6], 0 }
   0x5   :  { %22 = vsyncpa [#allocation9], 0 }
   0x6   :  { %23 = vsyncpa [#allocation12], 0 }
   0x7   :  { %24 = vsyncpa [#allocation15], 0 }
   0x8   :  { %25 = vsyncpa [#allocation18], 0  ;;  %s9256_s27 = smov [#allocation5]   ;;  %s9257_s29 = smov [#allocation8]  }
   0x9   :  { %s46_s28 = sshll.u32 %s9256_s27, 4  ;;  %s67_s30 = sshll.u32 %s9257_s29, 4  ;;  %s47_s28 = int_to_ptr.vmem [resolvable:$true] %s46_s28  ;;  %s9348_s30 = int_to_ptr.vmem [resolvable:$true] %s67_s30 }
   0xa   :  { %s9024_s16 = scalar_lea.hbm %s10155_s2, 48 }
   0xb   :  { %p9025_p0 = scmp.ne.s32.totalorder %s10155_s2, %s9024_s16  ;;  %p9028_p1 = scmp.lt.u32.totalorder %s9024_s16, %s10155_s2 }
   0xd   :  { %p9030_p2 = pnand %p9028_p1, %p9025_p0 }
   0xf   :  { %9033 = shalt.err (!%p9030_p2)
}
  0x10   :  { %s9034_s20 = scalar_lea.vmem %s47_s28, 48  ;;  %s9038_s21 = scalar_lea.vmem %s47_s28, 64 }
  0x11   :  { %p9035_p3 = scmp.ne.s32.totalorder %s47_s28, %s9034_s20  ;;  %p9039_p4 = scmp.lt.s32.totalorder %s47_s28, %s47_s28 }
  0x12   :  { %p9040_p5 = scmp.lt.s32.totalorder %s9038_s21, %s9034_s20 }
  0x14   :  { %p9041_p6 = por %p9040_p5, %p9039_p4 }
  0x16   :  { %p9042_p7 = pnand %p9041_p6, %p9035_p3 }
  0x18   :  { %9045 = shalt.err (!%p9042_p7)
}
  0x19   :  { %49 = dma.hbm_to_vmem [thread:$0]  %s10155_s2, 48, %s47_s28, [#allocation6]  }
  0x1a   :  { %s9046_s26 = scalar_lea.hbm %s10158_s5, 1536 }
  0x1b   :  { %p9047_p8 = scmp.ne.s32.totalorder %s10158_s5, %s9046_s26  ;;  %p9050_p9 = scmp.lt.u32.totalorder %s9046_s26, %s10158_s5 }
  0x1d   :  { %p9052_p10 = pnand %p9050_p9, %p9047_p8 }
  0x1f   :  { %9055 = shalt.err (!%p9052_p10)
}
  0x20   :  { %s9056_s16 = scalar_lea.vmem %s9348_s30, 1536  ;;  %p9061_p12 = scmp.lt.s32.totalorder %s9348_s30, %s9348_s30 }
  0x21   :  { %p9057_p11 = scmp.ne.s32.totalorder %s9348_s30, %s9056_s16  ;;  %p9062_p13 = scmp.lt.s32.totalorder %s9056_s16, %s9056_s16 }
  0x23   :  { %p9063_p0 = por %p9062_p13, %p9061_p12 }
  0x25   :  { %p9064_p1 = pnand %p9063_p0, %p9057_p11 }
  0x27   :  { %9067 = shalt.err (!%p9064_p1)
}
  0x28   :  { %s9258_s2 = smov 64   ;;  %s9259_s28 = smov 4  }
  0x29   :  { %73 = dma.hbm_to_vmem [thread:$0]  %s10158_s5, 1536, %s9348_s30, [#allocation9], %s9258_s2, %s9258_s2, %s9259_s28  }
  0x2a   :  { %s9260_s18 = smov [#allocation11]   ;;  %s9068_s22 = scalar_lea.hbm %s10160_s7, 73728 }
  0x2b   :  { %s89_s19 = sshll.u32 %s9260_s18, 4  ;;  %p9069_p2 = scmp.ne.s32.totalorder %s10160_s7, %s9068_s22  ;;  %s90_s19 = int_to_ptr.vmem [resolvable:$true] %s89_s19 }
  0x2c   :  { %p9072_p3 = scmp.lt.u32.totalorder %s9068_s22, %s10160_s7 }
  0x2e   :  { %p9074_p4 = pnand %p9072_p3, %p9069_p2 }
  0x30   :  { %9077 = shalt.err (!%p9074_p4)
}
  0x31   :  { %s9078_s27 = scalar_lea.vmem %s90_s19, 73728  ;;  %p9083_p6 = scmp.lt.s32.totalorder %s90_s19, %s90_s19 }
  0x32   :  { %p9079_p5 = scmp.ne.s32.totalorder %s90_s19, %s9078_s27  ;;  %p9084_p7 = scmp.lt.s32.totalorder %s9078_s27, %s9078_s27 }
  0x34   :  { %p9085_p8 = por %p9084_p7, %p9083_p6 }
  0x36   :  { %p9086_p9 = pnand %p9085_p8, %p9079_p5 }
  0x38   :  { %9089 = shalt.err (!%p9086_p9)
}
  0x39   :  { %s9261_s5 = smov 256   ;;  %s9262_s30 = smov 16  }
  0x3a   :  { %95 = dma.hbm_to_vmem [thread:$0]  %s10160_s7, 73728, %s90_s19, [#allocation12], %s9261_s5, %s9261_s5, %s9262_s30  }
  0x3b   :  { %s9263_s15 = smov [#allocation14]   ;;  %s9264_s17 = smov [#allocation3]  }
  0x3c   :  { %s111_s16 = sshll.u32 %s9263_s15, 4  ;;  %s33_s12 = sshll.u32 %s9264_s17, 4  ;;  %s112_s16 = int_to_ptr.vmem [resolvable:$true] %s111_s16  ;;  %s34_s12 = int_to_ptr.vmem [resolvable:$true] %s33_s12 }
  0x3d   :  { %s9090_s21 = scalar_lea.hbm %s10162_s9, 4096 }
  0x3e   :  { %p9091_p10 = scmp.ne.s32.totalorder %s10162_s9, %s9090_s21  ;;  %p9094_p11 = scmp.lt.u32.totalorder %s9090_s21, %s10162_s9 }
  0x40   :  { %p9096_p12 = pnand %p9094_p11, %p9091_p10 }
  0x42   :  { %9099 = shalt.err (!%p9096_p12)
}
  0x43   :  { %s9100_s7 = scalar_lea.vmem %s112_s16, 4096  ;;  %p9105_p0 = scmp.lt.s32.totalorder %s112_s16, %s112_s16 }
  0x44   :  { %p9101_p13 = scmp.ne.s32.totalorder %s112_s16, %s9100_s7  ;;  %p9106_p1 = scmp.lt.s32.totalorder %s9100_s7, %s9100_s7 }
  0x46   :  { %p9107_p2 = por %p9106_p1, %p9105_p0 }
  0x48   :  { %p9108_p3 = pnand %p9107_p2, %p9101_p13 }
  0x4a   :  { %9111 = shalt.err (!%p9108_p3)
}
  0x4b   :  { %117 = dma.hbm_to_vmem [thread:$0]  %s10162_s9, 4096, %s112_s16, [#allocation15], %s9258_s2, %s9258_s2, %s9259_s28  }
  0x4c   :  { %s9112_s30 = scalar_lea.hbm %s10154_s1, 960 }
  0x4d   :  { %p9113_p4 = scmp.ne.s32.totalorder %s10154_s1, %s9112_s30  ;;  %p9116_p5 = scmp.lt.u32.totalorder %s9112_s30, %s10154_s1 }
  0x4f   :  { %p9118_p6 = pnand %p9116_p5, %p9113_p4 }
  0x51   :  { %9121 = shalt.err (!%p9118_p6)
}
  0x52   :  { %s9122_s18 = scalar_lea.vmem %s34_s12, 960  ;;  %p9127_p8 = scmp.lt.s32.totalorder %s34_s12, %s34_s12 }
  0x53   :  { %p9123_p7 = scmp.ne.s32.totalorder %s34_s12, %s9122_s18  ;;  %p9128_p9 = scmp.lt.s32.totalorder %s9122_s18, %s9122_s18 }
  0x55   :  { %p9129_p10 = por %p9128_p9, %p9127_p8 }
  0x57   :  { %p9130_p11 = pnand %p9129_p10, %p9123_p7 }
  0x59   :  { %9133 = shalt.err (!%p9130_p11)
}
  0x5a   :  { %s9265_s9 = smov 192   ;;  %s9266_s2 = smov 12  }
  0x5b   :  { %39 = dma.hbm_to_vmem [thread:$0]  %s10154_s1, 960, %s34_s12, [#allocation4], %s9265_s9, %s9265_s9, %s9266_s2  }
  0x5c   :  { %s9267_s20 = smov [#allocation7]   ;;  %s9268_s22 = smov [#allocation10]  }
  0x5d   :  { %s58_s21 = sshll.u32 %s9267_s20, 4  ;;  %s80_s23 = sshll.u32 %s9268_s22, 4  ;;  %s59_s21 = int_to_ptr.vmem [resolvable:$true] %s58_s21  ;;  %s81_s23 = int_to_ptr.vmem [resolvable:$true] %s80_s23 }
  0x5e   :  { %s9134_s7 = scalar_lea.hbm %s10157_s4, 32 }
  0x5f   :  { %p9135_p12 = scmp.ne.s32.totalorder %s10157_s4, %s9134_s7  ;;  %p9138_p13 = scmp.lt.u32.totalorder %s9134_s7, %s10157_s4 }
  0x61   :  { %p9140_p0 = pnand %p9138_p13, %p9135_p12 }
  0x63   :  { %9143 = shalt.err (!%p9140_p0)
}
  0x64   :  { %s9144_s1 = scalar_lea.vmem %s59_s21, 32  ;;  %p9149_p2 = scmp.lt.s32.totalorder %s59_s21, %s59_s21 }
  0x65   :  { %p9145_p1 = scmp.ne.s32.totalorder %s59_s21, %s9144_s1  ;;  %p9150_p3 = scmp.lt.s32.totalorder %s9144_s1, %s9144_s1 }
  0x67   :  { %p9151_p4 = por %p9150_p3, %p9149_p2 }
  0x69   :  { %p9152_p5 = pnand %p9151_p4, %p9145_p1 }
  0x6b   :  { %9155 = shalt.err (!%p9152_p5)
}
  0x6c   :  { %61 = dma.hbm_to_vmem [thread:$0]  %s10157_s4, 32, %s59_s21, [#allocation6]  }
  0x6d   :  { %s9156_s15 = scalar_lea.hbm %s10159_s6, 16 }
  0x6e   :  { %p9157_p6 = scmp.ne.s32.totalorder %s10159_s6, %s9156_s15  ;;  %p9160_p7 = scmp.lt.u32.totalorder %s9156_s15, %s10159_s6 }
  0x70   :  { %p9162_p8 = pnand %p9160_p7, %p9157_p6 }
  0x72   :  { %9165 = shalt.err (!%p9162_p8)
}
  0x73   :  { %s9166_s28 = scalar_lea.vmem %s81_s23, 16  ;;  %s9170_s16 = scalar_lea.vmem %s81_s23, 32 }
  0x74   :  { %p9167_p9 = scmp.ne.s32.totalorder %s81_s23, %s9166_s28  ;;  %p9171_p10 = scmp.lt.s32.totalorder %s81_s23, %s81_s23 }
  0x75   :  { %p9172_p11 = scmp.lt.s32.totalorder %s9170_s16, %s9166_s28 }
  0x77   :  { %p9173_p12 = por %p9172_p11, %p9171_p10 }
  0x79   :  { %p9174_p13 = pnand %p9173_p12, %p9167_p9 }
  0x7b   :  { %9177 = shalt.err (!%p9174_p13)
}
  0x7c   :  { %83 = dma.hbm_to_vmem [thread:$0]  %s10159_s6, 16, %s81_s23, [#allocation9]  }
  0x7d   :  { %s9269_s21 = smov [#allocation13]   ;;  %s9270_s24 = smov [#allocation16]  }
  0x7e   :  { %s102_s22 = sshll.u32 %s9269_s21, 4  ;;  %s124_s25 = sshll.u32 %s9270_s24, 4  ;;  %s103_s22 = int_to_ptr.vmem [resolvable:$true] %s102_s22  ;;  %s125_s25 = int_to_ptr.vmem [resolvable:$true] %s124_s25 }
  0x7f   :  { %s9178_s26 = scalar_lea.hbm %s10161_s8, 64 }
  0x80   :  { %p9179_p0 = scmp.ne.s32.totalorder %s10161_s8, %s9178_s26  ;;  %p9182_p1 = scmp.lt.u32.totalorder %s9178_s26, %s10161_s8 }
  0x82   :  { %p9184_p2 = pnand %p9182_p1, %p9179_p0 }
  0x84   :  { %9187 = shalt.err (!%p9184_p2)
}
  0x85   :  { %s9188_s6 = scalar_lea.vmem %s103_s22, 64  ;;  %p9193_p4 = scmp.lt.s32.totalorder %s103_s22, %s103_s22 }
  0x86   :  { %p9189_p3 = scmp.ne.s32.totalorder %s103_s22, %s9188_s6  ;;  %p9194_p5 = scmp.lt.s32.totalorder %s9188_s6, %s9188_s6 }
  0x88   :  { %p9195_p6 = por %p9194_p5, %p9193_p4 }
  0x8a   :  { %p9196_p7 = pnand %p9195_p6, %p9189_p3 }
  0x8c   :  { %9199 = shalt.err (!%p9196_p7)
}
  0x8d   :  { %105 = dma.hbm_to_vmem [thread:$0]  %s10161_s8, 64, %s103_s22, [#allocation12]  }
  0x8e   :  { %s9200_s15 = scalar_lea.hbm %s10163_s10, 16 }
  0x8f   :  { %p9201_p8 = scmp.ne.s32.totalorder %s10163_s10, %s9200_s15  ;;  %p9204_p9 = scmp.lt.u32.totalorder %s9200_s15, %s10163_s10 }
  0x91   :  { %p9206_p10 = pnand %p9204_p9, %p9201_p8 }
  0x93   :  { %9209 = shalt.err (!%p9206_p10)
}
  0x94   :  { %s9210_s28 = scalar_lea.vmem %s125_s25, 16  ;;  %s9214_s16 = scalar_lea.vmem %s125_s25, 32 }
  0x95   :  { %p9211_p11 = scmp.ne.s32.totalorder %s125_s25, %s9210_s28  ;;  %p9215_p12 = scmp.lt.s32.totalorder %s125_s25, %s125_s25 }
  0x96   :  { %p9216_p13 = scmp.lt.s32.totalorder %s9214_s16, %s9210_s28 }
  0x98   :  { %p9217_p0 = por %p9216_p13, %p9215_p12 }
  0x9a   :  { %p9218_p1 = pnand %p9217_p0, %p9211_p11 }
  0x9c   :  { %9221 = shalt.err (!%p9218_p1)
}
  0x9d   :  { %127 = dma.hbm_to_vmem [thread:$0]  %s10163_s10, 16, %s125_s25, [#allocation15]  }
  0x9e   :  { %s9271_s20 = smov [#allocation17]   ;;  %s9222_s7 = scalar_lea.hbm %s10164_s11, 16 }
  0x9f   :  { %s134_s21 = sshll.u32 %s9271_s20, 4  ;;  %p9223_p2 = scmp.ne.s32.totalorder %s10164_s11, %s9222_s7  ;;  %s135_s21 = int_to_ptr.vmem [resolvable:$true] %s134_s21 }
  0xa0   :  { %p9226_p3 = scmp.lt.u32.totalorder %s9222_s7, %s10164_s11 }
  0xa2   :  { %p9228_p4 = pnand %p9226_p3, %p9223_p2 }
  0xa4   :  { %9231 = shalt.err (!%p9228_p4)
}
  0xa5   :  { %s9232_s1 = scalar_lea.vmem %s135_s21, 16  ;;  %s9236_s10 = scalar_lea.vmem %s135_s21, 32 }
  0xa6   :  { %p9233_p5 = scmp.ne.s32.totalorder %s135_s21, %s9232_s1  ;;  %p9237_p6 = scmp.lt.s32.totalorder %s135_s21, %s135_s21 }
  0xa7   :  { %p9238_p7 = scmp.lt.s32.totalorder %s9236_s10, %s9232_s1 }
  0xa9   :  { %p9239_p8 = por %p9238_p7, %p9237_p6 }
  0xab   :  { %p9240_p9 = pnand %p9239_p8, %p9233_p5 }
  0xad   :  { %9243 = shalt.err (!%p9240_p9)
}
  0xae   :  { %137 = dma.hbm_to_vmem [thread:$0]  %s10164_s11, 16, %s135_s21, [#allocation18]  }
  0xaf   :  { %9244 = dma.done.wait [#allocation4], 960  }
  0xb0   :  { %9245 = vsyncadd [#allocation4], 4294966336 }
  0xb1   :  { %9246 = dma.done.wait [#allocation6], 80  }
  0xb2   :  { %9247 = vsyncadd [#allocation6], 4294967216 }
  0xb3   :  { %9248 = dma.done.wait [#allocation9], 1552  }
  0xb4   :  { %9249 = vsyncadd [#allocation9], 4294965744 }
  0xb5   :  { %9250 = dma.done.wait [#allocation12], 73792  }
  0xb6   :  { %9251 = vsyncadd [#allocation12], 4294893504 }
  0xb7   :  { %9252 = dma.done.wait [#allocation15], 4112  }
  0xb8   :  { %9253 = vsyncadd [#allocation15], 4294963184 }
  0xb9   :  { %9254 = dma.done.wait [#allocation18], 16  }
  0xba   :  { %9255 = vsyncadd [#allocation18], 4294967280  ;;  %v9272_v1 = vmov 0   ;;  %v9273_v2 = vmov 0.0   ;;  %vm9274_vm0 = vmmov 0   ;;  %vm329_vm1 = vcmask 1040384  }
  0xbb   :  { %373 = vmatprep.mubr.bf16.mxu0 %v9272_v1  ;;  %7885 = vmatprep.subr.bf16.mxu1 %v9273_v2  ;;  %v8024_v3 = vld [vmem:[#allocation3 + $0x4] ss:$12 sps:$4 sm:$0xff]   ;;  %v8026_v4 = vld [vmem:[#allocation3] ss:$12 sps:$4 sm:$0xff]   ;;  %v8027_v5 = vld [vmem:[#allocation3 + $0x1c] ss:$12 sps:$4 sm:$0xff]   ;;  %v201_v59 = vlaneseq }
  0xbc   :  { %7891 = vmatprep.mubr.msk.bf16.mxu1 %vm9274_vm0, %v9273_v2  ;;  %8023 = vset.pattern.permute.xlu0 %v9272_v1  ;;  %v197_v6 = vld [vmem:[#allocation3 + $0x30] sm:$0x11]  ;;  %v331_v7 = vsel %vm329_vm1, 65535, %v9272_v1  ;;  %v8029_v8 = vld [vmem:[#allocation3 + $0x18] ss:$12 sps:$4 sm:$0xff]   ;;  %vm301_vm2 = vcmask 269312  }
  0xbd   :  { %341 = vmatprep.subr.bf16.mxu0 %v8024_v3  ;;  %v7086_v9 = vcombine.high %v197_v6, %v197_v6  ;;  %v7085_v10 = vcombine.low %v197_v6, %v197_v6  ;;  %v8032_v13 = vld [vmem:[%s10153_s0] sm:$0xff]   ;;  %v8040_v14 = vld [vmem:[#allocation3 + $0x8] ss:$12 sps:$4 sm:$0xff]   ;;  %v8043_v16 = vld [vmem:[#allocation3 + $0x38] ss:$0 sps:$4 sm:$0x11]  }
  0xbe   :  { %342 = vmatpush1.bf16.msra.mxu0 %v8026_v4  ;;  %7886 = vmatpush3.bf16.msra.mxu1 %v8040_v14  ;;  %v8042_v15 = vld [vmem:[#allocation3 + $0x20] ss:$12 sps:$4 sm:$0xff]   ;;  %v339_v19 = vand.u32 %v8043_v16, %v331_v7  ;;  %v8049_v20 = vld [vmem:[%s10156_s3 + $0x14] ss:$8 sps:$4 sm:$0xff]   ;;  %v9658_v60 = vshrl.u32 %v201_v59, 7  ;;  %vm926_vm3 = vcmask 785408  }
  0xbf   :  { %343 = vmatprep.subr.bf16.mxu0 %v8027_v5  ;;  %v336_v11 = vand.u32 %v7086_v9, %v331_v7  ;;  %v333_v12 = vand.u32 %v7085_v10, %v331_v7  ;;  %7887 = vmatprep.subr.bf16.mxu1 %v9273_v2  ;;  %v8044_v17 = vld [vmem:[%s10156_s3] ss:$8 sps:$4 sm:$0xff]   ;;  %v8046_v18 = vld [vmem:[%s10156_s3 + $0x4] ss:$8 sps:$4 sm:$0xff]   ;;  %v8047_v22 = vld [vmem:[%s10156_s3 + $0x10] ss:$8 sps:$4 sm:$0xff]  }
  0xc0   :  { %v8033_v21 = vld [vmem:[%s10153_s0 + $0x8] sm:$0xff]   ;;  %v8055_v25 = vld [vmem:[%s10156_s3 + $0x34] ss:$8 sps:$4 sm:$0xff]   ;;  %v8053_v27 = vld [vmem:[%s10156_s3 + $0x30] ss:$8 sps:$4 sm:$0xff]   ;;  %v9661_v62 = vsub.s32 0, %v9658_v60 }
  0xc1   :  { %v8052_v23 = vld [vmem:[%s10156_s3 + $0x24] ss:$8 sps:$4 sm:$0xff]   ;;  %v8050_v24 = vld [vmem:[%s10156_s3 + $0x20] ss:$8 sps:$4 sm:$0xff]   ;;  %v8034_v26 = vld [vmem:[%s10153_s0 + $0x10] sm:$0xff]   ;;  %v9664_v63 = vsub.s32 1, %v9658_v60 }
  0xc2   :  { %344 = vmatpush1.bf16.msra.mxu0 %v8029_v8  ;;  %7888 = vmatpush3.bf16.msra.mxu1 %v8042_v15  ;;  %v8058_v28 = vld [vmem:[%s10156_s3 + $0x44] ss:$8 sps:$4 sm:$0xff]   ;;  %v8056_v29 = vld [vmem:[%s10156_s3 + $0x40] ss:$8 sps:$4 sm:$0xff]   ;;  %v8061_v30 = vld [vmem:[%s10156_s3 + $0x54] ss:$8 sps:$4 sm:$0xff]  }
  0xc3   :  { %345 = vmatprep.subr.bf16.mxu0 %v336_v11  ;;  %7889 = vmatprep.subr.bf16.mxu1 %v9273_v2  ;;  %v8035_v31 = vld [vmem:[%s10153_s0 + $0x18] sm:$0xff]   ;;  %v8064_v33 = vld [vmem:[%s10156_s3 + $0x64] ss:$8 sps:$4 sm:$0xff]   ;;  %v8062_v34 = vld [vmem:[%s10156_s3 + $0x60] ss:$8 sps:$4 sm:$0xff]   ;;  %v211_v11 = vsub.s32 2, %v9658_v60 }
  0xc4   :  { %v8059_v32 = vld [vmem:[%s10156_s3 + $0x50] ss:$8 sps:$4 sm:$0xff]   ;;  %v8067_v35 = vld [vmem:[%s10156_s3 + $0x74] ss:$8 sps:$4 sm:$0xff]   ;;  %v8036_v36 = vld [vmem:[%s10153_s0 + $0x20] sm:$0xff]   ;;  %vm1357_vm4 = vcmask 523264  }
  0xc5   :  { %v8065_v37 = vld [vmem:[%s10156_s3 + $0x70] ss:$8 sps:$4 sm:$0xff]   ;;  %v8070_v38 = vld [vmem:[%s10156_s3 + $0x84] ss:$8 sps:$4 sm:$0xff]   ;;  %v8068_v39 = vld [vmem:[%s10156_s3 + $0x80] ss:$8 sps:$4 sm:$0xff]  }
  0xc6   :  { %346 = vmatpush1.bf16.msra.mxu0 %v333_v12  ;;  %7890 = vmatpush3.bf16.msra.mxu1 %v339_v19  ;;  %v8073_v40 = vld [vmem:[%s10156_s3 + $0x94] ss:$8 sps:$4 sm:$0xff]   ;;  %v8037_v41 = vld [vmem:[%s10153_s0 + $0x28] sm:$0xff]   ;;  %v8071_v42 = vld [vmem:[%s10156_s3 + $0x90] ss:$8 sps:$4 sm:$0xff]   ;;  %vm7058_vm5 = vcmask 57344  }
  0xc7   :  { %954 = vmatprep.subr.bf16.mxu0 %v8046_v18  ;;  %1385 = vmatprep.subr.bf16.mxu1 %v9272_v1  ;;  %v8076_v43 = vld [vmem:[%s10156_s3 + $0xa4] ss:$8 sps:$4 sm:$0xff]   ;;  %v8074_v44 = vld [vmem:[%s10156_s3 + $0xa0] ss:$8 sps:$4 sm:$0xff]   ;;  %v8079_v45 = vld [vmem:[%s10156_s3 + $0xb4] ss:$8 sps:$4 sm:$0xff]  }
  0xc8   :  { %v8038_v46 = vld [vmem:[%s10153_s0 + $0x30] sm:$0xff]   ;;  %v8082_v48 = vld [vmem:[%s10156_s3 + $0xc4] ss:$8 sps:$4 sm:$0xff]   ;;  %v8080_v49 = vld [vmem:[%s10156_s3 + $0xc0] ss:$8 sps:$4 sm:$0xff]  }
  0xc9   :  { %7088 = vmatmul.mubr.msk.bf16.vlgmr.msra.gmra.mrb[0].mxu0 %vm301_vm2, %v8032_v13  ;;  %7892 = vmatmul.mubr.msk.bf16.vlgmr.msra.gmra.mrb[0].mxu1 %vm301_vm2, %v8032_v13  ;;  %v8077_v47 = vld [vmem:[%s10156_s3 + $0xb0] ss:$8 sps:$4 sm:$0xff]   ;;  %v8085_v50 = vld [vmem:[%s10156_s3 + $0xd4] ss:$8 sps:$4 sm:$0xff]   ;;  %v8041_v53 = vld [vmem:[%s10153_s0 + $0x40] sm:$0xff]  }
  0xca   :  { %383 = vmatprep.mubr.bf16.mxu0 %v9272_v1  ;;  %955 = vmatpush1.bf16.msra.mxu0 %v8044_v17  ;;  %v8039_v51 = vld [vmem:[%s10153_s0 + $0x38] sm:$0xff]   ;;  %v8088_v54 = vld [vmem:[%s10156_s3 + $0xe4] ss:$8 sps:$4 sm:$0xff]   ;;  %v8086_v55 = vld [vmem:[%s10156_s3 + $0xe0] ss:$8 sps:$4 sm:$0xff]  }
  0xcb   :  { %956 = vmatprep.subr.bf16.mxu0 %v8049_v20  ;;  %7895 = vmatprep.mubr.msk.bf16.mxu1 %vm9274_vm0, %v9273_v2  ;;  %v8083_v52 = vld [vmem:[%s10156_s3 + $0xd0] ss:$8 sps:$4 sm:$0xff]   ;;  %v8091_v56 = vld [vmem:[%s10156_s3 + $0xf4] ss:$8 sps:$4 sm:$0xff]   ;;  %v8094_v58 = vld [vmem:[%s10156_s3 + $0x104] ss:$8 sps:$4 sm:$0xff]  }
  0xcc   :  { %v8089_v57 = vld [vmem:[%s10156_s3 + $0xf0] ss:$8 sps:$4 sm:$0xff]   ;;  %v199_v61 = vld [vmem:[#allocation5] sm:$0x7]  ;;  %v8092_v17 = vld [vmem:[%s10156_s3 + $0x100] ss:$8 sps:$4 sm:$0xff]  }
  0xcd   :  { %v9667_v0 = vrot.slane %v199_v61, %v9661_v62  ;;  %v9670_v3 = vrot.slane %v199_v61, %v9664_v63  ;;  %v8097_v19 = vld [vmem:[%s10156_s3 + $0x114] ss:$8 sps:$4 sm:$0xff]   ;;  %v9685_v20 = vrot.slane %v199_v61, %v211_v11  ;;  %v8110_v59 = vld [vmem:[#allocation8] sm:$0xff]  }
  0xce   :  { %957 = vmatpush1.bf16.msra.mxu0 %v8047_v22  ;;  %1386 = vmatpush1.bf16.msra.mxu1 %v8110_v59 }
  0xcf   :  { %958 = vmatprep.subr.bf16.mxu0 %v8052_v23  ;;  %1387 = vmatprep.subr.bf16.mxu1 %v9272_v1 }
  0xd1   :  { %7089 = vmatmul.mubr.msk.bf16.gmra.mrb[4].mxu0 %vm301_vm2, %v8033_v21  ;;  %7896 = vmatmul.mubr.msk.bf16.gmra.mrb[4].mxu1 %vm301_vm2, %v8033_v21 }
  0xd2   :  { %393 = vmatprep.mubr.bf16.mxu0 %v9272_v1  ;;  %959 = vmatpush1.bf16.msra.mxu0 %v8050_v24 }
  0xd3   :  { %960 = vmatprep.subr.bf16.mxu0 %v8055_v25  ;;  %7899 = vmatprep.mubr.msk.bf16.mxu1 %vm9274_vm0, %v9273_v2 }
  0xd6   :  { %961 = vmatpush1.bf16.msra.mxu0 %v8053_v27  ;;  %v8095_v27 = vld [vmem:[%s10156_s3 + $0x110] ss:$8 sps:$4 sm:$0xff]  }
  0xd7   :  { %962 = vmatprep.subr.bf16.mxu0 %v8058_v28 }
  0xd9   :  { %7090 = vmatmul.mubr.msk.bf16.gmra.mrb[8].mxu0 %vm301_vm2, %v8034_v26  ;;  %7900 = vmatmul.mubr.msk.bf16.gmra.mrb[8].mxu1 %vm301_vm2, %v8034_v26 }
  0xda   :  { %403 = vmatprep.mubr.bf16.mxu0 %v9272_v1  ;;  %963 = vmatpush1.bf16.msra.mxu0 %v8056_v29 }
  0xdb   :  { %964 = vmatprep.subr.bf16.mxu0 %v8061_v30  ;;  %7903 = vmatprep.mubr.msk.bf16.mxu1 %vm9274_vm0, %v9273_v2 }
  0xde   :  { %965 = vmatpush1.bf16.msra.mxu0 %v8059_v32 }
  0xdf   :  { %966 = vmatprep.subr.bf16.mxu0 %v8064_v33 }
  0xe1   :  { %7091 = vmatmul.mubr.msk.bf16.gmra.mrb[12].mxu0 %vm301_vm2, %v8035_v31  ;;  %7904 = vmatmul.mubr.msk.bf16.gmra.mrb[12].mxu1 %vm301_vm2, %v8035_v31  ;;  %v8100_v31 = vld [vmem:[%s10156_s3 + $0x124] ss:$8 sps:$4 sm:$0xff]  }
  0xe2   :  { %413 = vmatprep.mubr.bf16.mxu0 %v9272_v1  ;;  %967 = vmatpush1.bf16.msra.mxu0 %v8062_v34 }
  0xe3   :  { %968 = vmatprep.subr.bf16.mxu0 %v8067_v35  ;;  %7907 = vmatprep.mubr.msk.bf16.mxu1 %vm9274_vm0, %v9273_v2 }
  0xe6   :  { %969 = vmatpush1.bf16.msra.mxu0 %v8065_v37 }
  0xe7   :  { %970 = vmatprep.subr.bf16.mxu0 %v8070_v38 }
  0xe9   :  { %7092 = vmatmul.mubr.msk.bf16.gmra.mrb[16].mxu0 %vm301_vm2, %v8036_v36  ;;  %7908 = vmatmul.mubr.msk.bf16.gmra.mrb[16].mxu1 %vm301_vm2, %v8036_v36 }
  0xea   :  { %423 = vmatprep.mubr.bf16.mxu0 %v9272_v1  ;;  %971 = vmatpush1.bf16.msra.mxu0 %v8068_v39 }
  0xeb   :  { %972 = vmatprep.subr.bf16.mxu0 %v8073_v40  ;;  %7911 = vmatprep.mubr.msk.bf16.mxu1 %vm9274_vm0, %v9273_v2 }
  0xee   :  { %973 = vmatpush1.bf16.msra.mxu0 %v8071_v42 }
  0xef   :  { %974 = vmatprep.subr.bf16.mxu0 %v8076_v43  ;;  %v8098_v43 = vld [vmem:[%s10156_s3 + $0x120] ss:$8 sps:$4 sm:$0xff]  }
  0xf1   :  { %7093 = vmatmul.mubr.msk.bf16.gmra.mrb[20].mxu0 %vm301_vm2, %v8037_v41  ;;  %7912 = vmatmul.mubr.msk.bf16.gmra.mrb[20].mxu1 %vm301_vm2, %v8037_v41 }
  0xf2   :  { %433 = vmatprep.mubr.bf16.mxu0 %v9272_v1  ;;  %975 = vmatpush1.bf16.msra.mxu0 %v8074_v44 }
  0xf3   :  { %976 = vmatprep.subr.bf16.mxu0 %v8079_v45  ;;  %7915 = vmatprep.mubr.msk.bf16.mxu1 %vm9274_vm0, %v9273_v2  ;;  %v8103_v45 = vld [vmem:[%s10156_s3 + $0x134] ss:$8 sps:$4 sm:$0xff]  }
  0xf6   :  { %977 = vmatpush1.bf16.msra.mxu0 %v8077_v47 }
  0xf7   :  { %978 = vmatprep.subr.bf16.mxu0 %v8082_v48 }
  0xf9   :  { %7094 = vmatmul.mubr.msk.bf16.gmra.mrb[24].mxu0 %vm301_vm2, %v8038_v46  ;;  %7916 = vmatmul.mubr.msk.bf16.gmra.mrb[24].mxu1 %vm301_vm2, %v8038_v46 }
  0xfa   :  { %443 = vmatprep.mubr.bf16.mxu0 %v9272_v1  ;;  %979 = vmatpush1.bf16.msra.mxu0 %v8080_v49 }
  0xfb   :  { %980 = vmatprep.subr.bf16.mxu0 %v8085_v50  ;;  %7919 = vmatprep.mubr.msk.bf16.mxu1 %vm9274_vm0, %v9273_v2 }
  0xfe   :  { %981 = vmatpush1.bf16.msra.mxu0 %v8083_v52 }
  0xff   :  { %982 = vmatprep.subr.bf16.mxu0 %v8088_v54 }
 0x101   :  { %7095 = vmatmul.mubr.msk.bf16.gmra.mrb[28].mxu0 %vm301_vm2, %v8039_v51  ;;  %7920 = vmatmul.mubr.msk.bf16.gmra.mrb[28].mxu1 %vm301_vm2, %v8039_v51 }
 0x102   :  { %453 = vmatprep.mubr.bf16.mxu0 %v9272_v1  ;;  %7923 = vmatprep.mubr.msk.bf16.mxu1 %vm9274_vm0, %v9273_v2 }
 0x103   :  { %983 = vmatpush1.bf16.msra.mxu0 %v8086_v55 }
 0x104   :  { %984 = vmatprep.subr.bf16.mxu0 %v8091_v56 }
 0x107   :  { %985 = vmatpush1.bf16.msra.mxu0 %v8089_v57 }
 0x108   :  { %1077 = vmatprep.subr.bf16.mxu0 %v8094_v58 }
 0x109   :  { %7096 = vmatmul.mubr.msk.bf16.gmra.mrb[32].mxu0 %vm301_vm2, %v8041_v53  ;;  %7924 = vmatmul.mubr.msk.bf16.gmra.mrb[32].mxu1 %vm301_vm2, %v8041_v53 }
 0x19c   :  { %v375_v4 = vpop.f32.mrb[0].mxu0  ;;  %v498_v28 = vpop.f32.mrb[0].mxu1 }
 0x19d   :  { %v376_v5 = vadd.f32 %v375_v4, %v9667_v0  ;;  %v377_v6 = vpop.f32.mrb[1].mxu0  ;;  %v499_v32 = vadd.f32 %v498_v28, %v9685_v20  ;;  %v7893_v33 = vpop.f32.mrb[1].mxu1  ;;  %v8101_v4 = vld [vmem:[%s10156_s3 + $0x130] ss:$8 sps:$4 sm:$0xff]  }
 0x19e   :  { %v378_v7 = vadd.f32 %v377_v6, %v9670_v3  ;;  %v379_v8 = vpop.f32.mrb[2].mxu0  ;;  %v501_v36 = vpop.f32.mrb[2].mxu1 }
 0x19f   :  { %v380_v9 = vadd.f32 %v379_v8, %v9667_v0  ;;  %v381_v10 = vpop.f32.mrb[3].mxu0  ;;  %v569_v13 = vmax.f32 %v376_v5, 0.0  ;;  %v571_v38 = vmax.f32 %v499_v32, 0.0  ;;  %v502_v39 = vadd.f32 %v501_v36, %v9685_v20  ;;  %v7894_v40 = vpop.f32.mrb[3].mxu1  ;;  %v8106_v5 = vld [vmem:[%s10156_s3 + $0x144] ss:$8 sps:$4 sm:$0xff]  }
 0x1a0   :  { %v382_v12 = vadd.f32 %v381_v10, %v9670_v3  ;;  %v570_v15 = vmax.f32 %v378_v7, 0.0  ;;  %v8107_v32 = vld [vmem:[%s10156_s3 + $0x150] ss:$8 sps:$4 sm:$0xff]  }
 0x1a1   :  { %v572_v14 = vmax.f32 %v380_v9, 0.0  ;;  %v574_v46 = vmax.f32 %v502_v39, 0.0 }
 0x1a2   :  { %v573_v16 = vmax.f32 %v382_v12, 0.0 }
 0x1a3   :  { %v623_v18 = vpack.c.bf16 %v572_v14, %v569_v13  ;;  %v9706_v51 = vpack.c.bf16 %v574_v46, %v571_v38  ;;  %v8111_v13 = vld [vmem:[#allocation8 + $0x8] sm:$0xff]  }
 0x1a4   :  { %v624_v21 = vpack.c.bf16 %v573_v16, %v570_v15  ;;  %v385_v22 = vpop.f32.mrb[4].mxu0  ;;  %v506_v54 = vpop.f32.mrb[4].mxu1  ;;  %v8104_v16 = vld [vmem:[%s10156_s3 + $0x140] ss:$8 sps:$4 sm:$0xff]   ;;  %1388 = vmatpush1.bf16.msra.mxu1 %v8111_v13 }
 0x1a5   :  { %v386_v23 = vadd.f32 %v385_v22, %v9667_v0  ;;  %v387_v24 = vpop.f32.mrb[5].mxu0  ;;  %v507_v57 = vadd.f32 %v506_v54, %v9685_v20  ;;  %v7897_v58 = vpop.f32.mrb[5].mxu1  ;;  %1389 = vmatprep.subr.bf16.mxu1 %v9272_v1 }
 0x1a6   :  { %v388_v25 = vadd.f32 %v387_v24, %v9670_v3  ;;  %v389_v26 = vpop.f32.mrb[6].mxu0  ;;  %986 = vmatprep.mubr.bf16.mxu0 %v624_v21  ;;  %v509_v6 = vpop.f32.mrb[6].mxu1 }
 0x1a7   :  { %v390_v29 = vadd.f32 %v389_v26, %v9667_v0  ;;  %v391_v30 = vpop.f32.mrb[7].mxu0  ;;  %987 = vmatmul.mubr.bf16.vlgmr.msra.gmra.mrb[36].mxu0 %v623_v18  ;;  %v575_v34 = vmax.f32 %v386_v23, 0.0  ;;  %v577_v9 = vmax.f32 %v507_v57, 0.0  ;;  %v510_v10 = vadd.f32 %v509_v6, %v9685_v20  ;;  %v7898_v12 = vpop.f32.mrb[7].mxu1  ;;  %v8109_v18 = vld [vmem:[%s10156_s3 + $0x154] ss:$8 sps:$4 sm:$0xff]  }
 0x1a8   :  { %v392_v35 = vadd.f32 %v391_v30, %v9670_v3  ;;  %1078 = vmatpush1.bf16.msra.mxu0 %v8092_v17  ;;  %v576_v41 = vmax.f32 %v388_v25, 0.0  ;;  %v8112_v26 = vld [vmem:[#allocation8 + $0x10] sm:$0xff]   ;;  %v8115_v6 = vld [vmem:[#allocation8 + $0x28] sm:$0xff]  }
 0x1a9   :  { %v578_v37 = vmax.f32 %v390_v29, 0.0  ;;  %1079 = vmatprep.subr.bf16.mxu0 %v8097_v19  ;;  %v580_v19 = vmax.f32 %v510_v10, 0.0  ;;  %1390 = vmatpush1.bf16.msra.mxu1 %v8112_v26 }
 0x1aa   :  { %v579_v42 = vmax.f32 %v392_v35, 0.0  ;;  %1391 = vmatprep.subr.bf16.mxu1 %v9272_v1 }
 0x1ab   :  { %v626_v44 = vpack.c.bf16 %v578_v37, %v575_v34  ;;  %v9727_v25 = vpack.c.bf16 %v580_v19, %v577_v9  ;;  %v8113_v37 = vld [vmem:[#allocation8 + $0x18] sm:$0xff]  }
 0x1ac   :  { %v627_v47 = vpack.c.bf16 %v579_v42, %v576_v41  ;;  %v395_v48 = vpop.f32.mrb[8].mxu0  ;;  %1080 = vmatpush1.bf16.msra.mxu0 %v8095_v27  ;;  %v514_v29 = vpop.f32.mrb[8].mxu1 }
 0x1ad   :  { %v396_v49 = vadd.f32 %v395_v48, %v9667_v0  ;;  %v397_v50 = vpop.f32.mrb[9].mxu0  ;;  %1081 = vmatprep.subr.bf16.mxu0 %v8100_v31  ;;  %v515_v33 = vadd.f32 %v514_v29, %v9685_v20  ;;  %v7901_v34 = vpop.f32.mrb[9].mxu1  ;;  %1392 = vmatpush1.bf16.msra.mxu1 %v8113_v37 }
 0x1ae   :  { %v398_v52 = vadd.f32 %v397_v50, %v9670_v3  ;;  %v399_v53 = vpop.f32.mrb[10].mxu0  ;;  %996 = vmatprep.mubr.bf16.mxu0 %v627_v47  ;;  %v517_v36 = vpop.f32.mrb[10].mxu1  ;;  %1393 = vmatprep.subr.bf16.mxu1 %v9272_v1  ;;  %v8117_v34 = vld [vmem:[#allocation8 + $0x38] sm:$0xff]  }
 0x1af   :  { %v400_v55 = vadd.f32 %v399_v53, %v9667_v0  ;;  %v401_v56 = vpop.f32.mrb[11].mxu0  ;;  %997 = vmatmul.mubr.bf16.gmra.mrb[40].mxu0 %v626_v44  ;;  %v581_v7 = vmax.f32 %v396_v49, 0.0  ;;  %v583_v40 = vmax.f32 %v515_v33, 0.0  ;;  %v518_v41 = vadd.f32 %v517_v36, %v9685_v20  ;;  %v7902_v42 = vpop.f32.mrb[11].mxu1  ;;  %v8114_v53 = vld [vmem:[#allocation8 + $0x20] sm:$0xff]  }
 0x1b0   :  { %v402_v61 = vadd.f32 %v401_v56, %v9670_v3  ;;  %1082 = vmatpush1.bf16.msra.mxu0 %v8098_v43  ;;  %v582_v14 = vmax.f32 %v398_v52, 0.0 }
 0x1b1   :  { %v584_v8 = vmax.f32 %v400_v55, 0.0  ;;  %1083 = vmatprep.subr.bf16.mxu0 %v8103_v45  ;;  %v586_v46 = vmax.f32 %v518_v41, 0.0  ;;  %1394 = vmatpush1.bf16.msra.mxu1 %v8114_v53 }
 0x1b2   :  { %v585_v15 = vmax.f32 %v402_v61, 0.0  ;;  %1395 = vmatprep.subr.bf16.mxu1 %v9272_v1 }
 0x1b3   :  { %v629_v17 = vpack.c.bf16 %v584_v8, %v581_v7  ;;  %v9740_v52 = vpack.c.bf16 %v586_v46, %v583_v40 }
 0x1b4   :  { %v630_v21 = vpack.c.bf16 %v585_v15, %v582_v14  ;;  %v405_v22 = vpop.f32.mrb[12].mxu0  ;;  %1084 = vmatpush1.bf16.msra.mxu0 %v8101_v4  ;;  %v522_v56 = vpop.f32.mrb[12].mxu1 }
 0x1b5   :  { %v406_v23 = vadd.f32 %v405_v22, %v9667_v0  ;;  %v407_v24 = vpop.f32.mrb[13].mxu0  ;;  %1085 = vmatprep.subr.bf16.mxu0 %v8106_v5  ;;  %v523_v59 = vadd.f32 %v522_v56, %v9685_v20  ;;  %v7905_v61 = vpop.f32.mrb[13].mxu1  ;;  %1396 = vmatpush1.bf16.msra.mxu1 %v8115_v6 }
 0x1b6   :  { %v408_v27 = vadd.f32 %v407_v24, %v9670_v3  ;;  %v409_v28 = vpop.f32.mrb[14].mxu0  ;;  %1006 = vmatprep.mubr.bf16.mxu0 %v630_v21  ;;  %v525_v5 = vpop.f32.mrb[14].mxu1  ;;  %1397 = vmatprep.subr.bf16.mxu1 %v9272_v1 }
 0x1b7   :  { %v410_v30 = vadd.f32 %v409_v28, %v9667_v0  ;;  %v411_v31 = vpop.f32.mrb[15].mxu0  ;;  %1007 = vmatmul.mubr.bf16.gmra.mrb[44].mxu0 %v629_v17  ;;  %v587_v38 = vmax.f32 %v406_v23, 0.0  ;;  %v589_v9 = vmax.f32 %v523_v59, 0.0  ;;  %v526_v10 = vadd.f32 %v525_v5, %v9685_v20  ;;  %v7906_v12 = vpop.f32.mrb[15].mxu1  ;;  %v8116_v23 = vld [vmem:[#allocation8 + $0x30] sm:$0xff]  }
 0x1b8   :  { %v412_v35 = vadd.f32 %v411_v31, %v9670_v3  ;;  %1086 = vmatpush1.bf16.msra.mxu0 %v8104_v16  ;;  %v588_v43 = vmax.f32 %v408_v27, 0.0 }
 0x1b9   :  { %v590_v39 = vmax.f32 %v410_v30, 0.0  ;;  %1087 = vmatprep.subr.bf16.mxu0 %v8109_v18  ;;  %v592_v16 = vmax.f32 %v526_v10, 0.0  ;;  %1398 = vmatpush1.bf16.msra.mxu1 %v8116_v23 }
 0x1ba   :  { %v591_v44 = vmax.f32 %v412_v35, 0.0  ;;  %1399 = vmatprep.subr.bf16.mxu1 %v9272_v1 }
 0x1bb   :  { %v632_v45 = vpack.c.bf16 %v590_v39, %v587_v38  ;;  %v9750_v22 = vpack.c.bf16 %v592_v16, %v589_v9 }
 0x1bc   :  { %v633_v47 = vpack.c.bf16 %v591_v44, %v588_v43  ;;  %v415_v48 = vpop.f32.mrb[16].mxu0  ;;  %1088 = vmatpush1.bf16.msra.mxu0 %v8107_v32  ;;  %v530_v27 = vpop.f32.mrb[16].mxu1 }
 0x1bd   :  { %v416_v49 = vadd.f32 %v415_v48, %v9667_v0  ;;  %v417_v50 = vpop.f32.mrb[17].mxu0  ;;  %v531_v30 = vadd.f32 %v530_v27, %v9685_v20  ;;  %v7909_v31 = vpop.f32.mrb[17].mxu1  ;;  %1400 = vmatpush1.bf16.msra.mxu1 %v8117_v34 }
 0x1be   :  { %v418_v54 = vadd.f32 %v417_v50, %v9670_v3  ;;  %v419_v55 = vpop.f32.mrb[18].mxu0  ;;  %1016 = vmatprep.mubr.bf16.mxu0 %v633_v47  ;;  %v533_v33 = vpop.f32.mrb[18].mxu1  ;;  %1401 = vmatprep.subr.bf16.mxu1 %v9272_v1 }
 0x1bf   :  { %v420_v57 = vadd.f32 %v419_v55, %v9667_v0  ;;  %v421_v58 = vpop.f32.mrb[19].mxu0  ;;  %1017 = vmatmul.mubr.bf16.gmra.mrb[48].mxu0 %v632_v45  ;;  %v593_v7 = vmax.f32 %v416_v49, 0.0  ;;  %v595_v37 = vmax.f32 %v531_v30, 0.0  ;;  %v534_v38 = vadd.f32 %v533_v33, %v9685_v20  ;;  %v7910_v39 = vpop.f32.mrb[19].mxu1  ;;  %v8118_v49 = vld [vmem:[#allocation8 + $0x40] sm:$0xff]  }
 0x1c0   :  { %v422_v4 = vadd.f32 %v421_v58, %v9670_v3  ;;  %v594_v13 = vmax.f32 %v418_v54, 0.0 }
 0x1c1   :  { %v596_v8 = vmax.f32 %v420_v57, 0.0  ;;  %v598_v43 = vmax.f32 %v534_v38, 0.0  ;;  %1402 = vmatpush1.bf16.msra.mxu1 %v8118_v49 }
 0x1c2   :  { %v597_v14 = vmax.f32 %v422_v4, 0.0  ;;  %v8119_v4 = vld [vmem:[#allocation8 + $0x48] sm:$0xff]   ;;  %1403 = vmatprep.subr.bf16.mxu1 %v9272_v1 }
 0x1c3   :  { %v635_v15 = vpack.c.bf16 %v596_v8, %v593_v7  ;;  %v9760_v48 = vpack.c.bf16 %v598_v43, %v595_v37 }
 0x1c4   :  { %v636_v17 = vpack.c.bf16 %v597_v14, %v594_v13  ;;  %v425_v18 = vpop.f32.mrb[20].mxu0  ;;  %v538_v54 = vpop.f32.mrb[20].mxu1 }
 0x1c5   :  { %v426_v19 = vadd.f32 %v425_v18, %v9667_v0  ;;  %v427_v21 = vpop.f32.mrb[21].mxu0  ;;  %v539_v57 = vadd.f32 %v538_v54, %v9685_v20  ;;  %v7913_v58 = vpop.f32.mrb[21].mxu1  ;;  %1404 = vmatpush1.bf16.msra.mxu1 %v8119_v4 }
 0x1c6   :  { %v428_v24 = vadd.f32 %v427_v21, %v9670_v3  ;;  %v429_v26 = vpop.f32.mrb[22].mxu0  ;;  %1026 = vmatprep.mubr.bf16.mxu0 %v636_v17  ;;  %v541_v61 = vpop.f32.mrb[22].mxu1  ;;  %1405 = vmatprep.subr.bf16.mxu1 %v9272_v1 }
 0x1c7   :  { %v430_v28 = vadd.f32 %v429_v26, %v9667_v0  ;;  %v431_v29 = vpop.f32.mrb[23].mxu0  ;;  %1027 = vmatmul.mubr.bf16.gmra.mrb[52].mxu0 %v635_v15  ;;  %v599_v35 = vmax.f32 %v426_v19, 0.0  ;;  %v601_v7 = vmax.f32 %v539_v57, 0.0  ;;  %v542_v8 = vadd.f32 %v541_v61, %v9685_v20  ;;  %v7914_v9 = vpop.f32.mrb[23].mxu1 }
 0x1c8   :  { %v432_v32 = vadd.f32 %v431_v29, %v9670_v3  ;;  %v600_v40 = vmax.f32 %v428_v24, 0.0 }
 0x1c9   :  { %v602_v36 = vmax.f32 %v430_v28, 0.0  ;;  %v604_v14 = vmax.f32 %v542_v8, 0.0 }
 0x1ca   :  { %v603_v41 = vmax.f32 %v432_v32, 0.0 }
 0x1cb   :  { %v638_v42 = vpack.c.bf16 %v602_v36, %v599_v35  ;;  %v9770_v19 = vpack.c.bf16 %v604_v14, %v601_v7 }
 0x1cc   :  { %v639_v44 = vpack.c.bf16 %v603_v41, %v600_v40  ;;  %v435_v45 = vpop.f32.mrb[24].mxu0  ;;  %v546_v24 = vpop.f32.mrb[24].mxu1 }
 0x1cd   :  { %v436_v46 = vadd.f32 %v435_v45, %v9667_v0  ;;  %v437_v47 = vpop.f32.mrb[25].mxu0  ;;  %v547_v28 = vadd.f32 %v546_v24, %v9685_v20  ;;  %v7917_v29 = vpop.f32.mrb[25].mxu1  ;;  %v8143_v24 = vld [vmem:[#allocation11 + $0x48] ss:$16 sps:$4 sm:$0xff]  }
 0x1ce   :  { %v438_v50 = vadd.f32 %v437_v47, %v9670_v3  ;;  %v439_v53 = vpop.f32.mrb[26].mxu0  ;;  %1036 = vmatprep.mubr.bf16.mxu0 %v639_v44  ;;  %v549_v31 = vpop.f32.mrb[26].mxu1  ;;  %v8152_v29 = vld [vmem:[#allocation11 + $0x88] ss:$16 sps:$4 sm:$0xff]  }
 0x1cf   :  { %v440_v55 = vadd.f32 %v439_v53, %v9667_v0  ;;  %v441_v56 = vpop.f32.mrb[27].mxu0  ;;  %1037 = vmatmul.mubr.bf16.gmra.mrb[56].mxu0 %v638_v42  ;;  %v605_v5 = vmax.f32 %v436_v46, 0.0  ;;  %v607_v34 = vmax.f32 %v547_v28, 0.0  ;;  %v550_v35 = vadd.f32 %v549_v31, %v9685_v20  ;;  %v7918_v36 = vpop.f32.mrb[27].mxu1  ;;  %v8154_v28 = vld [vmem:[#allocation11 + $0x8c] ss:$16 sps:$4 sm:$0xff]  }
 0x1d0   :  { %v442_v59 = vadd.f32 %v441_v56, %v9670_v3  ;;  %v606_v10 = vmax.f32 %v438_v50, 0.0  ;;  %v8155_v31 = vld [vmem:[#allocation11 + $0xa8] ss:$16 sps:$4 sm:$0xff]  }
 0x1d1   :  { %v608_v6 = vmax.f32 %v440_v55, 0.0  ;;  %v610_v40 = vmax.f32 %v550_v35, 0.0 }
 0x1d2   :  { %v609_v12 = vmax.f32 %v442_v59, 0.0 }
 0x1d3   :  { %v641_v13 = vpack.c.bf16 %v608_v6, %v605_v5  ;;  %v643_v45 = vpack.c.bf16 %v610_v40, %v607_v34  ;;  %v694_v34 = vld [vmem:[#allocation7] sm:$0x3] }
 0x1d4   :  { %v642_v15 = vpack.c.bf16 %v609_v12, %v606_v10  ;;  %v445_v16 = vpop.f32.mrb[28].mxu0  ;;  %v554_v49 = vpop.f32.mrb[28].mxu1  ;;  %v9813_v35 = vrot.slane %v694_v34, %v9661_v62  ;;  %v9816_v36 = vrot.slane %v694_v34, %v9664_v63 }
 0x1d5   :  { %v446_v17 = vadd.f32 %v445_v16, %v9667_v0  ;;  %v447_v18 = vpop.f32.mrb[29].mxu0  ;;  %v555_v54 = vadd.f32 %v554_v49, %v9685_v20  ;;  %v7921_v55 = vpop.f32.mrb[29].mxu1 }
 0x1d6   :  { %v448_v21 = vadd.f32 %v447_v18, %v9670_v3  ;;  %v449_v23 = vpop.f32.mrb[30].mxu0  ;;  %1046 = vmatprep.mubr.bf16.mxu0 %v642_v15  ;;  %v557_v57 = vpop.f32.mrb[30].mxu1  ;;  %v8122_v55 = vld [vmem:[#allocation11 + $0x100] ss:$16 sps:$4 sm:$0xff]  }
 0x1d7   :  { %v450_v26 = vadd.f32 %v449_v23, %v9667_v0  ;;  %v451_v27 = vpop.f32.mrb[31].mxu0  ;;  %1047 = vmatmul.mubr.bf16.gmra.mrb[60].mxu0 %v641_v13  ;;  %v611_v32 = vmax.f32 %v446_v17, 0.0  ;;  %v613_v61 = vmax.f32 %v555_v54, 0.0  ;;  %v558_v4 = vadd.f32 %v557_v57, %v9685_v20  ;;  %v7922_v5 = vpop.f32.mrb[31].mxu1  ;;  %v8145_v23 = vld [vmem:[#allocation11 + $0x4c] ss:$16 sps:$4 sm:$0xff]  }
 0x1d8   :  { %v452_v30 = vadd.f32 %v451_v27, %v9670_v3  ;;  %v612_v37 = vmax.f32 %v448_v21, 0.0  ;;  %v8149_v27 = vld [vmem:[#allocation11 + $0x68] ss:$16 sps:$4 sm:$0xff]  }
 0x1d9   :  { %v614_v33 = vmax.f32 %v450_v26, 0.0  ;;  %v616_v9 = vmax.f32 %v558_v4, 0.0  ;;  %v8151_v26 = vld [vmem:[#allocation11 + $0x6c] ss:$16 sps:$4 sm:$0xff]  }
 0x1da   :  { %v615_v38 = vmax.f32 %v452_v30, 0.0  ;;  %v8157_v30 = vld [vmem:[#allocation11 + $0xac] ss:$16 sps:$4 sm:$0xff]  }
 0x1db   :  { %v644_v39 = vpack.c.bf16 %v614_v33, %v611_v32  ;;  %v8163_v32 = vld [vmem:[#allocation11 + $0xcc] ss:$16 sps:$4 sm:$0xff]   ;;  %v8161_v33 = vld [vmem:[#allocation11 + $0xc8] ss:$16 sps:$4 sm:$0xff]  }
 0x1dc   :  { %v645_v41 = vpack.c.bf16 %v615_v38, %v612_v37  ;;  %v455_v42 = vpop.f32.mrb[32].mxu0  ;;  %v562_v12 = vpop.f32.mrb[32].mxu1 }
 0x1dd   :  { %v456_v43 = vadd.f32 %v455_v42, %v9667_v0  ;;  %v457_v44 = vpop.f32.mrb[33].mxu0  ;;  %v563_v13 = vadd.f32 %v562_v12, %v9685_v20  ;;  %v7925_v14 = vpop.f32.mrb[33].mxu1 }
 0x1de   :  { %v458_v46 = vadd.f32 %v457_v44, %v9670_v3  ;;  %v459_v47 = vpop.f32.mrb[34].mxu0  ;;  %1056 = vmatprep.mubr.bf16.mxu0 %v645_v41 }
 0x1df   :  { %v460_v50 = vadd.f32 %v459_v47, %v9667_v0  ;;  %v461_v53 = vpop.f32.mrb[35].mxu0  ;;  %1057 = vmatmul.mubr.bf16.gmra.mrb[64].mxu0 %v644_v39  ;;  %v617_v58 = vmax.f32 %v456_v43, 0.0  ;;  %v646_v0 = vpack.c.bf16 %v616_v9, %v613_v61  ;;  %v619_v15 = vmax.f32 %v563_v13, 0.0 }
 0x1e0   :  { %v462_v56 = vadd.f32 %v461_v53, %v9670_v3  ;;  %v618_v6 = vmax.f32 %v458_v46, 0.0  ;;  %v565_v3 = vpop.f32.mrb[34].mxu1 }
 0x1e1   :  { %v620_v59 = vmax.f32 %v460_v50, 0.0  ;;  %v566_v16 = vadd.f32 %v565_v3, %v9685_v20  ;;  %v7926_v17 = vpop.f32.mrb[35].mxu1  ;;  %v8120_v20 = vld [vmem:[#allocation8 + $0x50] sm:$0xff]  }
 0x1e2   :  { %v621_v7 = vmax.f32 %v462_v56, 0.0  ;;  %1406 = vmatpush1.bf16.msra.mxu1 %v8120_v20 }
 0x1e3   :  { %v647_v8 = vpack.c.bf16 %v620_v59, %v617_v58  ;;  %v622_v18 = vmax.f32 %v566_v16, 0.0  ;;  %1407 = vmatprep.subr.bf16.mxu1 %v9272_v1  ;;  %v8127_v58 = vld [vmem:[#allocation11 + $0x124] ss:$16 sps:$4 sm:$0xff]  }
 0x1e4   :  { %v648_v10 = vpack.c.bf16 %v621_v7, %v618_v6  ;;  %v8125_v7 = vld [vmem:[#allocation11 + $0x120] ss:$16 sps:$4 sm:$0xff]  }
 0x1e5   :  { %v649_v21 = vpack.c.bf16 %v622_v18, %v619_v15  ;;  %v8128_v15 = vld [vmem:[#allocation11 + $0x140] ss:$16 sps:$4 sm:$0xff]   ;;  %v8133_v18 = vld [vmem:[#allocation11 + $0x164] ss:$16 sps:$4 sm:$0xff]  }
 0x1e6   :  { %1066 = vmatprep.mubr.bf16.mxu0 %v648_v10  ;;  %v8130_v10 = vld [vmem:[#allocation11 + $0x144] ss:$16 sps:$4 sm:$0xff]  }
 0x1e7   :  { %1067 = vmatmul.mubr.bf16.gmra.mrb[68].mxu0 %v647_v8 }
 0x1e8   :  { %1109 = vmatprep.mubr.bf16.mxu0 %v9272_v1 }
 0x1ef   :  { %7150 = vmatmul.mubr.msk.bf16.vlgmr.msra.gmra.mrb[36].mxu0 %vm926_vm3, %v9706_v51  ;;  %v8121_v51 = vld [vmem:[#allocation8 + $0x58] sm:$0xff]  }
 0x1f0   :  { %1119 = vmatprep.mubr.bf16.mxu0 %v9272_v1  ;;  %1408 = vmatpush1.bf16.msra.mxu1 %v8121_v51 }
 0x1f7   :  { %7151 = vmatmul.mubr.msk.bf16.gmra.mrb[40].mxu0 %vm926_vm3, %v9727_v25  ;;  %v8124_v25 = vld [vmem:[#allocation11 + $0x104] ss:$16 sps:$4 sm:$0xff]  }
 0x1f8   :  { %1129 = vmatprep.mubr.bf16.mxu0 %v9272_v1  ;;  %1805 = vmatprep.subr.bf16.mxu1 %v8124_v25 }
 0x1ff   :  { %7152 = vmatmul.mubr.msk.bf16.gmra.mrb[44].mxu0 %vm926_vm3, %v9740_v52  ;;  %v8134_v52 = vld [vmem:[#allocation11 + $0x8] ss:$16 sps:$4 sm:$0xff]  }
 0x200   :  { %1139 = vmatprep.mubr.bf16.mxu0 %v9272_v1 }
 0x207   :  { %7153 = vmatmul.mubr.msk.bf16.gmra.mrb[48].mxu0 %vm926_vm3, %v9750_v22  ;;  %v8136_v22 = vld [vmem:[#allocation11 + $0xc] ss:$16 sps:$4 sm:$0xff]  }
 0x208   :  { %1149 = vmatprep.mubr.bf16.mxu0 %v9272_v1  ;;  %2088 = vmatprep.subr.bf16.mxu0 %v8136_v22  ;;  %v8131_v22 = vld [vmem:[#allocation11 + $0x160] ss:$16 sps:$4 sm:$0xff]  }
 0x209   :  { %2089 = vmatpush1.bf16.msra.mxu0 %v8134_v52 }
 0x20f   :  { %7154 = vmatmul.mubr.msk.bf16.gmra.mrb[52].mxu0 %vm926_vm3, %v9760_v48  ;;  %v8142_v48 = vld [vmem:[#allocation11 + $0x2c] ss:$16 sps:$4 sm:$0xff]  }
 0x210   :  { %1159 = vmatprep.mubr.bf16.mxu0 %v9272_v1  ;;  %2090 = vmatprep.subr.bf16.mxu0 %v8142_v48 }
 0x217   :  { %7155 = vmatmul.mubr.msk.bf16.gmra.mrb[56].mxu0 %vm926_vm3, %v9770_v19  ;;  %v8140_v19 = vld [vmem:[#allocation11 + $0x28] ss:$16 sps:$4 sm:$0xff]  }
 0x218   :  { %1169 = vmatprep.mubr.bf16.mxu0 %v9272_v1  ;;  %2091 = vmatpush1.bf16.msra.mxu0 %v8140_v19 }
 0x219   :  { %2092 = vmatprep.subr.bf16.mxu0 %v8145_v23  ;;  %v8139_v23 = vld [vmem:[#allocation11 + $0x184] ss:$16 sps:$4 sm:$0xff]  }
 0x21c   :  { %2093 = vmatpush1.bf16.msra.mxu0 %v8143_v24 }
 0x21d   :  { %2094 = vmatprep.subr.bf16.mxu0 %v8151_v26 }
 0x21f   :  { %7156 = vmatmul.mubr.msk.bf16.gmra.mrb[60].mxu0 %vm926_vm3, %v643_v45 }
 0x220   :  { %1179 = vmatprep.mubr.bf16.mxu0 %v9272_v1  ;;  %2095 = vmatpush1.bf16.msra.mxu0 %v8149_v27 }
 0x221   :  { %2096 = vmatprep.subr.bf16.mxu0 %v8154_v28 }
 0x224   :  { %2097 = vmatpush1.bf16.msra.mxu0 %v8152_v29 }
 0x225   :  { %2098 = vmatprep.subr.bf16.mxu0 %v8157_v30  ;;  %v8137_v30 = vld [vmem:[#allocation11 + $0x180] ss:$16 sps:$4 sm:$0xff]  }
 0x227   :  { %7157 = vmatmul.mubr.msk.bf16.gmra.mrb[64].mxu0 %vm926_vm3, %v646_v0 }
 0x228   :  { %1189 = vmatprep.mubr.bf16.mxu0 %v9272_v1  ;;  %2099 = vmatpush1.bf16.msra.mxu0 %v8155_v31 }
 0x229   :  { %2100 = vmatprep.subr.bf16.mxu0 %v8163_v32 }
 0x22c   :  { %2101 = vmatpush1.bf16.msra.mxu0 %v8161_v33  ;;  %v8148_v33 = vld [vmem:[#allocation11 + $0x1a4] ss:$16 sps:$4 sm:$0xff]  }
 0x22f   :  { %7158 = vmatmul.mubr.msk.bf16.gmra.mrb[68].mxu0 %vm926_vm3, %v649_v21 }
 0x230   :  { %2120 = vmatprep.mubr.bf16.mxu0 %v9272_v1 }
 0x2c2   :  { %v1111_v37 = vpop.f32.mrb[36].mxu0 }
 0x2c3   :  { %v7932_v38 = vadd.f32 %v1111_v37, %v9813_v35  ;;  %v1113_v39 = vpop.f32.mrb[37].mxu0 }
 0x2c4   :  { %v7933_v40 = vadd.f32 %v1113_v39, %v9816_v36  ;;  %v1115_v41 = vpop.f32.mrb[38].mxu0 }
 0x2c5   :  { %v7934_v42 = vadd.f32 %v1115_v41, %v9813_v35  ;;  %v1117_v43 = vpop.f32.mrb[39].mxu0  ;;  %v1200_v45 = vmax.f32 %v7932_v38, 0.0  ;;  %v8146_v41 = vld [vmem:[#allocation11 + $0x1a0] ss:$16 sps:$4 sm:$0xff]  }
 0x2c6   :  { %v7935_v44 = vadd.f32 %v1117_v43, %v9816_v36  ;;  %v1201_v47 = vmax.f32 %v7933_v40, 0.0 }
 0x2c7   :  { %v1202_v46 = vmax.f32 %v7934_v42, 0.0 }
 0x2c8   :  { %v1203_v49 = vmax.f32 %v7935_v44, 0.0  ;;  %v8160_v44 = vld [vmem:[#allocation11 + $0x1c4] ss:$16 sps:$4 sm:$0xff]  }
 0x2c9   :  { %v1236_v50 = vpack.c.bf16 %v1202_v46, %v1200_v45 }
 0x2ca   :  { %v1237_v53 = vpack.c.bf16 %v1203_v49, %v1201_v47  ;;  %v1121_v54 = vpop.f32.mrb[40].mxu0 }
 0x2cb   :  { %v7936_v56 = vadd.f32 %v1121_v54, %v9813_v35  ;;  %v1123_v57 = vpop.f32.mrb[41].mxu0 }
 0x2cc   :  { %v7937_v59 = vadd.f32 %v1123_v57, %v9816_v36  ;;  %v1125_v61 = vpop.f32.mrb[42].mxu0  ;;  %7172 = vmatprep.mubr.msk.bf16.mxu1 %vm1357_vm4, %v1237_v53  ;;  %v8158_v53 = vld [vmem:[#allocation11 + $0x1c0] ss:$16 sps:$4 sm:$0xff]  }
 0x2cd   :  { %v7938_v4 = vadd.f32 %v1125_v61, %v9813_v35  ;;  %v1127_v5 = vpop.f32.mrb[43].mxu0  ;;  %1418 = vmatmul.mubr.bf16.vlgmr.msra.gmra.mrb[36].mxu1 %v1236_v50  ;;  %v1204_v8 = vmax.f32 %v7936_v56, 0.0 }
 0x2ce   :  { %v7939_v6 = vadd.f32 %v1127_v5, %v9816_v36  ;;  %1806 = vmatpush1.bf16.msra.mxu1 %v8122_v55  ;;  %v1205_v0 = vmax.f32 %v7937_v59, 0.0 }
 0x2cf   :  { %v1206_v9 = vmax.f32 %v7938_v4, 0.0  ;;  %1807 = vmatprep.subr.bf16.mxu1 %v8127_v58 }
 0x2d0   :  { %v1207_v12 = vmax.f32 %v7939_v6, 0.0 }
 0x2d1   :  { %v1238_v13 = vpack.c.bf16 %v1206_v9, %v1204_v8 }
 0x2d2   :  { %v1239_v14 = vpack.c.bf16 %v1207_v12, %v1205_v0  ;;  %v1131_v3 = vpop.f32.mrb[44].mxu0  ;;  %1808 = vmatpush1.bf16.msra.mxu1 %v8125_v7 }
 0x2d3   :  { %v7940_v16 = vadd.f32 %v1131_v3, %v9813_v35  ;;  %v1133_v17 = vpop.f32.mrb[45].mxu0  ;;  %1809 = vmatprep.subr.bf16.mxu1 %v8130_v10 }
 0x2d4   :  { %v7941_v21 = vadd.f32 %v1133_v17, %v9816_v36  ;;  %v1135_v20 = vpop.f32.mrb[46].mxu0  ;;  %7173 = vmatprep.mubr.msk.bf16.mxu1 %vm1357_vm4, %v1239_v14 }
 0x2d5   :  { %v7942_v51 = vadd.f32 %v1135_v20, %v9813_v35  ;;  %v1137_v25 = vpop.f32.mrb[47].mxu0  ;;  %1426 = vmatmul.mubr.bf16.gmra.mrb[40].mxu1 %v1238_v13  ;;  %v1208_v48 = vmax.f32 %v7940_v16, 0.0 }
 0x2d6   :  { %v7943_v52 = vadd.f32 %v1137_v25, %v9816_v36  ;;  %1810 = vmatpush1.bf16.msra.mxu1 %v8128_v15  ;;  %v1209_v24 = vmax.f32 %v7941_v21, 0.0 }
 0x2d7   :  { %v1210_v19 = vmax.f32 %v7942_v51, 0.0  ;;  %1811 = vmatprep.subr.bf16.mxu1 %v8133_v18 }
 0x2d8   :  { %v1211_v26 = vmax.f32 %v7943_v52, 0.0 }
 0x2d9   :  { %v1240_v27 = vpack.c.bf16 %v1210_v19, %v1208_v48 }
 0x2da   :  { %v1241_v28 = vpack.c.bf16 %v1211_v26, %v1209_v24  ;;  %v1141_v29 = vpop.f32.mrb[48].mxu0  ;;  %1812 = vmatpush1.bf16.msra.mxu1 %v8131_v22 }
 0x2db   :  { %v7944_v31 = vadd.f32 %v1141_v29, %v9813_v35  ;;  %v1143_v32 = vpop.f32.mrb[49].mxu0  ;;  %1813 = vmatprep.subr.bf16.mxu1 %v8139_v23 }
 0x2dc   :  { %v7945_v34 = vadd.f32 %v1143_v32, %v9816_v36  ;;  %v1145_v37 = vpop.f32.mrb[50].mxu0  ;;  %7174 = vmatprep.mubr.msk.bf16.mxu1 %vm1357_vm4, %v1241_v28 }
 0x2dd   :  { %v7946_v38 = vadd.f32 %v1145_v37, %v9813_v35  ;;  %v1147_v39 = vpop.f32.mrb[51].mxu0  ;;  %1434 = vmatmul.mubr.bf16.gmra.mrb[44].mxu1 %v1240_v27  ;;  %v1212_v42 = vmax.f32 %v7944_v31, 0.0 }
 0x2de   :  { %v7947_v40 = vadd.f32 %v1147_v39, %v9816_v36  ;;  %1814 = vmatpush1.bf16.msra.mxu1 %v8137_v30  ;;  %v1213_v45 = vmax.f32 %v7945_v34, 0.0 }
 0x2df   :  { %v1214_v43 = vmax.f32 %v7946_v38, 0.0  ;;  %1815 = vmatprep.subr.bf16.mxu1 %v8148_v33 }
 0x2e0   :  { %v1215_v46 = vmax.f32 %v7947_v40, 0.0 }
 0x2e1   :  { %v1242_v47 = vpack.c.bf16 %v1214_v43, %v1212_v42 }
 0x2e2   :  { %v1243_v49 = vpack.c.bf16 %v1215_v46, %v1213_v45  ;;  %v1151_v50 = vpop.f32.mrb[52].mxu0  ;;  %1816 = vmatpush1.bf16.msra.mxu1 %v8146_v41 }
 0x2e3   :  { %v7948_v54 = vadd.f32 %v1151_v50, %v9813_v35  ;;  %v1153_v55 = vpop.f32.mrb[53].mxu0  ;;  %1817 = vmatprep.subr.bf16.mxu1 %v8160_v44 }
 0x2e4   :  { %v7949_v56 = vadd.f32 %v1153_v55, %v9816_v36  ;;  %v1155_v57 = vpop.f32.mrb[54].mxu0  ;;  %7175 = vmatprep.mubr.msk.bf16.mxu1 %vm1357_vm4, %v1243_v49 }
 0x2e5   :  { %v7950_v58 = vadd.f32 %v1155_v57, %v9813_v35  ;;  %v1157_v59 = vpop.f32.mrb[55].mxu0  ;;  %1442 = vmatmul.mubr.bf16.gmra.mrb[48].mxu1 %v1242_v47  ;;  %v1216_v4 = vmax.f32 %v7948_v54, 0.0 }
 0x2e6   :  { %v7951_v61 = vadd.f32 %v1157_v59, %v9816_v36  ;;  %1818 = vmatpush1.bf16.msra.mxu1 %v8158_v53  ;;  %v1217_v6 = vmax.f32 %v7949_v56, 0.0 }
 0x2e7   :  { %v1218_v5 = vmax.f32 %v7950_v58, 0.0 }
 0x2e8   :  { %v1219_v7 = vmax.f32 %v7951_v61, 0.0 }
 0x2e9   :  { %v1244_v8 = vpack.c.bf16 %v1218_v5, %v1216_v4 }
 0x2ea   :  { %v1245_v9 = vpack.c.bf16 %v1219_v7, %v1217_v6  ;;  %v1161_v10 = vpop.f32.mrb[56].mxu0 }
 0x2eb   :  { %v7952_v0 = vadd.f32 %v1161_v10, %v9813_v35  ;;  %v1163_v12 = vpop.f32.mrb[57].mxu0  ;;  %v8166_v10 = vld [vmem:[#allocation11 + $0xec] ss:$16 sps:$4 sm:$0xff]  }
 0x2ec   :  { %v7953_v13 = vadd.f32 %v1163_v12, %v9816_v36  ;;  %v1165_v14 = vpop.f32.mrb[58].mxu0  ;;  %7176 = vmatprep.mubr.msk.bf16.mxu1 %vm1357_vm4, %v1245_v9  ;;  %2102 = vmatprep.subr.bf16.mxu0 %v8166_v10  ;;  %v8169_v12 = vld [vmem:[#allocation11 + $0x1e4] ss:$16 sps:$4 sm:$0xff]  }
 0x2ed   :  { %v7954_v3 = vadd.f32 %v1165_v14, %v9813_v35  ;;  %v1167_v15 = vpop.f32.mrb[59].mxu0  ;;  %1450 = vmatmul.mubr.bf16.gmra.mrb[52].mxu1 %v1244_v8  ;;  %v1220_v17 = vmax.f32 %v7952_v0, 0.0  ;;  %v8164_v0 = vld [vmem:[#allocation11 + $0xe8] ss:$16 sps:$4 sm:$0xff]   ;;  %1819 = vmatprep.subr.bf16.mxu1 %v8169_v12  ;;  %v9864_v14 = vld [vmem:[#allocation10] ss:$0 sm:$0xff] }
 0x2ee   :  { %v7955_v16 = vadd.f32 %v1167_v15, %v9816_v36  ;;  %v1221_v21 = vmax.f32 %v7953_v13, 0.0  ;;  %2103 = vmatpush1.bf16.msra.mxu0 %v8164_v0  ;;  %v8172_v13 = vld [vmem:[#allocation11 + $0x20c] ss:$16 sps:$4 sm:$0xff]   ;;  %v8212_v0 = vld [vmem:[#allocation11 + $0x2e8] ss:$16 sps:$4 sm:$0xff]  }
 0x2ef   :  { %v1222_v18 = vmax.f32 %v7954_v3, 0.0  ;;  %2363 = vmatprep.subr.bf16.mxu0 %v8172_v13  ;;  %v8220_v13 = vld [vmem:[#allocation11 + $0x30c] ss:$16 sps:$4 sm:$0xff]  }
 0x2f0   :  { %v1223_v20 = vmax.f32 %v7955_v16, 0.0 }
 0x2f1   :  { %v1246_v51 = vpack.c.bf16 %v1222_v18, %v1220_v17 }
 0x2f2   :  { %v1247_v25 = vpack.c.bf16 %v1223_v20, %v1221_v21  ;;  %v1171_v52 = vpop.f32.mrb[60].mxu0 }
 0x2f3   :  { %v7956_v22 = vadd.f32 %v1171_v52, %v9813_v35  ;;  %v1173_v48 = vpop.f32.mrb[61].mxu0 }
 0x2f4   :  { %v7957_v19 = vadd.f32 %v1173_v48, %v9816_v36  ;;  %v1175_v23 = vpop.f32.mrb[62].mxu0  ;;  %7177 = vmatprep.mubr.msk.bf16.mxu1 %vm1357_vm4, %v1247_v25  ;;  %v8173_v48 = vld [vmem:[#allocation11 + $0x108] ss:$16 sps:$4 sm:$0xff]  }
 0x2f5   :  { %v7958_v24 = vadd.f32 %v1175_v23, %v9813_v35  ;;  %v1177_v26 = vpop.f32.mrb[63].mxu0  ;;  %1458 = vmatmul.mubr.bf16.gmra.mrb[56].mxu1 %v1246_v51  ;;  %v1224_v28 = vmax.f32 %v7956_v22, 0.0  ;;  %v8170_v51 = vld [vmem:[#allocation11 + $0x208] ss:$16 sps:$4 sm:$0xff]   ;;  %v8178_v22 = vld [vmem:[#allocation11 + $0x22c] ss:$16 sps:$4 sm:$0xff]  }
 0x2f6   :  { %v7959_v27 = vadd.f32 %v1177_v26, %v9816_v36  ;;  %v1225_v30 = vmax.f32 %v7957_v19, 0.0  ;;  %v8181_v23 = vld [vmem:[#allocation11 + $0x12c] ss:$16 sps:$4 sm:$0xff]   ;;  %v8176_v26 = vld [vmem:[#allocation11 + $0x228] ss:$16 sps:$4 sm:$0xff]  }
 0x2f7   :  { %v1226_v29 = vmax.f32 %v7958_v24, 0.0 }
 0x2f8   :  { %v1227_v31 = vmax.f32 %v7959_v27, 0.0 }
 0x2f9   :  { %v1248_v32 = vpack.c.bf16 %v1226_v29, %v1224_v28  ;;  %v8184_v28 = vld [vmem:[#allocation11 + $0x24c] ss:$16 sps:$4 sm:$0xff]  }
 0x2fa   :  { %v1249_v33 = vpack.c.bf16 %v1227_v31, %v1225_v30  ;;  %v1181_v34 = vpop.f32.mrb[64].mxu0  ;;  %v8179_v30 = vld [vmem:[#allocation11 + $0x128] ss:$16 sps:$4 sm:$0xff]  }
 0x2fb   :  { %v7960_v37 = vadd.f32 %v1181_v34, %v9813_v35  ;;  %v1183_v38 = vpop.f32.mrb[65].mxu0  ;;  %v8190_v34 = vld [vmem:[#allocation11 + $0x26c] ss:$16 sps:$4 sm:$0xff]  }
 0x2fc   :  { %v7961_v39 = vadd.f32 %v1183_v38, %v9816_v36  ;;  %v1185_v40 = vpop.f32.mrb[66].mxu0  ;;  %7178 = vmatprep.mubr.msk.bf16.mxu1 %vm1357_vm4, %v1249_v33  ;;  %v8182_v33 = vld [vmem:[#allocation11 + $0x248] ss:$16 sps:$4 sm:$0xff]   ;;  %v8193_v38 = vld [vmem:[#allocation11 + $0x16c] ss:$16 sps:$4 sm:$0xff]  }
 0x2fd   :  { %v7962_v41 = vadd.f32 %v1185_v40, %v9813_v35  ;;  %v1187_v42 = vpop.f32.mrb[67].mxu0  ;;  %1466 = vmatmul.mubr.bf16.gmra.mrb[60].mxu1 %v1248_v32  ;;  %v1228_v44 = vmax.f32 %v7960_v37, 0.0  ;;  %v8187_v32 = vld [vmem:[#allocation11 + $0x14c] ss:$16 sps:$4 sm:$0xff]   ;;  %v8185_v37 = vld [vmem:[#allocation11 + $0x148] ss:$16 sps:$4 sm:$0xff]  }
 0x2fe   :  { %v7963_v43 = vadd.f32 %v1187_v42, %v9816_v36  ;;  %v1229_v46 = vmax.f32 %v7961_v39, 0.0  ;;  %v8188_v40 = vld [vmem:[#allocation11 + $0x268] ss:$16 sps:$4 sm:$0xff]   ;;  %v8196_v42 = vld [vmem:[#allocation11 + $0x28c] ss:$16 sps:$4 sm:$0xff]  }
 0x2ff   :  { %v1230_v45 = vmax.f32 %v7962_v41, 0.0 }
 0x300   :  { %v1231_v47 = vmax.f32 %v7963_v43, 0.0 }
 0x301   :  { %v1250_v49 = vpack.c.bf16 %v1230_v45, %v1228_v44  ;;  %v8191_v44 = vld [vmem:[#allocation11 + $0x168] ss:$16 sps:$4 sm:$0xff]  }
 0x302   :  { %v1251_v50 = vpack.c.bf16 %v1231_v47, %v1229_v46  ;;  %v1191_v53 = vpop.f32.mrb[68].mxu0  ;;  %v8199_v46 = vld [vmem:[#allocation11 + $0x18c] ss:$16 sps:$4 sm:$0xff]   ;;  %v8194_v47 = vld [vmem:[#allocation11 + $0x288] ss:$16 sps:$4 sm:$0xff]  }
 0x303   :  { %v7964_v54 = vadd.f32 %v1191_v53, %v9813_v35  ;;  %v1193_v55 = vpop.f32.mrb[69].mxu0  ;;  %v8205_v53 = vld [vmem:[#allocation11 + $0x1ac] ss:$16 sps:$4 sm:$0xff]  }
 0x304   :  { %v7965_v56 = vadd.f32 %v1193_v55, %v9816_v36  ;;  %v1195_v57 = vpop.f32.mrb[70].mxu0  ;;  %7179 = vmatprep.mubr.msk.bf16.mxu1 %vm1357_vm4, %v1251_v50  ;;  %v8197_v50 = vld [vmem:[#allocation11 + $0x188] ss:$16 sps:$4 sm:$0xff]  }
 0x305   :  { %v7966_v58 = vadd.f32 %v1195_v57, %v9813_v35  ;;  %v1197_v59 = vpop.f32.mrb[71].mxu0  ;;  %1474 = vmatmul.mubr.bf16.gmra.mrb[64].mxu1 %v1250_v49  ;;  %v1232_v4 = vmax.f32 %v7964_v54, 0.0  ;;  %v8167_v35 = vld [vmem:[#allocation11 + $0x1e0] ss:$16 sps:$4 sm:$0xff]   ;;  %v8202_v49 = vld [vmem:[#allocation11 + $0x2ac] ss:$16 sps:$4 sm:$0xff]  }
 0x306   :  { %v7967_v61 = vadd.f32 %v1197_v59, %v9816_v36  ;;  %v1233_v6 = vmax.f32 %v7965_v56, 0.0  ;;  %1820 = vmatpush1.bf16.msra.mxu1 %v8167_v35  ;;  %v8175_v36 = vld [vmem:[#allocation11 + $0x10c] ss:$16 sps:$4 sm:$0xff]   ;;  %v8200_v55 = vld [vmem:[#allocation11 + $0x2a8] ss:$16 sps:$4 sm:$0xff]  }
 0x307   :  { %v1234_v5 = vmax.f32 %v7966_v58, 0.0  ;;  %1846 = vmatprep.subr.bf16.mxu1 %v8175_v36  ;;  %v8208_v57 = vld [vmem:[#allocation11 + $0x2cc] ss:$16 sps:$4 sm:$0xff]   ;;  %v8203_v59 = vld [vmem:[#allocation11 + $0x1a8] ss:$16 sps:$4 sm:$0xff]  }
 0x308   :  { %v1235_v7 = vmax.f32 %v7967_v61, 0.0 }
 0x309   :  { %v1252_v8 = vpack.c.bf16 %v1234_v5, %v1232_v4  ;;  %v8211_v4 = vld [vmem:[#allocation11 + $0x1cc] ss:$16 sps:$4 sm:$0xff]   ;;  %v8206_v5 = vld [vmem:[#allocation11 + $0x2c8] ss:$16 sps:$4 sm:$0xff]  }
 0x30a   :  { %v1253_v9 = vpack.c.bf16 %v1235_v7, %v1233_v6  ;;  %v8214_v7 = vld [vmem:[#allocation11 + $0x2ec] ss:$16 sps:$4 sm:$0xff]  }
 0x30c   :  { %7180 = vmatprep.mubr.msk.bf16.mxu1 %vm1357_vm4, %v1253_v9  ;;  %v8217_v9 = vld [vmem:[#allocation11 + $0x1ec] ss:$16 sps:$4 sm:$0xff]  }
 0x30d   :  { %1482 = vmatmul.mubr.bf16.gmra.mrb[68].mxu1 %v1252_v8  ;;  %v8209_v8 = vld [vmem:[#allocation11 + $0x1c8] ss:$16 sps:$4 sm:$0xff]  }
 0x30e   :  { %1837 = vmatprep.mubr.bf16.mxu1 %v9272_v1 }
 0x3a0   :  { %v1419_v3 = vpop.f32.mrb[36].mxu1 }
 0x3a1   :  { %v1420_v15 = vadd.f32 %v9864_v14, %v1419_v3  ;;  %v1421_v16 = vpop.f32.mrb[37].mxu1  ;;  %v8215_v3 = vld [vmem:[#allocation11 + $0x1e8] ss:$16 sps:$4 sm:$0xff]  }
 0x3a2   :  { %v1422_v17 = vpop.f32.mrb[38].mxu1  ;;  %v8223_v16 = vld [vmem:[#allocation11 + $0x4] ss:$16 sps:$4 sm:$0xff]  }
 0x3a3   :  { %v1490_v18 = vmax.f32 %v1420_v15, 0.0  ;;  %v1423_v21 = vadd.f32 %v9864_v14, %v1422_v17  ;;  %v1424_v20 = vpop.f32.mrb[39].mxu1  ;;  %v8218_v17 = vld [vmem:[#allocation11 + $0x308] ss:$16 sps:$4 sm:$0xff]  }
 0x3a4   :  { %v8221_v20 = vld [vmem:[#allocation11] ss:$16 sps:$4 sm:$0xff]  }
 0x3a5   :  { %v9868_v25 = vpack.c.bf16 %v1490_v18, %v1490_v18  ;;  %v1491_v52 = vmax.f32 %v1423_v21, 0.0  ;;  %v8226_v21 = vld [vmem:[#allocation11 + $0x32c] ss:$16 sps:$4 sm:$0xff]  }
 0x3a7   :  { %v9870_v19 = vpack.c.bf16 %v1491_v52, %v1491_v52  ;;  %2121 = vmatmul.mubr.bf16.vlgmr.msra.gmra.mrb[72].mxu0 %v9868_v25 }
 0x3a8   :  { %2364 = vmatpush1.bf16.msra.mxu0 %v8170_v51  ;;  %v1427_v24 = vpop.f32.mrb[40].mxu1  ;;  %2395 = vmatprep.mubr.bf16.mxu0 %v9272_v1  ;;  %v8229_v51 = vld [vmem:[#allocation11 + $0x24] ss:$16 sps:$4 sm:$0xff]  }
 0x3a9   :  { %v1429_v27 = vpop.f32.mrb[41].mxu1  ;;  %1838 = vmatmul.mubr.bf16.vlgmr.msra.gmra.mrb[72].mxu1 %v9870_v19  ;;  %2365 = vmatprep.subr.bf16.mxu0 %v8178_v22  ;;  %v1428_v6 = vadd.f32 %v9864_v14, %v1427_v24  ;;  %v8224_v22 = vld [vmem:[#allocation11 + $0x328] ss:$16 sps:$4 sm:$0xff]  }
 0x3aa   :  { %1847 = vmatpush1.bf16.msra.mxu1 %v8173_v48  ;;  %v9875_v29 = vpop.f32.mrb[42].mxu1  ;;  %1878 = vmatprep.mubr.bf16.mxu1 %v9272_v1 }
 0x3ab   :  { %v1432_v31 = vpop.f32.mrb[43].mxu1  ;;  %1848 = vmatprep.subr.bf16.mxu1 %v8181_v23  ;;  %v1492_v12 = vmax.f32 %v1428_v6, 0.0  ;;  %v8232_v23 = vld [vmem:[#allocation11 + $0x34c] ss:$16 sps:$4 sm:$0xff]   ;;  %v1431_v6 = vadd.f32 %v9864_v14, %v9875_v29  ;;  %v8271_v29 = vld [vmem:[#allocation11 + $0x204] ss:$16 sps:$4 sm:$0xff]  }
 0x3ac   :  { %2366 = vmatpush1.bf16.msra.mxu0 %v8176_v26  ;;  %v8227_v26 = vld [vmem:[#allocation11 + $0x20] ss:$16 sps:$4 sm:$0xff]   ;;  %v8238_v31 = vld [vmem:[#allocation11 + $0x36c] ss:$16 sps:$4 sm:$0xff]  }
 0x3ad   :  { %2367 = vmatprep.subr.bf16.mxu0 %v8184_v28  ;;  %v9891_v18 = vpack.c.bf16 %v1492_v12, %v1492_v12  ;;  %v8235_v28 = vld [vmem:[#allocation11 + $0x44] ss:$16 sps:$4 sm:$0xff]   ;;  %v8260_v12 = vld [vmem:[#allocation11 + $0x3e8] ss:$16 sps:$4 sm:$0xff]  }
 0x3ae   :  { %1849 = vmatpush1.bf16.msra.mxu1 %v8179_v30  ;;  %v8230_v30 = vld [vmem:[#allocation11 + $0x348] ss:$16 sps:$4 sm:$0xff]  }
 0x3af   :  { %1850 = vmatprep.subr.bf16.mxu1 %v8187_v32  ;;  %v8233_v32 = vld [vmem:[#allocation11 + $0x40] ss:$16 sps:$4 sm:$0xff]  }
 0x3b0   :  { %2368 = vmatpush1.bf16.msra.mxu0 %v8182_v33  ;;  %v9878_v39 = vpop.f32.mrb[44].mxu1 }
 0x3b1   :  { %v1437_v41 = vpop.f32.mrb[45].mxu1  ;;  %2369 = vmatprep.subr.bf16.mxu0 %v8190_v34  ;;  %v8236_v34 = vld [vmem:[#allocation11 + $0x368] ss:$16 sps:$4 sm:$0xff]  }
 0x3b2   :  { %1851 = vmatpush1.bf16.msra.mxu1 %v8185_v37  ;;  %v9880_v43 = vpop.f32.mrb[46].mxu1  ;;  %v8239_v41 = vld [vmem:[#allocation11 + $0x60] ss:$16 sps:$4 sm:$0xff]  }
 0x3b3   :  { %v1440_v45 = vpop.f32.mrb[47].mxu1  ;;  %1852 = vmatprep.subr.bf16.mxu1 %v8193_v38  ;;  %v8244_v38 = vld [vmem:[#allocation11 + $0x38c] ss:$16 sps:$4 sm:$0xff]  }
 0x3b4   :  { %2370 = vmatpush1.bf16.msra.mxu0 %v8188_v40  ;;  %v8242_v45 = vld [vmem:[#allocation11 + $0x388] ss:$16 sps:$4 sm:$0xff]  }
 0x3b5   :  { %2371 = vmatprep.subr.bf16.mxu0 %v8196_v42 }
 0x3b6   :  { %1853 = vmatpush1.bf16.msra.mxu1 %v8191_v44  ;;  %v8247_v44 = vld [vmem:[#allocation11 + $0x84] ss:$16 sps:$4 sm:$0xff]  }
 0x3b7   :  { %1854 = vmatprep.subr.bf16.mxu1 %v8199_v46  ;;  %v8250_v46 = vld [vmem:[#allocation11 + $0x3ac] ss:$16 sps:$4 sm:$0xff]  }
 0x3b8   :  { %2372 = vmatpush1.bf16.msra.mxu0 %v8194_v47  ;;  %v9882_v54 = vpop.f32.mrb[48].mxu1  ;;  %v8245_v47 = vld [vmem:[#allocation11 + $0x80] ss:$16 sps:$4 sm:$0xff]  }
 0x3b9   :  { %v1445_v56 = vpop.f32.mrb[49].mxu1  ;;  %2373 = vmatprep.subr.bf16.mxu0 %v8202_v49  ;;  %v8253_v49 = vld [vmem:[#allocation11 + $0xa4] ss:$16 sps:$4 sm:$0xff]  }
 0x3ba   :  { %1855 = vmatpush1.bf16.msra.mxu1 %v8197_v50  ;;  %v9884_v58 = vpop.f32.mrb[50].mxu1  ;;  %v8256_v56 = vld [vmem:[#allocation11 + $0x3cc] ss:$16 sps:$4 sm:$0xff]  }
 0x3bb   :  { %v1448_v61 = vpop.f32.mrb[51].mxu1  ;;  %1856 = vmatprep.subr.bf16.mxu1 %v8205_v53  ;;  %v8248_v53 = vld [vmem:[#allocation11 + $0x3a8] ss:$16 sps:$4 sm:$0xff]  }
 0x3bc   :  { %2374 = vmatpush1.bf16.msra.mxu0 %v8200_v55 }
 0x3bd   :  { %2375 = vmatprep.subr.bf16.mxu0 %v8208_v57 }
 0x3be   :  { %1857 = vmatpush1.bf16.msra.mxu1 %v8203_v59  ;;  %v8251_v59 = vld [vmem:[#allocation11 + $0xa0] ss:$16 sps:$4 sm:$0xff]  }
 0x3bf   :  { %1858 = vmatprep.subr.bf16.mxu1 %v8211_v4  ;;  %v8259_v4 = vld [vmem:[#allocation11 + $0xc4] ss:$16 sps:$4 sm:$0xff]  }
 0x3c0   :  { %2376 = vmatpush1.bf16.msra.mxu0 %v8206_v5  ;;  %v9887_v10 = vpop.f32.mrb[52].mxu1  ;;  %v8254_v5 = vld [vmem:[#allocation11 + $0x3c8] ss:$16 sps:$4 sm:$0xff]  }
 0x3c1   :  { %v1453_v35 = vpop.f32.mrb[53].mxu1  ;;  %2377 = vmatprep.subr.bf16.mxu0 %v8214_v7  ;;  %v8262_v7 = vld [vmem:[#allocation11 + $0x3ec] ss:$16 sps:$4 sm:$0xff]  }
 0x3c2   :  { %1859 = vmatpush1.bf16.msra.mxu1 %v8209_v8  ;;  %v9889_v36 = vpop.f32.mrb[54].mxu1  ;;  %v8257_v8 = vld [vmem:[#allocation11 + $0xc0] ss:$16 sps:$4 sm:$0xff]   ;;  %v1493_v35 = vmax.f32 %v1431_v6, 0.0 }
 0x3c3   :  { %v1456_v15 = vpop.f32.mrb[55].mxu1  ;;  %1860 = vmatprep.subr.bf16.mxu1 %v8217_v9  ;;  %v8265_v9 = vld [vmem:[#allocation11 + $0xe4] ss:$16 sps:$4 sm:$0xff]  }
 0x3c4   :  { %2378 = vmatpush1.bf16.msra.mxu0 %v8212_v0 }
 0x3c5   :  { %2642 = vmatprep.subr.bf16.mxu0 %v8220_v13 }
 0x3c6   :  { %1861 = vmatpush1.bf16.msra.mxu1 %v8215_v3  ;;  %v8268_v3 = vld [vmem:[#allocation11 + $0x40c] ss:$16 sps:$4 sm:$0xff]  }
 0x3c7   :  { %2396 = vmatmul.mubr.bf16.vlgmr.msra.gmra.mrb[76].mxu0 %v9891_v18  ;;  %2047 = vmatprep.subr.bf16.mxu1 %v8223_v16  ;;  %v8263_v16 = vld [vmem:[#allocation11 + $0xe0] ss:$16 sps:$4 sm:$0xff]  }
 0x3c8   :  { %2643 = vmatpush1.bf16.msra.mxu0 %v8218_v17  ;;  %v9894_v52 = vpop.f32.mrb[56].mxu1  ;;  %2674 = vmatprep.mubr.bf16.mxu0 %v9272_v1 }
 0x3c9   :  { %1879 = vmatmul.mubr.bf16.vlgmr.msra.gmra.mrb[76].mxu1 %v9870_v19  ;;  %v1461_v48 = vpop.f32.mrb[57].mxu1  ;;  %2644 = vmatprep.subr.bf16.mxu0 %v8226_v21  ;;  %v8241_v19 = vld [vmem:[#allocation11 + $0x64] ss:$16 sps:$4 sm:$0xff]   ;;  %v8266_v21 = vld [vmem:[#allocation11 + $0x408] ss:$16 sps:$4 sm:$0xff]  }
 0x3ca   :  { %2048 = vmatpush1.bf16.msra.mxu1 %v8221_v20  ;;  %v9898_v24 = vpop.f32.mrb[58].mxu1  ;;  %2079 = vmatprep.mubr.bf16.mxu1 %v9272_v1  ;;  %v9915_v20 = vpack.c.bf16 %v1493_v35, %v1493_v35  ;;  %v8277_v48 = vld [vmem:[#allocation11 + $0x224] ss:$16 sps:$4 sm:$0xff]  }
 0x3cb   :  { %v1464_v27 = vpop.f32.mrb[59].mxu1  ;;  %2049 = vmatprep.subr.bf16.mxu1 %v8229_v51  ;;  %v8274_v51 = vld [vmem:[#allocation11 + $0x42c] ss:$16 sps:$4 sm:$0xff]  }
 0x3cc   :  { %2645 = vmatpush1.bf16.msra.mxu0 %v8224_v22  ;;  %v8269_v22 = vld [vmem:[#allocation11 + $0x200] ss:$16 sps:$4 sm:$0xff]  }
 0x3cd   :  { %2646 = vmatprep.subr.bf16.mxu0 %v8232_v23  ;;  %v8272_v23 = vld [vmem:[#allocation11 + $0x428] ss:$16 sps:$4 sm:$0xff]   ;;  %v8275_v27 = vld [vmem:[#allocation11 + $0x220] ss:$16 sps:$4 sm:$0xff]  }
 0x3ce   :  { %2050 = vmatpush1.bf16.msra.mxu1 %v8227_v26  ;;  %v8280_v26 = vld [vmem:[#allocation11 + $0x44c] ss:$16 sps:$4 sm:$0xff]  }
 0x3cf   :  { %2051 = vmatprep.subr.bf16.mxu1 %v8235_v28  ;;  %v8283_v28 = vld [vmem:[#allocation11 + $0x244] ss:$16 sps:$4 sm:$0xff]  }
 0x3d0   :  { %2647 = vmatpush1.bf16.msra.mxu0 %v8230_v30  ;;  %v9901_v33 = vpop.f32.mrb[60].mxu1  ;;  %v8278_v30 = vld [vmem:[#allocation11 + $0x448] ss:$16 sps:$4 sm:$0xff]  }
 0x3d1   :  { %v1469_v37 = vpop.f32.mrb[61].mxu1  ;;  %2648 = vmatprep.subr.bf16.mxu0 %v8238_v31  ;;  %v8286_v31 = vld [vmem:[#allocation11 + $0x46c] ss:$16 sps:$4 sm:$0xff]  }
 0x3d2   :  { %2052 = vmatpush1.bf16.msra.mxu1 %v8233_v32  ;;  %v9903_v40 = vpop.f32.mrb[62].mxu1  ;;  %v8281_v32 = vld [vmem:[#allocation11 + $0x240] ss:$16 sps:$4 sm:$0xff]  }
 0x3d3   :  { %v1472_v42 = vpop.f32.mrb[63].mxu1  ;;  %2053 = vmatprep.subr.bf16.mxu1 %v8241_v19  ;;  %v8289_v19 = vld [vmem:[#allocation11 + $0x264] ss:$16 sps:$4 sm:$0xff]   ;;  %v8287_v37 = vld [vmem:[#allocation11 + $0x260] ss:$16 sps:$4 sm:$0xff]  }
 0x3d4   :  { %2649 = vmatpush1.bf16.msra.mxu0 %v8236_v34  ;;  %v8284_v34 = vld [vmem:[#allocation11 + $0x468] ss:$16 sps:$4 sm:$0xff]   ;;  %v8298_v42 = vld [vmem:[#allocation11 + $0x4ac] ss:$16 sps:$4 sm:$0xff]  }
 0x3d5   :  { %2650 = vmatprep.subr.bf16.mxu0 %v8244_v38  ;;  %v8295_v38 = vld [vmem:[#allocation11 + $0x284] ss:$16 sps:$4 sm:$0xff]  }
 0x3d6   :  { %2054 = vmatpush1.bf16.msra.mxu1 %v8239_v41  ;;  %v8290_v41 = vld [vmem:[#allocation11 + $0x488] ss:$16 sps:$4 sm:$0xff]  }
 0x3d7   :  { %2055 = vmatprep.subr.bf16.mxu1 %v8247_v44  ;;  %v8293_v44 = vld [vmem:[#allocation11 + $0x280] ss:$16 sps:$4 sm:$0xff]  }
 0x3d8   :  { %2651 = vmatpush1.bf16.msra.mxu0 %v8242_v45  ;;  %v9905_v50 = vpop.f32.mrb[64].mxu1  ;;  %v8301_v45 = vld [vmem:[#allocation11 + $0x2a4] ss:$16 sps:$4 sm:$0xff]  }
 0x3d9   :  { %v1477_v55 = vpop.f32.mrb[65].mxu1  ;;  %2652 = vmatprep.subr.bf16.mxu0 %v8250_v46  ;;  %v8296_v46 = vld [vmem:[#allocation11 + $0x4a8] ss:$16 sps:$4 sm:$0xff]  }
 0x3da   :  { %2056 = vmatpush1.bf16.msra.mxu1 %v8245_v47  ;;  %v9907_v57 = vpop.f32.mrb[66].mxu1  ;;  %v8304_v47 = vld [vmem:[#allocation11 + $0x4cc] ss:$16 sps:$4 sm:$0xff]   ;;  %v8302_v55 = vld [vmem:[#allocation11 + $0x4c8] ss:$16 sps:$4 sm:$0xff]  }
 0x3db   :  { %v1480_v61 = vpop.f32.mrb[67].mxu1  ;;  %2057 = vmatprep.subr.bf16.mxu1 %v8253_v49  ;;  %v8299_v49 = vld [vmem:[#allocation11 + $0x2a0] ss:$16 sps:$4 sm:$0xff]  }
 0x3dc   :  { %2653 = vmatpush1.bf16.msra.mxu0 %v8248_v53  ;;  %v8307_v53 = vld [vmem:[#allocation11 + $0x2c4] ss:$16 sps:$4 sm:$0xff]   ;;  %v8305_v61 = vld [vmem:[#allocation11 + $0x2c0] ss:$16 sps:$4 sm:$0xff]  }
 0x3dd   :  { %2654 = vmatprep.subr.bf16.mxu0 %v8256_v56  ;;  %v1436_v56 = vadd.f32 %v9864_v14, %v9878_v39  ;;  %v8322_v39 = vld [vmem:[#allocation11 + $0x52c] ss:$16 sps:$4 sm:$0xff]  }
 0x3de   :  { %2058 = vmatpush1.bf16.msra.mxu1 %v8251_v59  ;;  %v8310_v59 = vld [vmem:[#allocation11 + $0x4ec] ss:$16 sps:$4 sm:$0xff]  }
 0x3df   :  { %2059 = vmatprep.subr.bf16.mxu1 %v8259_v4  ;;  %v8313_v4 = vld [vmem:[#allocation11 + $0x2e4] ss:$16 sps:$4 sm:$0xff]   ;;  %v1494_v6 = vmax.f32 %v1436_v56, 0.0 }
 0x3e0   :  { %2655 = vmatpush1.bf16.msra.mxu0 %v8254_v5  ;;  %v9911_v0 = vpop.f32.mrb[68].mxu1  ;;  %v8308_v5 = vld [vmem:[#allocation11 + $0x4e8] ss:$16 sps:$4 sm:$0xff]   ;;  %v8367_v56 = vld [vmem:[#allocation11 + $0x404] ss:$16 sps:$4 sm:$0xff]  }
 0x3e1   :  { %v1485_v13 = vpop.f32.mrb[69].mxu1  ;;  %2656 = vmatprep.subr.bf16.mxu0 %v8262_v7  ;;  %v8316_v7 = vld [vmem:[#allocation11 + $0x50c] ss:$16 sps:$4 sm:$0xff]   ;;  %v9923_v35 = vpack.c.bf16 %v1494_v6, %v1494_v6  ;;  %v8368_v6 = vld [vmem:[#allocation11 + $0x628] ss:$16 sps:$4 sm:$0xff]  }
 0x3e2   :  { %2060 = vmatpush1.bf16.msra.mxu1 %v8257_v8  ;;  %v9913_v15 = vpop.f32.mrb[70].mxu1  ;;  %v8311_v8 = vld [vmem:[#allocation11 + $0x2e0] ss:$16 sps:$4 sm:$0xff]  }
 0x3e3   :  { %v1488_v17 = vpop.f32.mrb[71].mxu1  ;;  %2061 = vmatprep.subr.bf16.mxu1 %v8265_v9  ;;  %v8319_v9 = vld [vmem:[#allocation11 + $0x304] ss:$16 sps:$4 sm:$0xff]   ;;  %v8317_v13 = vld [vmem:[#allocation11 + $0x300] ss:$16 sps:$4 sm:$0xff]  }
 0x3e4   :  { %2657 = vmatpush1.bf16.msra.mxu0 %v8260_v12  ;;  %v8314_v12 = vld [vmem:[#allocation11 + $0x508] ss:$16 sps:$4 sm:$0xff]   ;;  %v8328_v17 = vld [vmem:[#allocation11 + $0x54c] ss:$16 sps:$4 sm:$0xff]  }
 0x3e5   :  { %2921 = vmatprep.subr.bf16.mxu0 %v8268_v3  ;;  %v8325_v3 = vld [vmem:[#allocation11 + $0x324] ss:$16 sps:$4 sm:$0xff]  }
 0x3e6   :  { %2062 = vmatpush1.bf16.msra.mxu1 %v8263_v16  ;;  %v8320_v16 = vld [vmem:[#allocation11 + $0x528] ss:$16 sps:$4 sm:$0xff]  }
 0x3e7   :  { %2675 = vmatmul.mubr.bf16.vlgmr.msra.gmra.mrb[80].mxu0 %v9915_v20  ;;  %2322 = vmatprep.subr.bf16.mxu1 %v8271_v29  ;;  %v8323_v29 = vld [vmem:[#allocation11 + $0x320] ss:$16 sps:$4 sm:$0xff]  }
 0x3e8   :  { %2922 = vmatpush1.bf16.msra.mxu0 %v8266_v21  ;;  %2953 = vmatprep.mubr.bf16.mxu0 %v9272_v1  ;;  %v8331_v21 = vld [vmem:[#allocation11 + $0x344] ss:$16 sps:$4 sm:$0xff]  }
 0x3e9   :  { %2080 = vmatmul.mubr.bf16.vlgmr.msra.gmra.mrb[80].mxu1 %v9868_v25  ;;  %2923 = vmatprep.subr.bf16.mxu0 %v8274_v51  ;;  %v8292_v25 = vld [vmem:[#allocation11 + $0x48c] ss:$16 sps:$4 sm:$0xff]   ;;  %v8326_v51 = vld [vmem:[#allocation11 + $0x548] ss:$16 sps:$4 sm:$0xff]  }
 0x3ea   :  { %2323 = vmatpush1.bf16.msra.mxu1 %v8269_v22  ;;  %2354 = vmatprep.mubr.bf16.mxu1 %v9272_v1  ;;  %v8334_v22 = vld [vmem:[#allocation11 + $0x56c] ss:$16 sps:$4 sm:$0xff]  }
 0x3eb   :  { %2324 = vmatprep.subr.bf16.mxu1 %v8277_v48  ;;  %v8329_v48 = vld [vmem:[#allocation11 + $0x340] ss:$16 sps:$4 sm:$0xff]  }
 0x3ec   :  { %2924 = vmatpush1.bf16.msra.mxu0 %v8272_v23  ;;  %v8337_v23 = vld [vmem:[#allocation11 + $0x364] ss:$16 sps:$4 sm:$0xff]  }
 0x3ed   :  { %2925 = vmatprep.subr.bf16.mxu0 %v8280_v26  ;;  %v8332_v26 = vld [vmem:[#allocation11 + $0x568] ss:$16 sps:$4 sm:$0xff]  }
 0x3ee   :  { %2325 = vmatpush1.bf16.msra.mxu1 %v8275_v27  ;;  %v8335_v27 = vld [vmem:[#allocation11 + $0x360] ss:$16 sps:$4 sm:$0xff]  }
 0x3ef   :  { %2326 = vmatprep.subr.bf16.mxu1 %v8283_v28  ;;  %v8343_v28 = vld [vmem:[#allocation11 + $0x384] ss:$16 sps:$4 sm:$0xff]  }
 0x3f0   :  { %2926 = vmatpush1.bf16.msra.mxu0 %v8278_v30  ;;  %v8338_v30 = vld [vmem:[#allocation11 + $0x588] ss:$16 sps:$4 sm:$0xff]  }
 0x3f1   :  { %2927 = vmatprep.subr.bf16.mxu0 %v8286_v31  ;;  %v8346_v31 = vld [vmem:[#allocation11 + $0x5ac] ss:$16 sps:$4 sm:$0xff]  }
 0x3f2   :  { %2327 = vmatpush1.bf16.msra.mxu1 %v8281_v32  ;;  %v8341_v32 = vld [vmem:[#allocation11 + $0x380] ss:$16 sps:$4 sm:$0xff]  }
 0x3f3   :  { %2328 = vmatprep.subr.bf16.mxu1 %v8289_v19  ;;  %v8349_v19 = vld [vmem:[#allocation11 + $0x3a4] ss:$16 sps:$4 sm:$0xff]  }
 0x3f4   :  { %2928 = vmatpush1.bf16.msra.mxu0 %v8284_v34  ;;  %v8344_v34 = vld [vmem:[#allocation11 + $0x5a8] ss:$16 sps:$4 sm:$0xff]  }
 0x3f5   :  { %2929 = vmatprep.subr.bf16.mxu0 %v8292_v25  ;;  %v8352_v25 = vld [vmem:[#allocation11 + $0x5cc] ss:$16 sps:$4 sm:$0xff]  }
 0x3f6   :  { %2329 = vmatpush1.bf16.msra.mxu1 %v8287_v37  ;;  %v8347_v37 = vld [vmem:[#allocation11 + $0x3a0] ss:$16 sps:$4 sm:$0xff]  }
 0x3f7   :  { %2330 = vmatprep.subr.bf16.mxu1 %v8295_v38  ;;  %v8355_v38 = vld [vmem:[#allocation11 + $0x3c4] ss:$16 sps:$4 sm:$0xff]  }
 0x3f8   :  { %2930 = vmatpush1.bf16.msra.mxu0 %v8290_v41  ;;  %v8350_v41 = vld [vmem:[#allocation11 + $0x5c8] ss:$16 sps:$4 sm:$0xff]  }
 0x3f9   :  { %2931 = vmatprep.subr.bf16.mxu0 %v8298_v42  ;;  %v1439_v42 = vadd.f32 %v9864_v14, %v9880_v43  ;;  %v8370_v43 = vld [vmem:[#allocation11 + $0x62c] ss:$16 sps:$4 sm:$0xff]  }
 0x3fa   :  { %2331 = vmatpush1.bf16.msra.mxu1 %v8293_v44  ;;  %v8358_v44 = vld [vmem:[#allocation11 + $0x5ec] ss:$16 sps:$4 sm:$0xff]  }
 0x3fb   :  { %2332 = vmatprep.subr.bf16.mxu1 %v8301_v45  ;;  %v8353_v45 = vld [vmem:[#allocation11 + $0x3c0] ss:$16 sps:$4 sm:$0xff]  }
 0x3fc   :  { %2932 = vmatpush1.bf16.msra.mxu0 %v8296_v46  ;;  %v8361_v46 = vld [vmem:[#allocation11 + $0x3e4] ss:$16 sps:$4 sm:$0xff]  }
 0x3fd   :  { %2933 = vmatprep.subr.bf16.mxu0 %v8304_v47  ;;  %v8356_v47 = vld [vmem:[#allocation11 + $0x5e8] ss:$16 sps:$4 sm:$0xff]  }
 0x3fe   :  { %2333 = vmatpush1.bf16.msra.mxu1 %v8299_v49  ;;  %v1495_v49 = vmax.f32 %v1439_v42, 0.0  ;;  %v8410_v42 = vld [vmem:[#allocation11 + $0x708] ss:$16 sps:$4 sm:$0xff]  }
 0x3ff   :  { %2334 = vmatprep.subr.bf16.mxu1 %v8307_v53  ;;  %v8364_v53 = vld [vmem:[#allocation11 + $0x60c] ss:$16 sps:$4 sm:$0xff]  }
 0x400   :  { %2934 = vmatpush1.bf16.msra.mxu0 %v8302_v55  ;;  %v8359_v55 = vld [vmem:[#allocation11 + $0x3e0] ss:$16 sps:$4 sm:$0xff]  }
 0x401   :  { %2935 = vmatprep.subr.bf16.mxu0 %v8310_v59  ;;  %v8362_v59 = vld [vmem:[#allocation11 + $0x608] ss:$16 sps:$4 sm:$0xff]  }
 0x402   :  { %2335 = vmatpush1.bf16.msra.mxu1 %v8305_v61  ;;  %v9931_v61 = vpack.c.bf16 %v1495_v49, %v1495_v49  ;;  %v8424_v49 = vld [vmem:[#allocation11 + $0x74c] ss:$16 sps:$4 sm:$0xff]  }
 0x403   :  { %2336 = vmatprep.subr.bf16.mxu1 %v8313_v4  ;;  %v8365_v4 = vld [vmem:[#allocation11 + $0x400] ss:$16 sps:$4 sm:$0xff]  }
 0x404   :  { %2936 = vmatpush1.bf16.msra.mxu0 %v8308_v5  ;;  %v8373_v5 = vld [vmem:[#allocation11 + $0x424] ss:$16 sps:$4 sm:$0xff]  }
 0x405   :  { %3200 = vmatprep.subr.bf16.mxu0 %v8316_v7  ;;  %v8376_v7 = vld [vmem:[#allocation11 + $0x64c] ss:$16 sps:$4 sm:$0xff]  }
 0x406   :  { %2337 = vmatpush1.bf16.msra.mxu1 %v8311_v8  ;;  %v8371_v8 = vld [vmem:[#allocation11 + $0x420] ss:$16 sps:$4 sm:$0xff]  }
 0x407   :  { %2954 = vmatmul.mubr.bf16.vlgmr.msra.gmra.mrb[84].mxu0 %v9923_v35  ;;  %2601 = vmatprep.subr.bf16.mxu1 %v8319_v9  ;;  %v8379_v9 = vld [vmem:[#allocation11 + $0x444] ss:$16 sps:$4 sm:$0xff]  }
 0x408   :  { %3201 = vmatpush1.bf16.msra.mxu0 %v8314_v12  ;;  %3232 = vmatprep.mubr.bf16.mxu0 %v9272_v1  ;;  %v8374_v12 = vld [vmem:[#allocation11 + $0x648] ss:$16 sps:$4 sm:$0xff]  }
 0x409   :  { %2355 = vmatmul.mubr.bf16.vlgmr.msra.gmra.mrb[84].mxu1 %v9891_v18  ;;  %3202 = vmatprep.subr.bf16.mxu0 %v8322_v39  ;;  %v8340_v18 = vld [vmem:[#allocation11 + $0x58c] ss:$16 sps:$4 sm:$0xff]  }
 0x40a   :  { %2602 = vmatpush1.bf16.msra.mxu1 %v8317_v13  ;;  %2633 = vmatprep.mubr.bf16.mxu1 %v9272_v1  ;;  %v8382_v39 = vld [vmem:[#allocation11 + $0x66c] ss:$16 sps:$4 sm:$0xff]   ;;  %v8377_v13 = vld [vmem:[#allocation11 + $0x440] ss:$16 sps:$4 sm:$0xff]  }
 0x40b   :  { %2603 = vmatprep.subr.bf16.mxu1 %v8325_v3  ;;  %v8385_v3 = vld [vmem:[#allocation11 + $0x464] ss:$16 sps:$4 sm:$0xff]  }
 0x40c   :  { %3203 = vmatpush1.bf16.msra.mxu0 %v8320_v16  ;;  %v8380_v16 = vld [vmem:[#allocation11 + $0x668] ss:$16 sps:$4 sm:$0xff]  }
 0x40d   :  { %3204 = vmatprep.subr.bf16.mxu0 %v8328_v17  ;;  %v8383_v17 = vld [vmem:[#allocation11 + $0x460] ss:$16 sps:$4 sm:$0xff]  }
 0x40e   :  { %2604 = vmatpush1.bf16.msra.mxu1 %v8323_v29  ;;  %v8391_v29 = vld [vmem:[#allocation11 + $0x484] ss:$16 sps:$4 sm:$0xff]  }
 0x40f   :  { %2605 = vmatprep.subr.bf16.mxu1 %v8331_v21  ;;  %v8386_v21 = vld [vmem:[#allocation11 + $0x688] ss:$16 sps:$4 sm:$0xff]  }
 0x410   :  { %3205 = vmatpush1.bf16.msra.mxu0 %v8326_v51  ;;  %v8394_v51 = vld [vmem:[#allocation11 + $0x6ac] ss:$16 sps:$4 sm:$0xff]  }
 0x411   :  { %3206 = vmatprep.subr.bf16.mxu0 %v8334_v22  ;;  %v8389_v22 = vld [vmem:[#allocation11 + $0x480] ss:$16 sps:$4 sm:$0xff]  }
 0x412   :  { %2606 = vmatpush1.bf16.msra.mxu1 %v8329_v48  ;;  %v8397_v48 = vld [vmem:[#allocation11 + $0x4a4] ss:$16 sps:$4 sm:$0xff]  }
 0x413   :  { %2607 = vmatprep.subr.bf16.mxu1 %v8337_v23  ;;  %v8392_v23 = vld [vmem:[#allocation11 + $0x6a8] ss:$16 sps:$4 sm:$0xff]  }
 0x414   :  { %3207 = vmatpush1.bf16.msra.mxu0 %v8332_v26  ;;  %v8400_v26 = vld [vmem:[#allocation11 + $0x6cc] ss:$16 sps:$4 sm:$0xff]  }
 0x415   :  { %3208 = vmatprep.subr.bf16.mxu0 %v8340_v18  ;;  %v8395_v18 = vld [vmem:[#allocation11 + $0x4a0] ss:$16 sps:$4 sm:$0xff]  }
 0x416   :  { %2608 = vmatpush1.bf16.msra.mxu1 %v8335_v27  ;;  %v8403_v27 = vld [vmem:[#allocation11 + $0x4c4] ss:$16 sps:$4 sm:$0xff]  }
 0x417   :  { %2609 = vmatprep.subr.bf16.mxu1 %v8343_v28  ;;  %v8398_v28 = vld [vmem:[#allocation11 + $0x6c8] ss:$16 sps:$4 sm:$0xff]  }
 0x418   :  { %3209 = vmatpush1.bf16.msra.mxu0 %v8338_v30  ;;  %v1444_v30 = vadd.f32 %v9864_v14, %v9882_v54  ;;  %v8418_v54 = vld [vmem:[#allocation11 + $0x72c] ss:$16 sps:$4 sm:$0xff]  }
 0x419   :  { %3210 = vmatprep.subr.bf16.mxu0 %v8346_v31  ;;  %v8406_v31 = vld [vmem:[#allocation11 + $0x6ec] ss:$16 sps:$4 sm:$0xff]  }
 0x41a   :  { %2610 = vmatpush1.bf16.msra.mxu1 %v8341_v32  ;;  %v8401_v32 = vld [vmem:[#allocation11 + $0x4c0] ss:$16 sps:$4 sm:$0xff]  }
 0x41b   :  { %2611 = vmatprep.subr.bf16.mxu1 %v8349_v19  ;;  %v8409_v19 = vld [vmem:[#allocation11 + $0x4e4] ss:$16 sps:$4 sm:$0xff]  }
 0x41c   :  { %3211 = vmatpush1.bf16.msra.mxu0 %v8344_v34  ;;  %v8404_v34 = vld [vmem:[#allocation11 + $0x6e8] ss:$16 sps:$4 sm:$0xff]  }
 0x41d   :  { %3212 = vmatprep.subr.bf16.mxu0 %v8352_v25  ;;  %v1496_v25 = vmax.f32 %v1444_v30, 0.0 }
 0x41e   :  { %2612 = vmatpush1.bf16.msra.mxu1 %v8347_v37  ;;  %v8412_v37 = vld [vmem:[#allocation11 + $0x70c] ss:$16 sps:$4 sm:$0xff]  }
 0x41f   :  { %2613 = vmatprep.subr.bf16.mxu1 %v8355_v38  ;;  %v8407_v38 = vld [vmem:[#allocation11 + $0x4e0] ss:$16 sps:$4 sm:$0xff]  }
 0x420   :  { %3213 = vmatpush1.bf16.msra.mxu0 %v8350_v41  ;;  %v8415_v41 = vld [vmem:[#allocation11 + $0x504] ss:$16 sps:$4 sm:$0xff]  }
 0x421   :  { %3214 = vmatprep.subr.bf16.mxu0 %v8358_v44  ;;  %v9939_v44 = vpack.c.bf16 %v1496_v25, %v1496_v25  ;;  %v8475_v25 = vld [vmem:[#allocation11 + $0x644] ss:$16 sps:$4 sm:$0xff]  }
 0x422   :  { %2614 = vmatpush1.bf16.msra.mxu1 %v8353_v45  ;;  %v8413_v45 = vld [vmem:[#allocation11 + $0x500] ss:$16 sps:$4 sm:$0xff]  }
 0x423   :  { %2615 = vmatprep.subr.bf16.mxu1 %v8361_v46  ;;  %v8421_v46 = vld [vmem:[#allocation11 + $0x524] ss:$16 sps:$4 sm:$0xff]  }
 0x424   :  { %3215 = vmatpush1.bf16.msra.mxu0 %v8356_v47  ;;  %v8416_v47 = vld [vmem:[#allocation11 + $0x728] ss:$16 sps:$4 sm:$0xff]  }
 0x425   :  { %3479 = vmatprep.subr.bf16.mxu0 %v8364_v53  ;;  %v8419_v53 = vld [vmem:[#allocation11 + $0x520] ss:$16 sps:$4 sm:$0xff]  }
 0x426   :  { %2616 = vmatpush1.bf16.msra.mxu1 %v8359_v55  ;;  %v8427_v55 = vld [vmem:[#allocation11 + $0x544] ss:$16 sps:$4 sm:$0xff]  }
 0x427   :  { %3233 = vmatmul.mubr.bf16.vlgmr.msra.gmra.mrb[88].mxu0 %v9931_v61  ;;  %2880 = vmatprep.subr.bf16.mxu1 %v8367_v56  ;;  %v8422_v56 = vld [vmem:[#allocation11 + $0x748] ss:$16 sps:$4 sm:$0xff]  }
 0x428   :  { %3480 = vmatpush1.bf16.msra.mxu0 %v8362_v59  ;;  %3511 = vmatprep.mubr.bf16.mxu0 %v9272_v1  ;;  %v8430_v59 = vld [vmem:[#allocation11 + $0x76c] ss:$16 sps:$4 sm:$0xff]  }
 0x429   :  { %2634 = vmatmul.mubr.bf16.vlgmr.msra.gmra.mrb[88].mxu1 %v9915_v20  ;;  %3481 = vmatprep.subr.bf16.mxu0 %v8370_v43  ;;  %v8388_v20 = vld [vmem:[#allocation11 + $0x68c] ss:$16 sps:$4 sm:$0xff]   ;;  %v8425_v43 = vld [vmem:[#allocation11 + $0x540] ss:$16 sps:$4 sm:$0xff]  }
 0x42a   :  { %2881 = vmatpush1.bf16.msra.mxu1 %v8365_v4  ;;  %2912 = vmatprep.mubr.bf16.mxu1 %v9272_v1  ;;  %v8433_v4 = vld [vmem:[#allocation11 + $0x564] ss:$16 sps:$4 sm:$0xff]  }
 0x42b   :  { %2882 = vmatprep.subr.bf16.mxu1 %v8373_v5  ;;  %v8428_v5 = vld [vmem:[#allocation11 + $0x768] ss:$16 sps:$4 sm:$0xff]  }
 0x42c   :  { %3482 = vmatpush1.bf16.msra.mxu0 %v8368_v6  ;;  %v8431_v6 = vld [vmem:[#allocation11 + $0x560] ss:$16 sps:$4 sm:$0xff]  }
 0x42d   :  { %3483 = vmatprep.subr.bf16.mxu0 %v8376_v7  ;;  %v8439_v7 = vld [vmem:[#allocation11 + $0x584] ss:$16 sps:$4 sm:$0xff]  }
 0x42e   :  { %2883 = vmatpush1.bf16.msra.mxu1 %v8371_v8  ;;  %v8434_v8 = vld [vmem:[#allocation11 + $0x788] ss:$16 sps:$4 sm:$0xff]  }
 0x42f   :  { %2884 = vmatprep.subr.bf16.mxu1 %v8379_v9  ;;  %v8442_v9 = vld [vmem:[#allocation11 + $0x7ac] ss:$16 sps:$4 sm:$0xff]  }
 0x430   :  { %3484 = vmatpush1.bf16.msra.mxu0 %v8374_v12  ;;  %v8437_v12 = vld [vmem:[#allocation11 + $0x580] ss:$16 sps:$4 sm:$0xff]  }
 0x431   :  { %3485 = vmatprep.subr.bf16.mxu0 %v8382_v39  ;;  %v8445_v39 = vld [vmem:[#allocation11 + $0x5a4] ss:$16 sps:$4 sm:$0xff]  }
 0x432   :  { %2885 = vmatpush1.bf16.msra.mxu1 %v8377_v13  ;;  %v8440_v13 = vld [vmem:[#allocation11 + $0x7a8] ss:$16 sps:$4 sm:$0xff]  }
 0x433   :  { %2886 = vmatprep.subr.bf16.mxu1 %v8385_v3  ;;  %v8448_v3 = vld [vmem:[#allocation11 + $0x7cc] ss:$16 sps:$4 sm:$0xff]  }
 0x434   :  { %3486 = vmatpush1.bf16.msra.mxu0 %v8380_v16  ;;  %v8443_v16 = vld [vmem:[#allocation11 + $0x5a0] ss:$16 sps:$4 sm:$0xff]  }
 0x435   :  { %3487 = vmatprep.subr.bf16.mxu0 %v8388_v20  ;;  %v8451_v20 = vld [vmem:[#allocation11 + $0x5c4] ss:$16 sps:$4 sm:$0xff]  }
 0x436   :  { %2887 = vmatpush1.bf16.msra.mxu1 %v8383_v17  ;;  %v8446_v17 = vld [vmem:[#allocation11 + $0x7c8] ss:$16 sps:$4 sm:$0xff]  }
 0x437   :  { %2888 = vmatprep.subr.bf16.mxu1 %v8391_v29  ;;  %v1447_v29 = vadd.f32 %v9864_v14, %v9884_v58  ;;  %v8466_v14 = vld [vmem:[#allocation11 + $0x82c] ss:$16 sps:$4 sm:$0xff]   ;;  %v8461_v58 = vld [vmem:[#allocation11 + $0x600] ss:$16 sps:$4 sm:$0xff]  }
 0x438   :  { %3488 = vmatpush1.bf16.msra.mxu0 %v8386_v21  ;;  %v8454_v21 = vld [vmem:[#allocation11 + $0x7ec] ss:$16 sps:$4 sm:$0xff]  }
 0x439   :  { %3489 = vmatprep.subr.bf16.mxu0 %v8394_v51  ;;  %v8449_v51 = vld [vmem:[#allocation11 + $0x5c0] ss:$16 sps:$4 sm:$0xff]  }
 0x43a   :  { %2889 = vmatpush1.bf16.msra.mxu1 %v8389_v22  ;;  %v8457_v22 = vld [vmem:[#allocation11 + $0x5e4] ss:$16 sps:$4 sm:$0xff]  }
 0x43b   :  { %2890 = vmatprep.subr.bf16.mxu1 %v8397_v48  ;;  %v8452_v48 = vld [vmem:[#allocation11 + $0x7e8] ss:$16 sps:$4 sm:$0xff]  }
 0x43c   :  { %3490 = vmatpush1.bf16.msra.mxu0 %v8392_v23  ;;  %v1497_v23 = vmax.f32 %v1447_v29, 0.0  ;;  %v8505_v29 = vld [vmem:[#allocation11 + $0x6e4] ss:$16 sps:$4 sm:$0xff]  }
 0x43d   :  { %3491 = vmatprep.subr.bf16.mxu0 %v8400_v26  ;;  %v8460_v26 = vld [vmem:[#allocation11 + $0x80c] ss:$16 sps:$4 sm:$0xff]  }
 0x43e   :  { %2891 = vmatpush1.bf16.msra.mxu1 %v8395_v18  ;;  %v8455_v18 = vld [vmem:[#allocation11 + $0x5e0] ss:$16 sps:$4 sm:$0xff]   ;;  %v9947_v30 = vpack.c.bf16 %v1497_v23, %v1497_v23  ;;  %v8506_v23 = vld [vmem:[#allocation11 + $0x908] ss:$16 sps:$4 sm:$0xff]  }
 0x43f   :  { %2892 = vmatprep.subr.bf16.mxu1 %v8403_v27  ;;  %v8463_v27 = vld [vmem:[#allocation11 + $0x604] ss:$16 sps:$4 sm:$0xff]  }
 0x440   :  { %3492 = vmatpush1.bf16.msra.mxu0 %v8398_v28  ;;  %v8458_v28 = vld [vmem:[#allocation11 + $0x808] ss:$16 sps:$4 sm:$0xff]  }
 0x441   :  { %3493 = vmatprep.subr.bf16.mxu0 %v8406_v31  ;;  %v8469_v31 = vld [vmem:[#allocation11 + $0x624] ss:$16 sps:$4 sm:$0xff]  }
 0x442   :  { %2893 = vmatpush1.bf16.msra.mxu1 %v8401_v32  ;;  %v8464_v32 = vld [vmem:[#allocation11 + $0x828] ss:$16 sps:$4 sm:$0xff]  }
 0x443   :  { %2894 = vmatprep.subr.bf16.mxu1 %v8409_v19  ;;  %v8472_v19 = vld [vmem:[#allocation11 + $0x84c] ss:$16 sps:$4 sm:$0xff]  }
 0x444   :  { %3494 = vmatpush1.bf16.msra.mxu0 %v8404_v34  ;;  %v8467_v34 = vld [vmem:[#allocation11 + $0x620] ss:$16 sps:$4 sm:$0xff]  }
 0x445   :  { %3758 = vmatprep.subr.bf16.mxu0 %v8412_v37  ;;  %v8470_v37 = vld [vmem:[#allocation11 + $0x848] ss:$16 sps:$4 sm:$0xff]  }
 0x446   :  { %2895 = vmatpush1.bf16.msra.mxu1 %v8407_v38  ;;  %v8478_v38 = vld [vmem:[#allocation11 + $0x86c] ss:$16 sps:$4 sm:$0xff]  }
 0x447   :  { %3512 = vmatmul.mubr.bf16.vlgmr.msra.gmra.mrb[92].mxu0 %v9939_v44  ;;  %3159 = vmatprep.subr.bf16.mxu1 %v8415_v41  ;;  %v8473_v41 = vld [vmem:[#allocation11 + $0x640] ss:$16 sps:$4 sm:$0xff]  }
 0x448   :  { %3759 = vmatpush1.bf16.msra.mxu0 %v8410_v42  ;;  %3790 = vmatprep.mubr.bf16.mxu0 %v9272_v1  ;;  %v8481_v42 = vld [vmem:[#allocation11 + $0x664] ss:$16 sps:$4 sm:$0xff]  }
 0x449   :  { %2913 = vmatmul.mubr.bf16.vlgmr.msra.gmra.mrb[92].mxu1 %v9923_v35  ;;  %3760 = vmatprep.subr.bf16.mxu0 %v8418_v54  ;;  %v8436_v35 = vld [vmem:[#allocation11 + $0x78c] ss:$16 sps:$4 sm:$0xff]   ;;  %v8476_v54 = vld [vmem:[#allocation11 + $0x868] ss:$16 sps:$4 sm:$0xff]  }
 0x44a   :  { %3160 = vmatpush1.bf16.msra.mxu1 %v8413_v45  ;;  %3191 = vmatprep.mubr.bf16.mxu1 %v9272_v1  ;;  %v8479_v45 = vld [vmem:[#allocation11 + $0x660] ss:$16 sps:$4 sm:$0xff]  }
 0x44b   :  { %3161 = vmatprep.subr.bf16.mxu1 %v8421_v46  ;;  %v8487_v46 = vld [vmem:[#allocation11 + $0x684] ss:$16 sps:$4 sm:$0xff]  }
 0x44c   :  { %3761 = vmatpush1.bf16.msra.mxu0 %v8416_v47  ;;  %v8482_v47 = vld [vmem:[#allocation11 + $0x888] ss:$16 sps:$4 sm:$0xff]  }
 0x44d   :  { %3762 = vmatprep.subr.bf16.mxu0 %v8424_v49  ;;  %v8490_v49 = vld [vmem:[#allocation11 + $0x8ac] ss:$16 sps:$4 sm:$0xff]  }
 0x44e   :  { %3162 = vmatpush1.bf16.msra.mxu1 %v8419_v53  ;;  %v8485_v53 = vld [vmem:[#allocation11 + $0x680] ss:$16 sps:$4 sm:$0xff]  }
 0x44f   :  { %3163 = vmatprep.subr.bf16.mxu1 %v8427_v55  ;;  %v8493_v55 = vld [vmem:[#allocation11 + $0x6a4] ss:$16 sps:$4 sm:$0xff]  }
 0x450   :  { %3763 = vmatpush1.bf16.msra.mxu0 %v8422_v56  ;;  %v8488_v56 = vld [vmem:[#allocation11 + $0x8a8] ss:$16 sps:$4 sm:$0xff]  }
 0x451   :  { %3764 = vmatprep.subr.bf16.mxu0 %v8430_v59  ;;  %v8496_v59 = vld [vmem:[#allocation11 + $0x8cc] ss:$16 sps:$4 sm:$0xff]  }
 0x452   :  { %3164 = vmatpush1.bf16.msra.mxu1 %v8425_v43 }
 0x453   :  { %3165 = vmatprep.subr.bf16.mxu1 %v8433_v4  ;;  %v8491_v4 = vld [vmem:[#allocation11 + $0x6a0] ss:$16 sps:$4 sm:$0xff]  }
 0x454   :  { %3765 = vmatpush1.bf16.msra.mxu0 %v8428_v5 }
 0x455   :  { %3766 = vmatprep.subr.bf16.mxu0 %v8436_v35  ;;  %v8499_v35 = vld [vmem:[#allocation11 + $0x6c4] ss:$16 sps:$4 sm:$0xff]  }
 0x456   :  { %3166 = vmatpush1.bf16.msra.mxu1 %v8431_v6 }
 0x457   :  { %3167 = vmatprep.subr.bf16.mxu1 %v8439_v7 }
 0x458   :  { %3767 = vmatpush1.bf16.msra.mxu0 %v8434_v8  ;;  %v8494_v8 = vld [vmem:[#allocation11 + $0x8c8] ss:$16 sps:$4 sm:$0xff]  }
 0x459   :  { %3768 = vmatprep.subr.bf16.mxu0 %v8442_v9  ;;  %v9959_v9 = vld [vmem:[#allocation10] ss:$0 sm:$0xff] }
 0x45a   :  { %3168 = vmatpush1.bf16.msra.mxu1 %v8437_v12  ;;  %v1452_v12 = vadd.f32 %v9959_v9, %v9887_v10  ;;  %v8511_v10 = vld [vmem:[#allocation11 + $0x704] ss:$16 sps:$4 sm:$0xff]  }
 0x45b   :  { %3169 = vmatprep.subr.bf16.mxu1 %v8445_v39 }
 0x45c   :  { %3769 = vmatpush1.bf16.msra.mxu0 %v8440_v13 }
 0x45d   :  { %3770 = vmatprep.subr.bf16.mxu0 %v8448_v3  ;;  %v8502_v3 = vld [vmem:[#allocation11 + $0x8ec] ss:$16 sps:$4 sm:$0xff]  }
 0x45e   :  { %3170 = vmatpush1.bf16.msra.mxu1 %v8443_v16 }
 0x45f   :  { %3171 = vmatprep.subr.bf16.mxu1 %v8451_v20  ;;  %v8497_v20 = vld [vmem:[#allocation11 + $0x6c0] ss:$16 sps:$4 sm:$0xff]  }
 0x460   :  { %3771 = vmatpush1.bf16.msra.mxu0 %v8446_v17 }
 0x461   :  { %3772 = vmatprep.subr.bf16.mxu0 %v8454_v21  ;;  %v8500_v21 = vld [vmem:[#allocation11 + $0x8e8] ss:$16 sps:$4 sm:$0xff]  }
 0x462   :  { %3172 = vmatpush1.bf16.msra.mxu1 %v8449_v51  ;;  %v1498_v51 = vmax.f32 %v1452_v12, 0.0 }
 0x463   :  { %3173 = vmatprep.subr.bf16.mxu1 %v8457_v22  ;;  %v8508_v22 = vld [vmem:[#allocation11 + $0x90c] ss:$16 sps:$4 sm:$0xff]  }
 0x464   :  { %3773 = vmatpush1.bf16.msra.mxu0 %v8452_v48  ;;  %v8503_v48 = vld [vmem:[#allocation11 + $0x6e0] ss:$16 sps:$4 sm:$0xff]  }
 0x465   :  { %4037 = vmatprep.subr.bf16.mxu0 %v8460_v26  ;;  %v9965_v26 = vpack.c.bf16 %v1498_v51, %v1498_v51  ;;  %v8553_v51 = vld [vmem:[#allocation11 + $0x7e4] ss:$16 sps:$4 sm:$0xff]  }
 0x466   :  { %3174 = vmatpush1.bf16.msra.mxu1 %v8455_v18  ;;  %v8514_v18 = vld [vmem:[#allocation11 + $0x92c] ss:$16 sps:$4 sm:$0xff]  }
 0x467   :  { %3791 = vmatmul.mubr.bf16.vlgmr.msra.gmra.mrb[96].mxu0 %v9947_v30  ;;  %3438 = vmatprep.subr.bf16.mxu1 %v8463_v27  ;;  %v8509_v27 = vld [vmem:[#allocation11 + $0x700] ss:$16 sps:$4 sm:$0xff]  }
 0x468   :  { %4038 = vmatpush1.bf16.msra.mxu0 %v8458_v28  ;;  %4069 = vmatprep.mubr.bf16.mxu0 %v9272_v1  ;;  %v8517_v28 = vld [vmem:[#allocation11 + $0x724] ss:$16 sps:$4 sm:$0xff]  }
 0x469   :  { %3192 = vmatmul.mubr.bf16.vlgmr.msra.gmra.mrb[96].mxu1 %v9931_v61  ;;  %4039 = vmatprep.subr.bf16.mxu0 %v8466_v14  ;;  %v8484_v61 = vld [vmem:[#allocation11 + $0x88c] ss:$16 sps:$4 sm:$0xff]   ;;  %v8512_v14 = vld [vmem:[#allocation11 + $0x928] ss:$16 sps:$4 sm:$0xff]  }
 0x46a   :  { %3439 = vmatpush1.bf16.msra.mxu1 %v8461_v58  ;;  %3470 = vmatprep.mubr.bf16.mxu1 %v9272_v1  ;;  %v8520_v58 = vld [vmem:[#allocation11 + $0x94c] ss:$16 sps:$4 sm:$0xff]  }
 0x46b   :  { %3440 = vmatprep.subr.bf16.mxu1 %v8469_v31  ;;  %v8515_v31 = vld [vmem:[#allocation11 + $0x720] ss:$16 sps:$4 sm:$0xff]  }
 0x46c   :  { %4040 = vmatpush1.bf16.msra.mxu0 %v8464_v32  ;;  %v8523_v32 = vld [vmem:[#allocation11 + $0x744] ss:$16 sps:$4 sm:$0xff]  }
 0x46d   :  { %4041 = vmatprep.subr.bf16.mxu0 %v8472_v19  ;;  %v8518_v19 = vld [vmem:[#allocation11 + $0x948] ss:$16 sps:$4 sm:$0xff]  }
 0x46e   :  { %3441 = vmatpush1.bf16.msra.mxu1 %v8467_v34  ;;  %v8526_v34 = vld [vmem:[#allocation11 + $0x96c] ss:$16 sps:$4 sm:$0xff]  }
 0x46f   :  { %3442 = vmatprep.subr.bf16.mxu1 %v8475_v25  ;;  %v8521_v25 = vld [vmem:[#allocation11 + $0x740] ss:$16 sps:$4 sm:$0xff]  }
 0x470   :  { %4042 = vmatpush1.bf16.msra.mxu0 %v8470_v37  ;;  %v8529_v37 = vld [vmem:[#allocation11 + $0x764] ss:$16 sps:$4 sm:$0xff]  }
 0x471   :  { %4043 = vmatprep.subr.bf16.mxu0 %v8478_v38  ;;  %v8524_v38 = vld [vmem:[#allocation11 + $0x968] ss:$16 sps:$4 sm:$0xff]  }
 0x472   :  { %3443 = vmatpush1.bf16.msra.mxu1 %v8473_v41  ;;  %v8527_v41 = vld [vmem:[#allocation11 + $0x760] ss:$16 sps:$4 sm:$0xff]  }
 0x473   :  { %3444 = vmatprep.subr.bf16.mxu1 %v8481_v42  ;;  %v8535_v42 = vld [vmem:[#allocation11 + $0x784] ss:$16 sps:$4 sm:$0xff]  }
 0x474   :  { %4044 = vmatpush1.bf16.msra.mxu0 %v8476_v54  ;;  %v8530_v54 = vld [vmem:[#allocation11 + $0x988] ss:$16 sps:$4 sm:$0xff]  }
 0x475   :  { %4045 = vmatprep.subr.bf16.mxu0 %v8484_v61  ;;  %v8538_v61 = vld [vmem:[#allocation11 + $0x9ac] ss:$16 sps:$4 sm:$0xff]  }
 0x476   :  { %3445 = vmatpush1.bf16.msra.mxu1 %v8479_v45  ;;  %v8533_v45 = vld [vmem:[#allocation11 + $0x780] ss:$16 sps:$4 sm:$0xff]  }
 0x477   :  { %3446 = vmatprep.subr.bf16.mxu1 %v8487_v46  ;;  %v8541_v46 = vld [vmem:[#allocation11 + $0x7a4] ss:$16 sps:$4 sm:$0xff]  }
 0x478   :  { %4046 = vmatpush1.bf16.msra.mxu0 %v8482_v47  ;;  %v8536_v47 = vld [vmem:[#allocation11 + $0x9a8] ss:$16 sps:$4 sm:$0xff]  }
 0x479   :  { %4047 = vmatprep.subr.bf16.mxu0 %v8490_v49  ;;  %v8544_v49 = vld [vmem:[#allocation11 + $0x9cc] ss:$16 sps:$4 sm:$0xff]  }
 0x47a   :  { %3447 = vmatpush1.bf16.msra.mxu1 %v8485_v53  ;;  %v9953_v43 = vpop.f32.mrb[72].mxu0 }
 0x47b   :  { %v9955_v5 = vpop.f32.mrb[73].mxu0  ;;  %3448 = vmatprep.subr.bf16.mxu1 %v8493_v55  ;;  %v8539_v55 = vld [vmem:[#allocation11 + $0x7a0] ss:$16 sps:$4 sm:$0xff]  }
 0x47c   :  { %4048 = vmatpush1.bf16.msra.mxu0 %v8488_v56  ;;  %v9957_v6 = vpop.f32.mrb[72].mxu1  ;;  %v2126_v7 = vpop.f32.mrb[74].mxu0 }
 0x47d   :  { %v9963_v39 = vpop.f32.mrb[73].mxu1  ;;  %v2127_v13 = vpop.f32.mrb[75].mxu0  ;;  %4049 = vmatprep.subr.bf16.mxu0 %v8496_v59  ;;  %v8547_v59 = vld [vmem:[#allocation11 + $0x7c4] ss:$16 sps:$4 sm:$0xff]   ;;  %v8542_v7 = vld [vmem:[#allocation11 + $0x9c8] ss:$16 sps:$4 sm:$0xff]  }
 0x47e   :  { %3449 = vmatpush1.bf16.msra.mxu1 %v8491_v4  ;;  %v1843_v16 = vpop.f32.mrb[74].mxu1 }
 0x47f   :  { %v1844_v17 = vpop.f32.mrb[75].mxu1  ;;  %3450 = vmatprep.subr.bf16.mxu1 %v8499_v35  ;;  %v8550_v16 = vld [vmem:[#allocation11 + $0x9ec] ss:$16 sps:$4 sm:$0xff]  }
 0x480   :  { %4050 = vmatpush1.bf16.msra.mxu0 %v8494_v8  ;;  %v1455_v8 = vadd.f32 %v9959_v9, %v9889_v36 }
 0x481   :  { %4051 = vmatprep.subr.bf16.mxu0 %v8502_v3 }
 0x482   :  { %3451 = vmatpush1.bf16.msra.mxu1 %v8497_v20  ;;  %v1499_v36 = vmax.f32 %v1455_v8, 0.0 }
 0x483   :  { %3452 = vmatprep.subr.bf16.mxu1 %v8505_v29  ;;  %v8545_v29 = vld [vmem:[#allocation11 + $0x7c0] ss:$16 sps:$4 sm:$0xff]  }
 0x484   :  { %4052 = vmatpush1.bf16.msra.mxu0 %v8500_v21 }
 0x485   :  { %4316 = vmatprep.subr.bf16.mxu0 %v8508_v22 }
 0x486   :  { %3453 = vmatpush1.bf16.msra.mxu1 %v8503_v48  ;;  %v8548_v48 = vld [vmem:[#allocation11 + $0x9e8] ss:$16 sps:$4 sm:$0xff]  }
 0x487   :  { %4070 = vmatmul.mubr.bf16.vlgmr.msra.gmra.mrb[100].mxu0 %v9965_v26  ;;  %3717 = vmatprep.subr.bf16.mxu1 %v8511_v10 }
 0x488   :  { %4317 = vmatpush1.bf16.msra.mxu0 %v8506_v23  ;;  %4348 = vmatprep.mubr.bf16.mxu0 %v9272_v1  ;;  %v8551_v23 = vld [vmem:[#allocation11 + $0x7e0] ss:$16 sps:$4 sm:$0xff]  }
 0x489   :  { %3471 = vmatmul.mubr.bf16.vlgmr.msra.gmra.mrb[100].mxu1 %v9939_v44  ;;  %4318 = vmatprep.subr.bf16.mxu0 %v8514_v18  ;;  %v8532_v44 = vld [vmem:[#allocation11 + $0x98c] ss:$16 sps:$4 sm:$0xff]   ;;  %v8559_v18 = vld [vmem:[#allocation11 + $0x804] ss:$16 sps:$4 sm:$0xff]  }
 0x48a   :  { %3718 = vmatpush1.bf16.msra.mxu1 %v8509_v27  ;;  %3749 = vmatprep.mubr.bf16.mxu1 %v9272_v1  ;;  %v9979_v27 = vpack.c.bf16 %v1499_v36, %v1499_v36  ;;  %v8596_v36 = vld [vmem:[#allocation11 + $0xae8] ss:$16 sps:$4 sm:$0xff]  }
 0x48b   :  { %3719 = vmatprep.subr.bf16.mxu1 %v8517_v28  ;;  %v8562_v28 = vld [vmem:[#allocation11 + $0xa2c] ss:$16 sps:$4 sm:$0xff]  }
 0x48c   :  { %4319 = vmatpush1.bf16.msra.mxu0 %v8512_v14  ;;  %v8557_v14 = vld [vmem:[#allocation11 + $0x800] ss:$16 sps:$4 sm:$0xff]  }
 0x48d   :  { %4320 = vmatprep.subr.bf16.mxu0 %v8520_v58  ;;  %v8565_v58 = vld [vmem:[#allocation11 + $0x824] ss:$16 sps:$4 sm:$0xff]  }
 0x48e   :  { %3720 = vmatpush1.bf16.msra.mxu1 %v8515_v31  ;;  %v8560_v31 = vld [vmem:[#allocation11 + $0xa28] ss:$16 sps:$4 sm:$0xff]  }
 0x48f   :  { %3721 = vmatprep.subr.bf16.mxu1 %v8523_v32  ;;  %v8568_v32 = vld [vmem:[#allocation11 + $0xa4c] ss:$16 sps:$4 sm:$0xff]  }
 0x490   :  { %4321 = vmatpush1.bf16.msra.mxu0 %v8518_v19  ;;  %v8563_v19 = vld [vmem:[#allocation11 + $0x820] ss:$16 sps:$4 sm:$0xff]  }
 0x491   :  { %4322 = vmatprep.subr.bf16.mxu0 %v8526_v34  ;;  %v8571_v34 = vld [vmem:[#allocation11 + $0x844] ss:$16 sps:$4 sm:$0xff]  }
 0x492   :  { %3722 = vmatpush1.bf16.msra.mxu1 %v8521_v25  ;;  %v8566_v25 = vld [vmem:[#allocation11 + $0xa48] ss:$16 sps:$4 sm:$0xff]  }
 0x493   :  { %3723 = vmatprep.subr.bf16.mxu1 %v8529_v37  ;;  %v8574_v37 = vld [vmem:[#allocation11 + $0xa6c] ss:$16 sps:$4 sm:$0xff]  }
 0x494   :  { %4323 = vmatpush1.bf16.msra.mxu0 %v8524_v38  ;;  %v8569_v38 = vld [vmem:[#allocation11 + $0x840] ss:$16 sps:$4 sm:$0xff]  }
 0x495   :  { %4324 = vmatprep.subr.bf16.mxu0 %v8532_v44  ;;  %v8577_v44 = vld [vmem:[#allocation11 + $0x864] ss:$16 sps:$4 sm:$0xff]  }
 0x496   :  { %3724 = vmatpush1.bf16.msra.mxu1 %v8527_v41  ;;  %v8572_v41 = vld [vmem:[#allocation11 + $0xa68] ss:$16 sps:$4 sm:$0xff]  }
 0x497   :  { %3725 = vmatprep.subr.bf16.mxu1 %v8535_v42  ;;  %v8575_v42 = vld [vmem:[#allocation11 + $0x860] ss:$16 sps:$4 sm:$0xff]  }
 0x498   :  { %4325 = vmatpush1.bf16.msra.mxu0 %v8530_v54  ;;  %v8583_v54 = vld [vmem:[#allocation11 + $0x884] ss:$16 sps:$4 sm:$0xff]  }
 0x499   :  { %4326 = vmatprep.subr.bf16.mxu0 %v8538_v61  ;;  %v8578_v61 = vld [vmem:[#allocation11 + $0xa88] ss:$16 sps:$4 sm:$0xff]  }
 0x49a   :  { %v2397_v53 = vpop.f32.mrb[76].mxu0  ;;  %3726 = vmatpush1.bf16.msra.mxu1 %v8533_v45  ;;  %v8586_v45 = vld [vmem:[#allocation11 + $0xaac] ss:$16 sps:$4 sm:$0xff]  }
 0x49b   :  { %v2399_v56 = vpop.f32.mrb[77].mxu0  ;;  %3727 = vmatprep.subr.bf16.mxu1 %v8541_v46  ;;  %v8581_v46 = vld [vmem:[#allocation11 + $0x880] ss:$16 sps:$4 sm:$0xff]  }
 0x49c   :  { %v1880_v4 = vpop.f32.mrb[76].mxu1  ;;  %v2401_v35 = vpop.f32.mrb[78].mxu0  ;;  %4327 = vmatpush1.bf16.msra.mxu0 %v8536_v47  ;;  %v8589_v47 = vld [vmem:[#allocation11 + $0x8a4] ss:$16 sps:$4 sm:$0xff]  }
 0x49d   :  { %v2123_v12 = vadd.f32 %v9953_v43, %v1880_v4  ;;  %v1882_v13 = vpop.f32.mrb[77].mxu1  ;;  %v2402_v3 = vpop.f32.mrb[79].mxu0  ;;  %4328 = vmatprep.subr.bf16.mxu0 %v8544_v49  ;;  %v8556_v43 = vld [vmem:[#allocation11 + $0xa0c] ss:$16 sps:$4 sm:$0xff]   ;;  %v8584_v49 = vld [vmem:[#allocation11 + $0xaa8] ss:$16 sps:$4 sm:$0xff]  }
 0x49e   :  { %v2125_v20 = vadd.f32 %v9955_v5, %v1882_v13  ;;  %v1884_v17 = vpop.f32.mrb[78].mxu1  ;;  %3728 = vmatpush1.bf16.msra.mxu1 %v8539_v55  ;;  %v8554_v5 = vld [vmem:[#allocation11 + $0xa08] ss:$16 sps:$4 sm:$0xff]   ;;  %v8595_v35 = vld [vmem:[#allocation11 + $0x8c4] ss:$16 sps:$4 sm:$0xff]   ;;  %v1460_v3 = vadd.f32 %v9959_v9, %v9894_v52 }
 0x49f   :  { %v1885_v21 = vpop.f32.mrb[79].mxu1  ;;  %3729 = vmatprep.subr.bf16.mxu1 %v8547_v59  ;;  %v9975_v22 = vadd.f32 %v2397_v53, %v2123_v12  ;;  %v8592_v53 = vld [vmem:[#allocation11 + $0xacc] ss:$16 sps:$4 sm:$0xff]   ;;  %v8590_v13 = vld [vmem:[#allocation11 + $0xac8] ss:$16 sps:$4 sm:$0xff]  }
 0x4a0   :  { %4329 = vmatpush1.bf16.msra.mxu0 %v8542_v7  ;;  %v9977_v10 = vadd.f32 %v2399_v56, %v2125_v20  ;;  %v8587_v56 = vld [vmem:[#allocation11 + $0x8a0] ss:$16 sps:$4 sm:$0xff]   ;;  %v8604_v52 = vld [vmem:[#allocation11 + $0xb0c] ss:$16 sps:$4 sm:$0xff]  }
 0x4a1   :  { %4330 = vmatprep.subr.bf16.mxu0 %v8550_v16 }
 0x4a2   :  { %3730 = vmatpush1.bf16.msra.mxu1 %v8545_v29  ;;  %v8598_v29 = vld [vmem:[#allocation11 + $0xaec] ss:$16 sps:$4 sm:$0xff]  }
 0x4a3   :  { %3731 = vmatprep.subr.bf16.mxu1 %v8553_v51 }
 0x4a4   :  { %4331 = vmatpush1.bf16.msra.mxu0 %v8548_v48 }
 0x4a5   :  { %4595 = vmatprep.subr.bf16.mxu0 %v8556_v43  ;;  %v1500_v43 = vmax.f32 %v1460_v3, 0.0  ;;  %v1463_v3 = vadd.f32 %v9959_v9, %v9898_v24  ;;  %v8652_v24 = vld [vmem:[#allocation11 + $0xc0c] ss:$16 sps:$4 sm:$0xff]  }
 0x4a6   :  { %3732 = vmatpush1.bf16.msra.mxu1 %v8551_v23  ;;  %v8607_v23 = vld [vmem:[#allocation11 + $0x904] ss:$16 sps:$4 sm:$0xff]  }
 0x4a7   :  { %4349 = vmatmul.mubr.bf16.vlgmr.msra.gmra.mrb[104].mxu0 %v9979_v27  ;;  %3996 = vmatprep.subr.bf16.mxu1 %v8559_v18  ;;  %v8602_v18 = vld [vmem:[#allocation11 + $0xb08] ss:$16 sps:$4 sm:$0xff]  }
 0x4a8   :  { %4596 = vmatpush1.bf16.msra.mxu0 %v8554_v5  ;;  %4627 = vmatprep.mubr.bf16.mxu0 %v9272_v1  ;;  %v9999_v5 = vpack.c.bf16 %v1500_v43, %v1500_v43  ;;  %v1501_v43 = vmax.f32 %v1463_v3, 0.0 }
 0x4a9   :  { %3750 = vmatmul.mubr.bf16.vlgmr.msra.gmra.mrb[104].mxu1 %v9947_v30  ;;  %4597 = vmatprep.subr.bf16.mxu0 %v8562_v28  ;;  %v8580_v30 = vld [vmem:[#allocation11 + $0xa8c] ss:$16 sps:$4 sm:$0xff]   ;;  %v8605_v28 = vld [vmem:[#allocation11 + $0x900] ss:$16 sps:$4 sm:$0xff]  }
 0x4aa   :  { %3997 = vmatpush1.bf16.msra.mxu1 %v8557_v14  ;;  %4028 = vmatprep.mubr.bf16.mxu1 %v9272_v1  ;;  %v8613_v14 = vld [vmem:[#allocation11 + $0x924] ss:$16 sps:$4 sm:$0xff]  }
 0x4ab   :  { %3998 = vmatprep.subr.bf16.mxu1 %v8565_v58  ;;  %v8608_v58 = vld [vmem:[#allocation11 + $0xb28] ss:$16 sps:$4 sm:$0xff]  }
 0x4ac   :  { %4598 = vmatpush1.bf16.msra.mxu0 %v8560_v31  ;;  %v8616_v31 = vld [vmem:[#allocation11 + $0xb4c] ss:$16 sps:$4 sm:$0xff]  }
 0x4ad   :  { %4599 = vmatprep.subr.bf16.mxu0 %v8568_v32  ;;  %v8611_v32 = vld [vmem:[#allocation11 + $0x920] ss:$16 sps:$4 sm:$0xff]  }
 0x4ae   :  { %3999 = vmatpush1.bf16.msra.mxu1 %v8563_v19  ;;  %v8619_v19 = vld [vmem:[#allocation11 + $0x944] ss:$16 sps:$4 sm:$0xff]  }
 0x4af   :  { %4000 = vmatprep.subr.bf16.mxu1 %v8571_v34  ;;  %v8614_v34 = vld [vmem:[#allocation11 + $0xb48] ss:$16 sps:$4 sm:$0xff]  }
 0x4b0   :  { %4600 = vmatpush1.bf16.msra.mxu0 %v8566_v25  ;;  %v8622_v25 = vld [vmem:[#allocation11 + $0xb6c] ss:$16 sps:$4 sm:$0xff]  }
 0x4b1   :  { %4601 = vmatprep.subr.bf16.mxu0 %v8574_v37  ;;  %v8617_v37 = vld [vmem:[#allocation11 + $0x940] ss:$16 sps:$4 sm:$0xff]  }
 0x4b2   :  { %4001 = vmatpush1.bf16.msra.mxu1 %v8569_v38  ;;  %v8625_v38 = vld [vmem:[#allocation11 + $0x964] ss:$16 sps:$4 sm:$0xff]  }
 0x4b3   :  { %4002 = vmatprep.subr.bf16.mxu1 %v8577_v44  ;;  %v8620_v44 = vld [vmem:[#allocation11 + $0xb68] ss:$16 sps:$4 sm:$0xff]  }
 0x4b4   :  { %4602 = vmatpush1.bf16.msra.mxu0 %v8572_v41  ;;  %v8623_v41 = vld [vmem:[#allocation11 + $0x960] ss:$16 sps:$4 sm:$0xff]  }
 0x4b5   :  { %4603 = vmatprep.subr.bf16.mxu0 %v8580_v30  ;;  %v8631_v30 = vld [vmem:[#allocation11 + $0x984] ss:$16 sps:$4 sm:$0xff]  }
 0x4b6   :  { %4003 = vmatpush1.bf16.msra.mxu1 %v8575_v42  ;;  %v8626_v42 = vld [vmem:[#allocation11 + $0xb88] ss:$16 sps:$4 sm:$0xff]  }
 0x4b7   :  { %4004 = vmatprep.subr.bf16.mxu1 %v8583_v54  ;;  %v8634_v54 = vld [vmem:[#allocation11 + $0xbac] ss:$16 sps:$4 sm:$0xff]  }
 0x4b8   :  { %4604 = vmatpush1.bf16.msra.mxu0 %v8578_v61  ;;  %v8629_v61 = vld [vmem:[#allocation11 + $0x980] ss:$16 sps:$4 sm:$0xff]  }
 0x4b9   :  { %4605 = vmatprep.subr.bf16.mxu0 %v8586_v45  ;;  %v8637_v45 = vld [vmem:[#allocation11 + $0x9a4] ss:$16 sps:$4 sm:$0xff]  }
 0x4ba   :  { %v2676_v55 = vpop.f32.mrb[80].mxu0  ;;  %4005 = vmatpush1.bf16.msra.mxu1 %v8581_v46  ;;  %v8632_v46 = vld [vmem:[#allocation11 + $0xba8] ss:$16 sps:$4 sm:$0xff]  }
 0x4bb   :  { %v9986_v59 = vadd.f32 %v2676_v55, %v9975_v22  ;;  %v2678_v4 = vpop.f32.mrb[81].mxu0  ;;  %4006 = vmatprep.subr.bf16.mxu1 %v8589_v47  ;;  %v8593_v22 = vld [vmem:[#allocation11 + $0x8c0] ss:$16 sps:$4 sm:$0xff]   ;;  %v8640_v47 = vld [vmem:[#allocation11 + $0xbcc] ss:$16 sps:$4 sm:$0xff]  }
 0x4bc   :  { %v9989_v7 = vadd.f32 %v2678_v4, %v9977_v10  ;;  %v2081_v8 = vpop.f32.mrb[80].mxu1  ;;  %v2680_v12 = vpop.f32.mrb[82].mxu0  ;;  %4606 = vmatpush1.bf16.msra.mxu0 %v8584_v49  ;;  %v8601_v10 = vld [vmem:[#allocation11 + $0x8e4] ss:$16 sps:$4 sm:$0xff]  }
 0x4bd   :  { %v9994_v16 = vadd.f32 %v2081_v8, %v9957_v6  ;;  %v2083_v20 = vpop.f32.mrb[81].mxu1  ;;  %v2681_v17 = vpop.f32.mrb[83].mxu0  ;;  %4607 = vmatprep.subr.bf16.mxu0 %v8592_v53  ;;  %v8599_v6 = vld [vmem:[#allocation11 + $0x8e0] ss:$16 sps:$4 sm:$0xff]   ;;  %v8643_v4 = vld [vmem:[#allocation11 + $0x9c4] ss:$16 sps:$4 sm:$0xff]  }
 0x4be   :  { %v9997_v21 = vadd.f32 %v2083_v20, %v9963_v39  ;;  %v2085_v51 = vpop.f32.mrb[82].mxu1  ;;  %4007 = vmatpush1.bf16.msra.mxu1 %v8587_v56  ;;  %v8610_v39 = vld [vmem:[#allocation11 + $0xb2c] ss:$16 sps:$4 sm:$0xff]   ;;  %v8635_v53 = vld [vmem:[#allocation11 + $0x9a0] ss:$16 sps:$4 sm:$0xff]  }
 0x4bf   :  { %v2086_v48 = vpop.f32.mrb[83].mxu1  ;;  %4008 = vmatprep.subr.bf16.mxu1 %v8595_v35 }
 0x4c0   :  { %4608 = vmatpush1.bf16.msra.mxu0 %v8590_v13  ;;  %v8638_v13 = vld [vmem:[#allocation11 + $0xbc8] ss:$16 sps:$4 sm:$0xff]  }
 0x4c1   :  { %4609 = vmatprep.subr.bf16.mxu0 %v8598_v29 }
 0x4c2   :  { %4009 = vmatpush1.bf16.msra.mxu1 %v8593_v22 }
 0x4c3   :  { %4010 = vmatprep.subr.bf16.mxu1 %v8601_v10  ;;  %v8649_v10 = vld [vmem:[#allocation11 + $0x9e4] ss:$16 sps:$4 sm:$0xff]  }
 0x4c4   :  { %4610 = vmatpush1.bf16.msra.mxu0 %v8596_v36  ;;  %v8644_v36 = vld [vmem:[#allocation11 + $0xbe8] ss:$16 sps:$4 sm:$0xff]  }
 0x4c5   :  { %4874 = vmatprep.subr.bf16.mxu0 %v8604_v52  ;;  %v8655_v52 = vld [vmem:[#allocation11 + $0xa04] ss:$16 sps:$4 sm:$0xff]  }
 0x4c6   :  { %4011 = vmatpush1.bf16.msra.mxu1 %v8599_v6  ;;  %v8650_v6 = vld [vmem:[#allocation11 + $0xc08] ss:$16 sps:$4 sm:$0xff]  }
 0x4c7   :  { %4628 = vmatmul.mubr.bf16.vlgmr.msra.gmra.mrb[108].mxu0 %v9999_v5  ;;  %4275 = vmatprep.subr.bf16.mxu1 %v8607_v23  ;;  %v10019_v23 = vpack.c.bf16 %v1501_v43, %v1501_v43  ;;  %v8703_v43 = vld [vmem:[#allocation11 + $0xb04] ss:$16 sps:$4 sm:$0xff]  }
 0x4c8   :  { %4875 = vmatpush1.bf16.msra.mxu0 %v8602_v18  ;;  %4906 = vmatprep.mubr.bf16.mxu0 %v9272_v1  ;;  %v8653_v18 = vld [vmem:[#allocation11 + $0xa00] ss:$16 sps:$4 sm:$0xff]  }
 0x4c9   :  { %4029 = vmatmul.mubr.bf16.vlgmr.msra.gmra.mrb[108].mxu1 %v9965_v26  ;;  %4876 = vmatprep.subr.bf16.mxu0 %v8610_v39  ;;  %v8628_v26 = vld [vmem:[#allocation11 + $0xb8c] ss:$16 sps:$4 sm:$0xff]   ;;  %v8661_v39 = vld [vmem:[#allocation11 + $0xa24] ss:$16 sps:$4 sm:$0xff]  }
 0x4ca   :  { %4276 = vmatpush1.bf16.msra.mxu1 %v8605_v28  ;;  %4307 = vmatprep.mubr.bf16.mxu1 %v9272_v1  ;;  %v8656_v28 = vld [vmem:[#allocation11 + $0xc28] ss:$16 sps:$4 sm:$0xff]  }
 0x4cb   :  { %4277 = vmatprep.subr.bf16.mxu1 %v8613_v14  ;;  %v8664_v14 = vld [vmem:[#allocation11 + $0xc4c] ss:$16 sps:$4 sm:$0xff]  }
 0x4cc   :  { %4877 = vmatpush1.bf16.msra.mxu0 %v8608_v58  ;;  %v8659_v58 = vld [vmem:[#allocation11 + $0xa20] ss:$16 sps:$4 sm:$0xff]  }
 0x4cd   :  { %4878 = vmatprep.subr.bf16.mxu0 %v8616_v31  ;;  %v8667_v31 = vld [vmem:[#allocation11 + $0xa44] ss:$16 sps:$4 sm:$0xff]  }
 0x4ce   :  { %4278 = vmatpush1.bf16.msra.mxu1 %v8611_v32  ;;  %v8662_v32 = vld [vmem:[#allocation11 + $0xc48] ss:$16 sps:$4 sm:$0xff]  }
 0x4cf   :  { %4279 = vmatprep.subr.bf16.mxu1 %v8619_v19  ;;  %v8670_v19 = vld [vmem:[#allocation11 + $0xc6c] ss:$16 sps:$4 sm:$0xff]  }
 0x4d0   :  { %4879 = vmatpush1.bf16.msra.mxu0 %v8614_v34  ;;  %v8665_v34 = vld [vmem:[#allocation11 + $0xa40] ss:$16 sps:$4 sm:$0xff]  }
 0x4d1   :  { %4880 = vmatprep.subr.bf16.mxu0 %v8622_v25  ;;  %v8673_v25 = vld [vmem:[#allocation11 + $0xa64] ss:$16 sps:$4 sm:$0xff]  }
 0x4d2   :  { %4280 = vmatpush1.bf16.msra.mxu1 %v8617_v37  ;;  %v8668_v37 = vld [vmem:[#allocation11 + $0xc68] ss:$16 sps:$4 sm:$0xff]  }
 0x4d3   :  { %4281 = vmatprep.subr.bf16.mxu1 %v8625_v38  ;;  %v8671_v38 = vld [vmem:[#allocation11 + $0xa60] ss:$16 sps:$4 sm:$0xff]  }
 0x4d4   :  { %4881 = vmatpush1.bf16.msra.mxu0 %v8620_v44  ;;  %v8679_v44 = vld [vmem:[#allocation11 + $0xa84] ss:$16 sps:$4 sm:$0xff]  }
 0x4d5   :  { %4882 = vmatprep.subr.bf16.mxu0 %v8628_v26  ;;  %v8674_v26 = vld [vmem:[#allocation11 + $0xc88] ss:$16 sps:$4 sm:$0xff]  }
 0x4d6   :  { %4282 = vmatpush1.bf16.msra.mxu1 %v8623_v41  ;;  %v8682_v41 = vld [vmem:[#allocation11 + $0xcac] ss:$16 sps:$4 sm:$0xff]  }
 0x4d7   :  { %4283 = vmatprep.subr.bf16.mxu1 %v8631_v30  ;;  %v8677_v30 = vld [vmem:[#allocation11 + $0xa80] ss:$16 sps:$4 sm:$0xff]  }
 0x4d8   :  { %4883 = vmatpush1.bf16.msra.mxu0 %v8626_v42  ;;  %v8685_v42 = vld [vmem:[#allocation11 + $0xaa4] ss:$16 sps:$4 sm:$0xff]  }
 0x4d9   :  { %4884 = vmatprep.subr.bf16.mxu0 %v8634_v54  ;;  %v8680_v54 = vld [vmem:[#allocation11 + $0xca8] ss:$16 sps:$4 sm:$0xff]  }
 0x4da   :  { %v2955_v49 = vpop.f32.mrb[84].mxu0  ;;  %4284 = vmatpush1.bf16.msra.mxu1 %v8629_v61  ;;  %v8688_v61 = vld [vmem:[#allocation11 + $0xccc] ss:$16 sps:$4 sm:$0xff]  }
 0x4db   :  { %v10006_v55 = vadd.f32 %v2955_v49, %v9986_v59  ;;  %v2957_v56 = vpop.f32.mrb[85].mxu0  ;;  %4285 = vmatprep.subr.bf16.mxu1 %v8637_v45  ;;  %v8646_v59 = vld [vmem:[#allocation11 + $0xbec] ss:$16 sps:$4 sm:$0xff]  }
 0x4dc   :  { %v10009_v35 = vadd.f32 %v2957_v56, %v9989_v7  ;;  %v2356_v8 = vpop.f32.mrb[84].mxu1  ;;  %v2959_v12 = vpop.f32.mrb[86].mxu0  ;;  %4885 = vmatpush1.bf16.msra.mxu0 %v8632_v46  ;;  %v8641_v7 = vld [vmem:[#allocation11 + $0x9c0] ss:$16 sps:$4 sm:$0xff]  }
 0x4dd   :  { %v10014_v20 = vadd.f32 %v2356_v8, %v9994_v16  ;;  %v2358_v17 = vpop.f32.mrb[85].mxu1  ;;  %v2960_v29 = vpop.f32.mrb[87].mxu0  ;;  %4886 = vmatprep.subr.bf16.mxu0 %v8640_v47  ;;  %v8647_v16 = vld [vmem:[#allocation11 + $0x9e0] ss:$16 sps:$4 sm:$0xff]   ;;  %v8686_v12 = vld [vmem:[#allocation11 + $0xcc8] ss:$16 sps:$4 sm:$0xff]  }
 0x4de   :  { %v10017_v51 = vadd.f32 %v2358_v17, %v9997_v21  ;;  %v2360_v22 = vpop.f32.mrb[86].mxu1  ;;  %4286 = vmatpush1.bf16.msra.mxu1 %v8635_v53  ;;  %v8658_v21 = vld [vmem:[#allocation11 + $0xc2c] ss:$16 sps:$4 sm:$0xff]   ;;  %v8683_v46 = vld [vmem:[#allocation11 + $0xaa0] ss:$16 sps:$4 sm:$0xff]  }
 0x4df   :  { %v2361_v48 = vpop.f32.mrb[87].mxu1  ;;  %4287 = vmatprep.subr.bf16.mxu1 %v8643_v4  ;;  %v8691_v53 = vld [vmem:[#allocation11 + $0xac4] ss:$16 sps:$4 sm:$0xff]  }
 0x4e0   :  { %4887 = vmatpush1.bf16.msra.mxu0 %v8638_v13  ;;  %v1468_v13 = vadd.f32 %v9959_v9, %v9901_v33  ;;  %v8697_v48 = vld [vmem:[#allocation11 + $0xae4] ss:$16 sps:$4 sm:$0xff]   ;;  %v8700_v33 = vld [vmem:[#allocation11 + $0xd0c] ss:$16 sps:$4 sm:$0xff]  }
 0x4e1   :  { %4888 = vmatprep.subr.bf16.mxu0 %v8646_v59 }
 0x4e2   :  { %4288 = vmatpush1.bf16.msra.mxu1 %v8641_v7 }
 0x4e3   :  { %4289 = vmatprep.subr.bf16.mxu1 %v8649_v10  ;;  %v8692_v10 = vld [vmem:[#allocation11 + $0xce8] ss:$16 sps:$4 sm:$0xff]  }
 0x4e4   :  { %4889 = vmatpush1.bf16.msra.mxu0 %v8644_v36  ;;  %v1502_v36 = vmax.f32 %v1468_v13, 0.0 }
 0x4e5   :  { %5153 = vmatprep.subr.bf16.mxu0 %v8652_v24  ;;  %v8698_v24 = vld [vmem:[#allocation11 + $0xd08] ss:$16 sps:$4 sm:$0xff]  }
 0x4e6   :  { %4290 = vmatpush1.bf16.msra.mxu1 %v8647_v16  ;;  %v10039_v16 = vpack.c.bf16 %v1502_v36, %v1502_v36  ;;  %v8746_v36 = vld [vmem:[#allocation11 + $0xe08] ss:$16 sps:$4 sm:$0xff]  }
 0x4e7   :  { %4907 = vmatmul.mubr.bf16.vlgmr.msra.gmra.mrb[112].mxu0 %v10019_v23  ;;  %4554 = vmatprep.subr.bf16.mxu1 %v8655_v52  ;;  %v8701_v52 = vld [vmem:[#allocation11 + $0xb00] ss:$16 sps:$4 sm:$0xff]  }
 0x4e8   :  { %5154 = vmatpush1.bf16.msra.mxu0 %v8650_v6  ;;  %5185 = vmatprep.mubr.bf16.mxu0 %v9272_v1  ;;  %v8709_v6 = vld [vmem:[#allocation11 + $0xb24] ss:$16 sps:$4 sm:$0xff]  }
 0x4e9   :  { %4308 = vmatmul.mubr.bf16.vlgmr.msra.gmra.mrb[112].mxu1 %v9979_v27  ;;  %5155 = vmatprep.subr.bf16.mxu0 %v8658_v21  ;;  %v8676_v27 = vld [vmem:[#allocation11 + $0xc8c] ss:$16 sps:$4 sm:$0xff]   ;;  %v8704_v21 = vld [vmem:[#allocation11 + $0xd28] ss:$16 sps:$4 sm:$0xff]  }
 0x4ea   :  { %4555 = vmatpush1.bf16.msra.mxu1 %v8653_v18  ;;  %4586 = vmatprep.mubr.bf16.mxu1 %v9272_v1  ;;  %v8712_v18 = vld [vmem:[#allocation11 + $0xd4c] ss:$16 sps:$4 sm:$0xff]  }
 0x4eb   :  { %4556 = vmatprep.subr.bf16.mxu1 %v8661_v39  ;;  %v8707_v39 = vld [vmem:[#allocation11 + $0xb20] ss:$16 sps:$4 sm:$0xff]  }
 0x4ec   :  { %5156 = vmatpush1.bf16.msra.mxu0 %v8656_v28  ;;  %v8715_v28 = vld [vmem:[#allocation11 + $0xb44] ss:$16 sps:$4 sm:$0xff]  }
 0x4ed   :  { %5157 = vmatprep.subr.bf16.mxu0 %v8664_v14  ;;  %v8710_v14 = vld [vmem:[#allocation11 + $0xd48] ss:$16 sps:$4 sm:$0xff]  }
 0x4ee   :  { %4557 = vmatpush1.bf16.msra.mxu1 %v8659_v58  ;;  %v8718_v58 = vld [vmem:[#allocation11 + $0xd6c] ss:$16 sps:$4 sm:$0xff]  }
 0x4ef   :  { %4558 = vmatprep.subr.bf16.mxu1 %v8667_v31  ;;  %v8713_v31 = vld [vmem:[#allocation11 + $0xb40] ss:$16 sps:$4 sm:$0xff]  }
 0x4f0   :  { %5158 = vmatpush1.bf16.msra.mxu0 %v8662_v32  ;;  %v8721_v32 = vld [vmem:[#allocation11 + $0xb64] ss:$16 sps:$4 sm:$0xff]  }
 0x4f1   :  { %5159 = vmatprep.subr.bf16.mxu0 %v8670_v19  ;;  %v8716_v19 = vld [vmem:[#allocation11 + $0xd68] ss:$16 sps:$4 sm:$0xff]  }
 0x4f2   :  { %4559 = vmatpush1.bf16.msra.mxu1 %v8665_v34  ;;  %v8719_v34 = vld [vmem:[#allocation11 + $0xb60] ss:$16 sps:$4 sm:$0xff]  }
 0x4f3   :  { %4560 = vmatprep.subr.bf16.mxu1 %v8673_v25  ;;  %v8727_v25 = vld [vmem:[#allocation11 + $0xb84] ss:$16 sps:$4 sm:$0xff]  }
 0x4f4   :  { %5160 = vmatpush1.bf16.msra.mxu0 %v8668_v37  ;;  %v8722_v37 = vld [vmem:[#allocation11 + $0xd88] ss:$16 sps:$4 sm:$0xff]  }
 0x4f5   :  { %5161 = vmatprep.subr.bf16.mxu0 %v8676_v27  ;;  %v8730_v27 = vld [vmem:[#allocation11 + $0xdac] ss:$16 sps:$4 sm:$0xff]  }
 0x4f6   :  { %4561 = vmatpush1.bf16.msra.mxu1 %v8671_v38  ;;  %v8725_v38 = vld [vmem:[#allocation11 + $0xb80] ss:$16 sps:$4 sm:$0xff]  }
 0x4f7   :  { %4562 = vmatprep.subr.bf16.mxu1 %v8679_v44  ;;  %v8733_v44 = vld [vmem:[#allocation11 + $0xba4] ss:$16 sps:$4 sm:$0xff]  }
 0x4f8   :  { %5162 = vmatpush1.bf16.msra.mxu0 %v8674_v26  ;;  %v8728_v26 = vld [vmem:[#allocation11 + $0xda8] ss:$16 sps:$4 sm:$0xff]  }
 0x4f9   :  { %5163 = vmatprep.subr.bf16.mxu0 %v8682_v41  ;;  %v8736_v41 = vld [vmem:[#allocation11 + $0xdcc] ss:$16 sps:$4 sm:$0xff]  }
 0x4fa   :  { %v3234_v45 = vpop.f32.mrb[88].mxu0  ;;  %4563 = vmatpush1.bf16.msra.mxu1 %v8677_v30 }
 0x4fb   :  { %v10026_v47 = vadd.f32 %v3234_v45, %v10006_v55  ;;  %v3236_v49 = vpop.f32.mrb[89].mxu0  ;;  %4564 = vmatprep.subr.bf16.mxu1 %v8685_v42  ;;  %v8694_v55 = vld [vmem:[#allocation11 + $0xcec] ss:$16 sps:$4 sm:$0xff]   ;;  %v8731_v42 = vld [vmem:[#allocation11 + $0xba0] ss:$16 sps:$4 sm:$0xff]  }
 0x4fc   :  { %v10029_v56 = vadd.f32 %v3236_v49, %v10009_v35  ;;  %v2635_v4 = vpop.f32.mrb[88].mxu1  ;;  %v3238_v8 = vpop.f32.mrb[90].mxu0  ;;  %5164 = vmatpush1.bf16.msra.mxu0 %v8680_v54  ;;  %v8689_v35 = vld [vmem:[#allocation11 + $0xac0] ss:$16 sps:$4 sm:$0xff]   ;;  %v8739_v45 = vld [vmem:[#allocation11 + $0xbc4] ss:$16 sps:$4 sm:$0xff]  }
 0x4fd   :  { %v10034_v3 = vadd.f32 %v2635_v4, %v10014_v20  ;;  %v2637_v17 = vpop.f32.mrb[89].mxu1  ;;  %v3239_v29 = vpop.f32.mrb[91].mxu0  ;;  %5165 = vmatprep.subr.bf16.mxu0 %v8688_v61  ;;  %v8695_v20 = vld [vmem:[#allocation11 + $0xae0] ss:$16 sps:$4 sm:$0xff]   ;;  %v8734_v4 = vld [vmem:[#allocation11 + $0xdc8] ss:$16 sps:$4 sm:$0xff]   ;;  %v1471_v8 = vadd.f32 %v9959_v9, %v9903_v40 }
 0x4fe   :  { %v10037_v59 = vadd.f32 %v2637_v17, %v10017_v51  ;;  %v2639_v22 = vpop.f32.mrb[90].mxu1  ;;  %4565 = vmatpush1.bf16.msra.mxu1 %v8683_v46  ;;  %v8706_v51 = vld [vmem:[#allocation11 + $0xd2c] ss:$16 sps:$4 sm:$0xff]  }
 0x4ff   :  { %v2640_v7 = vpop.f32.mrb[91].mxu1  ;;  %4566 = vmatprep.subr.bf16.mxu1 %v8691_v53  ;;  %v8748_v40 = vld [vmem:[#allocation11 + $0xe0c] ss:$16 sps:$4 sm:$0xff]  }
 0x500   :  { %5166 = vmatpush1.bf16.msra.mxu0 %v8686_v12  ;;  %v8740_v7 = vld [vmem:[#allocation11 + $0xde8] ss:$16 sps:$4 sm:$0xff]  }
 0x501   :  { %5167 = vmatprep.subr.bf16.mxu0 %v8694_v55 }
 0x502   :  { %4567 = vmatpush1.bf16.msra.mxu1 %v8689_v35  ;;  %v8745_v35 = vld [vmem:[#allocation11 + $0xbe4] ss:$16 sps:$4 sm:$0xff]  }
 0x503   :  { %4568 = vmatprep.subr.bf16.mxu1 %v8697_v48  ;;  %v1503_v48 = vmax.f32 %v1471_v8, 0.0 }
 0x504   :  { %5168 = vmatpush1.bf16.msra.mxu0 %v8692_v10  ;;  %v8751_v10 = vld [vmem:[#allocation11 + $0xc04] ss:$16 sps:$4 sm:$0xff]  }
 0x505   :  { %5432 = vmatprep.subr.bf16.mxu0 %v8700_v33  ;;  %v10059_v33 = vpack.c.bf16 %v1503_v48, %v1503_v48  ;;  %v8797_v48 = vld [vmem:[#allocation11 + $0xd00] ss:$16 sps:$4 sm:$0xff]  }
 0x506   :  { %4569 = vmatpush1.bf16.msra.mxu1 %v8695_v20  ;;  %v8749_v20 = vld [vmem:[#allocation11 + $0xc00] ss:$16 sps:$4 sm:$0xff]  }
 0x507   :  { %5186 = vmatmul.mubr.bf16.vlgmr.msra.gmra.mrb[116].mxu0 %v10039_v16  ;;  %4833 = vmatprep.subr.bf16.mxu1 %v8703_v43  ;;  %v8757_v43 = vld [vmem:[#allocation11 + $0xc24] ss:$16 sps:$4 sm:$0xff]  }
 0x508   :  { %5433 = vmatpush1.bf16.msra.mxu0 %v8698_v24  ;;  %5464 = vmatprep.mubr.bf16.mxu0 %v9272_v1  ;;  %v8752_v24 = vld [vmem:[#allocation11 + $0xe28] ss:$16 sps:$4 sm:$0xff]  }
 0x509   :  { %4587 = vmatmul.mubr.bf16.vlgmr.msra.gmra.mrb[116].mxu1 %v9999_v5  ;;  %5434 = vmatprep.subr.bf16.mxu0 %v8706_v51  ;;  %v8724_v5 = vld [vmem:[#allocation11 + $0xd8c] ss:$16 sps:$4 sm:$0xff]  }
 0x50a   :  { %4834 = vmatpush1.bf16.msra.mxu1 %v8701_v52  ;;  %4865 = vmatprep.mubr.bf16.mxu1 %v9272_v1  ;;  %v8760_v51 = vld [vmem:[#allocation11 + $0xe4c] ss:$16 sps:$4 sm:$0xff]   ;;  %v8755_v52 = vld [vmem:[#allocation11 + $0xc20] ss:$16 sps:$4 sm:$0xff]  }
 0x50b   :  { %4835 = vmatprep.subr.bf16.mxu1 %v8709_v6  ;;  %v8763_v6 = vld [vmem:[#allocation11 + $0xc44] ss:$16 sps:$4 sm:$0xff]  }
 0x50c   :  { %5435 = vmatpush1.bf16.msra.mxu0 %v8704_v21  ;;  %v8758_v21 = vld [vmem:[#allocation11 + $0xe48] ss:$16 sps:$4 sm:$0xff]  }
 0x50d   :  { %5436 = vmatprep.subr.bf16.mxu0 %v8712_v18  ;;  %v8766_v18 = vld [vmem:[#allocation11 + $0xe6c] ss:$16 sps:$4 sm:$0xff]  }
 0x50e   :  { %4836 = vmatpush1.bf16.msra.mxu1 %v8707_v39  ;;  %v8761_v39 = vld [vmem:[#allocation11 + $0xc40] ss:$16 sps:$4 sm:$0xff]  }
 0x50f   :  { %4837 = vmatprep.subr.bf16.mxu1 %v8715_v28  ;;  %v8769_v28 = vld [vmem:[#allocation11 + $0xc64] ss:$16 sps:$4 sm:$0xff]  }
 0x510   :  { %5437 = vmatpush1.bf16.msra.mxu0 %v8710_v14  ;;  %v8764_v14 = vld [vmem:[#allocation11 + $0xe68] ss:$16 sps:$4 sm:$0xff]  }
 0x511   :  { %5438 = vmatprep.subr.bf16.mxu0 %v8718_v58  ;;  %v8767_v58 = vld [vmem:[#allocation11 + $0xc60] ss:$16 sps:$4 sm:$0xff]  }
 0x512   :  { %4838 = vmatpush1.bf16.msra.mxu1 %v8713_v31  ;;  %v8775_v31 = vld [vmem:[#allocation11 + $0xc84] ss:$16 sps:$4 sm:$0xff]  }
 0x513   :  { %4839 = vmatprep.subr.bf16.mxu1 %v8721_v32  ;;  %v8770_v32 = vld [vmem:[#allocation11 + $0xe88] ss:$16 sps:$4 sm:$0xff]  }
 0x514   :  { %5439 = vmatpush1.bf16.msra.mxu0 %v8716_v19  ;;  %v8778_v19 = vld [vmem:[#allocation11 + $0xeac] ss:$16 sps:$4 sm:$0xff]  }
 0x515   :  { %5440 = vmatprep.subr.bf16.mxu0 %v8724_v5  ;;  %v8773_v5 = vld [vmem:[#allocation11 + $0xc80] ss:$16 sps:$4 sm:$0xff]  }
 0x516   :  { %4840 = vmatpush1.bf16.msra.mxu1 %v8719_v34  ;;  %v8781_v34 = vld [vmem:[#allocation11 + $0xca4] ss:$16 sps:$4 sm:$0xff]  }
 0x517   :  { %4841 = vmatprep.subr.bf16.mxu1 %v8727_v25  ;;  %v8776_v25 = vld [vmem:[#allocation11 + $0xea8] ss:$16 sps:$4 sm:$0xff]  }
 0x518   :  { %5441 = vmatpush1.bf16.msra.mxu0 %v8722_v37  ;;  %v8784_v37 = vld [vmem:[#allocation11 + $0xecc] ss:$16 sps:$4 sm:$0xff]  }
 0x519   :  { %5442 = vmatprep.subr.bf16.mxu0 %v8730_v27 }
 0x51a   :  { %v3513_v30 = vpop.f32.mrb[92].mxu0  ;;  %4842 = vmatpush1.bf16.msra.mxu1 %v8725_v38  ;;  %v8779_v38 = vld [vmem:[#allocation11 + $0xca0] ss:$16 sps:$4 sm:$0xff]  }
 0x51b   :  { %v10046_v54 = vadd.f32 %v3513_v30, %v10026_v47  ;;  %v3515_v61 = vpop.f32.mrb[93].mxu0  ;;  %4843 = vmatprep.subr.bf16.mxu1 %v8733_v44  ;;  %v8742_v47 = vld [vmem:[#allocation11 + $0xdec] ss:$16 sps:$4 sm:$0xff]  }
 0x51c   :  { %v10049_v46 = vadd.f32 %v3515_v61, %v10029_v56  ;;  %v2914_v49 = vpop.f32.mrb[92].mxu1  ;;  %v3517_v53 = vpop.f32.mrb[94].mxu0  ;;  %5443 = vmatpush1.bf16.msra.mxu0 %v8728_v26  ;;  %v8737_v56 = vld [vmem:[#allocation11 + $0xbc0] ss:$16 sps:$4 sm:$0xff]  }
 0x51d   :  { %v10054_v12 = vadd.f32 %v2914_v49, %v10034_v3  ;;  %v2916_v13 = vpop.f32.mrb[93].mxu1  ;;  %v3518_v17 = vpop.f32.mrb[95].mxu0  ;;  %5444 = vmatprep.subr.bf16.mxu0 %v8736_v41  ;;  %v8743_v3 = vld [vmem:[#allocation11 + $0xbe0] ss:$16 sps:$4 sm:$0xff]   ;;  %v8787_v41 = vld [vmem:[#allocation11 + $0xcc4] ss:$16 sps:$4 sm:$0xff]   ;;  %v1476_v49 = vadd.f32 %v9959_v9, %v9905_v50 }
 0x51e   :  { %v10057_v29 = vadd.f32 %v2916_v13, %v10037_v59  ;;  %v2918_v55 = vpop.f32.mrb[94].mxu1  ;;  %4844 = vmatpush1.bf16.msra.mxu1 %v8731_v42  ;;  %v8754_v59 = vld [vmem:[#allocation11 + $0xe2c] ss:$16 sps:$4 sm:$0xff]   ;;  %v8791_v9 = vld [vmem:[#allocation11 + $0xce0] ss:$16 sps:$4 sm:$0xff]  }
 0x51f   :  { %v2919_v22 = vpop.f32.mrb[95].mxu1  ;;  %4845 = vmatprep.subr.bf16.mxu1 %v8739_v45  ;;  %v8782_v45 = vld [vmem:[#allocation11 + $0xec8] ss:$16 sps:$4 sm:$0xff]   ;;  %v8793_v55 = vld [vmem:[#allocation11 + $0xce4] ss:$16 sps:$4 sm:$0xff]  }
 0x520   :  { %5445 = vmatpush1.bf16.msra.mxu0 %v8734_v4  ;;  %v1504_v22 = vmax.f32 %v1476_v49, 0.0  ;;  %v8796_v50 = vld [vmem:[#allocation11 + $0xf0c] ss:$16 sps:$4 sm:$0xff]  }
 0x521   :  { %5446 = vmatprep.subr.bf16.mxu0 %v8742_v47 }
 0x522   :  { %4846 = vmatpush1.bf16.msra.mxu1 %v8737_v56  ;;  %v8788_v56 = vld [vmem:[#allocation11 + $0xee8] ss:$16 sps:$4 sm:$0xff]  }
 0x523   :  { %4847 = vmatprep.subr.bf16.mxu1 %v8745_v35  ;;  %v8794_v35 = vld [vmem:[#allocation11 + $0xf08] ss:$16 sps:$4 sm:$0xff]  }
 0x524   :  { %5447 = vmatpush1.bf16.msra.mxu0 %v8740_v7  ;;  %v10079_v7 = vpack.c.bf16 %v1504_v22, %v1504_v22  ;;  %v8845_v22 = vld [vmem:[#allocation11 + $0xe00] ss:$16 sps:$4 sm:$0xff]  }
 0x525   :  { %5711 = vmatprep.subr.bf16.mxu0 %v8748_v40  ;;  %v8805_v40 = vld [vmem:[#allocation11 + $0xd24] ss:$16 sps:$4 sm:$0xff]  }
 0x526   :  { %4848 = vmatpush1.bf16.msra.mxu1 %v8743_v3  ;;  %v8800_v3 = vld [vmem:[#allocation11 + $0xf28] ss:$16 sps:$4 sm:$0xff]  }
 0x527   :  { %5465 = vmatmul.mubr.bf16.vlgmr.msra.gmra.mrb[120].mxu0 %v10059_v33  ;;  %5112 = vmatprep.subr.bf16.mxu1 %v8751_v10  ;;  %v8808_v10 = vld [vmem:[#allocation11 + $0xf4c] ss:$16 sps:$4 sm:$0xff]  }
 0x528   :  { %5712 = vmatpush1.bf16.msra.mxu0 %v8746_v36  ;;  %5743 = vmatprep.mubr.bf16.mxu0 %v9272_v1  ;;  %v8803_v36 = vld [vmem:[#allocation11 + $0xd20] ss:$16 sps:$4 sm:$0xff]  }
 0x529   :  { %4866 = vmatmul.mubr.bf16.vlgmr.msra.gmra.mrb[120].mxu1 %v10019_v23  ;;  %5713 = vmatprep.subr.bf16.mxu0 %v8754_v59  ;;  %v8772_v23 = vld [vmem:[#allocation11 + $0xe8c] ss:$16 sps:$4 sm:$0xff]   ;;  %v8811_v59 = vld [vmem:[#allocation11 + $0xd44] ss:$16 sps:$4 sm:$0xff]  }
 0x52a   :  { %5113 = vmatpush1.bf16.msra.mxu1 %v8749_v20  ;;  %5144 = vmatprep.mubr.bf16.mxu1 %v9272_v1  ;;  %v8806_v20 = vld [vmem:[#allocation11 + $0xf48] ss:$16 sps:$4 sm:$0xff]  }
 0x52b   :  { %5114 = vmatprep.subr.bf16.mxu1 %v8757_v43  ;;  %v8814_v43 = vld [vmem:[#allocation11 + $0xf6c] ss:$16 sps:$4 sm:$0xff]  }
 0x52c   :  { %5714 = vmatpush1.bf16.msra.mxu0 %v8752_v24  ;;  %v8809_v24 = vld [vmem:[#allocation11 + $0xd40] ss:$16 sps:$4 sm:$0xff]  }
 0x52d   :  { %5715 = vmatprep.subr.bf16.mxu0 %v8760_v51  ;;  %v8817_v51 = vld [vmem:[#allocation11 + $0xd64] ss:$16 sps:$4 sm:$0xff]  }
 0x52e   :  { %5115 = vmatpush1.bf16.msra.mxu1 %v8755_v52  ;;  %v8812_v52 = vld [vmem:[#allocation11 + $0xf68] ss:$16 sps:$4 sm:$0xff]  }
 0x52f   :  { %5116 = vmatprep.subr.bf16.mxu1 %v8763_v6  ;;  %v8815_v6 = vld [vmem:[#allocation11 + $0xd60] ss:$16 sps:$4 sm:$0xff]  }
 0x530   :  { %5716 = vmatpush1.bf16.msra.mxu0 %v8758_v21  ;;  %v8823_v21 = vld [vmem:[#allocation11 + $0xd84] ss:$16 sps:$4 sm:$0xff]  }
 0x531   :  { %5717 = vmatprep.subr.bf16.mxu0 %v8766_v18  ;;  %v8818_v18 = vld [vmem:[#allocation11 + $0xf88] ss:$16 sps:$4 sm:$0xff]  }
 0x532   :  { %5117 = vmatpush1.bf16.msra.mxu1 %v8761_v39  ;;  %v8826_v39 = vld [vmem:[#allocation11 + $0xfac] ss:$16 sps:$4 sm:$0xff]  }
 0x533   :  { %5118 = vmatprep.subr.bf16.mxu1 %v8769_v28  ;;  %v8821_v28 = vld [vmem:[#allocation11 + $0xd80] ss:$16 sps:$4 sm:$0xff]  }
 0x534   :  { %5718 = vmatpush1.bf16.msra.mxu0 %v8764_v14  ;;  %v8829_v14 = vld [vmem:[#allocation11 + $0xda4] ss:$16 sps:$4 sm:$0xff]  }
 0x535   :  { %5719 = vmatprep.subr.bf16.mxu0 %v8772_v23  ;;  %v8824_v23 = vld [vmem:[#allocation11 + $0xfa8] ss:$16 sps:$4 sm:$0xff]  }
 0x536   :  { %5119 = vmatpush1.bf16.msra.mxu1 %v8767_v58  ;;  %v8832_v58 = vld [vmem:[#allocation11 + $0xfcc] ss:$16 sps:$4 sm:$0xff]  }
 0x537   :  { %5120 = vmatprep.subr.bf16.mxu1 %v8775_v31 }
 0x538   :  { %5720 = vmatpush1.bf16.msra.mxu0 %v8770_v32  ;;  %v8827_v32 = vld [vmem:[#allocation11 + $0xda0] ss:$16 sps:$4 sm:$0xff]  }
 0x539   :  { %5721 = vmatprep.subr.bf16.mxu0 %v8778_v19 }
 0x53a   :  { %v3792_v27 = vpop.f32.mrb[96].mxu0  ;;  %5121 = vmatpush1.bf16.msra.mxu1 %v8773_v5 }
 0x53b   :  { %v10066_v44 = vadd.f32 %v3792_v27, %v10046_v54  ;;  %v3794_v26 = vpop.f32.mrb[97].mxu0  ;;  %5122 = vmatprep.subr.bf16.mxu1 %v8781_v34  ;;  %v8790_v54 = vld [vmem:[#allocation11 + $0xeec] ss:$16 sps:$4 sm:$0xff]   ;;  %v8835_v34 = vld [vmem:[#allocation11 + $0xdc4] ss:$16 sps:$4 sm:$0xff]  }
 0x53c   :  { %v10069_v30 = vadd.f32 %v3794_v26, %v10049_v46  ;;  %v3193_v42 = vpop.f32.mrb[96].mxu1  ;;  %v3796_v61 = vpop.f32.mrb[98].mxu0  ;;  %5722 = vmatpush1.bf16.msra.mxu0 %v8776_v25  ;;  %v8785_v46 = vld [vmem:[#allocation11 + $0xcc0] ss:$16 sps:$4 sm:$0xff]   ;;  %v10091_v26 = vld [vmem:[#allocation10] ss:$0 sm:$0xff] }
 0x53d   :  { %v10074_v53 = vadd.f32 %v3193_v42, %v10054_v12  ;;  %v3195_v4 = vpop.f32.mrb[97].mxu1  ;;  %v3797_v8 = vpop.f32.mrb[99].mxu0  ;;  %5723 = vmatprep.subr.bf16.mxu0 %v8784_v37  ;;  %v8799_v12 = vld [vmem:[#allocation11 + $0xd04] ss:$16 sps:$4 sm:$0xff]  }
 0x53e   :  { %v10077_v13 = vadd.f32 %v3195_v4, %v10057_v29  ;;  %v3197_v17 = vpop.f32.mrb[98].mxu1  ;;  %5123 = vmatpush1.bf16.msra.mxu1 %v8779_v38  ;;  %v8802_v29 = vld [vmem:[#allocation11 + $0xf2c] ss:$16 sps:$4 sm:$0xff]   ;;  %v8830_v38 = vld [vmem:[#allocation11 + $0xfc8] ss:$16 sps:$4 sm:$0xff]  }
 0x53f   :  { %v3198_v47 = vpop.f32.mrb[99].mxu1  ;;  %5124 = vmatprep.subr.bf16.mxu1 %v8787_v41  ;;  %v1479_v41 = vadd.f32 %v10091_v26, %v9907_v57  ;;  %v8833_v4 = vld [vmem:[#allocation11 + $0xdc0] ss:$16 sps:$4 sm:$0xff]   ;;  %v8836_v17 = vld [vmem:[#allocation11 + $0xfe8] ss:$16 sps:$4 sm:$0xff]  }
 0x540   :  { %5724 = vmatpush1.bf16.msra.mxu0 %v8782_v45  ;;  %v8838_v45 = vld [vmem:[#allocation11 + $0xfec] ss:$16 sps:$4 sm:$0xff]   ;;  %v8847_v47 = vld [vmem:[#allocation11 + $0xe04] ss:$16 sps:$4 sm:$0xff]  }
 0x541   :  { %5725 = vmatprep.subr.bf16.mxu0 %v8790_v54  ;;  %v8841_v54 = vld [vmem:[#allocation11 + $0xde4] ss:$16 sps:$4 sm:$0xff]   ;;  %v8844_v57 = vld [vmem:[#allocation11 + $0x100c] ss:$16 sps:$4 sm:$0xff]  }
 0x542   :  { %5125 = vmatpush1.bf16.msra.mxu1 %v8785_v46  ;;  %v1505_v46 = vmax.f32 %v1479_v41, 0.0 }
 0x543   :  { %5126 = vmatprep.subr.bf16.mxu1 %v8793_v55  ;;  %v8842_v55 = vld [vmem:[#allocation11 + $0x1008] ss:$16 sps:$4 sm:$0xff]  }
 0x544   :  { %5726 = vmatpush1.bf16.msra.mxu0 %v8788_v56  ;;  %v10101_v56 = vpack.c.bf16 %v1505_v46, %v1505_v46  ;;  %v8901_v46 = vld [vmem:[#allocation11 + $0xf24] ss:$16 sps:$4 sm:$0xff]  }
 0x545   :  { %5990 = vmatprep.subr.bf16.mxu0 %v8796_v50  ;;  %v8853_v50 = vld [vmem:[#allocation11 + $0xe24] ss:$16 sps:$4 sm:$0xff]  }
 0x546   :  { %5127 = vmatpush1.bf16.msra.mxu1 %v8791_v9  ;;  %v8848_v9 = vld [vmem:[#allocation11 + $0x1028] ss:$16 sps:$4 sm:$0xff]  }
 0x547   :  { %5744 = vmatmul.mubr.bf16.vlgmr.msra.gmra.mrb[124].mxu0 %v10079_v7  ;;  %5391 = vmatprep.subr.bf16.mxu1 %v8799_v12  ;;  %v8856_v12 = vld [vmem:[#allocation11 + $0x104c] ss:$16 sps:$4 sm:$0xff]  }
 0x548   :  { %5991 = vmatpush1.bf16.msra.mxu0 %v8794_v35  ;;  %6022 = vmatprep.mubr.bf16.mxu0 %v9272_v1  ;;  %v8851_v35 = vld [vmem:[#allocation11 + $0xe20] ss:$16 sps:$4 sm:$0xff]  }
 0x549   :  { %5145 = vmatmul.mubr.bf16.vlgmr.msra.gmra.mrb[124].mxu1 %v10039_v16  ;;  %5992 = vmatprep.subr.bf16.mxu0 %v8802_v29  ;;  %v8820_v16 = vld [vmem:[#allocation11 + $0xf8c] ss:$16 sps:$4 sm:$0xff]   ;;  %v8859_v29 = vld [vmem:[#allocation11 + $0xe44] ss:$16 sps:$4 sm:$0xff]  }
 0x54a   :  { %5392 = vmatpush1.bf16.msra.mxu1 %v8797_v48  ;;  %5423 = vmatprep.mubr.bf16.mxu1 %v9272_v1  ;;  %v8854_v48 = vld [vmem:[#allocation11 + $0x1048] ss:$16 sps:$4 sm:$0xff]  }
 0x54b   :  { %5393 = vmatprep.subr.bf16.mxu1 %v8805_v40  ;;  %v8862_v40 = vld [vmem:[#allocation11 + $0x106c] ss:$16 sps:$4 sm:$0xff]  }
 0x54c   :  { %5993 = vmatpush1.bf16.msra.mxu0 %v8800_v3  ;;  %v8857_v3 = vld [vmem:[#allocation11 + $0xe40] ss:$16 sps:$4 sm:$0xff]  }
 0x54d   :  { %5994 = vmatprep.subr.bf16.mxu0 %v8808_v10  ;;  %v8865_v10 = vld [vmem:[#allocation11 + $0xe64] ss:$16 sps:$4 sm:$0xff]  }
 0x54e   :  { %5394 = vmatpush1.bf16.msra.mxu1 %v8803_v36  ;;  %v8860_v36 = vld [vmem:[#allocation11 + $0x1068] ss:$16 sps:$4 sm:$0xff]  }
 0x54f   :  { %5395 = vmatprep.subr.bf16.mxu1 %v8811_v59  ;;  %v8863_v59 = vld [vmem:[#allocation11 + $0xe60] ss:$16 sps:$4 sm:$0xff]  }
 0x550   :  { %5995 = vmatpush1.bf16.msra.mxu0 %v8806_v20  ;;  %v8871_v20 = vld [vmem:[#allocation11 + $0xe84] ss:$16 sps:$4 sm:$0xff]  }
 0x551   :  { %5996 = vmatprep.subr.bf16.mxu0 %v8814_v43  ;;  %v8866_v43 = vld [vmem:[#allocation11 + $0x1088] ss:$16 sps:$4 sm:$0xff]  }
 0x552   :  { %5396 = vmatpush1.bf16.msra.mxu1 %v8809_v24  ;;  %v8874_v24 = vld [vmem:[#allocation11 + $0x10ac] ss:$16 sps:$4 sm:$0xff]  }
 0x553   :  { %5397 = vmatprep.subr.bf16.mxu1 %v8817_v51  ;;  %v8869_v51 = vld [vmem:[#allocation11 + $0xe80] ss:$16 sps:$4 sm:$0xff]  }
 0x554   :  { %5997 = vmatpush1.bf16.msra.mxu0 %v8812_v52  ;;  %v8877_v52 = vld [vmem:[#allocation11 + $0xea4] ss:$16 sps:$4 sm:$0xff]  }
 0x555   :  { %5998 = vmatprep.subr.bf16.mxu0 %v8820_v16  ;;  %v8872_v16 = vld [vmem:[#allocation11 + $0x10a8] ss:$16 sps:$4 sm:$0xff]  }
 0x556   :  { %5398 = vmatpush1.bf16.msra.mxu1 %v8815_v6  ;;  %v8880_v6 = vld [vmem:[#allocation11 + $0x10cc] ss:$16 sps:$4 sm:$0xff]  }
 0x557   :  { %5399 = vmatprep.subr.bf16.mxu1 %v8823_v21 }
 0x558   :  { %5999 = vmatpush1.bf16.msra.mxu0 %v8818_v18  ;;  %v8875_v18 = vld [vmem:[#allocation11 + $0xea0] ss:$16 sps:$4 sm:$0xff]  }
 0x559   :  { %6000 = vmatprep.subr.bf16.mxu0 %v8826_v39 }
 0x55a   :  { %v4071_v31 = vpop.f32.mrb[100].mxu0  ;;  %5400 = vmatpush1.bf16.msra.mxu1 %v8821_v28 }
 0x55b   :  { %v10086_v19 = vadd.f32 %v4071_v31, %v10066_v44  ;;  %v4073_v5 = vpop.f32.mrb[101].mxu0  ;;  %5401 = vmatprep.subr.bf16.mxu1 %v8829_v14  ;;  %v8883_v14 = vld [vmem:[#allocation11 + $0xec4] ss:$16 sps:$4 sm:$0xff]  }
 0x55c   :  { %v10089_v25 = vadd.f32 %v4073_v5, %v10069_v30  ;;  %v3472_v37 = vpop.f32.mrb[100].mxu1  ;;  %v4075_v27 = vpop.f32.mrb[102].mxu0  ;;  %6001 = vmatpush1.bf16.msra.mxu0 %v8824_v23  ;;  %v1484_v5 = vadd.f32 %v10091_v26, %v9911_v0  ;;  %v8892_v0 = vld [vmem:[#allocation11 + $0x110c] ss:$16 sps:$4 sm:$0xff]  }
 0x55d   :  { %v10096_v42 = vadd.f32 %v3472_v37, %v10074_v53  ;;  %v3474_v44 = vpop.f32.mrb[101].mxu1  ;;  %v4076_v61 = vpop.f32.mrb[103].mxu0  ;;  %6002 = vmatprep.subr.bf16.mxu0 %v8832_v58  ;;  %v8839_v53 = vld [vmem:[#allocation11 + $0xde0] ss:$16 sps:$4 sm:$0xff]  }
 0x55e   :  { %v10099_v49 = vadd.f32 %v3474_v44, %v10077_v13  ;;  %v3476_v30 = vpop.f32.mrb[102].mxu1  ;;  %5402 = vmatpush1.bf16.msra.mxu1 %v8827_v32  ;;  %v8850_v13 = vld [vmem:[#allocation11 + $0x102c] ss:$16 sps:$4 sm:$0xff]   ;;  %v8878_v32 = vld [vmem:[#allocation11 + $0x10c8] ss:$16 sps:$4 sm:$0xff]  }
 0x55f   :  { %v3477_v8 = vpop.f32.mrb[103].mxu1  ;;  %5403 = vmatprep.subr.bf16.mxu1 %v8835_v34  ;;  %v8889_v61 = vld [vmem:[#allocation11 + $0xee4] ss:$16 sps:$4 sm:$0xff]   ;;  %v1506_v30 = vmax.f32 %v1484_v5, 0.0  ;;  %v8929_v5 = vld [vmem:[#allocation11 + $0xfc0] ss:$16 sps:$4 sm:$0xff]  }
 0x560   :  { %6003 = vmatpush1.bf16.msra.mxu0 %v8830_v38  ;;  %v8890_v8 = vld [vmem:[#allocation11 + $0x1108] ss:$16 sps:$4 sm:$0xff]  }
 0x561   :  { %6004 = vmatprep.subr.bf16.mxu0 %v8838_v45  ;;  %v8884_v45 = vld [vmem:[#allocation11 + $0x10e8] ss:$16 sps:$4 sm:$0xff]  }
 0x562   :  { %5404 = vmatpush1.bf16.msra.mxu1 %v8833_v4  ;;  %v8895_v4 = vld [vmem:[#allocation11 + $0xf04] ss:$16 sps:$4 sm:$0xff]  }
 0x563   :  { %5405 = vmatprep.subr.bf16.mxu1 %v8841_v54  ;;  %v10121_v54 = vpack.c.bf16 %v1506_v30, %v1506_v30  ;;  %v8947_v30 = vld [vmem:[#allocation11 + $0x1060] ss:$16 sps:$4 sm:$0xff]  }
 0x564   :  { %6005 = vmatpush1.bf16.msra.mxu0 %v8836_v17  ;;  %v8893_v17 = vld [vmem:[#allocation11 + $0xf00] ss:$16 sps:$4 sm:$0xff]  }
 0x565   :  { %6269 = vmatprep.subr.bf16.mxu0 %v8844_v57  ;;  %v8896_v57 = vld [vmem:[#allocation11 + $0x1128] ss:$16 sps:$4 sm:$0xff]  }
 0x566   :  { %5406 = vmatpush1.bf16.msra.mxu1 %v8839_v53  ;;  %v8904_v53 = vld [vmem:[#allocation11 + $0x114c] ss:$16 sps:$4 sm:$0xff]  }
 0x567   :  { %6023 = vmatmul.mubr.bf16.vlgmr.msra.gmra.mrb[128].mxu0 %v10101_v56  ;;  %5670 = vmatprep.subr.bf16.mxu1 %v8847_v47  ;;  %v8899_v47 = vld [vmem:[#allocation11 + $0xf20] ss:$16 sps:$4 sm:$0xff]  }
 0x568   :  { %6270 = vmatpush1.bf16.msra.mxu0 %v8842_v55  ;;  %6301 = vmatprep.mubr.bf16.mxu0 %v9272_v1  ;;  %v8907_v55 = vld [vmem:[#allocation11 + $0xf44] ss:$16 sps:$4 sm:$0xff]  }
 0x569   :  { %5424 = vmatmul.mubr.bf16.vlgmr.msra.gmra.mrb[128].mxu1 %v10059_v33  ;;  %6271 = vmatprep.subr.bf16.mxu0 %v8850_v13  ;;  %v8868_v33 = vld [vmem:[#allocation11 + $0x108c] ss:$16 sps:$4 sm:$0xff]   ;;  %v8902_v13 = vld [vmem:[#allocation11 + $0x1148] ss:$16 sps:$4 sm:$0xff]  }
 0x56a   :  { %5671 = vmatpush1.bf16.msra.mxu1 %v8845_v22  ;;  %5702 = vmatprep.mubr.bf16.mxu1 %v9272_v1  ;;  %v8910_v22 = vld [vmem:[#allocation11 + $0x116c] ss:$16 sps:$4 sm:$0xff]  }
 0x56b   :  { %5672 = vmatprep.subr.bf16.mxu1 %v8853_v50  ;;  %v8905_v50 = vld [vmem:[#allocation11 + $0xf40] ss:$16 sps:$4 sm:$0xff]  }
 0x56c   :  { %6272 = vmatpush1.bf16.msra.mxu0 %v8848_v9  ;;  %v8913_v9 = vld [vmem:[#allocation11 + $0xf64] ss:$16 sps:$4 sm:$0xff]  }
 0x56d   :  { %6273 = vmatprep.subr.bf16.mxu0 %v8856_v12  ;;  %v8908_v12 = vld [vmem:[#allocation11 + $0x1168] ss:$16 sps:$4 sm:$0xff]  }
 0x56e   :  { %5673 = vmatpush1.bf16.msra.mxu1 %v8851_v35  ;;  %v8911_v35 = vld [vmem:[#allocation11 + $0xf60] ss:$16 sps:$4 sm:$0xff]  }
 0x56f   :  { %5674 = vmatprep.subr.bf16.mxu1 %v8859_v29  ;;  %v8919_v29 = vld [vmem:[#allocation11 + $0xf84] ss:$16 sps:$4 sm:$0xff]  }
 0x570   :  { %6274 = vmatpush1.bf16.msra.mxu0 %v8854_v48  ;;  %v8914_v48 = vld [vmem:[#allocation11 + $0x1188] ss:$16 sps:$4 sm:$0xff]  }
 0x571   :  { %6275 = vmatprep.subr.bf16.mxu0 %v8862_v40  ;;  %v8922_v40 = vld [vmem:[#allocation11 + $0x11ac] ss:$16 sps:$4 sm:$0xff]  }
 0x572   :  { %5675 = vmatpush1.bf16.msra.mxu1 %v8857_v3  ;;  %v8917_v3 = vld [vmem:[#allocation11 + $0xf80] ss:$16 sps:$4 sm:$0xff]  }
 0x573   :  { %5676 = vmatprep.subr.bf16.mxu1 %v8865_v10  ;;  %v8925_v10 = vld [vmem:[#allocation11 + $0xfa4] ss:$16 sps:$4 sm:$0xff]  }
 0x574   :  { %6276 = vmatpush1.bf16.msra.mxu0 %v8860_v36  ;;  %v8920_v36 = vld [vmem:[#allocation11 + $0x11a8] ss:$16 sps:$4 sm:$0xff]  }
 0x575   :  { %6277 = vmatprep.subr.bf16.mxu0 %v8868_v33  ;;  %v8928_v33 = vld [vmem:[#allocation11 + $0x11cc] ss:$16 sps:$4 sm:$0xff]  }
 0x576   :  { %5677 = vmatpush1.bf16.msra.mxu1 %v8863_v59 }
 0x577   :  { %5678 = vmatprep.subr.bf16.mxu1 %v8871_v20  ;;  %v8923_v20 = vld [vmem:[#allocation11 + $0xfa0] ss:$16 sps:$4 sm:$0xff]  }
 0x578   :  { %6278 = vmatpush1.bf16.msra.mxu0 %v8866_v43 }
 0x579   :  { %6279 = vmatprep.subr.bf16.mxu0 %v8874_v24 }
 0x57a   :  { %v4350_v21 = vpop.f32.mrb[104].mxu0  ;;  %5679 = vmatpush1.bf16.msra.mxu1 %v8869_v51  ;;  %v8931_v51 = vld [vmem:[#allocation11 + $0xfc4] ss:$16 sps:$4 sm:$0xff]  }
 0x57b   :  { %v10108_v39 = vadd.f32 %v4350_v21, %v10086_v19  ;;  %v4352_v28 = vpop.f32.mrb[105].mxu0  ;;  %5680 = vmatprep.subr.bf16.mxu1 %v8877_v52  ;;  %v8886_v19 = vld [vmem:[#allocation11 + $0x10ec] ss:$16 sps:$4 sm:$0xff]   ;;  %v8926_v21 = vld [vmem:[#allocation11 + $0x11c8] ss:$16 sps:$4 sm:$0xff]  }
 0x57c   :  { %v10111_v23 = vadd.f32 %v4352_v28, %v10089_v25  ;;  %v3751_v58 = vpop.f32.mrb[104].mxu1  ;;  %v4354_v31 = vpop.f32.mrb[106].mxu0  ;;  %6280 = vmatpush1.bf16.msra.mxu0 %v8872_v16  ;;  %v8881_v25 = vld [vmem:[#allocation11 + $0xec0] ss:$16 sps:$4 sm:$0xff]  }
 0x57d   :  { %v10116_v34 = vadd.f32 %v3751_v58, %v10096_v42  ;;  %v3753_v37 = vpop.f32.mrb[105].mxu1  ;;  %v4355_v27 = vpop.f32.mrb[107].mxu0  ;;  %6281 = vmatprep.subr.bf16.mxu0 %v8880_v6  ;;  %v8887_v42 = vld [vmem:[#allocation11 + $0xee0] ss:$16 sps:$4 sm:$0xff]   ;;  %v8934_v31 = vld [vmem:[#allocation11 + $0x11ec] ss:$16 sps:$4 sm:$0xff]  }
 0x57e   :  { %v10119_v38 = vadd.f32 %v3753_v37, %v10099_v49  ;;  %v3755_v41 = vpop.f32.mrb[106].mxu1  ;;  %5681 = vmatpush1.bf16.msra.mxu1 %v8875_v18  ;;  %v8898_v49 = vld [vmem:[#allocation11 + $0x112c] ss:$16 sps:$4 sm:$0xff]   ;;  %v1487_v18 = vadd.f32 %v10091_v26, %v9913_v15  ;;  %v8932_v27 = vld [vmem:[#allocation11 + $0x11e8] ss:$16 sps:$4 sm:$0xff]  }
 0x57f   :  { %v3756_v44 = vpop.f32.mrb[107].mxu1  ;;  %5682 = vmatprep.subr.bf16.mxu1 %v8883_v14  ;;  %v8935_v15 = vld [vmem:[#allocation11 + $0xfe0] ss:$16 sps:$4 sm:$0xff]   ;;  %v8940_v26 = vld [vmem:[#allocation11 + $0x1004] ss:$16 sps:$4 sm:$0xff]  }
 0x580   :  { %6282 = vmatpush1.bf16.msra.mxu0 %v8878_v32  ;;  %v8938_v41 = vld [vmem:[#allocation11 + $0x1000] ss:$16 sps:$4 sm:$0xff]   ;;  %v8946_v44 = vld [vmem:[#allocation11 + $0x1044] ss:$16 sps:$4 sm:$0xff]  }
 0x581   :  { %6283 = vmatprep.subr.bf16.mxu0 %v8886_v19  ;;  %v1507_v19 = vmax.f32 %v1487_v18, 0.0 }
 0x582   :  { %5683 = vmatpush1.bf16.msra.mxu1 %v8881_v25  ;;  %v8941_v25 = vld [vmem:[#allocation11 + $0x1020] ss:$16 sps:$4 sm:$0xff]  }
 0x583   :  { %5684 = vmatprep.subr.bf16.mxu1 %v8889_v61  ;;  %v8944_v61 = vld [vmem:[#allocation11 + $0x1040] ss:$16 sps:$4 sm:$0xff]  }
 0x584   :  { %6284 = vmatpush1.bf16.msra.mxu0 %v8884_v45  ;;  %v8949_v45 = vld [vmem:[#allocation11 + $0x1064] ss:$16 sps:$4 sm:$0xff]  }
 0x585   :  { %6548 = vmatprep.subr.bf16.mxu0 %v8892_v0  ;;  %v8952_v0 = vld [vmem:[#allocation11 + $0x1084] ss:$16 sps:$4 sm:$0xff]  }
 0x586   :  { %5685 = vmatpush1.bf16.msra.mxu1 %v8887_v42  ;;  %v8950_v42 = vld [vmem:[#allocation11 + $0x1080] ss:$16 sps:$4 sm:$0xff]  }
 0x587   :  { %6302 = vmatmul.mubr.bf16.vlgmr.msra.gmra.mrb[132].mxu0 %v10121_v54  ;;  %5949 = vmatprep.subr.bf16.mxu1 %v8895_v4  ;;  %v8955_v4 = vld [vmem:[#allocation11 + $0x10a4] ss:$16 sps:$4 sm:$0xff]  }
 0x588   :  { %6549 = vmatpush1.bf16.msra.mxu0 %v8890_v8  ;;  %6580 = vmatprep.mubr.bf16.mxu0 %v9272_v1 }
 0x589   :  { %5703 = vmatmul.mubr.bf16.vlgmr.msra.gmra.mrb[132].mxu1 %v10079_v7  ;;  %6550 = vmatprep.subr.bf16.mxu0 %v8898_v49  ;;  %v8916_v7 = vld [vmem:[#allocation11 + $0x118c] ss:$16 sps:$4 sm:$0xff]  }
 0x58a   :  { %5950 = vmatpush1.bf16.msra.mxu1 %v8893_v17  ;;  %5981 = vmatprep.mubr.bf16.mxu1 %v9272_v1 }
 0x58b   :  { %5951 = vmatprep.subr.bf16.mxu1 %v8901_v46  ;;  %v8958_v46 = vld [vmem:[#allocation11 + $0x10c4] ss:$16 sps:$4 sm:$0xff]  }
 0x58c   :  { %6551 = vmatpush1.bf16.msra.mxu0 %v8896_v57 }
 0x58d   :  { %6552 = vmatprep.subr.bf16.mxu0 %v8904_v53 }
 0x58e   :  { %5952 = vmatpush1.bf16.msra.mxu1 %v8899_v47 }
 0x58f   :  { %5953 = vmatprep.subr.bf16.mxu1 %v8907_v55 }
 0x590   :  { %6553 = vmatpush1.bf16.msra.mxu0 %v8902_v13 }
 0x591   :  { %6554 = vmatprep.subr.bf16.mxu0 %v8910_v22 }
 0x592   :  { %5954 = vmatpush1.bf16.msra.mxu1 %v8905_v50 }
 0x593   :  { %5955 = vmatprep.subr.bf16.mxu1 %v8913_v9 }
 0x594   :  { %6555 = vmatpush1.bf16.msra.mxu0 %v8908_v12  ;;  %v8956_v12 = vld [vmem:[#allocation11 + $0x10c0] ss:$16 sps:$4 sm:$0xff]  }
 0x595   :  { %6556 = vmatprep.subr.bf16.mxu0 %v8916_v7 }
 0x596   :  { %5956 = vmatpush1.bf16.msra.mxu1 %v8911_v35  ;;  %v8961_v35 = vld [vmem:[#allocation11 + $0x10e4] ss:$16 sps:$4 sm:$0xff]  }
 0x597   :  { %5957 = vmatprep.subr.bf16.mxu1 %v8919_v29  ;;  %v8959_v29 = vld [vmem:[#allocation11 + $0x10e0] ss:$16 sps:$4 sm:$0xff]  }
 0x598   :  { %6557 = vmatpush1.bf16.msra.mxu0 %v8914_v48  ;;  %v8964_v48 = vld [vmem:[#allocation11 + $0x1104] ss:$16 sps:$4 sm:$0xff]  }
 0x599   :  { %6558 = vmatprep.subr.bf16.mxu0 %v8922_v40  ;;  %v8962_v40 = vld [vmem:[#allocation11 + $0x1100] ss:$16 sps:$4 sm:$0xff]  }
 0x59a   :  { %v4629_v59 = vpop.f32.mrb[108].mxu0  ;;  %5958 = vmatpush1.bf16.msra.mxu1 %v8917_v3  ;;  %v8967_v3 = vld [vmem:[#allocation11 + $0x1124] ss:$16 sps:$4 sm:$0xff]  }
 0x59b   :  { %v4638_v43 = vadd.f32 %v4629_v59, %v10108_v39  ;;  %v4631_v24 = vpop.f32.mrb[109].mxu0  ;;  %5959 = vmatprep.subr.bf16.mxu1 %v8925_v10  ;;  %v8965_v10 = vld [vmem:[#allocation11 + $0x1120] ss:$16 sps:$4 sm:$0xff]   ;;  %v8973_v59 = vld [vmem:[#allocation11 + $0x1164] ss:$16 sps:$4 sm:$0xff]  }
 0x59c   :  { %v4639_v52 = vadd.f32 %v4631_v24, %v10111_v23  ;;  %v4030_v16 = vpop.f32.mrb[108].mxu1  ;;  %v4633_v6 = vpop.f32.mrb[110].mxu0  ;;  %6559 = vmatpush1.bf16.msra.mxu0 %v8920_v36  ;;  %v8937_v23 = vld [vmem:[#allocation11 + $0xfe4] ss:$16 sps:$4 sm:$0xff]   ;;  %v8974_v24 = vld [vmem:[#allocation11 + $0x1180] ss:$16 sps:$4 sm:$0xff]  }
 0x59d   :  { %v4078_v28 = vadd.f32 %v4030_v16, %v10116_v34  ;;  %v4032_v14 = vpop.f32.mrb[109].mxu1  ;;  %v4634_v58 = vpop.f32.mrb[111].mxu0  ;;  %6560 = vmatprep.subr.bf16.mxu0 %v8928_v33  ;;  %v10133_v34 = vpack.c.bf16 %v1507_v19, %v1507_v19  ;;  %v8970_v36 = vld [vmem:[#allocation11 + $0x1144] ss:$16 sps:$4 sm:$0xff]   ;;  %v8968_v33 = vld [vmem:[#allocation11 + $0x1140] ss:$16 sps:$4 sm:$0xff]  }
 0x59e   :  { %v4079_v39 = vadd.f32 %v4032_v14, %v10119_v38  ;;  %v4034_v32 = vpop.f32.mrb[110].mxu1  ;;  %5960 = vmatpush1.bf16.msra.mxu1 %v8923_v20  ;;  %v8943_v38 = vld [vmem:[#allocation11 + $0x1024] ss:$16 sps:$4 sm:$0xff]   ;;  %v8971_v20 = vld [vmem:[#allocation11 + $0x1160] ss:$16 sps:$4 sm:$0xff]  }
 0x59f   :  { %v4035_v37 = vpop.f32.mrb[111].mxu1  ;;  %5961 = vmatprep.subr.bf16.mxu1 %v8931_v51  ;;  %v8979_v51 = vld [vmem:[#allocation11 + $0x11a4] ss:$16 sps:$4 sm:$0xff]  }
 0x5a0   :  { %6561 = vmatpush1.bf16.msra.mxu0 %v8926_v21  ;;  %v8985_v37 = vld [vmem:[#allocation11 + $0x11e4] ss:$16 sps:$4 sm:$0xff]  }
 0x5a1   :  { %6562 = vmatprep.subr.bf16.mxu0 %v8934_v31  ;;  %v8987_v19 = vld [vmem:[#allocation14 + $0x80] sm:$0xff]  }
 0x5a2   :  { %5962 = vmatpush1.bf16.msra.mxu1 %v8929_v5  ;;  %v8980_v5 = vld [vmem:[#allocation11 + $0x11c0] ss:$16 sps:$4 sm:$0xff]  }
 0x5a3   :  { %5963 = vmatprep.subr.bf16.mxu1 %v8937_v23 }
 0x5a4   :  { %6563 = vmatpush1.bf16.msra.mxu0 %v8932_v27  ;;  %v8986_v27 = vld [vmem:[#allocation14 + $0xc0] sm:$0xff]  }
 0x5a5   :  { %7861 = vmatprep.subr.bf16.mxu0 %v8986_v27 }
 0x5a6   :  { %5964 = vmatpush1.bf16.msra.mxu1 %v8935_v15  ;;  %v8988_v15 = vld [vmem:[#allocation14 + $0xc8] sm:$0xff]  }
 0x5a7   :  { %6581 = vmatmul.mubr.bf16.vlgmr.msra.gmra.mrb[136].mxu0 %v10133_v34  ;;  %6228 = vmatprep.subr.bf16.mxu1 %v8940_v26  ;;  %v8983_v26 = vld [vmem:[#allocation11 + $0x11e0] ss:$16 sps:$4 sm:$0xff]  }
 0x5a8   :  { %7862 = vmatpush3.bf16.msra.mxu0 %v8987_v19 }
 0x5a9   :  { %5982 = vmatmul.mubr.bf16.vlgmr.msra.gmra.mrb[136].mxu1 %v10101_v56  ;;  %v8953_v56 = vld [vmem:[#allocation11 + $0x10a0] ss:$16 sps:$4 sm:$0xff]   ;;  %7863 = vmatprep.subr.bf16.mxu0 %v8988_v15 }
 0x5aa   :  { %6229 = vmatpush1.bf16.msra.mxu1 %v8938_v41  ;;  %6260 = vmatprep.mubr.bf16.mxu1 %v9272_v1  ;;  %v8989_v41 = vld [vmem:[#allocation14 + $0x88] sm:$0xff]  }
 0x5ab   :  { %6230 = vmatprep.subr.bf16.mxu1 %v8943_v38  ;;  %v8990_v38 = vld [vmem:[#allocation14 + $0xd0] sm:$0xff]  }
 0x5ac   :  { %7864 = vmatpush3.bf16.msra.mxu0 %v8989_v41 }
 0x5ad   :  { %7865 = vmatprep.subr.bf16.mxu0 %v8990_v38 }
 0x5ae   :  { %6231 = vmatpush1.bf16.msra.mxu1 %v8941_v25  ;;  %v8991_v25 = vld [vmem:[#allocation14 + $0x90] sm:$0xff]  }
 0x5af   :  { %6232 = vmatprep.subr.bf16.mxu1 %v8946_v44  ;;  %v8992_v44 = vld [vmem:[#allocation14 + $0xd8] sm:$0xff]  }
 0x5b0   :  { %7866 = vmatpush3.bf16.msra.mxu0 %v8991_v25  ;;  %v9015_v25 = vld [vmem:[#allocation14 + $0x30] sm:$0xff]  }
 0x5b1   :  { %7867 = vmatprep.subr.bf16.mxu0 %v8992_v44 }
 0x5b2   :  { %6233 = vmatpush1.bf16.msra.mxu1 %v8944_v61  ;;  %v8993_v61 = vld [vmem:[#allocation14 + $0x98] sm:$0xff]  }
 0x5b3   :  { %6234 = vmatprep.subr.bf16.mxu1 %v8949_v45  ;;  %v8994_v45 = vld [vmem:[#allocation14 + $0xe0] sm:$0xff]  }
 0x5b4   :  { %7868 = vmatpush3.bf16.msra.mxu0 %v8993_v61  ;;  %v9016_v61 = vld [vmem:[#allocation14 + $0x78] sm:$0xff]  }
 0x5b5   :  { %7869 = vmatprep.subr.bf16.mxu0 %v8994_v45  ;;  %v9017_v45 = vld [vmem:[#allocation14 + $0x38] sm:$0xff]  }
 0x5b6   :  { %6235 = vmatpush1.bf16.msra.mxu1 %v8947_v30  ;;  %v8995_v30 = vld [vmem:[#allocation14 + $0xa0] sm:$0xff]  }
 0x5b7   :  { %6236 = vmatprep.subr.bf16.mxu1 %v8952_v0  ;;  %v8996_v0 = vld [vmem:[#allocation14 + $0xe8] sm:$0xff]  }
 0x5b8   :  { %7870 = vmatpush3.bf16.msra.mxu0 %v8995_v30 }
 0x5b9   :  { %7871 = vmatprep.subr.bf16.mxu0 %v8996_v0 }
 0x5ba   :  { %v4908_v8 = vpop.f32.mrb[112].mxu0  ;;  %6237 = vmatpush1.bf16.msra.mxu1 %v8950_v42  ;;  %v8997_v42 = vld [vmem:[#allocation14 + $0xa8] sm:$0xff]  }
 0x5bb   :  { %v4917_v49 = vadd.f32 %v4908_v8, %v4638_v43  ;;  %v4910_v17 = vpop.f32.mrb[113].mxu0  ;;  %6238 = vmatprep.subr.bf16.mxu1 %v8955_v4  ;;  %v8976_v43 = vld [vmem:[#allocation11 + $0x1184] ss:$16 sps:$4 sm:$0xff]  }
 0x5bc   :  { %v4918_v57 = vadd.f32 %v4910_v17, %v4639_v52  ;;  %v4309_v53 = vpop.f32.mrb[112].mxu1  ;;  %v4912_v47 = vpop.f32.mrb[114].mxu0  ;;  %7872 = vmatpush3.bf16.msra.mxu0 %v8997_v42 }
 0x5bd   :  { %v4357_v55 = vadd.f32 %v4309_v53, %v4078_v28  ;;  %v4311_v13 = vpop.f32.mrb[113].mxu1  ;;  %v4913_v22 = vpop.f32.mrb[115].mxu0 }
 0x5be   :  { %v4358_v50 = vadd.f32 %v4311_v13, %v4079_v39  ;;  %v4313_v9 = vpop.f32.mrb[114].mxu1  ;;  %6239 = vmatpush1.bf16.msra.mxu1 %v8953_v56 }
 0x5bf   :  { %v4314_v7 = vpop.f32.mrb[115].mxu1  ;;  %6240 = vmatprep.subr.bf16.mxu1 %v8958_v46  ;;  %v9000_v9 = vld [vmem:[#allocation14 + $0xf8] sm:$0xff]  }
 0x5c2   :  { %6241 = vmatpush1.bf16.msra.mxu1 %v8956_v12  ;;  %v9001_v12 = vld [vmem:[#allocation14 + $0xb8] sm:$0xff]  }
 0x5c3   :  { %6242 = vmatprep.subr.bf16.mxu1 %v8961_v35 }
 0x5c6   :  { %6243 = vmatpush1.bf16.msra.mxu1 %v8959_v29 }
 0x5c7   :  { %6507 = vmatprep.subr.bf16.mxu1 %v8964_v48 }
 0x5c9   :  { %6261 = vmatmul.mubr.bf16.vlgmr.msra.gmra.mrb[140].mxu1 %v10121_v54  ;;  %v8977_v54 = vld [vmem:[#allocation11 + $0x11a0] ss:$16 sps:$4 sm:$0xff]  }
 0x5ca   :  { %6508 = vmatpush1.bf16.msra.mxu1 %v8962_v40  ;;  %6539 = vmatprep.mubr.bf16.mxu1 %v9272_v1  ;;  %v8982_v1 = vld [vmem:[#allocation11 + $0x11c4] ss:$16 sps:$4 sm:$0xff]  }
 0x5cb   :  { %6509 = vmatprep.subr.bf16.mxu1 %v8967_v3 }
 0x5ce   :  { %6510 = vmatpush1.bf16.msra.mxu1 %v8965_v10 }
 0x5cf   :  { %6511 = vmatprep.subr.bf16.mxu1 %v8970_v36 }
 0x5d2   :  { %6512 = vmatpush1.bf16.msra.mxu1 %v8968_v33 }
 0x5d3   :  { %6513 = vmatprep.subr.bf16.mxu1 %v8973_v59 }
 0x5d6   :  { %6514 = vmatpush1.bf16.msra.mxu1 %v8971_v20 }
 0x5d7   :  { %6515 = vmatprep.subr.bf16.mxu1 %v8976_v43 }
 0x5da   :  { %v5187_v52 = vpop.f32.mrb[116].mxu0  ;;  %6516 = vmatpush1.bf16.msra.mxu1 %v8974_v24  ;;  %v9002_v24 = vld [vmem:[#allocation14 + $0x40] sm:$0xff]  }
 0x5db   :  { %v5196_v16 = vadd.f32 %v5187_v52, %v4917_v49  ;;  %v5189_v6 = vpop.f32.mrb[117].mxu0  ;;  %6517 = vmatprep.subr.bf16.mxu1 %v8979_v51  ;;  %v8998_v49 = vld [vmem:[#allocation14 + $0xf0] sm:$0xff]   ;;  %v9003_v51 = vld [vmem:[#allocation14] sm:$0xff]   ;;  %v9004_v52 = vld [vmem:[#allocation14 + $0x48] sm:$0xff]  }
 0x5dc   :  { %v5197_v21 = vadd.f32 %v5189_v6, %v4918_v57  ;;  %v4588_v18 = vpop.f32.mrb[116].mxu1  ;;  %v5191_v28 = vpop.f32.mrb[118].mxu0  ;;  %7873 = vmatprep.subr.bf16.mxu0 %v8998_v49  ;;  %v9007_v6 = vld [vmem:[#allocation14 + $0x10] sm:$0xff]  }
 0x5dd   :  { %v4636_v14 = vadd.f32 %v4588_v18, %v4357_v55  ;;  %v4590_v58 = vpop.f32.mrb[117].mxu1  ;;  %v5192_v31 = vpop.f32.mrb[119].mxu0  ;;  %v9010_v18 = vld [vmem:[#allocation14 + $0x60] sm:$0xff]  }
 0x5de   :  { %v4637_v39 = vadd.f32 %v4590_v58, %v4358_v50  ;;  %v4592_v32 = vpop.f32.mrb[118].mxu1  ;;  %6518 = vmatpush1.bf16.msra.mxu1 %v8977_v54  ;;  %v9005_v54 = vld [vmem:[#allocation14 + $0x8] sm:$0xff]   ;;  %v9011_v28 = vld [vmem:[#allocation14 + $0x20] sm:$0xff]  }
 0x5df   :  { %v4593_v23 = vpop.f32.mrb[119].mxu1  ;;  %6519 = vmatprep.subr.bf16.mxu1 %v8982_v1  ;;  %v9008_v1 = vld [vmem:[#allocation14 + $0x58] sm:$0xff]   ;;  %v9013_v31 = vld [vmem:[#allocation14 + $0x28] sm:$0xff]  }
 0x5e2   :  { %6520 = vmatpush1.bf16.msra.mxu1 %v8980_v5 }
 0x5e3   :  { %6521 = vmatprep.subr.bf16.mxu1 %v8985_v37 }
 0x5e6   :  { %6522 = vmatpush1.bf16.msra.mxu1 %v8983_v26  ;;  %v9014_v26 = vld [vmem:[#allocation14 + $0x70] sm:$0xff]  }
 0x5e7   :  { %7839 = vmatprep.subr.bf16.mxu1 %v9002_v24 }
 0x5e9   :  { %6540 = vmatmul.mubr.bf16.vlgmr.msra.gmra.mrb[144].mxu1 %v10133_v34  ;;  %v8999_v34 = vld [vmem:[#allocation14 + $0xb0] sm:$0xff]  }
 0x5ea   :  { %7874 = vmatpush3.bf16.msra.mxu0 %v8999_v34  ;;  %7840 = vmatpush3.bf16.msra.mxu1 %v9003_v51 }
 0x5eb   :  { %7875 = vmatprep.subr.bf16.mxu0 %v9000_v9  ;;  %7841 = vmatprep.subr.bf16.mxu1 %v9004_v52 }
 0x5ee   :  { %7876 = vmatpush3.bf16.msra.mxu0 %v9001_v12  ;;  %7842 = vmatpush3.bf16.msra.mxu1 %v9005_v54 }
 0x5fa   :  { %v5466_v4 = vpop.f32.mrb[120].mxu0 }
 0x5fb   :  { %v5475_v8 = vadd.f32 %v5466_v4, %v5196_v16  ;;  %v5468_v56 = vpop.f32.mrb[121].mxu0  ;;  %v9006_v16 = vld [vmem:[#allocation14 + $0x50] sm:$0xff]  }
 0x5fc   :  { %v5476_v17 = vadd.f32 %v5468_v56, %v5197_v21  ;;  %v4867_v46 = vpop.f32.mrb[120].mxu1  ;;  %v5470_v57 = vpop.f32.mrb[122].mxu0  ;;  %7843 = vmatprep.subr.bf16.mxu1 %v9006_v16  ;;  %v9009_v21 = vld [vmem:[#allocation14 + $0x18] sm:$0xff]  }
 0x5fd   :  { %v4915_v53 = vadd.f32 %v4867_v46, %v4636_v14  ;;  %v4869_v47 = vpop.f32.mrb[121].mxu1  ;;  %v5471_v55 = vpop.f32.mrb[123].mxu0  ;;  %7844 = vmatpush3.bf16.msra.mxu1 %v9007_v6  ;;  %v9012_v14 = vld [vmem:[#allocation14 + $0x68] sm:$0xff]  }
 0x5fe   :  { %v4916_v13 = vadd.f32 %v4869_v47, %v4637_v39  ;;  %v4871_v22 = vpop.f32.mrb[122].mxu1  ;;  %7845 = vmatprep.subr.bf16.mxu1 %v9008_v1  ;;  %v6593_v47 = vld [vmem:[#allocation13] sm:$0xf]  ;;  %v6609_v55 = vsub.s32 3, %v9658_v60 }
 0x5ff   :  { %v4872_v50 = vpop.f32.mrb[123].mxu1 }
 0x600   :  { %v6610_v50 = vrot.slane %v6593_v47, %v6609_v55 }
 0x601   :  { %7846 = vmatpush3.bf16.msra.mxu1 %v9009_v21  ;;  %v6598_v21 = vrot.slane %v6593_v47, %v9661_v62 }
 0x602   :  { %7847 = vmatprep.subr.bf16.mxu1 %v9010_v18 }
 0x605   :  { %7848 = vmatpush3.bf16.msra.mxu1 %v9011_v28  ;;  %v6602_v28 = vrot.slane %v6593_v47, %v9664_v63 }
 0x606   :  { %7849 = vmatprep.subr.bf16.mxu1 %v9012_v14 }
 0x609   :  { %7850 = vmatpush3.bf16.msra.mxu1 %v9013_v31 }
 0x60a   :  { %7851 = vmatprep.subr.bf16.mxu1 %v9014_v26  ;;  %v6972_v26 = vld [vmem:[#allocation2] sm:$0x1] }
 0x60b   :  { %6975 = vperm.xlu0 %8023, %v6972_v26  }
 0x60d   :  { %7852 = vmatpush3.bf16.msra.mxu1 %v9015_v25 }
 0x60e   :  { %7853 = vmatprep.subr.bf16.mxu1 %v9016_v61 }
 0x611   :  { %7854 = vmatpush3.bf16.msra.mxu1 %v9017_v45  ;;  %v7775_v45 = vld [vmem:[#allocation16] ss:$0 sm:$0xff] }
 0x612   :  { %7927 = vmatprep.subr.mxu1 %v9273_v2 }
 0x61a   :  { %v5745_v7 = vpop.f32.mrb[124].mxu0 }
 0x61b   :  { %v5754_v35 = vadd.f32 %v5745_v7, %v5475_v8  ;;  %v5747_v29 = vpop.f32.mrb[125].mxu0 }
 0x61c   :  { %v5755_v48 = vadd.f32 %v5747_v29, %v5476_v17  ;;  %v5146_v40 = vpop.f32.mrb[124].mxu1  ;;  %v5749_v3 = vpop.f32.mrb[126].mxu0 }
 0x61d   :  { %v5194_v10 = vadd.f32 %v5146_v40, %v4915_v53  ;;  %v5148_v36 = vpop.f32.mrb[125].mxu1  ;;  %v5750_v33 = vpop.f32.mrb[127].mxu0 }
 0x61e   :  { %v5195_v59 = vadd.f32 %v5148_v36, %v4916_v13  ;;  %v5150_v20 = vpop.f32.mrb[126].mxu1  ;;  %v6606_v13 = vrot.slane %v6593_v47, %v211_v11 }
 0x61f   :  { %v5151_v43 = vpop.f32.mrb[127].mxu1 }
 0x63a   :  { %v6024_v58 = vpop.f32.mrb[128].mxu0 }
 0x63b   :  { %v6033_v39 = vadd.f32 %v6024_v58, %v5754_v35  ;;  %v6026_v32 = vpop.f32.mrb[129].mxu0 }
 0x63c   :  { %v6034_v5 = vadd.f32 %v6026_v32, %v5755_v48  ;;  %v5425_v37 = vpop.f32.mrb[128].mxu1  ;;  %v6028_v23 = vpop.f32.mrb[130].mxu0 }
 0x63d   :  { %v5473_v27 = vadd.f32 %v5425_v37, %v5194_v10  ;;  %v5427_v19 = vpop.f32.mrb[129].mxu1  ;;  %v6029_v15 = vpop.f32.mrb[131].mxu0 }
 0x63e   :  { %v5474_v41 = vadd.f32 %v5427_v19, %v5195_v59  ;;  %v5429_v38 = vpop.f32.mrb[130].mxu1 }
 0x63f   :  { %v5430_v44 = vpop.f32.mrb[131].mxu1 }
 0x65a   :  { %v6303_v30 = vpop.f32.mrb[132].mxu0 }
 0x65b   :  { %v6312_v0 = vadd.f32 %v6303_v30, %v6033_v39  ;;  %v6305_v42 = vpop.f32.mrb[133].mxu0 }
 0x65c   :  { %v6313_v4 = vadd.f32 %v6305_v42, %v6034_v5  ;;  %v5704_v8 = vpop.f32.mrb[132].mxu1  ;;  %v6307_v56 = vpop.f32.mrb[134].mxu0 }
 0x65d   :  { %v5752_v49 = vadd.f32 %v5704_v8, %v5473_v27  ;;  %v5706_v17 = vpop.f32.mrb[133].mxu1  ;;  %v6308_v46 = vpop.f32.mrb[135].mxu0 }
 0x65e   :  { %v5753_v57 = vadd.f32 %v5706_v17, %v5474_v41  ;;  %v5708_v34 = vpop.f32.mrb[134].mxu1  ;;  %v6971_v17 = vld [vmem:[#allocation17] sm:$0x1] }
 0x65f   :  { %v5709_v53 = vpop.f32.mrb[135].mxu1 }
 0x67a   :  { %v6582_v22 = vpop.f32.mrb[136].mxu0 }
 0x67b   :  { %v6591_v9 = vadd.f32 %v6582_v22, %v6312_v0  ;;  %v6584_v12 = vpop.f32.mrb[137].mxu0 }
 0x67c   :  { %v6592_v7 = vadd.f32 %v6584_v12, %v6313_v4  ;;  %v5983_v35 = vpop.f32.mrb[136].mxu1  ;;  %v6586_v29 = vpop.f32.mrb[138].mxu0 }
 0x67d   :  { %v6617_v48 = vadd.f32 %v6606_v13, %v6591_v9  ;;  %v6031_v40 = vadd.f32 %v5983_v35, %v5752_v49  ;;  %v5985_v3 = vpop.f32.mrb[137].mxu1  ;;  %v6587_v10 = vpop.f32.mrb[139].mxu0 }
 0x67e   :  { %v6618_v36 = vadd.f32 %v6610_v50, %v6592_v7  ;;  %v6032_v33 = vadd.f32 %v5985_v3, %v5753_v57  ;;  %v5987_v59 = vpop.f32.mrb[138].mxu1 }
 0x67f   :  { %v6621_v20 = vmax.f32 %v6617_v48, 0.0  ;;  %v5988_v43 = vpop.f32.mrb[139].mxu1 }
 0x680   :  { %v6622_v24 = vmax.f32 %v6618_v36, 0.0 }
 0x681   :  { %v6625_v60 = vpack.c.bf16 %v6621_v20, %v6621_v20 }
 0x682   :  { %v6626_v51 = vpack.c.bf16 %v6622_v24, %v6622_v24 }
 0x684   :  { %6962 = vmatprep.mubr.bf16.mxu0 %v6626_v51 }
 0x685   :  { %6963 = vmatmul.mubr.bf16.vlgmr.msra.gmra.mrb[140].mxu0 %v6625_v60 }
 0x69c   :  { %v6262_v11 = vpop.f32.mrb[140].mxu1 }
 0x69d   :  { %v6310_v52 = vadd.f32 %v6262_v11, %v6031_v40  ;;  %v6264_v54 = vpop.f32.mrb[141].mxu1 }
 0x69e   :  { %v6311_v16 = vadd.f32 %v6264_v54, %v6032_v33  ;;  %v6266_v6 = vpop.f32.mrb[142].mxu1 }
 0x69f   :  { %v6267_v1 = vpop.f32.mrb[143].mxu1 }
 0x6bc   :  { %v6541_v18 = vpop.f32.mrb[144].mxu1 }
 0x6bd   :  { %v6589_v14 = vadd.f32 %v6541_v18, %v6310_v52  ;;  %v6543_v58 = vpop.f32.mrb[145].mxu1 }
 0x6be   :  { %v6590_v31 = vadd.f32 %v6543_v58, %v6311_v16  ;;  %v6545_v39 = vpop.f32.mrb[146].mxu1 }
 0x6bf   :  { %v6615_v32 = vadd.f32 %v6598_v21, %v6589_v14  ;;  %v6546_v5 = vpop.f32.mrb[147].mxu1 }
 0x6c0   :  { %v6616_v37 = vadd.f32 %v6602_v28, %v6590_v31 }
 0x6c1   :  { %v6619_v23 = vmax.f32 %v6615_v32, 0.0 }
 0x6c2   :  { %v6620_v27 = vmax.f32 %v6616_v37, 0.0 }
 0x6c3   :  { %v6623_v15 = vpack.c.bf16 %v6619_v23, %v6619_v23 }
 0x6c4   :  { %v6624_v19 = vpack.c.bf16 %v6620_v27, %v6620_v27 }
 0x6c6   :  { %6922 = vmatprep.mubr.bf16.mxu1 %v6624_v19 }
 0x6c7   :  { %6923 = vmatmul.mubr.bf16.vlgmr.msra.gmra.mrb[148].mxu1 %v6623_v15 }
 0x6c8   :  { %7929 = vmatprep.mubr.msk.f32.mxu1 %vm9274_vm0, %v9273_v2  ;;  %v6976_v2 = vpop.permute.xlu0 %6975 }
 0x6c9   :  { %v6981_v46 = vrot.slane %v6976_v2, %v9661_v62 }
 0x758   :  { %v7877_v41 = vpop.f32.mrb[140].mxu0 }
 0x759   :  { %v7878_v63 = vpop.f32.mrb[141].mxu0 }
 0x75a   :  { %v7879_v38 = vadd.f32 %v7878_v63, %v7877_v41  ;;  %v7880_v25 = vpop.f32.mrb[142].mxu0 }
 0x75b   :  { %v7881_v44 = vpop.f32.mrb[143].mxu0 }
 0x79a   :  { %v7855_v61 = vpop.f32.mrb[148].mxu1 }
 0x79b   :  { %v7856_v30 = vpop.f32.mrb[149].mxu1 }
 0x79c   :  { %v7857_v0 = vadd.f32 %v7856_v30, %v7855_v61  ;;  %v7858_v42 = vpop.f32.mrb[150].mxu1 }
 0x79d   :  { %v7859_v4 = vpop.f32.mrb[151].mxu1 }
 0x79e   :  { %v6925_v8 = vadd.f32 %v7857_v0, %v7775_v45 }
 0x7a0   :  { %v6965_v56 = vadd.f32 %v7879_v38, %v6925_v8 }
 0x7a2   :  { %v6970_v49 = vmax.f32 %v6965_v56, 0.0 }
 0x7a4   :  { %7928 = vmatpush3.xpose.msra.mxu1 %v6970_v49 }
 0x7a7   :  { %7930 = vmatmul.mubr.f32.vlgmr.msra.gmra.mrb[152].mxu1 %v6971_v17 }
 0x87a   :  { %v7048_v57 = vpop.f32.mrb[152].mxu1 }
 0x87b   :  { %v7049_v34 = vadd.f32 %v7048_v57, %v6981_v46  ;;  %v7931_v53 = vpop.f32.mrb[153].mxu1 }
 0x87d   :  { %v7808_v47 = vmul.f32 -1.442695, %v7049_v34 }
 0x87f   :  { %9018 = vpow2.f32 %v7808_v47 }
 0x889   :  { %v9019_v55 = vpop.eup %9018 }
 0x88a   :  { %v7055_v13 = vadd.f32 1.0, %v9019_v55 }
 0x88c   :  { %9020 = vrcp.f32 %v7055_v13 }
 0x896   :  { %v9021_v22 = vpop.eup %9020 }
 0x897   :  { %7059 = vst.msk [vmem:[%s10166_s13] sm:$0x1] %vm7058_vm5, %v9021_v22 }
 0x898   :  { %7064 = vsyncpa [#allocation4], 1 }
 0x899   :  { %7065 = vsyncpa [#allocation6], 1 }
 0x89a   :  { %7066 = vsyncpa [#allocation9], 1 }
 0x89b   :  { %7067 = vsyncpa [#allocation12], 1 }
 0x89c   :  { %7068 = vsyncpa [#allocation15], 1 }
 0x89d   :  { %7069 = vsyncpa [#allocation18], 1 }

</bundles_post_ra>
